<compile_context>
chip_gen: v7x
topology: tpu7x:2x2x1
jax: 0.10.0
libtpu: 0.0.40
codegen_flags: <defaults>
</compile_context>

<pallas_src>
import jax
import jax.numpy as jnp
import numpy as np
from jax.experimental import pallas as pl
from jax.experimental.pallas import tpu as pltpu


# ------------------------------ fused kernel ---------------------------------

def make_bottleneck_kernel(H, W, Cin, P, Cout, rc):
    """Build the fused Bottleneck kernel (one batch element per grid step).

    rc = row chunk (divides H). Refs seen by the kernel:
      x_ref  : (H*W, Cin)    bf16   conv1 input AND residual (2-D, lane-dense)
      w1_ref : (Cin, P)      bf16   BN1 scale already folded in
      b1_ref : (1, P)        f32    BN1 bias
      w2_ref : (9*P, P)      bf16   3x3 weights, HWIO flattened tap-major, BN2 folded
      b2_ref : (1, P)        f32
      w3_ref : (P, Cout)     bf16   BN3 folded
      b3_ref : (1, Cout)     f32
      out_ref: (H*W, Cout)   bf16
      hp_ref : (H+2, W+2, P) bf16   VMEM scratch, zero-padded stage-1 output
      col_ref: (rc*W, 9*P)   bf16   VMEM scratch, im2col slab per row chunk
    """
    n_chunks = H // rc
    RW = rc * W

    def kernel(x_ref, w1_ref, b1_ref, w2_ref, b2_ref, w3_ref, b3_ref,
               out_ref, hp_ref, col_ref):
        # Zero only the 1-px halo: the interior is fully overwritten by
        # stage 1 every grid step (scratch is uninitialized at allocation,
        # and re-zeroing each step is megacore-safe and nearly free).
        zrow = jnp.zeros((1, W + 2, P), dtype=hp_ref.dtype)
        zcol = jnp.zeros((H + 2, 1, P), dtype=hp_ref.dtype)
        hp_ref[0:1, :, :] = zrow
        hp_ref[H + 1:H + 2, :, :] = zrow
        hp_ref[:, 0:1, :] = zcol
        hp_ref[:, W + 1:W + 2, :] = zcol

        # Hoist bias reads (broadcasts are not CSE'd by JAX).
        b1 = b1_ref[...]
        b2 = b2_ref[...]
        b3 = b3_ref[...]

        # ---- stage 1: 1x1 conv (BN scale folded) + bias + ReLU ------------
        # -> written straight into the interior of the padded scratch.
        for c in range(n_chunks):
            r0 = c * RW
            xs = x_ref[r0:r0 + RW, :]                               # (RW, Cin) bf16
            h1 = jnp.dot(xs, w1_ref[...],
                         preferred_element_type=jnp.float32)        # f32 acc
            h1 = jnp.maximum(h1 + b1, 0.0)
            hp_ref[1 + c * rc:1 + (c + 1) * rc, 1:W + 1, :] = (
                h1.astype(hp_ref.dtype).reshape(rc, W, P))

        # ---- stages 2+3 per row chunk:
        #      3x3 conv as ONE matmul over K=9P (im2col slab in VMEM),
        #      bias + ReLU, 1x1 conv + bias, residual add, final ReLU -------
        for c in range(n_chunks):
            h0 = c * rc
            r0 = c * RW
            for dy in range(3):
                for dx in range(3):
                    t = dy * 3 + dx
                    col_ref[:, t * P:(t + 1) * P] = (
                        hp_ref[h0 + dy:h0 + dy + rc, dx:dx + W, :]
                        .reshape(RW, P))
            h2 = jnp.dot(col_ref[...], w2_ref[...],
                         preferred_element_type=jnp.float32)
            h2 = jnp.maximum(h2 + b2, 0.0)

            h3 = jnp.dot(h2.astype(w3_ref.dtype), w3_ref[...],
                         preferred_element_type=jnp.float32)
            h3 = h3 + b3

            res = x_ref[r0:r0 + RW, :].astype(jnp.float32)
            out = jnp.maximum(h3 + res, 0.0)
            out_ref[r0:r0 + RW, :] = out.astype(out_ref.dtype)      # bf16 store

    return kernel


# ------------------------------ wrapper --------------------------------------

def _pick_row_chunk(H, W, P, Cout, max_chunk_bytes=3 << 20):
    """Largest divisor of H whose per-chunk live set stays within budget.

    Live set per chunk ~ im2col slab (bf16) + f32 intermediates h2/h3/res/out.
    """
    per_row = W * (9 * P * 2 + (P + 3 * Cout) * 4)
    max_rows = max(1, max_chunk_bytes // per_row)
    best = 1
    for d in range(1, H + 1):
        if H % d == 0 and d <= max_rows:
            best = d
    return best


def _vmem_bytes_estimate(H, W, Cin, P, Cout, rc):
    x_blk = H * W * Cin * 2                       # bf16 input block
    out_blk = H * W * Cout * 2                    # bf16 output block
    hp = (H + 2) * (W + 2) * P * 2                # padded stage-1 scratch
    col = rc * W * 9 * P * 2                      # im2col scratch
    # weights / biases are whole-array VMEM residents (single-buffered)
    wts = (Cin * P + 9 * P * P + P * Cout) * 2 + (2 * P + Cout) * 4
    # compiler internal scratch for the per-chunk f32 intermediates
    interm = rc * W * (P + 3 * Cout) * 4
    # double-buffered x/out blocks + everything else + modest headroom
    return 2 * (x_blk + out_blk) + hp + col + wts + interm + (4 << 20)


def bottleneck_pallas(x_nhwc, params):
    """Fused Bottleneck block. x_nhwc: (N, H, W, Cin) bf16. Returns (N, H, W, Cout) bf16."""
    (w1, b1, w2, b2, w3, b3) = params
    N, H, W, Cin = x_nhwc.shape
    P = w1.shape[1]
    Cout = w3.shape[1]
    assert Cin == Cout, "identity-residual Bottleneck requires inplanes == planes*4"
    assert w2.shape == (9 * P, P)
    # TODO(synk): stride > 1 / downsample branch not implemented (identity path only).

    x2 = x_nhwc.reshape(N, H * W, Cin).astype(jnp.bfloat16)   # 2-D lane-dense blocks

    rc = _pick_row_chunk(H, W, P, Cout)
    kernel = make_bottleneck_kernel(H, W, Cin, P, Cout, rc)

    # Cap at 56 MiB: leaves headroom on v7x (64 MiB / TensorCore) for Mosaic
    # internal scratch; v5e/v6e (128 MiB) are never the binding constraint here.
    vmem_limit = int(min(max(_vmem_bytes_estimate(H, W, Cin, P, Cout, rc),
                             32 << 20), 56 << 20))

    def resident():
        # Whole-array VMEM operand: constant across the grid -> single-buffered.
        return pl.BlockSpec(memory_space=pltpu.MemorySpace.VMEM)

    out2 = pl.pallas_call(
        kernel,
        out_shape=jax.ShapeDtypeStruct((N, H * W, Cout), jnp.bfloat16),
        grid=(N,),
        in_specs=[
            pl.BlockSpec((None, H * W, Cin), lambda n: (n, 0, 0)),  # x (conv in + residual)
            resident(),     # w1 (BN1 folded)
            resident(),     # b1
            resident(),     # w2 (flattened 3x3, BN2 folded)
            resident(),     # b2
            resident(),     # w3 (BN3 folded)
            resident(),     # b3
        ],
        out_specs=pl.BlockSpec((None, H * W, Cout), lambda n: (n, 0, 0)),
        scratch_shapes=[
            pltpu.VMEM((H + 2, W + 2, P), jnp.bfloat16),   # padded h1
            pltpu.VMEM((rc * W, 9 * P), jnp.bfloat16),     # im2col slab
        ],
        compiler_params=pltpu.CompilerParams(
            dimension_semantics=("parallel",),             # megacore split over batch
            vmem_limit_bytes=vmem_limit),
    )(x2, w1, b1, w2, b2, w3, b3)

    return out2.reshape(N, H, W, Cout)


# --------------------------- parameter setup ---------------------------------

def fold_bn(gamma, beta, mean, var, eps=1e-5):
    scale = gamma / jnp.sqrt(var + eps)
    bias = beta - mean * scale
    return scale, bias


def make_params(key, inplanes, planes):
    """Build deterministic PyTorch-style params and fold BN (eval mode) into them."""
    expansion = 4
    cout = planes * expansion
    ks = jax.random.split(key, 6)

    # PyTorch conv weights (OIHW), deterministic, f32
    w1_oihw = 0.1 * jax.random.normal(ks[0], (planes, inplanes, 1, 1), jnp.float32)
    w2_oihw = 0.1 * jax.random.normal(ks[1], (planes, planes, 3, 3), jnp.float32)
    w3_oihw = 0.1 * jax.random.normal(ks[2], (cout, planes, 1, 1), jnp.float32)

    def bn_params(k, c):
        k1, k2, k3, k4 = jax.random.split(k, 4)
        gamma = 1.0 + 0.1 * jax.random.normal(k1, (c,), jnp.float32)
        beta = 0.1 * jax.random.normal(k2, (c,), jnp.float32)
        mean = 0.1 * jax.random.normal(k3, (c,), jnp.float32)
        var = jnp.abs(jax.random.normal(k4, (c,), jnp.float32)) + 0.5
        return fold_bn(gamma, beta, mean, var)

    s1, b1 = bn_params(ks[3], planes)
    s2, b2 = bn_params(ks[4], planes)
    s3, b3 = bn_params(ks[5], cout)

    # Kernel layouts, with the BN scale folded into the output channels in f32,
    # then cast to bf16 (the same folded bf16 weights feed kernel AND reference):
    #   1x1 -> (Cin, Cout); 3x3 -> HWIO flattened to (9*Cin, Cout), tap-major.
    w1_k = (w1_oihw.reshape(planes, inplanes).T * s1[None, :]).astype(jnp.bfloat16)
    w2_hwio = jnp.transpose(w2_oihw, (2, 3, 1, 0)).reshape(9 * planes, planes)
    w2_k = (w2_hwio * s2[None, :]).astype(jnp.bfloat16)
    w3_k = (w3_oihw.reshape(cout, planes).T * s3[None, :]).astype(jnp.bfloat16)

    return (w1_k, b1.reshape(1, -1),
            w2_k, b2.reshape(1, -1),
            w3_k, b3.reshape(1, -1))


# --------------------------- pure-JAX reference -------------------------------

def bottleneck_ref(x_nhwc_bf16, params):
    """Pure-JAX im2col reference, mirroring the kernel's dtypes / rounding points.

    conv1x1+BN+ReLU -> conv3x3(pad=1)+BN+ReLU -> conv1x1+BN -> +residual -> ReLU,
    with BN scale pre-folded into the bf16 weights and f32 accumulation.
    """
    (w1, b1, w2, b2, w3, b3) = params
    N, H, W, Cin = x_nhwc_bf16.shape
    P = w1.shape[1]
    Cout = w3.shape[1]

    x2 = x_nhwc_bf16.reshape(N * H * W, Cin).astype(jnp.bfloat16)

    # stage 1
    h1 = jnp.dot(x2, w1, preferred_element_type=jnp.float32)
    h1 = jnp.maximum(h1 + b1, 0.0).astype(jnp.bfloat16).reshape(N, H, W, P)

    # stage 2: 3x3 conv via im2col (same tap order t = dy*3+dx as the kernel)
    hp = jnp.pad(h1, ((0, 0), (1, 1), (1, 1), (0, 0)))
    taps = [hp[:, dy:dy + H, dx:dx + W, :] for dy in range(3) for dx in range(3)]
    col = jnp.concatenate(taps, axis=-1).reshape(N * H * W, 9 * P)
    h2 = jnp.dot(col, w2, preferred_element_type=jnp.float32)
    h2 = jnp.maximum(h2 + b2, 0.0).astype(jnp.bfloat16)

    # stage 3 + residual + final ReLU
    h3 = jnp.dot(h2, w3, preferred_element_type=jnp.float32) + b3
    out = jnp.maximum(h3 + x2.astype(jnp.float32), 0.0)
    return out.astype(jnp.bfloat16).reshape(N, H, W, Cout)


# ------------------------------- main -----------------------------------------

if __name__ == "__main__":
    key = jax.random.PRNGKey(0)
    k_x, k_p = jax.random.split(key)

    # Small but lane-dense, real-ResNet-style channel counts (Cout = 512 is a
    # multiple of 128 -> unmasked stores).
    N, H, W = 2, 16, 16
    planes = 128
    inplanes = planes * 4            # identity residual => inplanes == planes * 4

    x_f32 = jax.random.normal(k_x, (N, inplanes, H, W), jnp.float32)
    params = make_params(k_p, inplanes, planes)

    # NCHW -> NHWC + bf16 cast: test-harness glue only; in production feed
    # NHWC bf16 end-to-end so no transpose sits in the hot path.
    x_nhwc = jnp.transpose(x_f32, (0, 2, 3, 1)).astype(jnp.bfloat16)

    out = jax.block_until_ready(bottleneck_pallas(x_nhwc, params))
    ref = jax.block_until_ready(bottleneck_ref(x_nhwc, params))

    np.testing.assert_allclose(np.asarray(out.astype(jnp.float32)),
                               np.asarray(ref.astype(jnp.float32)),
                               rtol=1e-2, atol=1e-2)
    print("KERNEL_OK")
</pallas_src>

<mosaic_0001>
module attributes {stable_mosaic.version = 11 : i64} {
  func.func @kernel(%arg0: i32, %arg1: memref<1x256x512xbf16, #tpu.memory_space<vmem>>, %arg2: memref<512x128xbf16, #tpu.memory_space<vmem>>, %arg3: memref<1x128xf32, #tpu.memory_space<vmem>>, %arg4: memref<1152x128xbf16, #tpu.memory_space<vmem>>, %arg5: memref<1x128xf32, #tpu.memory_space<vmem>>, %arg6: memref<128x512xbf16, #tpu.memory_space<vmem>>, %arg7: memref<1x512xf32, #tpu.memory_space<vmem>>, %arg8: memref<1x256x512xbf16, #tpu.memory_space<vmem>>, %arg9: memref<18x18x128xbf16, #tpu.memory_space<vmem>>, %arg10: memref<256x1152xbf16, #tpu.memory_space<vmem>>) attributes {dimension_semantics = [#tpu.dimension_semantics<parallel>], iteration_bounds = array<i64: 2>, scalar_prefetch = 0 : i64, scratch_operands = 2 : i64, tpu.core_type = #tpu.core_type<tc>, window_params = [{transform_indices = @transform_0, window_bounds = array<i64: 1, 256, 512>}, {pipeline_mode = #tpu.pipeline_mode<synchronous>, transform_indices = @transform_1, window_bounds = array<i64: 512, 128>}, {pipeline_mode = #tpu.pipeline_mode<synchronous>, transform_indices = @transform_2, window_bounds = array<i64: 1, 128>}, {pipeline_mode = #tpu.pipeline_mode<synchronous>, transform_indices = @transform_3, window_bounds = array<i64: 1152, 128>}, {pipeline_mode = #tpu.pipeline_mode<synchronous>, transform_indices = @transform_4, window_bounds = array<i64: 1, 128>}, {pipeline_mode = #tpu.pipeline_mode<synchronous>, transform_indices = @transform_5, window_bounds = array<i64: 128, 512>}, {pipeline_mode = #tpu.pipeline_mode<synchronous>, transform_indices = @transform_6, window_bounds = array<i64: 1, 512>}, {transform_indices = @transform_7, window_bounds = array<i64: 1, 256, 512>}]} {
    %cst = arith.constant 0.000000e+00 : bf16
    %0 = vector.broadcast %cst : bf16 to vector<1x18x128xbf16>
    %cst_0 = arith.constant 0.000000e+00 : bf16
    %1 = vector.broadcast %cst_0 : bf16 to vector<18x1x128xbf16>
    %c0 = arith.constant 0 : index
    %c0_1 = arith.constant 0 : index
    %c0_2 = arith.constant 0 : index
    %2 = vector.load %arg9[%c0, %c0_1, %c0_2] : memref<18x18x128xbf16, #tpu.memory_space<vmem>>, vector<1x18x128xbf16>
    tpu.vector_store %arg9[%c0, %c0_1, %c0_2], %0 {strides = array<i32>} : memref<18x18x128xbf16, #tpu.memory_space<vmem>>, vector<1x18x128xbf16>,
    %c17 = arith.constant 17 : index
    %c0_3 = arith.constant 0 : index
    %c0_4 = arith.constant 0 : index
    %3 = vector.load %arg9[%c17, %c0_3, %c0_4] : memref<18x18x128xbf16, #tpu.memory_space<vmem>>, vector<1x18x128xbf16>
    tpu.vector_store %arg9[%c17, %c0_3, %c0_4], %0 {strides = array<i32>} : memref<18x18x128xbf16, #tpu.memory_space<vmem>>, vector<1x18x128xbf16>,
    %c0_5 = arith.constant 0 : index
    %c0_6 = arith.constant 0 : index
    %c0_7 = arith.constant 0 : index
    %4 = vector.load %arg9[%c0_5, %c0_6, %c0_7] : memref<18x18x128xbf16, #tpu.memory_space<vmem>>, vector<18x1x128xbf16>
    tpu.vector_store %arg9[%c0_5, %c0_6, %c0_7], %1 {strides = array<i32>} : memref<18x18x128xbf16, #tpu.memory_space<vmem>>, vector<18x1x128xbf16>,
    %c0_8 = arith.constant 0 : index
    %c17_9 = arith.constant 17 : index
    %c0_10 = arith.constant 0 : index
    %5 = vector.load %arg9[%c0_8, %c17_9, %c0_10] : memref<18x18x128xbf16, #tpu.memory_space<vmem>>, vector<18x1x128xbf16>
    tpu.vector_store %arg9[%c0_8, %c17_9, %c0_10], %1 {strides = array<i32>} : memref<18x18x128xbf16, #tpu.memory_space<vmem>>, vector<18x1x128xbf16>,
    %c0_11 = arith.constant 0 : index
    %c0_12 = arith.constant 0 : index
    %6 = vector.load %arg3[%c0_11, %c0_12] : memref<1x128xf32, #tpu.memory_space<vmem>>, vector<1x128xf32>
    %c0_13 = arith.constant 0 : index
    %c0_14 = arith.constant 0 : index
    %7 = vector.load %arg5[%c0_13, %c0_14] : memref<1x128xf32, #tpu.memory_space<vmem>>, vector<1x128xf32>
    %c0_15 = arith.constant 0 : index
    %c0_16 = arith.constant 0 : index
    %8 = vector.load %arg7[%c0_15, %c0_16] : memref<1x512xf32, #tpu.memory_space<vmem>>, vector<1x512xf32>
    %c0_17 = arith.constant 0 : index
    %c0_18 = arith.constant 0 : index
    %c0_19 = arith.constant 0 : index
    %9 = vector.load %arg1[%c0_17, %c0_18, %c0_19] : memref<1x256x512xbf16, #tpu.memory_space<vmem>>, vector<1x256x512xbf16>
    %10 = vector.shape_cast %9 : vector<1x256x512xbf16> to vector<256x512xbf16>
    %c0_20 = arith.constant 0 : index
    %c0_21 = arith.constant 0 : index
    %11 = vector.load %arg2[%c0_20, %c0_21] : memref<512x128xbf16, #tpu.memory_space<vmem>>, vector<512x128xbf16>
    %cst_22 = arith.constant dense<0.000000e+00> : vector<256x128xf32>
    %12 = tpu.matmul %10, %11, %cst_22 {dimension_numbers = #tpu.dot_dimension_numbers<[1], [0], [0], [1], [0, 0, 1, 1], [], []>} : vector<256x512xbf16>, vector<512x128xbf16>, vector<256x128xf32> -> vector<256x128xf32>
    %13 = vector.broadcast %6 : vector<1x128xf32> to vector<256x128xf32>
    %14 = arith.addf %12, %13 : vector<256x128xf32>
    %cst_23 = arith.constant 0.000000e+00 : f32
    %15 = vector.broadcast %cst_23 : f32 to vector<256x128xf32>
    %16 = arith.maximumf %14, %15 : vector<256x128xf32>
    %17 = arith.truncf %16 : vector<256x128xf32> to vector<256x128xbf16>
    %18 = vector.shape_cast %17 : vector<256x128xbf16> to vector<16x16x128xbf16>
    %c1 = arith.constant 1 : index
    %c1_24 = arith.constant 1 : index
    %c0_25 = arith.constant 0 : index
    %19 = vector.load %arg9[%c1, %c1_24, %c0_25] : memref<18x18x128xbf16, #tpu.memory_space<vmem>>, vector<16x16x128xbf16>
    tpu.vector_store %arg9[%c1, %c1_24, %c0_25], %18 {strides = array<i32>} : memref<18x18x128xbf16, #tpu.memory_space<vmem>>, vector<16x16x128xbf16>,
    %c0_26 = arith.constant 0 : index
    %c0_27 = arith.constant 0 : index
    %c0_28 = arith.constant 0 : index
    %20 = vector.load %arg9[%c0_26, %c0_27, %c0_28] : memref<18x18x128xbf16, #tpu.memory_space<vmem>>, vector<16x16x128xbf16>
    %21 = vector.shape_cast %20 : vector<16x16x128xbf16> to vector<256x128xbf16>
    %c0_29 = arith.constant 0 : index
    %c0_30 = arith.constant 0 : index
    %22 = vector.load %arg10[%c0_29, %c0_30] : memref<256x1152xbf16, #tpu.memory_space<vmem>>, vector<256x128xbf16>
    tpu.vector_store %arg10[%c0_29, %c0_30], %21 {strides = array<i32>} : memref<256x1152xbf16, #tpu.memory_space<vmem>>, vector<256x128xbf16>,
    %c0_31 = arith.constant 0 : index
    %c1_32 = arith.constant 1 : index
    %c0_33 = arith.constant 0 : index
    %23 = vector.load %arg9[%c0_31, %c1_32, %c0_33] : memref<18x18x128xbf16, #tpu.memory_space<vmem>>, vector<16x16x128xbf16>
    %24 = vector.shape_cast %23 : vector<16x16x128xbf16> to vector<256x128xbf16>
    %c0_34 = arith.constant 0 : index
    %c128 = arith.constant 128 : index
    %25 = vector.load %arg10[%c0_34, %c128] : memref<256x1152xbf16, #tpu.memory_space<vmem>>, vector<256x128xbf16>
    tpu.vector_store %arg10[%c0_34, %c128], %24 {strides = array<i32>} : memref<256x1152xbf16, #tpu.memory_space<vmem>>, vector<256x128xbf16>,
    %c0_35 = arith.constant 0 : index
    %c2 = arith.constant 2 : index
    %c0_36 = arith.constant 0 : index
    %26 = vector.load %arg9[%c0_35, %c2, %c0_36] : memref<18x18x128xbf16, #tpu.memory_space<vmem>>, vector<16x16x128xbf16>
    %27 = vector.shape_cast %26 : vector<16x16x128xbf16> to vector<256x128xbf16>
    %c0_37 = arith.constant 0 : index
    %c256 = arith.constant 256 : index
    %28 = vector.load %arg10[%c0_37, %c256] : memref<256x1152xbf16, #tpu.memory_space<vmem>>, vector<256x128xbf16>
    tpu.vector_store %arg10[%c0_37, %c256], %27 {strides = array<i32>} : memref<256x1152xbf16, #tpu.memory_space<vmem>>, vector<256x128xbf16>,
    %c1_38 = arith.constant 1 : index
    %c0_39 = arith.constant 0 : index
    %c0_40 = arith.constant 0 : index
    %29 = vector.load %arg9[%c1_38, %c0_39, %c0_40] : memref<18x18x128xbf16, #tpu.memory_space<vmem>>, vector<16x16x128xbf16>
    %30 = vector.shape_cast %29 : vector<16x16x128xbf16> to vector<256x128xbf16>
    %c0_41 = arith.constant 0 : index
    %c384 = arith.constant 384 : index
    %31 = vector.load %arg10[%c0_41, %c384] : memref<256x1152xbf16, #tpu.memory_space<vmem>>, vector<256x128xbf16>
    tpu.vector_store %arg10[%c0_41, %c384], %30 {strides = array<i32>} : memref<256x1152xbf16, #tpu.memory_space<vmem>>, vector<256x128xbf16>,
    %c1_42 = arith.constant 1 : index
    %c1_43 = arith.constant 1 : index
    %c0_44 = arith.constant 0 : index
    %32 = vector.load %arg9[%c1_42, %c1_43, %c0_44] : memref<18x18x128xbf16, #tpu.memory_space<vmem>>, vector<16x16x128xbf16>
    %33 = vector.shape_cast %32 : vector<16x16x128xbf16> to vector<256x128xbf16>
    %c0_45 = arith.constant 0 : index
    %c512 = arith.constant 512 : index
    %34 = vector.load %arg10[%c0_45, %c512] : memref<256x1152xbf16, #tpu.memory_space<vmem>>, vector<256x128xbf16>
    tpu.vector_store %arg10[%c0_45, %c512], %33 {strides = array<i32>} : memref<256x1152xbf16, #tpu.memory_space<vmem>>, vector<256x128xbf16>,
    %c1_46 = arith.constant 1 : index
    %c2_47 = arith.constant 2 : index
    %c0_48 = arith.constant 0 : index
    %35 = vector.load %arg9[%c1_46, %c2_47, %c0_48] : memref<18x18x128xbf16, #tpu.memory_space<vmem>>, vector<16x16x128xbf16>
    %36 = vector.shape_cast %35 : vector<16x16x128xbf16> to vector<256x128xbf16>
    %c0_49 = arith.constant 0 : index
    %c640 = arith.constant 640 : index
    %37 = vector.load %arg10[%c0_49, %c640] : memref<256x1152xbf16, #tpu.memory_space<vmem>>, vector<256x128xbf16>
    tpu.vector_store %arg10[%c0_49, %c640], %36 {strides = array<i32>} : memref<256x1152xbf16, #tpu.memory_space<vmem>>, vector<256x128xbf16>,
    %c2_50 = arith.constant 2 : index
    %c0_51 = arith.constant 0 : index
    %c0_52 = arith.constant 0 : index
    %38 = vector.load %arg9[%c2_50, %c0_51, %c0_52] : memref<18x18x128xbf16, #tpu.memory_space<vmem>>, vector<16x16x128xbf16>
    %39 = vector.shape_cast %38 : vector<16x16x128xbf16> to vector<256x128xbf16>
    %c0_53 = arith.constant 0 : index
    %c768 = arith.constant 768 : index
    %40 = vector.load %arg10[%c0_53, %c768] : memref<256x1152xbf16, #tpu.memory_space<vmem>>, vector<256x128xbf16>
    tpu.vector_store %arg10[%c0_53, %c768], %39 {strides = array<i32>} : memref<256x1152xbf16, #tpu.memory_space<vmem>>, vector<256x128xbf16>,
    %c2_54 = arith.constant 2 : index
    %c1_55 = arith.constant 1 : index
    %c0_56 = arith.constant 0 : index
    %41 = vector.load %arg9[%c2_54, %c1_55, %c0_56] : memref<18x18x128xbf16, #tpu.memory_space<vmem>>, vector<16x16x128xbf16>
    %42 = vector.shape_cast %41 : vector<16x16x128xbf16> to vector<256x128xbf16>
    %c0_57 = arith.constant 0 : index
    %c896 = arith.constant 896 : index
    %43 = vector.load %arg10[%c0_57, %c896] : memref<256x1152xbf16, #tpu.memory_space<vmem>>, vector<256x128xbf16>
    tpu.vector_store %arg10[%c0_57, %c896], %42 {strides = array<i32>} : memref<256x1152xbf16, #tpu.memory_space<vmem>>, vector<256x128xbf16>,
    %c2_58 = arith.constant 2 : index
    %c2_59 = arith.constant 2 : index
    %c0_60 = arith.constant 0 : index
    %44 = vector.load %arg9[%c2_58, %c2_59, %c0_60] : memref<18x18x128xbf16, #tpu.memory_space<vmem>>, vector<16x16x128xbf16>
    %45 = vector.shape_cast %44 : vector<16x16x128xbf16> to vector<256x128xbf16>
    %c0_61 = arith.constant 0 : index
    %c1024 = arith.constant 1024 : index
    %46 = vector.load %arg10[%c0_61, %c1024] : memref<256x1152xbf16, #tpu.memory_space<vmem>>, vector<256x128xbf16>
    tpu.vector_store %arg10[%c0_61, %c1024], %45 {strides = array<i32>} : memref<256x1152xbf16, #tpu.memory_space<vmem>>, vector<256x128xbf16>,
    %c0_62 = arith.constant 0 : index
    %c0_63 = arith.constant 0 : index
    %47 = vector.load %arg10[%c0_62, %c0_63] : memref<256x1152xbf16, #tpu.memory_space<vmem>>, vector<256x1152xbf16>
    %c0_64 = arith.constant 0 : index
    %c0_65 = arith.constant 0 : index
    %48 = vector.load %arg4[%c0_64, %c0_65] : memref<1152x128xbf16, #tpu.memory_space<vmem>>, vector<1152x128xbf16>
    %cst_66 = arith.constant dense<0.000000e+00> : vector<256x128xf32>
    %49 = tpu.matmul %47, %48, %cst_66 {dimension_numbers = #tpu.dot_dimension_numbers<[1], [0], [0], [1], [0, 0, 1, 1], [], []>} : vector<256x1152xbf16>, vector<1152x128xbf16>, vector<256x128xf32> -> vector<256x128xf32>
    %50 = vector.broadcast %7 : vector<1x128xf32> to vector<256x128xf32>
    %51 = arith.addf %49, %50 : vector<256x128xf32>
    %cst_67 = arith.constant 0.000000e+00 : f32
    %52 = vector.broadcast %cst_67 : f32 to vector<256x128xf32>
    %53 = arith.maximumf %51, %52 : vector<256x128xf32>
    %54 = arith.truncf %53 : vector<256x128xf32> to vector<256x128xbf16>
    %c0_68 = arith.constant 0 : index
    %c0_69 = arith.constant 0 : index
    %55 = vector.load %arg6[%c0_68, %c0_69] : memref<128x512xbf16, #tpu.memory_space<vmem>>, vector<128x512xbf16>
    %cst_70 = arith.constant dense<0.000000e+00> : vector<256x512xf32>
    %56 = tpu.matmul %54, %55, %cst_70 {dimension_numbers = #tpu.dot_dimension_numbers<[1], [0], [0], [1], [0, 0, 1, 1], [], []>} : vector<256x128xbf16>, vector<128x512xbf16>, vector<256x512xf32> -> vector<256x512xf32>
    %57 = vector.broadcast %8 : vector<1x512xf32> to vector<256x512xf32>
    %58 = arith.addf %56, %57 : vector<256x512xf32>
    %c0_71 = arith.constant 0 : index
    %c0_72 = arith.constant 0 : index
    %c0_73 = arith.constant 0 : index
    %59 = vector.load %arg1[%c0_71, %c0_72, %c0_73] : memref<1x256x512xbf16, #tpu.memory_space<vmem>>, vector<1x256x512xbf16>
    %60 = vector.shape_cast %59 : vector<1x256x512xbf16> to vector<256x512xbf16>
    %61 = arith.extf %60 : vector<256x512xbf16> to vector<256x512xf32>
    %62 = arith.addf %58, %61 : vector<256x512xf32>
    %cst_74 = arith.constant 0.000000e+00 : f32
    %63 = vector.broadcast %cst_74 : f32 to vector<256x512xf32>
    %64 = arith.maximumf %62, %63 : vector<256x512xf32>
    %65 = arith.truncf %64 : vector<256x512xf32> to vector<256x512xbf16>
    %c0_75 = arith.constant 0 : index
    %c0_76 = arith.constant 0 : index
    %c0_77 = arith.constant 0 : index
    %66 = vector.load %arg8[%c0_75, %c0_76, %c0_77] : memref<1x256x512xbf16, #tpu.memory_space<vmem>>, vector<1x256x512xbf16>
    %67 = vector.shape_cast %66 : vector<1x256x512xbf16> to vector<256x512xbf16>
    %68 = vector.shape_cast %65 : vector<256x512xbf16> to vector<1x256x512xbf16>
    tpu.vector_store %arg8[%c0_75, %c0_76, %c0_77], %68 {strides = array<i32>} : memref<1x256x512xbf16, #tpu.memory_space<vmem>>, vector<1x256x512xbf16>,
    return
  }
  func.func @transform_0(%arg0: i32) -> (i32, i32, i32) {
    %c0_i32 = arith.constant 0 : i32
    %c0_i32_0 = arith.constant 0 : i32
    %c0_i32_1 = arith.constant 0 : i32
    return %arg0, %c0_i32, %c0_i32_0 : i32, i32, i32
  }
  func.func @transform_1(%arg0: i32) -> (i32, i32) {
    %c0_i32 = arith.constant 0 : i32
    %c0_i32_0 = arith.constant 0 : i32
    %c0_i32_1 = arith.constant 0 : i32
    return %c0_i32, %c0_i32_0 : i32, i32
  }
  func.func @transform_2(%arg0: i32) -> (i32, i32) {
    %c0_i32 = arith.constant 0 : i32
    %c0_i32_0 = arith.constant 0 : i32
    %c0_i32_1 = arith.constant 0 : i32
    return %c0_i32, %c0_i32_0 : i32, i32
  }
  func.func @transform_3(%arg0: i32) -> (i32, i32) {
    %c0_i32 = arith.constant 0 : i32
    %c0_i32_0 = arith.constant 0 : i32
    %c0_i32_1 = arith.constant 0 : i32
    return %c0_i32, %c0_i32_0 : i32, i32
  }
  func.func @transform_4(%arg0: i32) -> (i32, i32) {
    %c0_i32 = arith.constant 0 : i32
    %c0_i32_0 = arith.constant 0 : i32
    %c0_i32_1 = arith.constant 0 : i32
    return %c0_i32, %c0_i32_0 : i32, i32
  }
  func.func @transform_5(%arg0: i32) -> (i32, i32) {
    %c0_i32 = arith.constant 0 : i32
    %c0_i32_0 = arith.constant 0 : i32
    %c0_i32_1 = arith.constant 0 : i32
    return %c0_i32, %c0_i32_0 : i32, i32
  }
  func.func @transform_6(%arg0: i32) -> (i32, i32) {
    %c0_i32 = arith.constant 0 : i32
    %c0_i32_0 = arith.constant 0 : i32
    %c0_i32_1 = arith.constant 0 : i32
    return %c0_i32, %c0_i32_0 : i32, i32
  }
  func.func @transform_7(%arg0: i32) -> (i32, i32, i32) {
    %c0_i32 = arith.constant 0 : i32
    %c0_i32_0 = arith.constant 0 : i32
    %c0_i32_1 = arith.constant 0 : i32
    return %arg0, %c0_i32, %c0_i32_0 : i32, i32, i32
  }
}

</mosaic_0001>

<bundles_post_ra>
// kernel: tpu_custom_call.1
= control target key start
LH: loop header
LB: loop body
LE: loop exit
PB: predicated region body
PF: predicated region fallthrough
CT: control target
= control target key end

     0   :  { %12 = vsyncpa [#allocation5], 0  ;;  %s12963_s0 = inlined_call_operand.hbm [shape: bf16[2,256,512], index: 0, kind: input, shape index: {}]   ;;  %s12964_s1 = inlined_call_operand.hbm [shape: bf16[512,128], index: 1, kind: input, shape index: {}]   ;;  %s12965_s2 = inlined_call_operand.vmem [shape: f32[1,128], index: 2, kind: input, shape index: {}]   ;;  %s12966_s3 = inlined_call_operand.hbm [shape: bf16[1152,128], index: 3, kind: input, shape index: {}]   ;;  %s12967_s4 = inlined_call_operand.vmem [shape: f32[1,128], index: 4, kind: input, shape index: {}]   ;;  %s12968_s5 = inlined_call_operand.hbm [shape: bf16[128,512], index: 5, kind: input, shape index: {}]   ;;  %s12969_s6 = inlined_call_operand.vmem [shape: f32[1,512], index: 6, kind: input, shape index: {}]   ;;  %s12970_s7 = inlined_call_operand.hbm [shape: bf16[2,256,512], index: 7, kind: output, shape index: {}]  }
   0x1   :  { %14 = vsyncpa [#allocation5 + $0x1], 0 }
   0x2   :  { %15 = vsyncpa [#allocation8], 0 }
   0x3   :  { %16 = vsyncpa [#allocation11], 0 }
   0x4   :  { %17 = vsyncpa [#allocation6], 0 }
   0x5   :  { %19 = vsyncpa [#allocation6 + $0x1], 0  ;;  %s10020_s24 = smov 0   ;;  %s10022_s25 = smov 0  }
   0x6   :  { %s10024_s26 = smov 0   ;;  %s10026_s27 = smov 0  }
   0x7 LB: > { %s10041_s28 = sadd.s32 4294967295, %s9966_s27   ;;  %s8027_s29 = sadd.s32 4294967294, %s9966_s27   ;;  %s9966_s27 = sphi %s10026_s27, %s13204_s27   ;;  %s9962_s26 = sphi %s10024_s26, %s13203_s26   ;;  %s9958_s25 = sphi %s10022_s25, %s13202_s25   ;;  %s9954_s24 = sphi %s10020_s24, %s13201_s24  }
   0x8   : > { %p45_p0 = scmp.ne.s32.totalorder %s9958_s25, %s9954_s24  ;;  %p12971_p1 = scmp.eq.s32.totalorder %s10041_s28, 0 }
   0x9   : > { %p201_p3 = scmp.eq.s32.totalorder %s8027_s29, 1  ;;  %p8028_p5 = scmp.ge.s32.totalorder %s9966_s27, 1 }
   0xa   : > { %p10050_p4 = por %p12971_p1, %p45_p0  ;;  %p208_p7 = scmp.lt.s32.totalorder %s9966_s27, 3 }
   0xb   : > { %p10055_p6 = por %p201_p3, %p45_p0  ;;  %s9968_s10 = smov [#allocation7]  }
   0xc   : > { %s12982_s30 = scalar_select %p10050_p4, 1, 0 }
   0xd   : > { %s12983_s8 = scalar_select %p10055_p6, 1, 0 }
   0xe   : > { %p10060_p8 = pnand %p8028_p5, %p208_p7  ;;  %s220_s11 = sshll.u32 %s9968_s10, 4  ;;  %s10064_s11 = int_to_ptr.vmem [resolvable:$true] %s220_s11 }
   0xf   : > { %12984 = sst [smem:[#allocation17_spill]] %s12983_s8  ;;  %s9969_s13 = smov [#allocation9]  }
  0x10   : > { %s12985_s9 = scalar_select %p10060_p8, 1, 0 }
  0x11   : > { %p9411_p9 = pneg %p10060_p8  ;;  %s236_s14 = sshll.u32 %s9969_s13, 4  ;;  %s10075_s14 = int_to_ptr.vmem [resolvable:$true] %s236_s14 }
  0x12   : > { %s9970_s15 = smov [#allocation10]   ;;  %s9778_s19 = scalar_lea.hbm %s12964_s1, 4096 }
  0x13   : > { %p10071_p11 = pnand %p9411_p9, %p12971_p1  ;;  %s10077_s16 = sshll.u32 %s9970_s15, 4  ;;  %s253_s16 = int_to_ptr.vmem [resolvable:$true] %s10077_s16 }
  0x14   : > { %p9779_p12 = scmp.ne.s32.totalorder %s12964_s1, %s9778_s19  ;;  %p9785_p5 = scmp.lt.u32.totalorder %s9778_s19, %s12964_s1 }
  0x15   : > { %p10087_p13 = pneg %p10071_p11 }
  0x17   : > { %p9781_p0 = pnand %p10087_p13, %p9779_p12 }
  0x19   : > { %p9782_p3 = pneg %p9781_p0 }
  0x1b   : > { %p9787_p7 = pnand %p9785_p5, %p9782_p3 }
  0x1d   : > { %9790 = shalt.err (!%p9787_p7)
}
  0x1e   : > { %s9791_s10 = scalar_lea.vmem %s10064_s11, 4096  ;;  %p9799_p2 = scmp.lt.s32.totalorder %s10064_s11, %s10064_s11 }
  0x1f   : > { %p9792_p9 = scmp.ne.s32.totalorder %s10064_s11, %s9791_s10  ;;  %p9800_p6 = scmp.lt.s32.totalorder %s9791_s10, %s9791_s10 }
  0x21   : > { %p9794_p10 = pnand %p9792_p9, %p10087_p13  ;;  %p9801_p12 = por %p9800_p6, %p9799_p2 }
  0x23   : > { %p9795_p1 = pneg %p9794_p10 }
  0x25   : > { %p9802_p0 = pnand %p9801_p12, %p9795_p1 }
  0x27   : > { %9805 = shalt.err (!%p9802_p0)
}
  0x28   : > { %s9971_s13 = smov 64   ;;  %s9972_s15 = smov 4  }
  0x29   : > { %9414 = dma.hbm_to_vmem [thread:$0]  (!%p10071_p11), %s12964_s1, 4096, %s10064_s11, [#allocation8], %s9971_s13, %s9971_s13, %s9972_s15  }
  0x2a   : > { %s9806_s21 = scalar_lea.hbm %s12966_s3, 9216 }
  0x2b   : > { %p9807_p2 = scmp.ne.s32.totalorder %s12966_s3, %s9806_s21  ;;  %p9813_p10 = scmp.lt.u32.totalorder %s9806_s21, %s12966_s3 }
  0x2d   : > { %p9809_p1 = pnand %p9807_p2, %p10087_p13 }
  0x2f   : > { %p9810_p6 = pneg %p9809_p1 }
  0x31   : > { %p9815_p3 = pnand %p9813_p10, %p9810_p6 }
  0x33   : > { %9818 = shalt.err (!%p9815_p3)
}
  0x34   : > { %s9819_s11 = scalar_lea.vmem %s10075_s14, 9216  ;;  %p9827_p12 = scmp.lt.s32.totalorder %s10075_s14, %s10075_s14 }
  0x35   : > { %p9820_p5 = scmp.ne.s32.totalorder %s10075_s14, %s9819_s11  ;;  %p9828_p0 = scmp.lt.s32.totalorder %s9819_s11, %s9819_s11 }
  0x37   : > { %p9822_p7 = pnand %p9820_p5, %p10087_p13  ;;  %p9829_p2 = por %p9828_p0, %p9827_p12 }
  0x39   : > { %p9823_p9 = pneg %p9822_p7 }
  0x3b   : > { %p9830_p1 = pnand %p9829_p2, %p9823_p9 }
  0x3d   : > { %9833 = shalt.err (!%p9830_p1)
}
  0x3e   : > { %9417 = dma.hbm_to_vmem [thread:$0]  (!%p10071_p11), %s12966_s3, 9216, %s10075_s14, [#allocation8], %s9971_s13, %s9971_s13, %s9972_s15  }
  0x3f   : > { %s9834_s20 = scalar_lea.hbm %s12968_s5, 4096 }
  0x40   : > { %p9835_p6 = scmp.ne.s32.totalorder %s12968_s5, %s9834_s20  ;;  %p9841_p5 = scmp.lt.u32.totalorder %s9834_s20, %s12968_s5 }
  0x42   : > { %p9837_p10 = pnand %p9835_p6, %p10087_p13 }
  0x44   : > { %p9838_p3 = pneg %p9837_p10 }
  0x46   : > { %p9843_p7 = pnand %p9841_p5, %p9838_p3 }
  0x48   : > { %9846 = shalt.err (!%p9843_p7)
}
  0x49   : > { %s9847_s11 = scalar_lea.vmem %s253_s16, 4096  ;;  %p9855_p2 = scmp.lt.s32.totalorder %s253_s16, %s253_s16 }
  0x4a   : > { %p9848_p9 = scmp.ne.s32.totalorder %s253_s16, %s9847_s11  ;;  %p9856_p1 = scmp.lt.s32.totalorder %s9847_s11, %s9847_s11 }
  0x4c   : > { %p9850_p12 = pnand %p9848_p9, %p10087_p13  ;;  %p9857_p4 = por %p9856_p1, %p9855_p2 }
  0x4e   : > { %p9851_p0 = pneg %p9850_p12 }
  0x50   : > { %p9858_p8 = pnand %p9857_p4, %p9851_p0 }
  0x52   : > { %9861 = shalt.err (!%p9858_p8)
}
  0x53   : > { %s9973_s14 = smov 256   ;;  %s9974_s22 = smov 16  }
  0x54   : > { %9420 = dma.hbm_to_vmem [thread:$0]  (!%p10071_p11), %s12968_s5, 4096, %s253_s16, [#allocation11], %s9973_s14, %s9973_s14, %s9974_s22  }
  0x55   : > { %s10154_s8 = sadd.s32 1, %s9966_s27   ;;  %s32_s18 = sadd.s32 1, %s9962_s26 }
  0x56   : > { %s29_s17 = ssub.s32 %s9966_s27, %s10154_s8  ;;  %p39_p8 = scmp.ne.s32.totalorder %s9962_s26, %s9958_s25 }
  0x57   : > { %p30_p4 = scmp.eq.s32.totalorder %s29_s17, 0  ;;  %p40_p13 = scmp.eq.s32.totalorder %s9966_s27, 0 }
  0x58   : > { %p9432_p6 = scmp.lt.s32.totalorder %s9966_s27, 2  ;;  %p12988_p3 = scmp.eq.s32.totalorder %s10041_s28, 1 }
  0x59   : > { %s10164_s19 = scalar_select %p30_p4, %s9962_s26, %s32_s18  }
  0x5a   : > { %p41_p10 = por %p40_p13, %p39_p8  ;;  %p10168_p5 = por %p12988_p3, %p39_p8 }
  0x5b   : > { %s269_s20 = sand.u32 1, %s9962_s26   ;;  %s8537_s21 = sshll.u32 %s9966_s27, 13 }
  0x5c   : > { %s8033_s16 = sshll.u32 %s269_s20, 9  ;;  %s10177_s10 = scalar_lea.hbm %s12963_s0, %s8537_s21 }
  0x5d   : > { %s273_s11 = scalar_lea.vmem [#allocation4], %s8033_s16  ;;  %p10179_p11 = pnand %p9432_p6, %p41_p10 }
  0x5e   : > { %s280_s13 = sshll.u32 %s273_s11, 4  ;;  %s10185_s17 = scalar_lea.sflag [#allocation5], %s269_s20  ;;  %s10183_s13 = int_to_ptr.vmem [resolvable:$true] %s280_s13 }
  0x5f   : > { %s9862_s18 = scalar_lea.hbm %s10177_s10, 8192  ;;  %p9864_p9 = pneg %p10179_p11 }
  0x60   : > { %p9863_p7 = scmp.ne.s32.totalorder %s10177_s10, %s9862_s18  ;;  %s9867_s23 = scalar_lea.hbm %s12963_s0, 16384 }
  0x61   : > { %p9868_p2 = scmp.lt.u32.totalorder %s10177_s10, %s12963_s0  ;;  %p9869_p1 = scmp.lt.u32.totalorder %s9867_s23, %s9862_s18 }
  0x62   : > { %p9865_p12 = pnand %p9864_p9, %p9863_p7  ;;  %p9871_p8 = scmp.lt.u32.totalorder %s9862_s18, %s10177_s10 }
  0x63   : > { %p9870_p4 = por %p9869_p1, %p9868_p2 }
  0x64   : > { %p9866_p0 = pneg %p9865_p12 }
  0x65   : > { %p9872_p13 = por %p9871_p8, %p9870_p4 }
  0x67   : > { %p9873_p6 = pnand %p9872_p13, %p9866_p0 }
  0x69   : > { %9876 = shalt.err (!%p9873_p6)
}
  0x6a   : > { %s9877_s20 = scalar_lea.vmem %s10183_s13, 8192  ;;  %s9975_s21 = smov [#allocation4]  }
  0x6b   : > { %p9878_p10 = scmp.ne.s32.totalorder %s10183_s13, %s9877_s20  ;;  %s9882_s16 = sshll.u32 %s9975_s21, 4  ;;  %s9883_s16 = int_to_ptr.vmem [resolvable:$false] %s9882_s16 }
  0x6c   : > { %s9884_s29 = scalar_lea.vmem %s9883_s16, 16384  ;;  %p9885_p12 = scmp.lt.s32.totalorder %s10183_s13, %s9883_s16 }
  0x6d   : > { %p9880_p3 = pnand %p9878_p10, %p9864_p9  ;;  %p9886_p2 = scmp.lt.s32.totalorder %s9884_s29, %s9877_s20 }
  0x6f   : > { %p9881_p7 = pneg %p9880_p3  ;;  %p9887_p1 = por %p9886_p2, %p9885_p12 }
  0x71   : > { %p9888_p4 = pnand %p9887_p1, %p9881_p7 }
  0x73   : > { %9891 = shalt.err (!%p9888_p4)
}
  0x74   : > { %9424 = dma.hbm_to_vmem [thread:$0]  (!%p10179_p11), %s10177_s10, 8192, %s10183_s13, %s10185_s17, %s9973_s14, %s9973_s14, %s9974_s22  }
  0x75   : > { %p12991_p9 = scmp.ne.s32.totalorder %s12985_s9, 0 }
  0x77   : > { %292 = sbr.rel (%p12991_p9) target bundleno = 1388 (0x56c), region = 48 }
  0x7e   : > { %s10219_s18 = sand.u32 1, %s9958_s25   ;;  %p12992_p0 = scmp.ne.s32.totalorder %s12982_s30, 0 }
  0x7f   : > { %s8037_s23 = sshll.u32 %s10219_s18, 9  ;;  %s295_s11 = scalar_lea.sflag [#allocation5], %s10219_s18 }
  0x80   : > { %s10225_s15 = scalar_lea.vmem [#allocation4], %s8037_s23 }
  0x81   : > { %9937 = dma.done.wait (%p12992_p0), %s295_s11, 8192  }
  0x82   : > { %9939 = vsyncadd (%p12992_p0), %s295_s11, 4294959104  ;;  %p12993_p11 = scmp.eq.s32.totalorder %s10041_s28, 0 }
  0x84   : > { %9941 = dma.done.wait (%p12993_p11), [#allocation8], 13312   ;;  %p12994_p8 = pmov %p12993_p11 }
  0x86   : > { %9943 = vsyncadd (%p12994_p8), [#allocation8], 4294953984  ;;  %p12995_p13 = pmov %p12994_p8 }
  0x87   : > { %p12996_p6 = pmov %p12994_p8 }
  0x88   : > { %9945 = dma.done.wait (%p12995_p13), [#allocation11], 4096  }
  0x89   : > { %9947 = vsyncadd (%p12996_p6), [#allocation11], 4294963200  ;;  %v9479_v0 = vld [vmem:[#allocation7 + $0x40] sm:$0xff]   ;;  %v9481_v2 = vld [vmem:[#allocation7 + $0x48] sm:$0xff]   ;;  %vm349_vm0 = vcmask 1040384   ;;  %vm2753_vm8 = vcmask 1042432  }
  0x8a   : > { %v9480_v1 = vld [vmem:[#allocation7] sm:$0xff]   ;;  %9379 = vmatprep.subr.bf16.mxu1 %v9479_v0  ;;  %8635 = vmatprep.subr.bf16.mxu0 %v9479_v0  ;;  %v9482_v3 = vld [vmem:[#allocation7 + $0x8] sm:$0xff]   ;;  %v9483_v4 = vld [vmem:[#allocation7 + $0x50] sm:$0xff]   ;;  %vm350_vm1 = vsmask.f32 256  ;;  %vm2754_vm9 = vcmask 1046532  }
  0x8b   : > { %9387 = vmatpush3.bf16.msra.mxu1 %v9480_v1  ;;  %8636 = vmatpush3.bf16.msra.mxu0 %v9480_v1  ;;  %v9484_v5 = vld [vmem:[#allocation7 + $0x10] sm:$0xff]   ;;  %v9485_v6 = vld [vmem:[#allocation7 + $0x58] sm:$0xff]   ;;  %v9487_v8 = vld [vmem:[#allocation7 + $0x60] sm:$0xff]   ;;  %vm406_vm3 = vsmask.f32 7938  ;;  %vm1884_vm11 = vcmask 1043456  }
  0x8c   : > { %9380 = vmatprep.subr.bf16.mxu1 %v9481_v2  ;;  %8637 = vmatprep.subr.bf16.mxu0 %v9481_v2  ;;  %v9486_v7 = vld [vmem:[#allocation7 + $0x18] sm:$0xff]   ;;  %v9488_v9 = vld [vmem:[#allocation7 + $0x20] sm:$0xff]   ;;  %v9489_v10 = vld [vmem:[#allocation7 + $0x68] sm:$0xff]   ;;  %vm2190_vm5 = vsmask.f32 3328  ;;  %s12366_s29 = scalar_lea.vmem [#allocation12], %s8037_s23 }
  0x8d   : > { %v9497_v11 = vld [vmem:[%s10225_s15 + $0x184] ss:$16 sps:$4 sm:$0xff]   ;;  %v9490_v12 = vld [vmem:[#allocation7 + $0x28] sm:$0xff]   ;;  %v9493_v15 = vld [vmem:[#allocation7 + $0x78] sm:$0xff]   ;;  %vm2191_vm6 = vsmask.f32 7440 }
  0x8e   : > { %1239 = vmatprep.mubr.bf16.mxu1 %v9497_v11  ;;  %v9491_v13 = vld [vmem:[#allocation7 + $0x70] sm:$0xff]   ;;  %v9494_v16 = vld [vmem:[#allocation7 + $0x38] sm:$0xff]   ;;  %v9498_v17 = vld [vmem:[#allocation7 + $0xc0] sm:$0xff]   ;;  %vm1561_vm12 = vsmask.f32 4368  ;;  %s8634_s23 = sshll.u32 %s10041_s28, 13 }
  0x8f   : > { %9388 = vmatpush3.bf16.msra.mxu1 %v9482_v3  ;;  %8638 = vmatpush3.bf16.msra.mxu0 %v9482_v3  ;;  %v9492_v14 = vld [vmem:[#allocation7 + $0x30] sm:$0xff]   ;;  %v9499_v19 = vld [vmem:[#allocation7 + $0x80] sm:$0xff]   ;;  %v9500_v21 = vld [vmem:[#allocation7 + $0xc8] sm:$0xff]   ;;  %s7925_s11 = sshll.u32 %s12366_s29, 4  ;;  %s12913_s9 = scalar_lea.hbm %s12970_s7, %s8634_s23  ;;  %s12915_s11 = int_to_ptr.vmem [resolvable:$true] %s7925_s11 }
  0x90   : > { %9381 = vmatprep.subr.bf16.mxu1 %v9483_v4  ;;  %8639 = vmatprep.subr.bf16.mxu0 %v9483_v4  ;;  %v9495_v18 = vld [vmem:[%s10225_s15 + $0x180] ss:$16 sps:$4 sm:$0xff]   ;;  %v9502_v20 = vld [vmem:[%s10225_s15 + $0x1a4] ss:$16 sps:$4 sm:$0xff]   ;;  %v9501_v22 = vld [vmem:[#allocation7 + $0x88] sm:$0xff]   ;;  %s7912_s28 = scalar_lea.sflag [#allocation6], %s10219_s18 }
  0x91   : > { %v9505_v23 = vld [vmem:[#allocation7 + $0xd0] sm:$0xff]   ;;  %v9507_v28 = vld [vmem:[#allocation7 + $0xd8] sm:$0xff]   ;;  %v9512_v32 = vld [vmem:[#allocation7 + $0xe0] sm:$0xff]   ;;  %s9892_s14 = scalar_lea.vmem %s12915_s11, 8192  ;;  %s9977_s22 = smov [#allocation12]  }
  0x92   : > { %v9521_v24 = vld [vmem:[%s10225_s15] ss:$16 sps:$4 sm:$0xff]   ;;  %v9523_v25 = vld [vmem:[%s10225_s15 + $0x4] ss:$16 sps:$4 sm:$0xff]   ;;  %v9508_v31 = vld [vmem:[#allocation7 + $0x98] sm:$0xff]   ;;  %p9893_p10 = scmp.ne.s32.totalorder %s12915_s11, %s9892_s14  ;;  %s9896_s10 = sshll.u32 %s9977_s22, 4  ;;  %s9897_s10 = int_to_ptr.vmem [resolvable:$false] %s9896_s10 }
  0x93   : > { %9389 = vmatpush3.bf16.msra.mxu1 %v9484_v5  ;;  %8640 = vmatpush3.bf16.msra.mxu0 %v9484_v5  ;;  %v9504_v26 = vld [vmem:[%s10225_s15 + $0x1a0] ss:$16 sps:$4 sm:$0xff]   ;;  %v9509_v29 = vld [vmem:[%s10225_s15 + $0x1c4] ss:$16 sps:$4 sm:$0xff]   ;;  %v9514_v38 = vld [vmem:[#allocation7 + $0xe8] sm:$0xff]   ;;  %s9898_s13 = scalar_lea.vmem %s9897_s10, 16384  ;;  %p9899_p12 = scmp.lt.s32.totalorder %s12915_s11, %s9897_s10 }
  0x94   : > { %9382 = vmatprep.subr.bf16.mxu1 %v9485_v6  ;;  %8641 = vmatprep.subr.bf16.mxu0 %v9485_v6  ;;  %v9506_v27 = vld [vmem:[#allocation7 + $0x90] sm:$0xff]   ;;  %v9513_v36 = vld [vmem:[#allocation7 + $0xa0] sm:$0xff]   ;;  %v9515_v39 = vld [vmem:[#allocation7 + $0xa8] sm:$0xff]   ;;  %p9894_p3 = pnand %p9893_p10, %p10168_p5  ;;  %p9900_p2 = scmp.lt.s32.totalorder %s9898_s13, %s9892_s14 }
  0x95   : > { %1143 = vmatprep.mubr.bf16.mxu0 %v9523_v25  ;;  %v9529_v30 = vld [vmem:[%s10225_s15 + $0x24] ss:$16 sps:$4 sm:$0xff]   ;;  %v9531_v33 = vld [vmem:[%s10225_s15 + $0x20] ss:$16 sps:$4 sm:$0xff]   ;;  %v9528_v45 = vld [vmem:[%s10225_s15 + $0xc] ss:$16 sps:$4 sm:$0xff]  }
  0x96   : > { %v9535_v34 = vld [vmem:[%s10225_s15 + $0x44] ss:$16 sps:$4 sm:$0xff]   ;;  %v9511_v35 = vld [vmem:[%s10225_s15 + $0x1c0] ss:$16 sps:$4 sm:$0xff]   ;;  %v9524_v46 = vld [vmem:[#allocation7 + $0xf8] sm:$0xff]   ;;  %p9895_p7 = pneg %p9894_p3  ;;  %p9901_p1 = por %p9900_p2, %p9899_p12 }
  0x97   : > { %9390 = vmatpush3.bf16.msra.mxu1 %v9486_v7  ;;  %8642 = vmatpush3.bf16.msra.mxu0 %v9486_v7  ;;  %v9516_v37 = vld [vmem:[%s10225_s15 + $0x1e4] ss:$16 sps:$4 sm:$0xff]   ;;  %v9537_v41 = vld [vmem:[%s10225_s15 + $0x40] ss:$16 sps:$4 sm:$0xff]   ;;  %v9525_v47 = vld [vmem:[#allocation7 + $0xb8] sm:$0xff]  }
  0x98   : > { %9383 = vmatprep.subr.bf16.mxu1 %v9487_v8  ;;  %8643 = vmatprep.subr.bf16.mxu0 %v9487_v8  ;;  %v9519_v40 = vld [vmem:[#allocation7 + $0xf0] sm:$0xff]   ;;  %v9526_v50 = vld [vmem:[%s10225_s15 + $0x8] ss:$16 sps:$4 sm:$0xff]   ;;  %v9532_v51 = vld [vmem:[%s10225_s15 + $0x2c] ss:$16 sps:$4 sm:$0xff]   ;;  %p9902_p4 = pnand %p9901_p1, %p9895_p7 }
  0x99   : > { %v9541_v42 = vld [vmem:[%s10225_s15 + $0x64] ss:$16 sps:$4 sm:$0xff]   ;;  %v9518_v43 = vld [vmem:[%s10225_s15 + $0x1e0] ss:$16 sps:$4 sm:$0xff]   ;;  %v9534_v54 = vld [vmem:[%s10225_s15 + $0x28] ss:$16 sps:$4 sm:$0xff]  }
  0x9a   : > { %v9520_v44 = vld [vmem:[#allocation7 + $0xb0] sm:$0xff]   ;;  %v9538_v55 = vld [vmem:[%s10225_s15 + $0x4c] ss:$16 sps:$4 sm:$0xff]   ;;  %v9607_v58 = vld [vmem:[#allocation9 + $0x40] sm:$0xff]  }
  0x9b   : > { %9391 = vmatpush3.bf16.msra.mxu1 %v9488_v9  ;;  %8644 = vmatpush3.bf16.msra.mxu0 %v9488_v9  ;;  %v9543_v48 = vld [vmem:[%s10225_s15 + $0x60] ss:$16 sps:$4 sm:$0xff]   ;;  %v9547_v49 = vld [vmem:[%s10225_s15 + $0x84] ss:$16 sps:$4 sm:$0xff]   ;;  %v9540_v59 = vld [vmem:[%s10225_s15 + $0x48] ss:$16 sps:$4 sm:$0xff]  }
  0x9c   : > { %9384 = vmatprep.subr.bf16.mxu1 %v9489_v10  ;;  %8645 = vmatprep.subr.bf16.mxu0 %v9489_v10  ;;  %v9549_v52 = vld [vmem:[%s10225_s15 + $0x80] ss:$16 sps:$4 sm:$0xff]   ;;  %v9553_v53 = vld [vmem:[%s10225_s15 + $0xa4] ss:$16 sps:$4 sm:$0xff]   ;;  %v9544_v61 = vld [vmem:[%s10225_s15 + $0x6c] ss:$16 sps:$4 sm:$0xff]  }
  0x9d   : > { %v9555_v56 = vld [vmem:[%s10225_s15 + $0xa0] ss:$16 sps:$4 sm:$0xff]   ;;  %v9559_v57 = vld [vmem:[%s10225_s15 + $0xc4] ss:$16 sps:$4 sm:$0xff]   ;;  %v9609_v62 = vld [vmem:[#allocation9 + $0x48] sm:$0xff]  }
  0x9e   : > { %v9608_v60 = vld [vmem:[#allocation9] sm:$0xff]   ;;  %v9610_v63 = vld [vmem:[#allocation9 + $0x8] sm:$0xff]   ;;  %v9611_v0 = vld [vmem:[#allocation9 + $0x50] sm:$0xff]  }
  0x9f   : > { %9392 = vmatpush3.bf16.msra.mxu1 %v9490_v12  ;;  %8646 = vmatpush3.bf16.msra.mxu0 %v9490_v12  ;;  %v9612_v1 = vld [vmem:[#allocation9 + $0x10] sm:$0xff]   ;;  %v9546_v4 = vld [vmem:[%s10225_s15 + $0x68] ss:$16 sps:$4 sm:$0xff]   ;;  %v9550_v5 = vld [vmem:[%s10225_s15 + $0x8c] ss:$16 sps:$4 sm:$0xff]  }
  0xa0   : > { %9385 = vmatprep.subr.bf16.mxu1 %v9491_v13  ;;  %8647 = vmatprep.subr.bf16.mxu0 %v9491_v13  ;;  %v9561_v2 = vld [vmem:[%s10225_s15 + $0xc0] ss:$16 sps:$4 sm:$0xff]   ;;  %v9565_v3 = vld [vmem:[%s10225_s15 + $0xe4] ss:$16 sps:$4 sm:$0xff]   ;;  %v9552_v8 = vld [vmem:[%s10225_s15 + $0x88] ss:$16 sps:$4 sm:$0xff]  }
  0xa1   : > { %v9567_v6 = vld [vmem:[%s10225_s15 + $0xe0] ss:$16 sps:$4 sm:$0xff]   ;;  %v9571_v7 = vld [vmem:[%s10225_s15 + $0x104] ss:$16 sps:$4 sm:$0xff]   ;;  %v9556_v9 = vld [vmem:[%s10225_s15 + $0xac] ss:$16 sps:$4 sm:$0xff]  }
  0xa2   : > { %v9573_v10 = vld [vmem:[%s10225_s15 + $0x100] ss:$16 sps:$4 sm:$0xff]   ;;  %v9577_v11 = vld [vmem:[%s10225_s15 + $0x124] ss:$16 sps:$4 sm:$0xff]   ;;  %v9558_v12 = vld [vmem:[%s10225_s15 + $0xa8] ss:$16 sps:$4 sm:$0xff]  }
  0xa3   : > { %9393 = vmatpush3.bf16.msra.mxu1 %v9492_v14  ;;  %8648 = vmatpush3.bf16.msra.mxu0 %v9492_v14  ;;  %v9562_v13 = vld [vmem:[%s10225_s15 + $0xcc] ss:$16 sps:$4 sm:$0xff]   ;;  %v9579_v14 = vld [vmem:[%s10225_s15 + $0x120] ss:$16 sps:$4 sm:$0xff]   ;;  %v9576_v25 = vld [vmem:[%s10225_s15 + $0x108] ss:$16 sps:$4 sm:$0xff]  }
  0xa4   : > { %9386 = vmatprep.subr.bf16.mxu1 %v9493_v15  ;;  %8649 = vmatprep.subr.bf16.mxu0 %v9493_v15  ;;  %v9583_v15 = vld [vmem:[%s10225_s15 + $0x144] ss:$16 sps:$4 sm:$0xff]   ;;  %vm10303_vm2 = vmand %vm349_vm0, %vm350_vm1 }
  0xa5   : > { %vm10312_vm4 = vmand %vm349_vm0, %vm406_vm3 }
  0xa6   : > { %vm10336_vm7 = vmor %vm2190_vm5, %vm2191_vm6 }
  0xa7   : > { %9394 = vmatpush3.bf16.msra.mxu1 %v9494_v16  ;;  %8650 = vmatpush3.bf16.msra.mxu0 %v9494_v16  ;;  %v9564_v16 = vld [vmem:[%s10225_s15 + $0xc8] ss:$16 sps:$4 sm:$0xff]   ;;  %vm10417_vm10 = vmor %vm2753_vm8, %vm2754_vm9 }
  0xa8   : > { %8747 = vmatprep.subr.bf16.mxu1 %v9498_v17  ;;  %8859 = vmatprep.subr.bf16.mxu0 %v9607_v58  ;;  %v9568_v17 = vld [vmem:[%s10225_s15 + $0xec] ss:$16 sps:$4 sm:$0xff]   ;;  %vm10459_vm13 = vmand %vm1884_vm11, %vm406_vm3 }
  0xa9   : > { %vm10475_vm14 = vmor %vm350_vm1, %vm1561_vm12 }
  0xaa   : > { %1240 = vmatmul.mubr.bf16.vlgmr.msra.gmra.mrb[0].mxu1 %v9495_v18  ;;  %1144 = vmatmul.mubr.bf16.vlgmr.msra.gmra.mrb[0].mxu0 %v9521_v24  ;;  %v9585_v18 = vld [vmem:[%s10225_s15 + $0x140] ss:$16 sps:$4 sm:$0xff]   ;;  %v9614_v24 = vld [vmem:[#allocation9 + $0x18] sm:$0xff]  }
  0xab   : > { %8748 = vmatpush3.bf16.msra.mxu1 %v9499_v19  ;;  %1247 = vmatprep.mubr.bf16.mxu1 %v9502_v20  ;;  %v9589_v19 = vld [vmem:[%s10225_s15 + $0x164] ss:$16 sps:$4 sm:$0xff]   ;;  %v9570_v20 = vld [vmem:[%s10225_s15 + $0xe8] ss:$16 sps:$4 sm:$0xff]  }
  0xac   : > { %8749 = vmatprep.subr.bf16.mxu1 %v9500_v21  ;;  %1151 = vmatprep.mubr.bf16.mxu0 %v9529_v30  ;;  %v9574_v21 = vld [vmem:[%s10225_s15 + $0x10c] ss:$16 sps:$4 sm:$0xff]   ;;  %v9616_v30 = vld [vmem:[#allocation9 + $0x20] sm:$0xff]  }
  0xad   : > { %8860 = vmatpush3.bf16.msra.mxu0 %v9608_v60  ;;  %v358_v60 = vld [vmem:[#allocation2 + $0x18] sm:$0x1] }
  0xae   : > { %8861 = vmatprep.subr.bf16.mxu0 %v9609_v62  ;;  %v414_v62 = vld [vmem:[#allocation2 + $0x20] sm:$0x1] }
  0xaf   : > { %8750 = vmatpush3.bf16.msra.mxu1 %v9501_v22  ;;  %v9591_v22 = vld [vmem:[%s10225_s15 + $0x160] ss:$16 sps:$4 sm:$0xff]  }
  0xb0   : > { %8751 = vmatprep.subr.bf16.mxu1 %v9505_v23  ;;  %v9613_v23 = vld [vmem:[#allocation9 + $0x58] sm:$0xff]  }
  0xb1   : > { %8862 = vmatpush3.bf16.msra.mxu0 %v9610_v63  ;;  %v9631_v63 = vld [vmem:[#allocation9 + $0xe8] sm:$0xff]  }
  0xb2   : > { %1248 = vmatmul.mubr.bf16.gmra.mrb[4].mxu1 %v9504_v26  ;;  %1152 = vmatmul.mubr.bf16.gmra.mrb[4].mxu0 %v9531_v33  ;;  %v9580_v26 = vld [vmem:[%s10225_s15 + $0x12c] ss:$16 sps:$4 sm:$0xff]   ;;  %v9619_v33 = vld [vmem:[#allocation9 + $0xc0] sm:$0xff]  }
  0xb3   : > { %8752 = vmatpush3.bf16.msra.mxu1 %v9506_v27  ;;  %1255 = vmatprep.mubr.bf16.mxu1 %v9509_v29  ;;  %v9615_v27 = vld [vmem:[#allocation9 + $0x60] sm:$0xff]   ;;  %v9586_v29 = vld [vmem:[%s10225_s15 + $0x14c] ss:$16 sps:$4 sm:$0xff]  }
  0xb4   : > { %8753 = vmatprep.subr.bf16.mxu1 %v9507_v28  ;;  %1159 = vmatprep.mubr.bf16.mxu0 %v9535_v34  ;;  %v9582_v28 = vld [vmem:[%s10225_s15 + $0x128] ss:$16 sps:$4 sm:$0xff]  }
  0xb5   : > { %8863 = vmatprep.subr.bf16.mxu0 %v9611_v0  ;;  %v9617_v34 = vld [vmem:[#allocation9 + $0x68] sm:$0xff]  }
  0xb6   : > { %8864 = vmatpush3.bf16.msra.mxu0 %v9612_v1  ;;  %v9600_v0 = vld [vmem:[%s10225_s15 + $0x1a8] ss:$16 sps:$4 sm:$0xff]   ;;  %v9601_v1 = vld [vmem:[%s10225_s15 + $0x1cc] ss:$16 sps:$4 sm:$0xff]  }
  0xb7   : > { %8754 = vmatpush3.bf16.msra.mxu1 %v9508_v31  ;;  %8865 = vmatprep.subr.bf16.mxu0 %v9613_v23  ;;  %v9588_v31 = vld [vmem:[%s10225_s15 + $0x148] ss:$16 sps:$4 sm:$0xff]  }
  0xb8   : > { %8755 = vmatprep.subr.bf16.mxu1 %v9512_v32  ;;  %v9592_v32 = vld [vmem:[%s10225_s15 + $0x16c] ss:$16 sps:$4 sm:$0xff]  }
  0xba   : > { %1256 = vmatmul.mubr.bf16.gmra.mrb[8].mxu1 %v9511_v35  ;;  %1160 = vmatmul.mubr.bf16.gmra.mrb[8].mxu0 %v9537_v41  ;;  %v9618_v35 = vld [vmem:[#allocation9 + $0x28] sm:$0xff]  }
  0xbb   : > { %8756 = vmatpush3.bf16.msra.mxu1 %v9513_v36  ;;  %1263 = vmatprep.mubr.bf16.mxu1 %v9516_v37  ;;  %v9620_v36 = vld [vmem:[#allocation9 + $0x80] sm:$0xff]   ;;  %v9621_v37 = vld [vmem:[#allocation9 + $0xc8] sm:$0xff]  }
  0xbc   : > { %8757 = vmatprep.subr.bf16.mxu1 %v9514_v38  ;;  %1167 = vmatprep.mubr.bf16.mxu0 %v9541_v42  ;;  %v355_v38 = vld [vmem:[#allocation2 + $0xc] sm:$0x1]  ;;  %v9594_v41 = vld [vmem:[%s10225_s15 + $0x168] ss:$16 sps:$4 sm:$0xff]   ;;  %v12997_v42 = vmov 0 }
  0xbd   : > { %8866 = vmatpush3.bf16.msra.mxu0 %v9614_v24  ;;  %v12998_v42 = vsel %vm10303_vm2, 4294967295, %v12997_v42 }
  0xbe   : > { %8867 = vmatprep.subr.bf16.mxu0 %v9615_v27  ;;  %12999 = vst [vmem:[#allocation18_spill] sm:$0xff] %v12998_v42  ;;  %v9637_v27 = vld [vmem:[#allocation9 + $0xf8] sm:$0xff]  }
  0xbf   : > { %8758 = vmatpush3.bf16.msra.mxu1 %v9515_v39  ;;  %v9622_v39 = vld [vmem:[#allocation9 + $0x88] sm:$0xff]  }
  0xc0   : > { %8759 = vmatprep.subr.bf16.mxu1 %v9519_v40  ;;  %v12975_v40 = vmov 0  }
  0xc1   : > { %8868 = vmatpush3.bf16.msra.mxu0 %v9616_v30  ;;  %342 = vst [vmem:[#allocation2] sm:$0xf] %v12975_v40  ;;  %343 = vst [vmem:[#allocation2 + $0x4] sm:$0xf] %v12975_v40  ;;  %v9638_v30 = vld [vmem:[#allocation9 + $0xb8] sm:$0xff]  }
  0xc2   : > { %1264 = vmatmul.mubr.bf16.gmra.mrb[12].mxu1 %v9518_v43  ;;  %1168 = vmatmul.mubr.bf16.gmra.mrb[12].mxu0 %v9543_v48  ;;  %344 = vst [vmem:[#allocation2 + $0x8] sm:$0x1] %v12975_v40  ;;  %346 = vst [vmem:[#allocation2 + $0xcc] sm:$0xf] %v12975_v40  ;;  %v9595_v43 = vld [vmem:[%s10225_s15 + $0x18c] ss:$16 sps:$4 sm:$0xff]  }
  0xc3   : > { %8760 = vmatpush3.bf16.msra.mxu1 %v9520_v44  ;;  %1304 = vmatprep.mubr.bf16.mxu1 %v9528_v45  ;;  %347 = vst [vmem:[#allocation2 + $0xd0] sm:$0xf] %v12975_v40  ;;  %348 = vst [vmem:[#allocation2 + $0xd4] sm:$0x1] %v12975_v40  ;;  %v356_v44 = vsel %vm10303_vm2, 0, %v355_v38  ;;  %v9623_v45 = vld [vmem:[#allocation9 + $0xd0] sm:$0xff]  }
  0xc4   : > { %8761 = vmatprep.subr.bf16.mxu1 %v9524_v46  ;;  %1175 = vmatprep.mubr.bf16.mxu0 %v9547_v49  ;;  %357 = vst [vmem:[#allocation2 + $0xc] sm:$0x1] %v356_v44  ;;  %v9625_v46 = vld [vmem:[#allocation9 + $0x90] sm:$0xff]   ;;  %v9627_v48 = vld [vmem:[#allocation9 + $0xd8] sm:$0xff]  }
  0xc5   : > { %8869 = vmatprep.subr.bf16.mxu0 %v9617_v34  ;;  %v9606_v44 = vld [vmem:[%s10225_s15 + $0x1e8] ss:$16 sps:$4 sm:$0xff]  }
  0xc6   : > { %8870 = vmatpush3.bf16.msra.mxu0 %v9618_v35 }
  0xc7   : > { %8762 = vmatpush3.bf16.msra.mxu1 %v9525_v47  ;;  %v13000_v47 = vmov 0 }
  0xc8   : > { %8971 = vmatprep.subr.bf16.mxu1 %v9619_v33  ;;  %v13001_v47 = vsel %vm10312_vm4, 4294967295, %v13000_v47  ;;  %v352_v49 = vld [vmem:[#allocation2] sm:$0x1] }
  0xc9   : > { %13002 = vst [vmem:[#allocation19_spill] sm:$0xff] %v13001_v47 }
  0xca   : > { %1305 = vmatmul.mubr.bf16.vlgmr.msra.gmra.mrb[16].mxu1 %v9526_v50  ;;  %1176 = vmatmul.mubr.bf16.gmra.mrb[16].mxu0 %v9549_v52  ;;  %v411_v50 = vld [vmem:[#allocation2 + $0x14] sm:$0x1]  ;;  %v9597_v52 = vld [vmem:[%s10225_s15 + $0x188] ss:$16 sps:$4 sm:$0xff]  }
  0xcb   : > { %1312 = vmatprep.mubr.bf16.mxu1 %v9532_v51  ;;  %1183 = vmatprep.mubr.bf16.mxu0 %v9553_v53  ;;  %v353_v51 = vsel %vm10303_vm2, 0, %v352_v49  ;;  %v412_v53 = vsel %vm10312_vm4, 0, %v411_v50  ;;  %v423_v50 = vld [vmem:[#allocation2 + $0x44] sm:$0x1] }
  0xcc   : > { %8972 = vmatpush3.bf16.msra.mxu1 %v9620_v36  ;;  %354 = vst [vmem:[#allocation2] sm:$0x1] %v353_v51  ;;  %413 = vst [vmem:[#allocation2 + $0x14] sm:$0x1] %v412_v53  ;;  %v424_v51 = vsel %vm10312_vm4, 0, %v423_v50  ;;  %v9642_v53 = vld [vmem:[#allocation9 + $0x100] sm:$0xff]  }
  0xcd   : > { %8973 = vmatprep.subr.bf16.mxu1 %v9621_v37  ;;  %425 = vst [vmem:[#allocation2 + $0x44] sm:$0x1] %v424_v51 }
  0xd0   : > { %8974 = vmatpush3.bf16.msra.mxu1 %v9622_v39 }
  0xd1   : > { %8975 = vmatprep.subr.bf16.mxu1 %v9623_v45  ;;  %v420_v45 = vld [vmem:[#allocation2 + $0x38] sm:$0x1] }
  0xd2   : > { %1313 = vmatmul.mubr.bf16.gmra.mrb[20].mxu1 %v9534_v54  ;;  %1184 = vmatmul.mubr.bf16.gmra.mrb[20].mxu0 %v9555_v56  ;;  %v9628_v54 = vld [vmem:[#allocation9 + $0x98] sm:$0xff]   ;;  %v408_v56 = vld [vmem:[#allocation2 + $0x8] sm:$0x1] }
  0xd3   : > { %1320 = vmatprep.mubr.bf16.mxu1 %v9538_v55  ;;  %1191 = vmatprep.mubr.bf16.mxu0 %v9559_v57  ;;  %v9598_v55 = vld [vmem:[%s10225_s15 + $0x1ac] ss:$16 sps:$4 sm:$0xff]   ;;  %v9629_v57 = vld [vmem:[#allocation9 + $0xe0] sm:$0xff]   ;;  %v409_v58 = vsel %vm10312_vm4, 0, %v408_v56  ;;  %v426_v56 = vld [vmem:[#allocation2 + $0x50] sm:$0x1] }
  0xd4   : > { %8976 = vmatpush3.bf16.msra.mxu1 %v9625_v46  ;;  %410 = vst [vmem:[#allocation2 + $0x8] sm:$0x1] %v409_v58  ;;  %v9639_v38 = vld [vmem:[#allocation2] sm:$0xff]   ;;  %v421_v46 = vsel %vm10312_vm4, 0, %v420_v45 }
  0xd5   : > { %8977 = vmatprep.subr.bf16.mxu1 %v9627_v48  ;;  %422 = vst [vmem:[#allocation2 + $0x38] sm:$0x1] %v421_v46  ;;  %v367_v48 = vld [vmem:[#allocation2 + $0x3c] sm:$0x1]  ;;  %v9647_v58 = vld [vmem:[#allocation9 + $0x148] sm:$0xff]  }
  0xd6   : > { %v368_v49 = vsel %vm10303_vm2, 0, %v367_v48 }
  0xd7   : > { %369 = vst [vmem:[#allocation2 + $0x3c] sm:$0x1] %v368_v49 }
  0xd8   : > { %8978 = vmatpush3.bf16.msra.mxu1 %v9628_v54  ;;  %v370_v54 = vld [vmem:[#allocation2 + $0x48] sm:$0x1] }
  0xd9   : > { %8979 = vmatprep.subr.bf16.mxu1 %v9629_v57  ;;  %v427_v57 = vsel %vm10312_vm4, 0, %v426_v56 }
  0xda   : > { %1321 = vmatmul.mubr.bf16.gmra.mrb[24].mxu1 %v9540_v59  ;;  %1192 = vmatmul.mubr.bf16.gmra.mrb[24].mxu0 %v9561_v2  ;;  %v9630_v59 = vld [vmem:[#allocation9 + $0xa0] sm:$0xff]   ;;  %v415_v2 = vsel %vm10312_vm4, 0, %v414_v62  ;;  %428 = vst [vmem:[#allocation2 + $0x50] sm:$0x1] %v427_v57 }
  0xdb   : > { %1328 = vmatprep.mubr.bf16.mxu1 %v9544_v61  ;;  %1199 = vmatprep.mubr.bf16.mxu0 %v9565_v3  ;;  %v359_v61 = vsel %vm10303_vm2, 0, %v358_v60  ;;  %v9633_v3 = vld [vmem:[#allocation9 + $0xa8] sm:$0xff]   ;;  %416 = vst [vmem:[#allocation2 + $0x20] sm:$0x1] %v415_v2  ;;  %v373_v60 = vld [vmem:[#allocation2 + $0x54] sm:$0x1] }
  0xdc   : > { %8980 = vmatpush3.bf16.msra.mxu1 %v9630_v59  ;;  %360 = vst [vmem:[#allocation2 + $0x18] sm:$0x1] %v359_v61  ;;  %v9648_v59 = vld [vmem:[#allocation9 + $0x108] sm:$0xff]   ;;  %v374_v61 = vsel %vm10303_vm2, 0, %v373_v60  ;;  %v429_v62 = vld [vmem:[#allocation2 + $0x5c] sm:$0x1] }
  0xdd   : > { %8981 = vmatprep.subr.bf16.mxu1 %v9631_v63  ;;  %375 = vst [vmem:[#allocation2 + $0x54] sm:$0x1] %v374_v61  ;;  %v430_v63 = vsel %vm10312_vm4, 0, %v429_v62  ;;  %v432_v2 = vld [vmem:[#allocation2 + $0x68] sm:$0x1] }
  0xde   : > { %431 = vst [vmem:[#allocation2 + $0x5c] sm:$0x1] %v430_v63 }
  0xe0   : > { %8982 = vmatpush3.bf16.msra.mxu1 %v9633_v3  ;;  %v433_v3 = vsel %vm10312_vm4, 0, %v432_v2 }
  0xe1   : > { %434 = vst [vmem:[#allocation2 + $0x68] sm:$0x1] %v433_v3 }
  0xe2   : > { %1329 = vmatmul.mubr.bf16.gmra.mrb[28].mxu1 %v9546_v4  ;;  %1200 = vmatmul.mubr.bf16.gmra.mrb[28].mxu0 %v9567_v6  ;;  %v9624_v4 = vld [vmem:[#allocation9 + $0x70] sm:$0xff]   ;;  %v2143_v6 = vld [vmem:[#allocation2 + $0x4] sm:$0xf] }
  0xe3   : > { %1336 = vmatprep.mubr.bf16.mxu1 %v9550_v5  ;;  %1207 = vmatprep.mubr.bf16.mxu0 %v9571_v7  ;;  %v2142_v5 = vld [vmem:[#allocation2] sm:$0xf]  ;;  %v9626_v7 = vld [vmem:[#allocation9 + $0x30] sm:$0xff]  }
  0xe4   : > { %8871 = vmatprep.subr.bf16.mxu0 %v9624_v4  ;;  %v9653_v4 = vld [vmem:[#allocation9 + $0x150] sm:$0xff]  }
  0xe5   : > { %8872 = vmatpush3.bf16.msra.mxu0 %v9626_v7 }
  0xea   : > { %1337 = vmatmul.mubr.bf16.gmra.mrb[32].mxu1 %v9552_v8  ;;  %1208 = vmatmul.mubr.bf16.gmra.mrb[32].mxu0 %v9573_v10  ;;  %v2194_v8 = vshrl.u32 %v2142_v5, 16  ;;  %v2203_v10 = vshll.u32 %v2143_v6, 16 }
  0xeb   : > { %1344 = vmatprep.mubr.bf16.mxu1 %v9556_v9  ;;  %1215 = vmatprep.mubr.bf16.mxu0 %v9577_v11  ;;  %v2197_v9 = vshll.u32 %v2142_v5, 16  ;;  %v2207_v11 = vshrl.u32 %v2143_v6, 16  ;;  %v9654_v5 = vld [vmem:[#allocation9 + $0x110] sm:$0xff]  }
  0xec   : > { %v379_v6 = vld [vmem:[#allocation2 + $0x6c] sm:$0x1] }
  0xed   : > { %v380_v7 = vsel %vm10303_vm2, 0, %v379_v6 }
  0xee   : > { %381 = vst [vmem:[#allocation2 + $0x6c] sm:$0x1] %v380_v7  ;;  %v10408_v7 = vld [vmem:[%s12965_s2] ss:$0 sm:$0xff] }
  0xf2   : > { %1345 = vmatmul.mubr.bf16.gmra.mrb[36].mxu1 %v9558_v12  ;;  %1216 = vmatmul.mubr.bf16.gmra.mrb[36].mxu0 %v9579_v14  ;;  %v9635_v12 = vld [vmem:[#allocation9 + $0xf0] sm:$0xff]  }
  0xf3   : > { %1352 = vmatprep.mubr.bf16.mxu1 %v9562_v13  ;;  %1223 = vmatprep.mubr.bf16.mxu0 %v9583_v15  ;;  %v2144_v13 = vld [vmem:[#allocation2 + $0x8] sm:$0x1]  ;;  %v2196_v15 = vrot.slane %v2194_v8, 4  ;;  %v435_v8 = vld [vmem:[#allocation2 + $0x74] sm:$0x1] }
  0xf4   : > { %v9636_v14 = vld [vmem:[#allocation9 + $0xb0] sm:$0xff]   ;;  %8983 = vmatprep.subr.bf16.mxu1 %v9635_v12  ;;  %v382_v12 = vld [vmem:[#allocation2 + $0x78] sm:$0x1] }
  0xf5   : > { %8984 = vmatpush3.bf16.msra.mxu1 %v9636_v14 }
  0xf6   : > { %8985 = vmatprep.subr.bf16.mxu1 %v9637_v27 }
  0xf9   : > { %8986 = vmatpush3.bf16.msra.mxu1 %v9638_v30 }
  0xfa   : > { %1353 = vmatmul.mubr.bf16.gmra.mrb[40].mxu1 %v9564_v16  ;;  %1224 = vmatmul.mubr.bf16.gmra.mrb[40].mxu0 %v9585_v18  ;;  %v2199_v16 = vrot.slane %v2197_v9, 5  ;;  %v2209_v18 = vrot.slane %v2207_v11, 4 }
  0xfb   : > { %1360 = vmatprep.mubr.bf16.mxu1 %v9568_v17  ;;  %1231 = vmatprep.mubr.bf16.mxu0 %v9589_v19  ;;  %v2205_v17 = vrot.slane %v2203_v10, 5  ;;  %v2213_v19 = vshll.u32 %v2144_v13, 16  ;;  %v436_v10 = vsel %vm10312_vm4, 0, %v435_v8 }
  0xfc   : > { %v2200_v23 = vor.u32 %v2199_v16, %v2196_v15  ;;  %437 = vst [vmem:[#allocation2 + $0x74] sm:$0x1] %v436_v10  ;;  %v383_v15 = vsel %vm10303_vm2, 0, %v382_v12 }
  0xfd   : > { %v2210_v24 = vor.u32 %v2209_v18, %v2205_v17  ;;  %384 = vst [vmem:[#allocation2 + $0x78] sm:$0x1] %v383_v15  ;;  %v2657_v15 = vld [vmem:[#allocation2] sm:$0xe] }
  0xff   : > { %v2211_v35 = vrot.slane %v2210_v24, 4 }
 0x102   : > { %1361 = vmatmul.mubr.bf16.gmra.mrb[44].mxu1 %v9570_v20  ;;  %1232 = vmatmul.mubr.bf16.gmra.mrb[44].mxu0 %v9591_v22  ;;  %v9603_v20 = vld [vmem:[%s10225_s15 + $0x1c8] ss:$16 sps:$4 sm:$0xff]  }
 0x103   : > { %1368 = vmatprep.mubr.bf16.mxu1 %v9574_v21  ;;  %v361_v21 = vld [vmem:[#allocation2 + $0x24] sm:$0x1]  ;;  %v9632_v22 = vld [vmem:[#allocation9 + $0x78] sm:$0xff]  }
 0x104   : > { %8873 = vmatprep.subr.bf16.mxu0 %v9632_v22 }
 0x10a   : > { %1369 = vmatmul.mubr.bf16.gmra.mrb[48].mxu1 %v9576_v25  ;;  %v362_v25 = vsel %vm10303_vm2, 0, %v361_v21 }
 0x10b   : > { %1376 = vmatprep.mubr.bf16.mxu1 %v9580_v26  ;;  %v9634_v26 = vld [vmem:[#allocation9 + $0x38] sm:$0xff]   ;;  %363 = vst [vmem:[#allocation2 + $0x24] sm:$0x1] %v362_v25 }
 0x10c   : > { %8874 = vmatpush3.bf16.msra.mxu0 %v9634_v26 }
 0x112   : > { %1377 = vmatmul.mubr.bf16.gmra.mrb[52].mxu1 %v9582_v28  ;;  %v2215_v28 = vrot.slane %v2213_v19, 5 }
 0x113   : > { %1384 = vmatprep.mubr.bf16.mxu1 %v9586_v29  ;;  %v417_v29 = vld [vmem:[#allocation2 + $0x2c] sm:$0x1] }
 0x114   : > { %v418_v33 = vsel %vm10312_vm4, 0, %v417_v29  ;;  %v2216_v37 = vsel %vm10336_vm7, %v2211_v35, %v2215_v28  ;;  %v438_v28 = vld [vmem:[#allocation2 + $0x80] sm:$0x1]  ;;  %v9659_v35 = vld [vmem:[#allocation9 + $0x158] sm:$0xff]  }
 0x115   : > { %419 = vst [vmem:[#allocation2 + $0x2c] sm:$0x1] %v418_v33  ;;  %v439_v30 = vsel %vm10312_vm4, 0, %v438_v28 }
 0x116   : > { %440 = vst [vmem:[#allocation2 + $0x80] sm:$0x1] %v439_v30 }
 0x11a   : > { %1385 = vmatmul.mubr.bf16.gmra.mrb[56].mxu1 %v9588_v31  ;;  %v2201_v31 = vrot.slane %v2200_v23, 4 }
 0x11b   : > { %1392 = vmatprep.mubr.bf16.mxu1 %v9592_v32  ;;  %v9604_v32 = vld [vmem:[%s10225_s15 + $0x1ec] ss:$16 sps:$4 sm:$0xff]  }
 0x11c   : > { %v2206_v36 = vsel %vm10336_vm7, %v2201_v31, %v2205_v17 }
 0x11d   : > { %v8187_v39 = vcombine.low %v2206_v36, %v2216_v37  ;;  %v9660_v36 = vld [vmem:[#allocation9 + $0x118] sm:$0xff]   ;;  %v385_v37 = vld [vmem:[#allocation2 + $0x84] sm:$0x1] }
 0x11f   : > { %5595 = vmatprep.mubr.bf16.mxu0 %v8187_v39 }
 0x120   : > { %5596 = vmatmul.mubr.bf16.vlgmr.msra.gmra.mrb[48].mxu0 %v9639_v38 }
 0x122   : > { %1393 = vmatmul.mubr.bf16.gmra.mrb[60].mxu1 %v9594_v41  ;;  %v364_v41 = vld [vmem:[#allocation2 + $0x30] sm:$0x1] }
 0x123   : > { %1400 = vmatprep.mubr.bf16.mxu1 %v9595_v43  ;;  %v365_v43 = vsel %vm10303_vm2, 0, %v364_v41  ;;  %v386_v41 = vsel %vm10303_vm2, 0, %v385_v37 }
 0x124   : > { %366 = vst [vmem:[#allocation2 + $0x30] sm:$0x1] %v365_v43  ;;  %387 = vst [vmem:[#allocation2 + $0x84] sm:$0x1] %v386_v41 }
 0x12a   : > { %1401 = vmatmul.mubr.bf16.gmra.mrb[64].mxu1 %v9597_v52  ;;  %v9641_v52 = vld [vmem:[#allocation9 + $0x140] sm:$0xff]  }
 0x12b   : > { %1408 = vmatprep.mubr.bf16.mxu1 %v9598_v55  ;;  %9083 = vmatprep.subr.bf16.mxu0 %v9641_v52  ;;  %v371_v55 = vsel %vm10303_vm2, 0, %v370_v54 }
 0x12c   : > { %9084 = vmatpush3.bf16.msra.mxu0 %v9642_v53  ;;  %372 = vst [vmem:[#allocation2 + $0x48] sm:$0x1] %v371_v55 }
 0x12d   : > { %9085 = vmatprep.subr.bf16.mxu0 %v9647_v58  ;;  %v441_v58 = vld [vmem:[#allocation2 + $0x8c] sm:$0x1] }
 0x12e   : > { %v442_v61 = vsel %vm10312_vm4, 0, %v441_v58 }
 0x12f   : > { %443 = vst [vmem:[#allocation2 + $0x8c] sm:$0x1] %v442_v61 }
 0x130   : > { %9086 = vmatpush3.bf16.msra.mxu0 %v9648_v59 }
 0x131   : > { %9087 = vmatprep.subr.bf16.mxu0 %v9653_v4  ;;  %v2658_v4 = vld [vmem:[#allocation2 + $0x4] sm:$0xf] }
 0x132   : > { %1409 = vmatmul.mubr.bf16.gmra.mrb[68].mxu1 %v9600_v0  ;;  %v376_v0 = vld [vmem:[#allocation2 + $0x60] sm:$0x1]  ;;  %v2758_v10 = vrot.slane %v2658_v4, 5 }
 0x133   : > { %1416 = vmatprep.mubr.bf16.mxu1 %v9601_v1  ;;  %v377_v1 = vsel %vm10303_vm2, 0, %v376_v0  ;;  %v388_v0 = vld [vmem:[#allocation2 + $0x90] sm:$0x1] }
 0x134   : > { %378 = vst [vmem:[#allocation2 + $0x60] sm:$0x1] %v377_v1  ;;  %9088 = vmatpush3.bf16.msra.mxu0 %v9654_v5  ;;  %v389_v2 = vsel %vm10303_vm2, 0, %v388_v0 }
 0x135   : > { %9089 = vmatprep.subr.bf16.mxu0 %v9659_v35  ;;  %390 = vst [vmem:[#allocation2 + $0x90] sm:$0x1] %v389_v2 }
 0x138   : > { %9090 = vmatpush3.bf16.msra.mxu0 %v9660_v36 }
 0x13a   : > { %1417 = vmatmul.mubr.bf16.gmra.mrb[72].mxu1 %v9603_v20 }
 0x13b   : > { %1424 = vmatprep.mubr.bf16.mxu1 %v9604_v32 }
 0x142   : > { %1425 = vmatmul.mubr.bf16.gmra.mrb[76].mxu1 %v9606_v44 }
 0x17d   : > { %v8723_v9 = vpop.f32.mrb[0].mxu1  ;;  %v8651_v18 = vpop.f32.mrb[0].mxu0 }
 0x17e   : > { %v8724_v11 = vpop.f32.mrb[1].mxu1  ;;  %v8652_v19 = vpop.f32.mrb[1].mxu0 }
 0x17f   : > { %v10369_v13 = vadd.f32 %v8724_v11, %v8723_v9  ;;  %v8726_v14 = vpop.f32.mrb[2].mxu1  ;;  %v8653_v20 = vadd.f32 %v8652_v19, %v8651_v18  ;;  %v8654_v21 = vpop.f32.mrb[2].mxu0 }
 0x180   : > { %v8727_v16 = vpop.f32.mrb[3].mxu1  ;;  %v8655_v23 = vpop.f32.mrb[3].mxu0 }
 0x181   : > { %v10373_v17 = vadd.f32 %v8727_v16, %v8726_v14  ;;  %v10375_v25 = vadd.f32 %v8655_v23, %v8654_v21  ;;  %v1146_v12 = vadd.f32 %v8653_v20, %v10408_v7  ;;  %v2659_v16 = vld [vmem:[#allocation2 + $0x8] sm:$0x1] }
 0x182   : > { %v2761_v28 = vrot.slane %v2659_v16, 5 }
 0x183   : > { %v1149_v30 = vadd.f32 %v10375_v25, %v10408_v7 }
 0x185   : > { %v8729_v22 = vpop.f32.mrb[4].mxu1  ;;  %v8657_v32 = vpop.f32.mrb[4].mxu0 }
 0x186   : > { %v8730_v24 = vpop.f32.mrb[5].mxu1  ;;  %v8658_v33 = vpop.f32.mrb[5].mxu0 }
 0x187   : > { %v10377_v26 = vadd.f32 %v8730_v24, %v8729_v22  ;;  %v8732_v27 = vpop.f32.mrb[6].mxu1  ;;  %v10383_v38 = vadd.f32 %v8658_v33, %v8657_v32  ;;  %v8660_v39 = vpop.f32.mrb[6].mxu0  ;;  %v8203_v24 = vrot.slane %v2657_v15, 9  ;;  %v444_v33 = vld [vmem:[#allocation2 + $0x98] sm:$0x1] }
 0x188   : > { %v8733_v29 = vpop.f32.mrb[7].mxu1  ;;  %v8661_v44 = vpop.f32.mrb[7].mxu0  ;;  %v445_v36 = vsel %vm10312_vm4, 0, %v444_v33 }
 0x189   : > { %v10381_v31 = vadd.f32 %v8733_v29, %v8732_v27  ;;  %v10387_v46 = vadd.f32 %v8661_v44, %v8660_v39  ;;  %v2760_v27 = vrot.slane %v2758_v10, 4  ;;  %446 = vst [vmem:[#allocation2 + $0x98] sm:$0x1] %v445_v36  ;;  %v9666_v44 = vld [vmem:[#allocation9 + $0x120] sm:$0xff]   ;;  %v1154_v58 = vadd.f32 %v10383_v38, %v10408_v7  ;;  %v447_v36 = vld [vmem:[#allocation2 + $0xa4] sm:$0x1] }
 0x18a   : > { %v10443_v38 = vadd.f32 %v10369_v13, %v10408_v7 }
 0x18d   : > { %v8735_v43 = vpop.f32.mrb[8].mxu1  ;;  %v8663_v52 = vpop.f32.mrb[8].mxu0 }
 0x18e   : > { %v8736_v45 = vpop.f32.mrb[9].mxu1  ;;  %v8664_v53 = vpop.f32.mrb[9].mxu0 }
 0x18f   : > { %v10389_v48 = vadd.f32 %v8736_v45, %v8735_v43  ;;  %v8738_v49 = vpop.f32.mrb[10].mxu1  ;;  %v10393_v54 = vadd.f32 %v8664_v53, %v8663_v52  ;;  %v8666_v55 = vpop.f32.mrb[10].mxu0  ;;  %v9665_v43 = vld [vmem:[#allocation9 + $0x160] sm:$0xff]   ;;  %v10431_v52 = vsel %vm10417_vm10, %v2760_v27, %v2761_v28 }
 0x190   : > { %v8739_v50 = vpop.f32.mrb[11].mxu1  ;;  %v8667_v57 = vpop.f32.mrb[11].mxu0  ;;  %v391_v45 = vld [vmem:[#allocation2 + $0x9c] sm:$0x1]  ;;  %9091 = vmatprep.subr.bf16.mxu0 %v9665_v43 }
 0x191   : > { %v10391_v51 = vadd.f32 %v8739_v50, %v8738_v49  ;;  %v10395_v60 = vadd.f32 %v8667_v57, %v8666_v55  ;;  %v10427_v50 = vsel %vm10417_vm10, %v8203_v24, %v2758_v10  ;;  %v392_v53 = vsel %vm10303_vm2, 0, %v391_v45  ;;  %9092 = vmatpush3.bf16.msra.mxu0 %v9666_v44 }
 0x192   : > { %393 = vst [vmem:[#allocation2 + $0x9c] sm:$0x1] %v392_v53  ;;  %v10451_v10 = vadd.f32 %v10377_v26, %v10408_v7 }
 0x195   : > { %v8741_v56 = vpop.f32.mrb[12].mxu1  ;;  %v8669_v5 = vpop.f32.mrb[12].mxu0 }
 0x196   : > { %v8742_v59 = vpop.f32.mrb[13].mxu1  ;;  %v8670_v6 = vpop.f32.mrb[13].mxu0 }
 0x197   : > { %v10399_v62 = vadd.f32 %v8742_v59, %v8741_v56  ;;  %v8744_v63 = vpop.f32.mrb[14].mxu1  ;;  %v10410_v8 = vadd.f32 %v8670_v6, %v8669_v5  ;;  %v8672_v9 = vpop.f32.mrb[14].mxu0  ;;  %v8219_v5 = vcombine.low %v10427_v50, %v10431_v52 }
 0x198   : > { %v8745_v1 = vpop.f32.mrb[15].mxu1  ;;  %v8673_v14 = vpop.f32.mrb[15].mxu0 }
 0x199   : > { %v10403_v3 = vadd.f32 %v8745_v1, %v8744_v63  ;;  %v10413_v19 = vadd.f32 %v8673_v14, %v8672_v9  ;;  %v10447_v9 = vadd.f32 %v10373_v17, %v10408_v7  ;;  %v1886_v17 = vld [vmem:[#allocation2 + $0xc] sm:$0xf] }
 0x19d   : > { %v8763_v11 = vpop.f32.mrb[16].mxu1  ;;  %v8675_v35 = vpop.f32.mrb[16].mxu0 }
 0x19e   : > { %v8764_v18 = vpop.f32.mrb[17].mxu1  ;;  %v8676_v41 = vpop.f32.mrb[17].mxu0 }
 0x19f   : > { %v8765_v21 = vadd.f32 %v8764_v18, %v8763_v11  ;;  %v8766_v22 = vpop.f32.mrb[18].mxu1  ;;  %v10423_v49 = vadd.f32 %v8676_v41, %v8675_v35  ;;  %v8678_v25 = vpop.f32.mrb[18].mxu0  ;;  %v10455_v11 = vadd.f32 %v10381_v31, %v10408_v7  ;;  %v1157_v18 = vadd.f32 %v10387_v46, %v10408_v7 }
 0x1a0   : > { %v8767_v23 = vpop.f32.mrb[19].mxu1  ;;  %v8679_v59 = vpop.f32.mrb[19].mxu0  ;;  %v10467_v31 = vadd.f32 %v10389_v48, %v10408_v7  ;;  %v1162_v48 = vadd.f32 %v10393_v54, %v10408_v7  ;;  %v448_v54 = vsel %vm10312_vm4, 0, %v447_v36 }
 0x1a1   : > { %v1307_v29 = vadd.f32 %v8765_v21, %v1146_v12  ;;  %v8768_v32 = vadd.f32 %v8767_v23, %v8766_v22  ;;  %v10437_v63 = vadd.f32 %v8679_v59, %v8678_v25  ;;  %v10471_v22 = vadd.f32 %v10391_v51, %v10408_v7  ;;  %449 = vst [vmem:[#allocation2 + $0xa4] sm:$0x1] %v448_v54 }
 0x1a3   : > { %v1433_v37 = vmax.f32 %v1307_v29, 0.0  ;;  %v1310_v39 = vadd.f32 %v8768_v32, %v1149_v30  ;;  %v1890_v32 = vld [vmem:[#allocation2 + $0x14] sm:$0x1] }
 0x1a5   : > { %v8538_v55 = vpack.c.bf16 %v1433_v37, %v1433_v37  ;;  %v1434_v56 = vmax.f32 %v1310_v39, 0.0  ;;  %v8769_v57 = vpop.f32.mrb[20].mxu1  ;;  %v8681_v21 = vpop.f32.mrb[20].mxu0 }
 0x1a6   : > { %v8770_v61 = vpop.f32.mrb[21].mxu1  ;;  %v8682_v29 = vpop.f32.mrb[21].mxu0 }
 0x1a7   : > { %v1564_v0 = vshrl.u32 %v8538_v55, 16  ;;  %v8539_v1 = vpack.c.bf16 %v1434_v56, %v1434_v56  ;;  %v8771_v2 = vadd.f32 %v8770_v61, %v8769_v57  ;;  %v8772_v4 = vpop.f32.mrb[22].mxu1  ;;  %v1567_v14 = vshll.u32 %v8538_v55, 16  ;;  %v8684_v51 = vpop.f32.mrb[22].mxu0  ;;  %v394_v57 = vld [vmem:[#allocation2 + $0xa8] sm:$0x1] }
 0x1a8   : > { %v8773_v6 = vpop.f32.mrb[23].mxu1  ;;  %v8683_v35 = vadd.f32 %v8682_v29, %v8681_v21  ;;  %v8685_v45 = vpop.f32.mrb[23].mxu0  ;;  %v1165_v55 = vadd.f32 %v10395_v60, %v10408_v7  ;;  %v1173_v21 = vadd.f32 %v10413_v19, %v10408_v7  ;;  %v10511_v29 = vadd.f32 %v10437_v63, %v10408_v7 }
 0x1a9   : > { %v1566_v12 = vrot.slane %v1564_v0, 7  ;;  %v1572_v15 = vshrl.u32 %v8539_v1, 16  ;;  %v1315_v16 = vadd.f32 %v8771_v2, %v1154_v58  ;;  %v8774_v26 = vadd.f32 %v8773_v6, %v8772_v4 }
 0x1aa   : > { %v1575_v27 = vshll.u32 %v8539_v1, 16  ;;  %v8686_v56 = vadd.f32 %v8685_v45, %v8684_v51  ;;  %v10493_v1 = vadd.f32 %v10399_v62, %v10408_v7  ;;  %v395_v6 = vsel %vm10303_vm2, 0, %v394_v57  ;;  %v1893_v62 = vld [vmem:[#allocation2 + $0x18] sm:$0xf] }
 0x1ab   : > { %v1569_v23 = vor.u32 %v1567_v14, %v1566_v12  ;;  %v1574_v24 = vrot.slane %v1572_v15, 7  ;;  %v1435_v28 = vmax.f32 %v1315_v16, 0.0  ;;  %v1570_v30 = vrot.slane %v1566_v12, 4  ;;  %396 = vst [vmem:[#allocation2 + $0xa8] sm:$0x1] %v395_v6 }
 0x1ac   : > { %v1318_v33 = vadd.f32 %v8774_v26, %v1157_v18  ;;  %13011 = vst [vmem:[#allocation20_spill] sm:$0xff] %v10493_v1  ;;  %v10499_v12 = vadd.f32 %v10403_v3, %v10408_v7 }
 0x1ad   : > { %v1887_v37 = vsel %vm10459_vm13, %v1569_v23, %v1886_v17  ;;  %v1577_v39 = vor.u32 %v1575_v27, %v1574_v24  ;;  %v1579_v41 = vrot.slane %v1574_v24, 4  ;;  %v8540_v43 = vpack.c.bf16 %v1435_v28, %v1435_v28  ;;  %v8775_v44 = vpop.f32.mrb[24].mxu1  ;;  %v8687_v24 = vpop.f32.mrb[24].mxu0 }
 0x1ae   : > { %1888 = vst [vmem:[#allocation2 + $0xc] sm:$0xf] %v1887_v37  ;;  %v1436_v25 = vmax.f32 %v1318_v33, 0.0  ;;  %v8776_v53 = vpop.f32.mrb[25].mxu1  ;;  %13012 = vst [vmem:[#allocation21_spill] sm:$0xff] %v10499_v12  ;;  %v1170_v17 = vadd.f32 %v10410_v8, %v10408_v7  ;;  %v10507_v23 = vadd.f32 %v10423_v49, %v10408_v7  ;;  %v8688_v8 = vpop.f32.mrb[25].mxu0 }
 0x1af   : > { %v1578_v58 = vsel %vm10475_vm14, %v1570_v30, %v1577_v39  ;;  %v1891_v59 = vsel %vm10303_vm2, %v1579_v41, %v1890_v32  ;;  %v1581_v61 = vshrl.u32 %v8540_v43, 16  ;;  %v8778_v0 = vpop.f32.mrb[26].mxu1  ;;  %v8777_v2 = vadd.f32 %v8776_v53, %v8775_v44  ;;  %v1897_v33 = vld [vmem:[#allocation2 + $0x20] sm:$0x1]  ;;  %v8690_v36 = vpop.f32.mrb[26].mxu0 }
 0x1b0   : > { %1889 = vst [vmem:[#allocation2 + $0x10] sm:$0xf] %v1578_v58  ;;  %1892 = vst [vmem:[#allocation2 + $0x14] sm:$0x1] %v1891_v59  ;;  %v8541_v60 = vpack.c.bf16 %v1436_v25, %v1436_v25  ;;  %v8779_v4 = vpop.f32.mrb[27].mxu1  ;;  %v1584_v15 = vshll.u32 %v8540_v43, 16  ;;  %v8689_v51 = vadd.f32 %v8688_v8, %v8687_v24  ;;  %v10516_v39 = vadd.f32 %v8683_v35, %v10408_v7 }
 0x1b1   : > { %v1583_v14 = vrot.slane %v1581_v61, 7  ;;  %v8780_v16 = vadd.f32 %v8779_v4, %v8778_v0  ;;  %v1323_v26 = vadd.f32 %v8777_v2, %v1162_v48  ;;  %v10519_v43 = vadd.f32 %v8686_v56, %v10408_v7  ;;  %v1939_v12 = vld [vmem:[#allocation2 + $0x68] sm:$0x1] }
 0x1b2   : > { %v1589_v18 = vshrl.u32 %v8541_v60, 16  ;;  %v1592_v27 = vshll.u32 %v8541_v60, 16  ;;  %v10522_v0 = vadd.f32 %v8689_v51, %v10408_v7 }
 0x1b3   : > { %v1586_v3 = vor.u32 %v1584_v15, %v1583_v14  ;;  %v1326_v28 = vadd.f32 %v8780_v16, %v1165_v55  ;;  %v1587_v30 = vrot.slane %v1583_v14, 4  ;;  %v1437_v48 = vmax.f32 %v1323_v26, 0.0  ;;  %v8691_v55 = vpop.f32.mrb[27].mxu0  ;;  %v1900_v14 = vld [vmem:[#allocation2 + $0x24] sm:$0xf] }
 0x1b4   : > { %v1591_v32 = vrot.slane %v1589_v18, 7  ;;  %v10524_v35 = vadd.f32 %v8691_v55, %v8690_v36 }
 0x1b5   : > { %v1894_v19 = vsel %vm10459_vm13, %v1586_v3, %v1893_v62  ;;  %v1438_v49 = vmax.f32 %v1326_v28, 0.0  ;;  %v8781_v37 = vpop.f32.mrb[28].mxu1  ;;  %v2145_v41 = vld [vmem:[#allocation2 + $0xc] sm:$0xf]  ;;  %v8542_v45 = vpack.c.bf16 %v1437_v48, %v1437_v48  ;;  %v10533_v48 = vpop.f32.mrb[28].mxu0 }
 0x1b6   : > { %1895 = vst [vmem:[#allocation2 + $0x18] sm:$0xf] %v1894_v19  ;;  %v1594_v63 = vor.u32 %v1592_v27, %v1591_v32  ;;  %v1596_v44 = vrot.slane %v1591_v32, 4  ;;  %v8782_v25 = vpop.f32.mrb[29].mxu1  ;;  %v2218_v53 = vshrl.u32 %v2145_v41, 16  ;;  %v2221_v27 = vshll.u32 %v2145_v41, 16 }
 0x1b7   : > { %v8543_v54 = vpack.c.bf16 %v1438_v49, %v1438_v49  ;;  %v8783_v57 = vadd.f32 %v8782_v25, %v8781_v37  ;;  %v8784_v58 = vpop.f32.mrb[30].mxu1  ;;  %v9640_v59 = vld [vmem:[#allocation2 + $0xc] sm:$0xff]   ;;  %v1598_v2 = vshrl.u32 %v8542_v45, 16  ;;  %v1601_v4 = vshll.u32 %v8542_v45, 16  ;;  %v2147_v26 = vld [vmem:[#allocation2 + $0x14] sm:$0x1] }
 0x1b8   : > { %v2146_v61 = vld [vmem:[#allocation2 + $0x10] sm:$0xf]  ;;  %v1595_v56 = vsel %vm10475_vm14, %v1587_v30, %v1594_v63  ;;  %v1898_v60 = vsel %vm10303_vm2, %v1596_v44, %v1897_v33  ;;  %v8785_v6 = vpop.f32.mrb[31].mxu1  ;;  %5756 = vmatprep.mubr.bf16.mxu1 %v9640_v59  ;;  %v2220_v3 = vrot.slane %v2218_v53, 4  ;;  %v2223_v19 = vrot.slane %v2221_v27, 5  ;;  %v10537_v37 = vpop.f32.mrb[29].mxu0 }
 0x1b9   : > { %1896 = vst [vmem:[#allocation2 + $0x1c] sm:$0xf] %v1595_v56  ;;  %1899 = vst [vmem:[#allocation2 + $0x20] sm:$0x1] %v1898_v60  ;;  %v1606_v15 = vshrl.u32 %v8543_v54, 16  ;;  %v1609_v16 = vshll.u32 %v8543_v54, 16  ;;  %v1331_v62 = vadd.f32 %v8783_v57, %v1170_v17  ;;  %v8786_v18 = vadd.f32 %v8785_v6, %v8784_v58  ;;  %5757 = vmatmul.mubr.bf16.vlgmr.msra.gmra.mrb[80].mxu1 %v8219_v5 }
 0x1ba   : > { %v1600_v24 = vrot.slane %v1598_v2, 7  ;;  %v2227_v28 = vshll.u32 %v2146_v61, 16  ;;  %v2231_v33 = vshrl.u32 %v2146_v61, 16  ;;  %v1904_v17 = vld [vmem:[#allocation2 + $0x2c] sm:$0x1]  ;;  %v10539_v44 = vpop.f32.mrb[30].mxu0  ;;  %v2224_v25 = vor.u32 %v2223_v19, %v2220_v3 }
 0x1bb   : > { %v1608_v8 = vrot.slane %v1606_v15, 7  ;;  %v1439_v30 = vmax.f32 %v1331_v62, 0.0  ;;  %v1334_v32 = vadd.f32 %v8786_v18, %v1173_v21  ;;  %v2237_v55 = vshll.u32 %v2147_v26, 16  ;;  %v2660_v54 = vld [vmem:[#allocation2 + $0xc] sm:$0xe]  ;;  %v10543_v57 = vpop.f32.mrb[31].mxu0 }
 0x1bc   : > { %v1603_v51 = vor.u32 %v1601_v4, %v1600_v24  ;;  %v1604_v36 = vrot.slane %v1600_v24, 4  ;;  %v10535_v49 = vrot.slane %v2227_v28, 5  ;;  %v2233_v53 = vrot.slane %v2231_v33, 4  ;;  %v2661_v2 = vld [vmem:[#allocation2 + $0x10] sm:$0xf]  ;;  %v9671_v4 = vld [vmem:[#allocation9 + $0x168] sm:$0xff]  }
 0x1bd   : > { %v1611_v63 = vor.u32 %v1609_v16, %v1608_v8  ;;  %v1613_v50 = vrot.slane %v1608_v8, 4  ;;  %v8544_v52 = vpack.c.bf16 %v1439_v30, %v1439_v30  ;;  %v1440_v5 = vmax.f32 %v1334_v32, 0.0  ;;  %v8787_v41 = vpop.f32.mrb[32].mxu1  ;;  %v2662_v27 = vld [vmem:[#allocation2 + $0x14] sm:$0x1]  ;;  %9093 = vmatprep.subr.bf16.mxu0 %v9671_v4  ;;  %v9672_v8 = vld [vmem:[#allocation9 + $0x128] sm:$0xff]  }
 0x1be   : > { %v1901_v21 = vsel %vm10459_vm13, %v1603_v51, %v1900_v14  ;;  %v8788_v45 = vpop.f32.mrb[33].mxu1  ;;  %v2225_v62 = vrot.slane %v2224_v25, 4  ;;  %v2234_v18 = vor.u32 %v2233_v53, %v10535_v49  ;;  %v2239_v3 = vrot.slane %v2237_v55, 5  ;;  %v1907_v30 = vld [vmem:[#allocation2 + $0x30] sm:$0xf]  ;;  %9094 = vmatpush3.bf16.msra.mxu0 %v9672_v8 }
 0x1bf   : > { %1902 = vst [vmem:[#allocation2 + $0x24] sm:$0xf] %v1901_v21  ;;  %v1612_v58 = vsel %vm10475_vm14, %v1604_v36, %v1611_v63  ;;  %v1905_v59 = vsel %vm10303_vm2, %v1613_v50, %v1904_v17  ;;  %v1615_v61 = vshrl.u32 %v8544_v52, 16  ;;  %v1618_v56 = vshll.u32 %v8544_v52, 16  ;;  %v8790_v60 = vpop.f32.mrb[34].mxu1 }
 0x1c0   : > { %1903 = vst [vmem:[#allocation2 + $0x28] sm:$0xf] %v1612_v58  ;;  %1906 = vst [vmem:[#allocation2 + $0x2c] sm:$0x1] %v1905_v59  ;;  %v8545_v6 = vpack.c.bf16 %v1440_v5, %v1440_v5  ;;  %v8789_v14 = vadd.f32 %v8788_v45, %v8787_v41  ;;  %v8791_v15 = vpop.f32.mrb[35].mxu1  ;;  %v9643_v16 = vld [vmem:[#allocation2 + $0x18] sm:$0xff]   ;;  %v2230_v36 = vsel %vm10336_vm7, %v2225_v62, %v10535_v49 }
 0x1c1   : > { %v1617_v26 = vrot.slane %v1615_v61, 7  ;;  %v8792_v24 = vadd.f32 %v8791_v15, %v8790_v60  ;;  %v8204_v28 = vrot.slane %v2660_v54, 9  ;;  %5764 = vmatprep.mubr.bf16.mxu1 %v9643_v16  ;;  %v10554_v17 = vld [vmem:[#allocation2 + $0x18] sm:$0xf]  ;;  %v2235_v52 = vrot.slane %v2234_v18, 4  ;;  %v10562_v58 = vpop.f32.mrb[32].mxu0 }
 0x1c2   : > { %v1623_v32 = vshrl.u32 %v8545_v6, 16  ;;  %v1626_v33 = vshll.u32 %v8545_v6, 16  ;;  %v1339_v51 = vadd.f32 %v8789_v14, %v10507_v23  ;;  %v2765_v21 = vrot.slane %v2661_v2, 5  ;;  %v1911_v25 = vld [vmem:[#allocation2 + $0x38] sm:$0x1]  ;;  %v9644_v14 = vld [vmem:[#allocation2 + $0xc] sm:$0xff]  }
 0x1c3   : > { %v1620_v19 = vor.u32 %v1618_v56, %v1617_v26  ;;  %v1621_v63 = vrot.slane %v1617_v26, 4  ;;  %v1342_v50 = vadd.f32 %v8792_v24, %v10511_v29  ;;  %v2768_v45 = vrot.slane %v2662_v27, 5  ;;  %v2149_v27 = vld [vmem:[#allocation2 + $0x1c] sm:$0xf]  ;;  %v10570_v8 = vpop.f32.mrb[33].mxu0 }
 0x1c4   : > { %v1625_v5 = vrot.slane %v1623_v32, 7  ;;  %v1441_v41 = vmax.f32 %v1339_v51, 0.0  ;;  %v2240_v49 = vsel %vm10336_vm7, %v2235_v52, %v2239_v3  ;;  %v2242_v54 = vshrl.u32 %v10554_v17, 16 }
 0x1c5   : > { %v1908_v23 = vsel %vm10459_vm13, %v1620_v19, %v1907_v30  ;;  %v1442_v53 = vmax.f32 %v1342_v50, 0.0  ;;  %v8793_v55 = vpop.f32.mrb[36].mxu1  ;;  %v8188_v56 = vcombine.low %v2230_v36, %v2240_v49  ;;  %v2766_v4 = vsel %vm10417_vm10, %v8204_v28, %v2765_v21  ;;  %v1914_v19 = vld [vmem:[#allocation2 + $0x3c] sm:$0xf] }
 0x1c6   : > { %1909 = vst [vmem:[#allocation2 + $0x30] sm:$0xf] %v1908_v23  ;;  %v1628_v29 = vor.u32 %v1626_v33, %v1625_v5  ;;  %v1630_v59 = vrot.slane %v1625_v5, 4  ;;  %v8546_v61 = vpack.c.bf16 %v1441_v41, %v1441_v41  ;;  %v8794_v60 = vpop.f32.mrb[37].mxu1  ;;  %v2767_v6 = vrot.slane %v2765_v21, 4 }
 0x1c7   : > { %v8547_v2 = vpack.c.bf16 %v1442_v53, %v1442_v53  ;;  %v8795_v15 = vadd.f32 %v8794_v60, %v8793_v55  ;;  %v8796_v16 = vpop.f32.mrb[38].mxu1  ;;  %5603 = vmatprep.mubr.bf16.mxu0 %v8188_v56  ;;  %v9645_v51 = vld [vmem:[#allocation2 + $0x24] sm:$0xff]   ;;  %v2244_v5 = vrot.slane %v2242_v54, 4  ;;  %v2150_v23 = vld [vmem:[#allocation2 + $0x20] sm:$0x1]  ;;  %v2251_v53 = vshll.u32 %v2149_v27, 16 }
 0x1c8   : > { %v1629_v62 = vsel %vm10475_vm14, %v1621_v63, %v1628_v29  ;;  %v1912_v18 = vsel %vm10303_vm2, %v1630_v59, %v1911_v25  ;;  %v1632_v26 = vshrl.u32 %v8546_v61, 16  ;;  %v1635_v24 = vshll.u32 %v8546_v61, 16  ;;  %v8797_v3 = vpop.f32.mrb[39].mxu1  ;;  %5604 = vmatmul.mubr.bf16.gmra.mrb[52].mxu0 %v9644_v14  ;;  %v1918_v63 = vld [vmem:[#allocation2 + $0x44] sm:$0x1]  ;;  %v10577_v61 = vpop.f32.mrb[34].mxu0 }
 0x1c9   : > { %1910 = vst [vmem:[#allocation2 + $0x34] sm:$0xf] %v1629_v62  ;;  %1913 = vst [vmem:[#allocation2 + $0x38] sm:$0x1] %v1912_v18  ;;  %v1640_v28 = vshrl.u32 %v8547_v2, 16  ;;  %v1643_v30 = vshll.u32 %v8547_v2, 16  ;;  %v2769_v32 = vsel %vm10417_vm10, %v2767_v6, %v2768_v45  ;;  %v1347_v33 = vadd.f32 %v8795_v15, %v10516_v39 }
 0x1ca   : > { %v1634_v36 = vrot.slane %v1632_v26, 7  ;;  %v8220_v50 = vcombine.low %v2766_v4, %v2769_v32  ;;  %v8798_v52 = vadd.f32 %v8797_v3, %v8796_v16  ;;  %v2245_v25 = vshll.u32 %v10554_v17, 16  ;;  %v2663_v39 = vld [vmem:[#allocation2 + $0x18] sm:$0xe]  ;;  %v2664_v59 = vld [vmem:[#allocation2 + $0x1c] sm:$0xf] }
 0x1cb   : > { %v1642_v41 = vrot.slane %v1640_v28, 7  ;;  %v1443_v21 = vmax.f32 %v1347_v33, 0.0  ;;  %v2255_v29 = vshrl.u32 %v2149_v27, 16  ;;  %v10579_v6 = vpop.f32.mrb[35].mxu0  ;;  %v2253_v15 = vrot.slane %v2251_v53, 5 }
 0x1cc   : > { %v1637_v49 = vor.u32 %v1635_v24, %v1634_v36  ;;  %v1638_v55 = vrot.slane %v1634_v36, 4  ;;  %5765 = vmatmul.mubr.bf16.gmra.mrb[84].mxu1 %v8220_v50  ;;  %v1350_v45 = vadd.f32 %v8798_v52, %v10519_v43  ;;  %v2247_v54 = vrot.slane %v2245_v25, 5  ;;  %v2665_v43 = vld [vmem:[#allocation2 + $0x20] sm:$0x1]  ;;  %v10587_v28 = vpop.f32.mrb[36].mxu0 }
 0x1cd   : > { %v1645_v56 = vor.u32 %v1643_v30, %v1642_v41  ;;  %v1647_v60 = vrot.slane %v1642_v41, 4  ;;  %v8548_v2 = vpack.c.bf16 %v1443_v21, %v1443_v21  ;;  %5772 = vmatprep.mubr.bf16.mxu1 %v9645_v51  ;;  %v8799_v4 = vpop.f32.mrb[40].mxu1  ;;  %v2257_v16 = vrot.slane %v2255_v29, 4  ;;  %v1921_v21 = vld [vmem:[#allocation2 + $0x48] sm:$0xf] }
 0x1ce   : > { %v1915_v17 = vsel %vm10459_vm13, %v1637_v49, %v1914_v19  ;;  %v1444_v14 = vmax.f32 %v1350_v45, 0.0  ;;  %v8800_v62 = vpop.f32.mrb[41].mxu1  ;;  %v2248_v32 = vor.u32 %v2247_v54, %v2244_v5  ;;  %v2261_v51 = vshll.u32 %v2150_v23, 16  ;;  %v1925_v29 = vld [vmem:[#allocation2 + $0x50] sm:$0x1] }
 0x1cf   : > { %1916 = vst [vmem:[#allocation2 + $0x3c] sm:$0xf] %v1915_v17  ;;  %v1646_v18 = vsel %vm10475_vm14, %v1638_v55, %v1645_v56  ;;  %v1919_v26 = vsel %vm10303_vm2, %v1647_v60, %v1918_v63  ;;  %v1649_v24 = vshrl.u32 %v8548_v2, 16  ;;  %v1652_v3 = vshll.u32 %v8548_v2, 16  ;;  %v8802_v27 = vpop.f32.mrb[42].mxu1 }
 0x1d0   : > { %1917 = vst [vmem:[#allocation2 + $0x40] sm:$0xf] %v1646_v18  ;;  %1920 = vst [vmem:[#allocation2 + $0x44] sm:$0x1] %v1919_v26  ;;  %v8549_v30 = vpack.c.bf16 %v1444_v14, %v1444_v14  ;;  %v2258_v33 = vor.u32 %v2257_v16, %v2253_v15  ;;  %v8803_v36 = vpop.f32.mrb[43].mxu1  ;;  %v8205_v50 = vrot.slane %v2663_v39, 9  ;;  %v8801_v14 = vadd.f32 %v8800_v62, %v8799_v4 }
 0x1d1   : > { %v1651_v19 = vrot.slane %v1649_v24, 7  ;;  %v2772_v52 = vrot.slane %v2664_v59, 5  ;;  %v2775_v41 = vrot.slane %v2665_v43, 5  ;;  %v2249_v63 = vrot.slane %v2248_v32, 4  ;;  %v2151_v5 = vld [vmem:[#allocation2 + $0x24] sm:$0xf] }
 0x1d2   : > { %v1657_v25 = vshrl.u32 %v8549_v30, 16  ;;  %v1660_v53 = vshll.u32 %v8549_v30, 16  ;;  %v2259_v49 = vrot.slane %v2258_v33, 4  ;;  %v2263_v56 = vrot.slane %v2261_v51, 5  ;;  %v9649_v43 = vld [vmem:[#allocation2 + $0x30] sm:$0xff]   ;;  %v10601_v24 = vpop.f32.mrb[37].mxu0 }
 0x1d3   : > { %v1654_v55 = vor.u32 %v1652_v3, %v1651_v19  ;;  %v1655_v45 = vrot.slane %v1651_v19, 4  ;;  %v2773_v60 = vsel %vm10417_vm10, %v8205_v50, %v2772_v52  ;;  %v2254_v23 = vsel %vm10336_vm7, %v2249_v63, %v2253_v15  ;;  %v2152_v18 = vld [vmem:[#allocation2 + $0x28] sm:$0xf]  ;;  %v10607_v33 = vpop.f32.mrb[38].mxu0  ;;  %v9676_v51 = vld [vmem:[#allocation9 + $0x1c0] sm:$0xff]  }
 0x1d4   : > { %v1659_v2 = vrot.slane %v1657_v25, 7  ;;  %v2774_v39 = vrot.slane %v2772_v52, 4  ;;  %v1197_v59 = vadd.f32 %v10524_v35, %v10408_v7  ;;  %v2264_v17 = vsel %vm10336_vm7, %v2259_v49, %v2263_v56  ;;  %v9646_v62 = vld [vmem:[#allocation2 + $0x18] sm:$0xff]   ;;  %v2153_v50 = vld [vmem:[#allocation2 + $0x2c] sm:$0x1]  ;;  %9195 = vmatprep.subr.bf16.mxu1 %v9676_v51 }
 0x1d5   : > { %v1922_v54 = vsel %vm10459_vm13, %v1654_v55, %v1921_v21  ;;  %v8804_v16 = vadd.f32 %v8803_v36, %v8802_v27  ;;  %v10599_v26 = vpop.f32.mrb[44].mxu1  ;;  %v8189_v30 = vcombine.low %v2254_v23, %v2264_v17  ;;  %v1355_v27 = vadd.f32 %v8801_v14, %v10522_v0  ;;  %v2666_v63 = vld [vmem:[#allocation2 + $0x24] sm:$0xe]  ;;  %v10616_v55 = vpop.f32.mrb[39].mxu0  ;;  %v2667_v56 = vld [vmem:[#allocation2 + $0x28] sm:$0xf] }
 0x1d6   : > { %1923 = vst [vmem:[#allocation2 + $0x48] sm:$0xf] %v1922_v54  ;;  %v1662_v15 = vor.u32 %v1660_v53, %v1659_v2  ;;  %v1664_v3 = vrot.slane %v1659_v2, 4  ;;  %v2776_v35 = vsel %vm10417_vm10, %v2774_v39, %v2775_v41  ;;  %v10605_v32 = vpop.f32.mrb[45].mxu1  ;;  %v8695_v19 = vadd.f32 %v10537_v37, %v10533_v48  ;;  %v2668_v54 = vld [vmem:[#allocation2 + $0x2c] sm:$0x1] }
 0x1d7   : > { %v8221_v4 = vcombine.low %v2773_v60, %v2776_v35  ;;  %v1358_v36 = vadd.f32 %v8804_v16, %v1197_v59  ;;  %v8808_v52 = vpop.f32.mrb[46].mxu1  ;;  %5611 = vmatprep.mubr.bf16.mxu0 %v8189_v30  ;;  %v2266_v25 = vshrl.u32 %v2151_v5, 16  ;;  %v2269_v53 = vshll.u32 %v2151_v5, 16  ;;  %v10619_v30 = vpop.f32.mrb[40].mxu0 }
 0x1d8   : > { %v1663_v21 = vsel %vm10475_vm14, %v1655_v45, %v1662_v15  ;;  %v1926_v41 = vsel %vm10303_vm2, %v1664_v3, %v1925_v29  ;;  %v8809_v49 = vpop.f32.mrb[47].mxu1  ;;  %5612 = vmatmul.mubr.bf16.gmra.mrb[56].mxu0 %v9646_v62  ;;  %v1445_v0 = vmax.f32 %v1355_v27, 0.0  ;;  %v1202_v37 = vadd.f32 %v8695_v19, %v10408_v7  ;;  %v10623_v27 = vpop.f32.mrb[41].mxu0 }
 0x1d9   : > { %1924 = vst [vmem:[#allocation2 + $0x4c] sm:$0xf] %v1663_v21  ;;  %1927 = vst [vmem:[#allocation2 + $0x50] sm:$0x1] %v1926_v41  ;;  %5773 = vmatmul.mubr.bf16.gmra.mrb[88].mxu1 %v8221_v4  ;;  %v1446_v48 = vmax.f32 %v1358_v36, 0.0  ;;  %v2275_v45 = vshll.u32 %v2152_v18, 16 }
 0x1da   : > { %5780 = vmatprep.mubr.bf16.mxu1 %v9649_v43  ;;  %v2268_v29 = vrot.slane %v2266_v25, 4  ;;  %v2271_v60 = vrot.slane %v2269_v53, 5  ;;  %v2279_v2 = vshrl.u32 %v2152_v18, 16  ;;  %v2285_v5 = vshll.u32 %v2153_v50, 16  ;;  %v1928_v18 = vld [vmem:[#allocation2 + $0x54] sm:$0xf] }
 0x1db   : > { %v8550_v23 = vpack.c.bf16 %v1445_v0, %v1445_v0  ;;  %v8551_v39 = vpack.c.bf16 %v1446_v48, %v1446_v48  ;;  %v2277_v59 = vrot.slane %v2275_v45, 5  ;;  %v8206_v17 = vrot.slane %v2666_v63, 9  ;;  %v1932_v36 = vld [vmem:[#allocation2 + $0x5c] sm:$0x1]  ;;  %v10629_v53 = vpop.f32.mrb[42].mxu0 }
 0x1dc   : > { %v2272_v14 = vor.u32 %v2271_v60, %v2268_v29  ;;  %v2281_v16 = vrot.slane %v2279_v2, 4  ;;  %v2287_v15 = vrot.slane %v2285_v5, 5  ;;  %v2779_v3 = vrot.slane %v2667_v56, 5 }
 0x1dd   : > { %v1666_v35 = vshrl.u32 %v8550_v23, 16  ;;  %v1669_v51 = vshll.u32 %v8550_v23, 16  ;;  %v1674_v4 = vshrl.u32 %v8551_v39, 16  ;;  %v1677_v62 = vshll.u32 %v8551_v39, 16  ;;  %v10621_v43 = vpop.f32.mrb[48].mxu1  ;;  %v10641_v39 = vpop.f32.mrb[43].mxu0 }
 0x1de   : > { %v2273_v19 = vrot.slane %v2272_v14, 4  ;;  %v2282_v50 = vor.u32 %v2281_v16, %v2277_v59  ;;  %v2780_v21 = vsel %vm10417_vm10, %v8206_v17, %v2779_v3  ;;  %v2781_v41 = vrot.slane %v2779_v3, 4  ;;  %v10627_v25 = vpop.f32.mrb[49].mxu1 }
 0x1df   : > { %v1668_v63 = vrot.slane %v1666_v35, 7  ;;  %v1676_v0 = vrot.slane %v1674_v4, 7  ;;  %v2782_v48 = vrot.slane %v2668_v54, 5  ;;  %v8698_v45 = vadd.f32 %v10543_v57, %v10539_v44  ;;  %v10633_v56 = vpop.f32.mrb[50].mxu1  ;;  %v2154_v35 = vld [vmem:[#allocation2 + $0x30] sm:$0xf] }
 0x1e0   : > { %v2278_v29 = vsel %vm10336_vm7, %v2273_v19, %v2277_v59  ;;  %v2283_v60 = vrot.slane %v2282_v50, 4  ;;  %v8807_v2 = vadd.f32 %v10605_v32, %v10599_v26  ;;  %v8810_v5 = vadd.f32 %v8809_v49, %v8808_v52  ;;  %v10639_v23 = vpop.f32.mrb[51].mxu1  ;;  %v2155_v26 = vld [vmem:[#allocation2 + $0x34] sm:$0xf]  ;;  %v2156_v32 = vld [vmem:[#allocation2 + $0x38] sm:$0x1] }
 0x1e1   : > { %v1671_v17 = vor.u32 %v1669_v51, %v1668_v63  ;;  %v1672_v14 = vrot.slane %v1668_v63, 4  ;;  %v1679_v54 = vor.u32 %v1677_v62, %v1676_v0  ;;  %v1681_v16 = vrot.slane %v1676_v0, 4  ;;  %v9650_v19 = vld [vmem:[#allocation2 + $0x24] sm:$0xff]   ;;  %v2669_v63 = vld [vmem:[#allocation2 + $0x30] sm:$0xe]  ;;  %v10656_v0 = vpop.f32.mrb[44].mxu0 }
 0x1e2   : > { %v2288_v44 = vsel %vm10336_vm7, %v2283_v60, %v2287_v15  ;;  %v2783_v57 = vsel %vm10417_vm10, %v2781_v41, %v2782_v48  ;;  %v1205_v59 = vadd.f32 %v8698_v45, %v10408_v7  ;;  %v1363_v3 = vadd.f32 %v8807_v2, %v1202_v37  ;;  %v9651_v15 = vld [vmem:[#allocation2 + $0x3c] sm:$0xff]   ;;  %v9678_v48 = vld [vmem:[#allocation9 + $0x170] sm:$0xff]  }
 0x1e3   : > { %v1929_v52 = vsel %vm10459_vm13, %v1671_v17, %v1928_v18  ;;  %v1680_v49 = vsel %vm10475_vm14, %v1672_v14, %v1679_v54  ;;  %v1933_v51 = vsel %vm10303_vm2, %v1681_v16, %v1932_v36  ;;  %v8190_v4 = vcombine.low %v2278_v29, %v2288_v44  ;;  %v2670_v18 = vld [vmem:[#allocation2 + $0x34] sm:$0xf]  ;;  %v10660_v17 = vpop.f32.mrb[45].mxu0  ;;  %v2671_v14 = vld [vmem:[#allocation2 + $0x38] sm:$0x1]  ;;  %9095 = vmatprep.subr.bf16.mxu0 %v9678_v48 }
 0x1e4   : > { %1930 = vst [vmem:[#allocation2 + $0x54] sm:$0xf] %v1929_v52  ;;  %1931 = vst [vmem:[#allocation2 + $0x58] sm:$0xf] %v1680_v49  ;;  %v8222_v62 = vcombine.low %v2780_v21, %v2783_v57  ;;  %v1447_v37 = vmax.f32 %v1363_v3, 0.0  ;;  %v1366_v50 = vadd.f32 %v8810_v5, %v1205_v59  ;;  %v8701_v41 = vadd.f32 %v10570_v8, %v10562_v58  ;;  %v10667_v16 = vpop.f32.mrb[46].mxu0 }
 0x1e5   : > { %1934 = vst [vmem:[#allocation2 + $0x5c] sm:$0x1] %v1933_v51  ;;  %5619 = vmatprep.mubr.bf16.mxu0 %v8190_v4  ;;  %v2290_v45 = vshrl.u32 %v2154_v35, 16  ;;  %v2293_v36 = vshll.u32 %v2154_v35, 16  ;;  %v2299_v29 = vshll.u32 %v2155_v26, 16  ;;  %v2303_v60 = vshrl.u32 %v2155_v26, 16 }
 0x1e6   : > { %v10658_v2 = vpop.f32.mrb[52].mxu1  ;;  %5781 = vmatmul.mubr.bf16.gmra.mrb[92].mxu1 %v8222_v62  ;;  %5620 = vmatmul.mubr.bf16.gmra.mrb[60].mxu0 %v9650_v19  ;;  %v8552_v21 = vpack.c.bf16 %v1447_v37, %v1447_v37  ;;  %v1448_v5 = vmax.f32 %v1366_v50, 0.0  ;;  %v10663_v58 = vadd.f32 %v8701_v41, %v10408_v7  ;;  %v2309_v8 = vshll.u32 %v2156_v32, 16  ;;  %v10671_v26 = vpop.f32.mrb[47].mxu0  ;;  %v9680_v50 = vld [vmem:[#allocation9 + $0x130] sm:$0xff]   ;;  %v9681_v41 = vld [vmem:[#allocation9 + $0x1c8] sm:$0xff]  }
 0x1e7   : > { %v10665_v54 = vpop.f32.mrb[53].mxu1  ;;  %5788 = vmatprep.mubr.bf16.mxu1 %v9651_v15  ;;  %v2292_v44 = vrot.slane %v2290_v45, 4  ;;  %v2295_v57 = vrot.slane %v2293_v36, 5  ;;  %v2301_v59 = vrot.slane %v2299_v29, 5  ;;  %v2305_v3 = vrot.slane %v2303_v60, 4  ;;  %v9679_v15 = vld [vmem:[#allocation9 + $0x180] sm:$0xff]   ;;  %9096 = vmatpush3.bf16.msra.mxu0 %v9680_v50 }
 0x1e8   : > { %v10669_v35 = vpop.f32.mrb[54].mxu1  ;;  %v1683_v52 = vshrl.u32 %v8552_v21, 16  ;;  %v1686_v49 = vshll.u32 %v8552_v21, 16  ;;  %v8553_v7 = vpack.c.bf16 %v1448_v5, %v1448_v5  ;;  %v2311_v51 = vrot.slane %v2309_v8, 5  ;;  %v1935_v36 = vld [vmem:[#allocation2 + $0x60] sm:$0xf]  ;;  %9196 = vmatpush3.bf16.msra.mxu1 %v9679_v15 }
 0x1e9   : > { %v10673_v32 = vpop.f32.mrb[55].mxu1  ;;  %v2296_v4 = vor.u32 %v2295_v57, %v2292_v44  ;;  %v2306_v62 = vor.u32 %v2305_v3, %v2301_v59  ;;  %v8207_v19 = vrot.slane %v2669_v63, 9  ;;  %v2786_v37 = vrot.slane %v2670_v18, 5  ;;  %v9682_v8 = vld [vmem:[#allocation9 + $0x188] sm:$0xff]   ;;  %9197 = vmatprep.subr.bf16.mxu1 %v9681_v41  ;;  %v9684_v3 = vld [vmem:[#allocation9 + $0x1d0] sm:$0xff]  }
 0x1ea   : > { %v1685_v45 = vrot.slane %v1683_v52, 7  ;;  %v1691_v29 = vshrl.u32 %v8553_v7, 16  ;;  %v1694_v60 = vshll.u32 %v8553_v7, 16  ;;  %v2789_v40 = vrot.slane %v2671_v14, 5  ;;  %v9655_v50 = vld [vmem:[#allocation2 + $0x48] sm:$0xff]  }
 0x1eb   : > { %v2297_v48 = vrot.slane %v2296_v4, 4  ;;  %v2307_v1 = vrot.slane %v2306_v62, 4  ;;  %v2787_v21 = vsel %vm10417_vm10, %v8207_v19, %v2786_v37  ;;  %v2788_v5 = vrot.slane %v2786_v37, 4  ;;  %v2158_v62 = vld [vmem:[#allocation2 + $0x40] sm:$0xf] }
 0x1ec   : > { %v1688_v63 = vor.u32 %v1686_v49, %v1685_v45  ;;  %v1689_v18 = vrot.slane %v1685_v45, 4  ;;  %v1693_v44 = vrot.slane %v1691_v29, 7  ;;  %v8704_v57 = vadd.f32 %v10579_v6, %v10577_v61  ;;  %v2157_v49 = vld [vmem:[#allocation2 + $0x3c] sm:$0xf]  ;;  %v2159_v41 = vld [vmem:[#allocation2 + $0x44] sm:$0x1]  ;;  %9198 = vmatpush3.bf16.msra.mxu1 %v9682_v8 }
 0x1ed   : > { %v2302_v14 = vsel %vm10336_vm7, %v2297_v48, %v2301_v59  ;;  %v2312_v52 = vsel %vm10336_vm7, %v2307_v1, %v2311_v51  ;;  %v2790_v7 = vsel %vm10417_vm10, %v2788_v5, %v2789_v40  ;;  %v8813_v4 = vadd.f32 %v10627_v25, %v10621_v43  ;;  %v10687_v19 = vpop.f32.mrb[56].mxu1  ;;  %v9652_v59 = vld [vmem:[#allocation2 + $0x30] sm:$0xff]   ;;  %v10696_v43 = vld [vmem:[%s12965_s2] ss:$0 sm:$0xff]  ;;  %9199 = vmatprep.subr.bf16.mxu1 %v9684_v3  ;;  %v11475_v34 = vld [vmem:[#allocation2 + $0x58] sm:$0xf] }
 0x1ee   : > { %v1936_v61 = vsel %vm10459_vm13, %v1688_v63, %v1935_v36  ;;  %v1696_v6 = vor.u32 %v1694_v60, %v1693_v44  ;;  %v1698_v37 = vrot.slane %v1693_v44, 4  ;;  %v8191_v15 = vcombine.low %v2302_v14, %v2312_v52  ;;  %v10691_v1 = vpop.f32.mrb[57].mxu1  ;;  %v2672_v36 = vld [vmem:[#allocation2 + $0x3c] sm:$0xe]  ;;  %v9686_v60 = vld [vmem:[#allocation9 + $0x190] sm:$0xff]   ;;  %v9692_v14 = vld [vmem:[#allocation9 + $0x178] sm:$0xff]  }
 0x1ef   : > { %1937 = vst [vmem:[#allocation2 + $0x60] sm:$0xf] %v1936_v61  ;;  %v8223_v40 = vcombine.low %v2787_v21, %v2790_v7  ;;  %v1213_v25 = vadd.f32 %v10696_v43, %v8704_v57  ;;  %v1371_v51 = vadd.f32 %v8813_v4, %v10663_v58  ;;  %v8816_v45 = vadd.f32 %v10639_v23, %v10633_v56  ;;  %v10702_v29 = vpop.f32.mrb[58].mxu1  ;;  %v9687_v56 = vld [vmem:[#allocation9 + $0x1d8] sm:$0xff]   ;;  %v2673_v57 = vld [vmem:[#allocation2 + $0x40] sm:$0xf] }
 0x1f0   : > { %v1697_v48 = vsel %vm10475_vm14, %v1689_v18, %v1696_v6  ;;  %v1940_v21 = vsel %vm10303_vm2, %v1698_v37, %v1939_v12  ;;  %5627 = vmatprep.mubr.bf16.mxu0 %v8191_v15  ;;  %v8707_v5 = vadd.f32 %v10601_v24, %v10587_v28  ;;  %v2314_v63 = vshrl.u32 %v2157_v49, 16  ;;  %v10710_v58 = vpop.f32.mrb[59].mxu1  ;;  %v9694_v7 = vld [vmem:[#allocation9 + $0x138] sm:$0xff]   ;;  %v2674_v37 = vld [vmem:[#allocation2 + $0x44] sm:$0x1]  ;;  %9200 = vmatpush3.bf16.msra.mxu1 %v9686_v60 }
 0x1f1   : > { %1938 = vst [vmem:[#allocation2 + $0x64] sm:$0xf] %v1697_v48  ;;  %1941 = vst [vmem:[#allocation2 + $0x68] sm:$0x1] %v1940_v21  ;;  %5789 = vmatmul.mubr.bf16.gmra.mrb[96].mxu1 %v8223_v40  ;;  %5628 = vmatmul.mubr.bf16.gmra.mrb[64].mxu0 %v9652_v59  ;;  %v1449_v23 = vmax.f32 %v1371_v51, 0.0  ;;  %v1374_v8 = vadd.f32 %v8816_v45, %v1213_v25  ;;  %v2317_v44 = vshll.u32 %v2157_v49, 16 }
 0x1f2   : > { %v2323_v18 = vshll.u32 %v2158_v62, 16  ;;  %v1218_v12 = vadd.f32 %v10696_v43, %v8707_v5  ;;  %5796 = vmatprep.mubr.bf16.mxu1 %v9655_v50  ;;  %v2316_v52 = vrot.slane %v2314_v63, 4  ;;  %v2327_v28 = vshrl.u32 %v2158_v62, 16  ;;  %v9688_v15 = vld [vmem:[#allocation9 + $0x198] sm:$0xff]   ;;  %9097 = vmatprep.subr.bf16.mxu0 %v9692_v14  ;;  %v9690_v51 = vld [vmem:[#allocation9 + $0x1e0] sm:$0xff]  }
 0x1f3   : > { %v2333_v24 = vshll.u32 %v2159_v41, 16  ;;  %v8554_v4 = vpack.c.bf16 %v1449_v23, %v1449_v23  ;;  %v1450_v3 = vmax.f32 %v1374_v8, 0.0  ;;  %v2319_v61 = vrot.slane %v2317_v44, 5  ;;  %9201 = vmatprep.subr.bf16.mxu1 %v9687_v56  ;;  %9098 = vmatpush3.bf16.msra.mxu0 %v9694_v7  ;;  %v1942_v21 = vld [vmem:[#allocation2 + $0x6c] sm:$0xf] }
 0x1f4   : > { %v2325_v6 = vrot.slane %v2323_v18, 5  ;;  %v2329_v59 = vrot.slane %v2327_v28, 4  ;;  %v8208_v40 = vrot.slane %v2672_v36, 9  ;;  %v2793_v25 = vrot.slane %v2673_v57, 5  ;;  %v9693_v36 = vld [vmem:[#allocation9 + $0x1a0] sm:$0xff]   ;;  %9202 = vmatpush3.bf16.msra.mxu1 %v9688_v15 }
 0x1f5   : > { %v2335_v49 = vrot.slane %v2333_v24, 5  ;;  %v1700_v50 = vshrl.u32 %v8554_v4, 16  ;;  %v1703_v45 = vshll.u32 %v8554_v4, 16  ;;  %v8555_v62 = vpack.c.bf16 %v1450_v3, %v1450_v3  ;;  %v10713_v48 = vpop.f32.mrb[60].mxu1  ;;  %9203 = vmatprep.subr.bf16.mxu1 %v9690_v51 }
 0x1f6   : > { %v2320_v41 = vor.u32 %v2319_v61, %v2316_v52  ;;  %v2330_v5 = vor.u32 %v2329_v59, %v2325_v6  ;;  %v2794_v60 = vsel %vm10417_vm10, %v8208_v40, %v2793_v25  ;;  %v2795_v63 = vrot.slane %v2793_v25, 4  ;;  %v10717_v8 = vpop.f32.mrb[61].mxu1  ;;  %v9704_v52 = vld [vmem:[#allocation9 + $0x200] sm:$0xff]   ;;  %v9695_v61 = vld [vmem:[#allocation9 + $0x1e8] sm:$0xff]  }
 0x1f7   : > { %v2796_v23 = vrot.slane %v2674_v37, 5  ;;  %v1702_v44 = vrot.slane %v1700_v50, 7  ;;  %v1708_v56 = vshrl.u32 %v8555_v62, 16  ;;  %v1711_v18 = vshll.u32 %v8555_v62, 16  ;;  %v10719_v14 = vpop.f32.mrb[62].mxu1  ;;  %v9657_v25 = vld [vmem:[#allocation2 + $0x54] sm:$0xff]   ;;  %9331 = vmatprep.subr.bf16.mxu0 %v9704_v52 }
 0x1f8   : > { %v2321_v57 = vrot.slane %v2320_v41, 4  ;;  %v2331_v28 = vrot.slane %v2330_v5, 4  ;;  %v8710_v7 = vadd.f32 %v10616_v55, %v10607_v33  ;;  %v8819_v4 = vadd.f32 %v10665_v54, %v10658_v2  ;;  %v10727_v3 = vpop.f32.mrb[63].mxu1  ;;  %v2160_v50 = vld [vmem:[#allocation2 + $0x48] sm:$0xf]  ;;  %9204 = vmatpush3.bf16.msra.mxu1 %v9693_v36 }
 0x1f9   : > { %v2797_v24 = vsel %vm10417_vm10, %v2795_v63, %v2796_v23  ;;  %v1705_v37 = vor.u32 %v1703_v45, %v1702_v44  ;;  %v1706_v59 = vrot.slane %v1702_v44, 4  ;;  %v1710_v40 = vrot.slane %v1708_v56, 7  ;;  %v1946_v62 = vld [vmem:[#allocation2 + $0x74] sm:$0x1]  ;;  %v2161_v41 = vld [vmem:[#allocation2 + $0x4c] sm:$0xf]  ;;  %9205 = vmatprep.subr.bf16.mxu1 %v9695_v61 }
 0x1fa   : > { %v2326_v15 = vsel %vm10336_vm7, %v2321_v57, %v2325_v6  ;;  %v2336_v33 = vsel %vm10336_vm7, %v2331_v28, %v2335_v49  ;;  %v8224_v55 = vcombine.low %v2794_v60, %v2797_v24  ;;  %v1221_v2 = vadd.f32 %v10696_v43, %v8710_v7  ;;  %v2162_v23 = vld [vmem:[#allocation2 + $0x50] sm:$0x1]  ;;  %v9696_v6 = vld [vmem:[#allocation9 + $0x1a8] sm:$0xff]   ;;  %v9698_v57 = vld [vmem:[#allocation9 + $0x1f0] sm:$0xff]  }
 0x1fb   : > { %v1379_v54 = vadd.f32 %v8819_v4, %v1218_v12  ;;  %v1943_v51 = vsel %vm10459_vm13, %v1705_v37, %v1942_v21  ;;  %v1713_v45 = vor.u32 %v1711_v18, %v1710_v40  ;;  %v1715_v5 = vrot.slane %v1710_v40, 4  ;;  %v9656_v44 = vld [vmem:[#allocation2 + $0x3c] sm:$0xff]   ;;  %v2675_v28 = vld [vmem:[#allocation2 + $0x48] sm:$0xe]  ;;  %v2676_v7 = vld [vmem:[#allocation2 + $0x4c] sm:$0xf] }
 0x1fc   : > { %v8192_v63 = vcombine.low %v2326_v15, %v2336_v33  ;;  %1944 = vst [vmem:[#allocation2 + $0x6c] sm:$0xf] %v1943_v51  ;;  %5797 = vmatmul.mubr.bf16.gmra.mrb[100].mxu1 %v8224_v55  ;;  %v8822_v49 = vadd.f32 %v10673_v32, %v10669_v35  ;;  %v8713_v12 = vadd.f32 %v10623_v27, %v10619_v30  ;;  %v2338_v60 = vshrl.u32 %v2160_v50, 16  ;;  %v2677_v4 = vld [vmem:[#allocation2 + $0x50] sm:$0x1] }
 0x1fd   : > { %v1451_v56 = vmax.f32 %v1379_v54, 0.0  ;;  %v1714_v21 = vsel %vm10475_vm14, %v1706_v59, %v1713_v45  ;;  %v1947_v36 = vsel %vm10303_vm2, %v1715_v5, %v1946_v62  ;;  %5804 = vmatprep.mubr.bf16.mxu1 %v9657_v25  ;;  %v2341_v18 = vshll.u32 %v2160_v50, 16  ;;  %v10744_v24 = vpop.f32.mrb[64].mxu1  ;;  %9206 = vmatpush3.bf16.msra.mxu1 %v9696_v6  ;;  %v9700_v50 = vld [vmem:[#allocation9 + $0x1b0] sm:$0xff]   ;;  %v9701_v51 = vld [vmem:[#allocation9 + $0x1f8] sm:$0xff]  }
 0x1fe   : > { %5635 = vmatprep.mubr.bf16.mxu0 %v8192_v63  ;;  %v2347_v52 = vshll.u32 %v2161_v41, 16  ;;  %1945 = vst [vmem:[#allocation2 + $0x70] sm:$0xf] %v1714_v21  ;;  %1948 = vst [vmem:[#allocation2 + $0x74] sm:$0x1] %v1947_v36  ;;  %v1382_v27 = vadd.f32 %v8822_v49, %v1221_v2  ;;  %v10747_v35 = vadd.f32 %v10696_v43, %v8713_v12  ;;  %v2340_v32 = vrot.slane %v2338_v60, 4 }
 0x1ff   : > { %5636 = vmatmul.mubr.bf16.gmra.mrb[68].mxu0 %v9656_v44  ;;  %v8556_v30 = vpack.c.bf16 %v1451_v56, %v1451_v56  ;;  %v10749_v61 = vpop.f32.mrb[65].mxu1  ;;  %v2343_v37 = vrot.slane %v2341_v18, 5  ;;  %v2351_v40 = vshrl.u32 %v2161_v41, 16  ;;  %v2357_v15 = vshll.u32 %v2162_v23, 16  ;;  %9207 = vmatprep.subr.bf16.mxu1 %v9698_v57  ;;  %v1949_v49 = vld [vmem:[#allocation2 + $0x78] sm:$0xf] }
 0x200   : > { %v2349_v59 = vrot.slane %v2347_v52, 5  ;;  %v10751_v25 = vpop.f32.mrb[66].mxu1  ;;  %v1452_v55 = vmax.f32 %v1382_v27, 0.0  ;;  %v8209_v2 = vrot.slane %v2675_v28, 9  ;;  %v2800_v44 = vrot.slane %v2676_v7, 5  ;;  %v9702_v57 = vld [vmem:[#allocation9 + $0x1b8] sm:$0xff]  }
 0x201   : > { %v1717_v62 = vshrl.u32 %v8556_v30, 16  ;;  %v1720_v33 = vshll.u32 %v8556_v30, 16  ;;  %v10753_v54 = vpop.f32.mrb[67].mxu1  ;;  %v2344_v45 = vor.u32 %v2343_v37, %v2340_v32  ;;  %v2353_v5 = vrot.slane %v2351_v40, 4  ;;  %9208 = vmatpush3.bf16.msra.mxu1 %v9700_v50  ;;  %v2163_v27 = vld [vmem:[#allocation2 + $0x54] sm:$0xf] }
 0x202   : > { %v2359_v63 = vrot.slane %v2357_v15, 5  ;;  %v8557_v41 = vpack.c.bf16 %v1452_v55, %v1452_v55  ;;  %v2803_v23 = vrot.slane %v2677_v4, 5  ;;  %v8716_v6 = vadd.f32 %v10641_v39, %v10629_v53  ;;  %9209 = vmatprep.subr.bf16.mxu1 %v9701_v51  ;;  %v9661_v4 = vld [vmem:[#allocation2 + $0x60] sm:$0xff]   ;;  %v2165_v51 = vld [vmem:[#allocation2 + $0x5c] sm:$0x1] }
 0x203   : > { %v1719_v56 = vrot.slane %v1717_v62, 7  ;;  %v2345_v12 = vrot.slane %v2344_v45, 4  ;;  %v2354_v60 = vor.u32 %v2353_v5, %v2349_v59  ;;  %v2801_v21 = vsel %vm10417_vm10, %v8209_v2, %v2800_v44  ;;  %v1953_v15 = vld [vmem:[#allocation2 + $0x80] sm:$0x1] }
 0x204   : > { %v2802_v36 = vrot.slane %v2800_v44, 4  ;;  %v1725_v28 = vshrl.u32 %v8557_v41, 16  ;;  %v1728_v30 = vshll.u32 %v8557_v41, 16  ;;  %v1229_v39 = vadd.f32 %v10696_v43, %v8716_v6 }
 0x205   : > { %v1722_v18 = vor.u32 %v1720_v33, %v1719_v56  ;;  %v1723_v52 = vrot.slane %v1719_v56, 4  ;;  %v2350_v32 = vsel %vm10336_vm7, %v2345_v12, %v2349_v59  ;;  %v2355_v7 = vrot.slane %v2354_v60, 4  ;;  %v2164_v33 = vld [vmem:[#allocation2 + $0x58] sm:$0xf]  ;;  %v10774_v5 = vpop.f32.mrb[68].mxu1  ;;  %9210 = vmatpush3.bf16.msra.mxu1 %v9702_v57 }
 0x206   : > { %v2804_v53 = vsel %vm10417_vm10, %v2802_v36, %v2803_v23  ;;  %v1727_v40 = vrot.slane %v1725_v28, 7  ;;  %v8825_v62 = vadd.f32 %v10691_v1, %v10687_v19  ;;  %v8828_v55 = vadd.f32 %v10710_v58, %v10702_v29  ;;  %v2678_v1 = vld [vmem:[#allocation2 + $0x54] sm:$0xe]  ;;  %v10777_v41 = vpop.f32.mrb[69].mxu1  ;;  %v2679_v58 = vld [vmem:[#allocation2 + $0x58] sm:$0xf] }
 0x207   : > { %v1950_v37 = vsel %vm10459_vm13, %v1722_v18, %v1949_v49  ;;  %v8225_v50 = vcombine.low %v2801_v21, %v2804_v53  ;;  %v2360_v59 = vsel %vm10336_vm7, %v2355_v7, %v2359_v63  ;;  %v8719_v2 = vadd.f32 %v10660_v17, %v10656_v0  ;;  %v9658_v63 = vld [vmem:[#allocation2 + $0x48] sm:$0xff]   ;;  %v10782_v6 = vpop.f32.mrb[70].mxu1 }
 0x208   : > { %1951 = vst [vmem:[#allocation2 + $0x78] sm:$0xf] %v1950_v37  ;;  %v2362_v45 = vshrl.u32 %v2163_v27, 16  ;;  %v1730_v44 = vor.u32 %v1728_v30, %v1727_v40  ;;  %v1732_v56 = vrot.slane %v1727_v40, 4  ;;  %v8193_v49 = vcombine.low %v2350_v32, %v2360_v59  ;;  %v10788_v36 = vpop.f32.mrb[71].mxu1 }
 0x209   : > { %5805 = vmatmul.mubr.bf16.gmra.mrb[104].mxu1 %v8225_v50  ;;  %v1387_v19 = vadd.f32 %v8825_v62, %v10747_v35  ;;  %v1390_v23 = vadd.f32 %v8828_v55, %v1229_v39  ;;  %v10780_v29 = vadd.f32 %v10696_v43, %v8719_v2  ;;  %v2365_v17 = vshll.u32 %v2163_v27, 16  ;;  %v2680_v40 = vld [vmem:[#allocation2 + $0x5c] sm:$0x1] }
 0x20a   : > { %5812 = vmatprep.mubr.bf16.mxu1 %v9661_v4  ;;  %v2364_v0 = vrot.slane %v2362_v45, 4  ;;  %v1731_v12 = vsel %vm10475_vm14, %v1723_v52, %v1730_v44  ;;  %v1954_v35 = vsel %vm10303_vm2, %v1732_v56, %v1953_v15  ;;  %5643 = vmatprep.mubr.bf16.mxu0 %v8193_v49  ;;  %v2371_v21 = vshll.u32 %v2164_v33, 16 }
 0x20b   : > { %v1453_v60 = vmax.f32 %v1387_v19, 0.0  ;;  %1952 = vst [vmem:[#allocation2 + $0x7c] sm:$0xf] %v1731_v12  ;;  %1955 = vst [vmem:[#allocation2 + $0x80] sm:$0x1] %v1954_v35  ;;  %5644 = vmatmul.mubr.bf16.gmra.mrb[72].mxu0 %v9658_v63  ;;  %v1454_v57 = vmax.f32 %v1390_v23, 0.0  ;;  %v8722_v23 = vadd.f32 %v10671_v26, %v10667_v16  ;;  %v8834_v35 = vadd.f32 %v10727_v3, %v10719_v14 }
 0x20c   : > { %v2367_v18 = vrot.slane %v2365_v17, 5  ;;  %v2375_v28 = vshrl.u32 %v2164_v33, 16  ;;  %v2381_v30 = vshll.u32 %v2165_v51, 16  ;;  %v2373_v32 = vrot.slane %v2371_v21, 5  ;;  %v1956_v33 = vld [vmem:[#allocation2 + $0x84] sm:$0xf] }
 0x20d   : > { %v8558_v27 = vpack.c.bf16 %v1453_v60, %v1453_v60  ;;  %v8210_v7 = vrot.slane %v2678_v1, 9  ;;  %v2807_v53 = vrot.slane %v2679_v58, 5  ;;  %v8559_v52 = vpack.c.bf16 %v1454_v57, %v1454_v57  ;;  %v10790_v15 = vpop.f32.mrb[72].mxu1  ;;  %v1960_v1 = vld [vmem:[#allocation2 + $0x8c] sm:$0x1] }
 0x20e   : > { %v2368_v39 = vor.u32 %v2367_v18, %v2364_v0  ;;  %v2377_v4 = vrot.slane %v2375_v28, 4  ;;  %v2383_v37 = vrot.slane %v2381_v30, 5  ;;  %v10794_v2 = vpop.f32.mrb[73].mxu1  ;;  %v2810_v63 = vrot.slane %v2680_v40, 5  ;;  %v2166_v60 = vld [vmem:[#allocation2 + $0x60] sm:$0xf] }
 0x20f   : > { %v1734_v50 = vshrl.u32 %v8558_v27, 16  ;;  %v1737_v62 = vshll.u32 %v8558_v27, 16  ;;  %v2808_v59 = vsel %vm10417_vm10, %v8210_v7, %v2807_v53  ;;  %v2809_v55 = vrot.slane %v2807_v53, 4  ;;  %v10796_v49 = vpop.f32.mrb[74].mxu1  ;;  %v9663_v26 = vld [vmem:[#allocation2 + $0x6c] sm:$0xff]  }
 0x210   : > { %v1742_v51 = vshrl.u32 %v8559_v52, 16  ;;  %v1745_v45 = vshll.u32 %v8559_v52, 16  ;;  %v2369_v44 = vrot.slane %v2368_v39, 4  ;;  %v2378_v56 = vor.u32 %v2377_v4, %v2373_v32  ;;  %v10806_v21 = vpop.f32.mrb[75].mxu1  ;;  %v2168_v7 = vld [vmem:[#allocation2 + $0x68] sm:$0x1] }
 0x211   : > { %v1736_v19 = vrot.slane %v1734_v50, 7  ;;  %v8831_v0 = vadd.f32 %v10717_v8, %v10713_v48  ;;  %v2811_v28 = vsel %vm10417_vm10, %v2809_v55, %v2810_v63  ;;  %v1237_v16 = vadd.f32 %v10696_v43, %v8722_v23  ;;  %v2167_v48 = vld [vmem:[#allocation2 + $0x64] sm:$0xf]  ;;  %v2681_v14 = vld [vmem:[#allocation2 + $0x60] sm:$0xe] }
 0x212   : > { %v1744_v17 = vrot.slane %v1742_v51, 7  ;;  %v2374_v58 = vsel %vm10336_vm7, %v2369_v44, %v2373_v32  ;;  %v2379_v12 = vrot.slane %v2378_v56, 4  ;;  %v8226_v32 = vcombine.low %v2808_v59, %v2811_v28  ;;  %v2682_v4 = vld [vmem:[#allocation2 + $0x64] sm:$0xf]  ;;  %v2683_v40 = vld [vmem:[#allocation2 + $0x68] sm:$0x1] }
 0x213   : > { %v1739_v57 = vor.u32 %v1737_v62, %v1736_v19  ;;  %v1740_v18 = vrot.slane %v1736_v19, 4  ;;  %v1395_v52 = vadd.f32 %v8831_v0, %v10780_v29  ;;  %v1398_v39 = vadd.f32 %v8834_v35, %v1237_v16 }
 0x214   : > { %v1747_v8 = vor.u32 %v1745_v45, %v1744_v17  ;;  %v1749_v30 = vrot.slane %v1744_v17, 4  ;;  %v2384_v27 = vsel %vm10336_vm7, %v2379_v12, %v2383_v37  ;;  %5813 = vmatmul.mubr.bf16.gmra.mrb[108].mxu1 %v8226_v32  ;;  %v9662_v37 = vld [vmem:[#allocation2 + $0x54] sm:$0xff]   ;;  %v2386_v62 = vshrl.u32 %v2166_v60, 16 }
 0x215   : > { %v1957_v3 = vsel %vm10459_vm13, %v1739_v57, %v1956_v33  ;;  %v8194_v53 = vcombine.low %v2374_v58, %v2384_v27  ;;  %v2389_v59 = vshll.u32 %v2166_v60, 16  ;;  %v10820_v55 = vpop.f32.mrb[76].mxu1  ;;  %v1455_v29 = vmax.f32 %v1395_v52, 0.0  ;;  %5820 = vmatprep.mubr.bf16.mxu1 %v9663_v26 }
 0x216   : > { %1958 = vst [vmem:[#allocation2 + $0x84] sm:$0xf] %v1957_v3  ;;  %v1748_v43 = vsel %vm10475_vm14, %v1740_v18, %v1747_v8  ;;  %v1961_v50 = vsel %vm10303_vm2, %v1749_v30, %v1960_v1  ;;  %v1456_v33 = vmax.f32 %v1398_v39, 0.0  ;;  %v2395_v51 = vshll.u32 %v2167_v48, 16  ;;  %v10822_v44 = vpop.f32.mrb[77].mxu1 }
 0x217   : > { %1959 = vst [vmem:[#allocation2 + $0x88] sm:$0xf] %v1748_v43  ;;  %1962 = vst [vmem:[#allocation2 + $0x8c] sm:$0x1] %v1961_v50  ;;  %5651 = vmatprep.mubr.bf16.mxu0 %v8194_v53  ;;  %v2399_v45 = vshrl.u32 %v2167_v48, 16  ;;  %v2388_v56 = vrot.slane %v2386_v62, 4  ;;  %v8560_v0 = vpack.c.bf16 %v1455_v29, %v1455_v29  ;;  %v8837_v39 = vadd.f32 %v10749_v61, %v10744_v24 }
 0x218   : > { %5652 = vmatmul.mubr.bf16.gmra.mrb[76].mxu0 %v9662_v37  ;;  %v2391_v19 = vrot.slane %v2389_v59, 5  ;;  %v2405_v1 = vshll.u32 %v2168_v7, 16  ;;  %v8211_v63 = vrot.slane %v2681_v14, 9  ;;  %v10824_v23 = vpop.f32.mrb[78].mxu1  ;;  %v8561_v17 = vpack.c.bf16 %v1456_v33, %v1456_v33  ;;  %v2169_v30 = vld [vmem:[#allocation2 + $0x6c] sm:$0xf] }
 0x219   : > { %v2397_v58 = vrot.slane %v2395_v51, 5  ;;  %v2401_v12 = vrot.slane %v2399_v45, 4  ;;  %v10826_v35 = vpop.f32.mrb[79].mxu1  ;;  %v2814_v18 = vrot.slane %v2682_v4, 5  ;;  %v2817_v28 = vrot.slane %v2683_v40, 5  ;;  %v9667_v45 = vld [vmem:[#allocation2 + $0x78] sm:$0xff]  }
 0x21a   : > { %v2392_v60 = vor.u32 %v2391_v19, %v2388_v56  ;;  %v2407_v57 = vrot.slane %v2405_v1, 5  ;;  %v1751_v16 = vshrl.u32 %v8560_v0, 16  ;;  %v1754_v26 = vshll.u32 %v8560_v0, 16  ;;  %v1963_v53 = vld [vmem:[#allocation2 + $0x90] sm:$0xf]  ;;  %v9664_v56 = vld [vmem:[#allocation2 + $0x60] sm:$0xff]  }
 0x21b   : > { %v1759_v48 = vshrl.u32 %v8561_v17, 16  ;;  %v1762_v8 = vshll.u32 %v8561_v17, 16  ;;  %v2402_v32 = vor.u32 %v2401_v12, %v2397_v58  ;;  %v2815_v7 = vsel %vm10417_vm10, %v8211_v63, %v2814_v18  ;;  %v1967_v40 = vld [vmem:[#allocation2 + $0x98] sm:$0x1]  ;;  %v2170_v19 = vld [vmem:[#allocation2 + $0x70] sm:$0xf] }
 0x21c   : > { %v2393_v27 = vrot.slane %v2392_v60, 4  ;;  %v2816_v14 = vrot.slane %v2814_v18, 4  ;;  %v1753_v3 = vrot.slane %v1751_v16, 7  ;;  %v8840_v4 = vadd.f32 %v10753_v54, %v10751_v25  ;;  %v2171_v1 = vld [vmem:[#allocation2 + $0x74] sm:$0x1] }
 0x21d   : > { %v1761_v52 = vrot.slane %v1759_v48, 7  ;;  %v2403_v50 = vrot.slane %v2402_v32, 4  ;;  %v2410_v62 = vshrl.u32 %v2169_v30, 16  ;;  %v1403_v25 = vadd.f32 %v8837_v39, %v10443_v38  ;;  %v2684_v63 = vld [vmem:[#allocation2 + $0x6c] sm:$0xe] }
 0x21e   : > { %v2398_v43 = vsel %vm10336_vm7, %v2393_v27, %v2397_v58  ;;  %v2818_v37 = vsel %vm10417_vm10, %v2816_v14, %v2817_v28  ;;  %v1756_v59 = vor.u32 %v1754_v26, %v1753_v3  ;;  %v1757_v29 = vrot.slane %v1753_v3, 4  ;;  %v2685_v60 = vld [vmem:[#allocation2 + $0x70] sm:$0xf]  ;;  %v2686_v28 = vld [vmem:[#allocation2 + $0x74] sm:$0x1] }
 0x21f   : > { %v1764_v33 = vor.u32 %v1762_v8, %v1761_v52  ;;  %v1766_v51 = vrot.slane %v1761_v52, 4  ;;  %v2408_v24 = vsel %vm10336_vm7, %v2403_v50, %v2407_v57  ;;  %v8227_v61 = vcombine.low %v2815_v7, %v2818_v37  ;;  %v450_v3 = vld [vmem:[#allocation2 + $0xb0] sm:$0x1]  ;;  %v1970_v37 = vld [vmem:[#allocation2 + $0x9c] sm:$0xf] }
 0x220   : > { %v1406_v54 = vadd.f32 %v8840_v4, %v10447_v9  ;;  %v1964_v0 = vsel %vm10459_vm13, %v1756_v59, %v1963_v53  ;;  %v8195_v12 = vcombine.low %v2398_v43, %v2408_v24  ;;  %v1457_v38 = vmax.f32 %v1403_v25, 0.0  ;;  %v1974_v24 = vld [vmem:[#allocation2 + $0xa4] sm:$0x1] }
 0x221   : > { %v1765_v17 = vsel %vm10475_vm14, %v1757_v29, %v1764_v33  ;;  %v1968_v58 = vsel %vm10303_vm2, %v1766_v51, %v1967_v40  ;;  %1965 = vst [vmem:[#allocation2 + $0x90] sm:$0xf] %v1964_v0  ;;  %5821 = vmatmul.mubr.bf16.gmra.mrb[112].mxu1 %v8227_v61  ;;  %v2412_v57 = vrot.slane %v2410_v62, 4  ;;  %v2413_v18 = vshll.u32 %v2169_v30, 16 }
 0x222   : > { %1966 = vst [vmem:[#allocation2 + $0x94] sm:$0xf] %v1765_v17  ;;  %1969 = vst [vmem:[#allocation2 + $0x98] sm:$0x1] %v1968_v58  ;;  %v1458_v9 = vmax.f32 %v1406_v54, 0.0  ;;  %5659 = vmatprep.mubr.bf16.mxu0 %v8195_v12  ;;  %5828 = vmatprep.mubr.bf16.mxu1 %v9667_v45  ;;  %v2419_v16 = vshll.u32 %v2170_v19, 16  ;;  %v8562_v27 = vpack.c.bf16 %v1457_v38, %v1457_v38 }
 0x223   : > { %v2423_v26 = vshrl.u32 %v2170_v19, 16  ;;  %v2429_v48 = vshll.u32 %v2171_v1, 16  ;;  %v8212_v8 = vrot.slane %v2684_v63, 9  ;;  %5660 = vmatmul.mubr.bf16.gmra.mrb[80].mxu0 %v9664_v56  ;;  %v2415_v7 = vrot.slane %v2413_v18, 5  ;;  %v9669_v12 = vld [vmem:[#allocation2 + $0x84] sm:$0xff]  }
 0x224   : > { %v8563_v32 = vpack.c.bf16 %v1458_v9, %v1458_v9  ;;  %v2821_v14 = vrot.slane %v2685_v60, 5  ;;  %v2421_v53 = vrot.slane %v2419_v16, 5  ;;  %v2824_v4 = vrot.slane %v2686_v28, 5  ;;  %v2172_v60 = vld [vmem:[#allocation2 + $0x78] sm:$0xf] }
 0x225   : > { %v2425_v52 = vrot.slane %v2423_v26, 4  ;;  %v2431_v39 = vrot.slane %v2429_v48, 5  ;;  %v1768_v40 = vshrl.u32 %v8562_v27, 16  ;;  %v1771_v43 = vshll.u32 %v8562_v27, 16  ;;  %v2174_v18 = vld [vmem:[#allocation2 + $0x80] sm:$0x1] }
 0x226   : > { %v1776_v30 = vshrl.u32 %v8563_v32, 16  ;;  %v1779_v50 = vshll.u32 %v8563_v32, 16  ;;  %v2416_v62 = vor.u32 %v2415_v7, %v2412_v57  ;;  %v2822_v29 = vsel %vm10417_vm10, %v8212_v8, %v2821_v14  ;;  %v2173_v57 = vld [vmem:[#allocation2 + $0x7c] sm:$0xf]  ;;  %v2687_v28 = vld [vmem:[#allocation2 + $0x78] sm:$0xe] }
 0x227   : > { %v2426_v59 = vor.u32 %v2425_v52, %v2421_v53  ;;  %v2823_v33 = vrot.slane %v2821_v14, 4  ;;  %v1770_v51 = vrot.slane %v1768_v40, 7  ;;  %v8843_v61 = vadd.f32 %v10777_v41, %v10774_v5  ;;  %v2688_v48 = vld [vmem:[#allocation2 + $0x7c] sm:$0xf]  ;;  %v9668_v8 = vld [vmem:[#allocation2 + $0x6c] sm:$0xff]  }
 0x228   : > { %v1778_v45 = vrot.slane %v1776_v30, 7  ;;  %v451_v56 = vsel %vm10312_vm4, 0, %v450_v3  ;;  %v2417_v25 = vrot.slane %v2416_v62, 4  ;;  %v8846_v1 = vadd.f32 %v10788_v36, %v10782_v6  ;;  %v2689_v30 = vld [vmem:[#allocation2 + $0x80] sm:$0x1] }
 0x229   : > { %v2427_v54 = vrot.slane %v2426_v59, 4  ;;  %v2825_v19 = vsel %vm10417_vm10, %v2823_v33, %v2824_v4  ;;  %452 = vst [vmem:[#allocation2 + $0xb0] sm:$0x1] %v451_v56  ;;  %v1773_v63 = vor.u32 %v1771_v43, %v1770_v51  ;;  %v1774_v0 = vrot.slane %v1770_v51, 4 }
 0x22a   : > { %v1781_v17 = vor.u32 %v1779_v50, %v1778_v45  ;;  %v1783_v58 = vrot.slane %v1778_v45, 4  ;;  %v2422_v5 = vsel %vm10336_vm7, %v2417_v25, %v2421_v53  ;;  %v8228_v38 = vcombine.low %v2822_v29, %v2825_v19  ;;  %v397_v45 = vld [vmem:[#allocation2 + $0xb4] sm:$0x1]  ;;  %v453_v19 = vld [vmem:[#allocation2 + $0xbc] sm:$0x1] }
 0x22b   : > { %v2432_v41 = vsel %vm10336_vm7, %v2427_v54, %v2431_v39  ;;  %v1411_v9 = vadd.f32 %v8843_v61, %v10451_v10  ;;  %v1971_v6 = vsel %vm10459_vm13, %v1773_v63, %v1970_v37  ;;  %v1414_v27 = vadd.f32 %v8846_v1, %v10455_v11 }
 0x22c   : > { %v1782_v36 = vsel %vm10475_vm14, %v1774_v0, %v1781_v17  ;;  %v1975_v16 = vsel %vm10303_vm2, %v1783_v58, %v1974_v24  ;;  %v8196_v26 = vcombine.low %v2422_v5, %v2432_v41  ;;  %1972 = vst [vmem:[#allocation2 + $0x9c] sm:$0xf] %v1971_v6  ;;  %5829 = vmatmul.mubr.bf16.gmra.mrb[116].mxu1 %v8228_v38  ;;  %v2434_v32 = vshrl.u32 %v2172_v60, 16  ;;  %v1977_v24 = vld [vmem:[#allocation2 + $0xa8] sm:$0xf] }
 0x22d   : > { %1973 = vst [vmem:[#allocation2 + $0xa0] sm:$0xf] %v1782_v36  ;;  %1976 = vst [vmem:[#allocation2 + $0xa4] sm:$0x1] %v1975_v16  ;;  %v1459_v10 = vmax.f32 %v1411_v9, 0.0  ;;  %v2437_v7 = vshll.u32 %v2172_v60, 16  ;;  %5836 = vmatprep.mubr.bf16.mxu1 %v9669_v12  ;;  %v8849_v5 = vadd.f32 %v10794_v2, %v10790_v15 }
 0x22e   : > { %5667 = vmatprep.mubr.bf16.mxu0 %v8196_v26  ;;  %v2443_v14 = vshll.u32 %v2173_v57, 16  ;;  %v2447_v3 = vshrl.u32 %v2173_v57, 16  ;;  %v2453_v53 = vshll.u32 %v2174_v18, 16  ;;  %v8213_v52 = vrot.slane %v2687_v28, 9  ;;  %v9673_v18 = vld [vmem:[#allocation2 + $0x90] sm:$0xff]  }
 0x22f   : > { %5668 = vmatmul.mubr.bf16.gmra.mrb[84].mxu0 %v9668_v8  ;;  %v8564_v39 = vpack.c.bf16 %v1459_v10, %v1459_v10  ;;  %v1460_v4 = vmax.f32 %v1414_v27, 0.0  ;;  %v2436_v40 = vrot.slane %v2434_v32, 4  ;;  %v2439_v43 = vrot.slane %v2437_v7, 5  ;;  %v2175_v28 = vld [vmem:[#allocation2 + $0x84] sm:$0xf] }
 0x230   : > { %v2445_v50 = vrot.slane %v2443_v14, 5  ;;  %v2449_v37 = vrot.slane %v2447_v3, 4  ;;  %v2455_v62 = vrot.slane %v2453_v53, 5  ;;  %v2828_v59 = vrot.slane %v2688_v48, 5  ;;  %v1981_v6 = vld [vmem:[#allocation2 + $0xb0] sm:$0x1] }
 0x231   : > { %v1785_v29 = vshrl.u32 %v8564_v39, 16  ;;  %v1788_v11 = vshll.u32 %v8564_v39, 16  ;;  %v8565_v33 = vpack.c.bf16 %v1460_v4, %v1460_v4  ;;  %v2440_v51 = vor.u32 %v2439_v43, %v2436_v40  ;;  %v2176_v15 = vld [vmem:[#allocation2 + $0x88] sm:$0xf]  ;;  %v2177_v32 = vld [vmem:[#allocation2 + $0x8c] sm:$0x1] }
 0x232   : > { %v2450_v61 = vor.u32 %v2449_v37, %v2445_v50  ;;  %v2829_v56 = vsel %vm10417_vm10, %v8213_v52, %v2828_v59  ;;  %v2830_v25 = vrot.slane %v2828_v59, 4  ;;  %v2831_v54 = vrot.slane %v2689_v30, 5  ;;  %v2690_v7 = vld [vmem:[#allocation2 + $0x84] sm:$0xe]  ;;  %v9670_v14 = vld [vmem:[#allocation2 + $0x78] sm:$0xff]  }
 0x233   : > { %v1787_v1 = vrot.slane %v1785_v29, 7  ;;  %v1793_v63 = vshrl.u32 %v8565_v33, 16  ;;  %v1796_v0 = vshll.u32 %v8565_v33, 16  ;;  %v2441_v17 = vrot.slane %v2440_v51, 4  ;;  %v2691_v39 = vld [vmem:[#allocation2 + $0x88] sm:$0xf] }
 0x234   : > { %v2451_v58 = vrot.slane %v2450_v61, 4  ;;  %v2832_v12 = vsel %vm10417_vm10, %v2830_v25, %v2831_v54  ;;  %v398_v60 = vsel %vm10303_vm2, 0, %v397_v45  ;;  %v1419_v26 = vadd.f32 %v8849_v5, %v10467_v31  ;;  %v400_v51 = vld [vmem:[#allocation2 + $0xc0] sm:$0x1] }
 0x235   : > { %v1790_v41 = vor.u32 %v1788_v11, %v1787_v1  ;;  %v1791_v38 = vrot.slane %v1787_v1, 4  ;;  %v1795_v9 = vrot.slane %v1793_v63, 7  ;;  %v2446_v57 = vsel %vm10336_vm7, %v2441_v17, %v2445_v50  ;;  %399 = vst [vmem:[#allocation2 + $0xb4] sm:$0x1] %v398_v60 }
 0x236   : > { %v2456_v36 = vsel %vm10336_vm7, %v2451_v58, %v2455_v62  ;;  %v8229_v16 = vcombine.low %v2829_v56, %v2832_v12  ;;  %v454_v48 = vsel %vm10312_vm4, 0, %v453_v19  ;;  %v1461_v3 = vmax.f32 %v1419_v26, 0.0  ;;  %v2692_v62 = vld [vmem:[#allocation2 + $0x8c] sm:$0x1]  ;;  %v456_v58 = vld [vmem:[#allocation2 + $0xc8] sm:$0x1] }
 0x237   : > { %v1978_v2 = vsel %vm10459_vm13, %v1790_v41, %v1977_v24  ;;  %v1798_v8 = vor.u32 %v1796_v0, %v1795_v9  ;;  %v1800_v10 = vrot.slane %v1795_v9, 4  ;;  %v8197_v27 = vcombine.low %v2446_v57, %v2456_v36  ;;  %455 = vst [vmem:[#allocation2 + $0xbc] sm:$0x1] %v454_v48  ;;  %v13013_v48 = vld [vmem:[#allocation20_spill] sm:$0xff] }
 0x238   : > { %1979 = vst [vmem:[#allocation2 + $0xa8] sm:$0xf] %v1978_v2  ;;  %5837 = vmatmul.mubr.bf16.gmra.mrb[120].mxu1 %v8229_v16  ;;  %v8852_v31 = vadd.f32 %v10806_v21, %v10796_v49  ;;  %v2458_v53 = vshrl.u32 %v2175_v28, 16  ;;  %v2461_v52 = vshll.u32 %v2175_v28, 16  ;;  %v2467_v43 = vshll.u32 %v2176_v15, 16  ;;  %v9675_v2 = vld [vmem:[#allocation2 + $0x9c] sm:$0xff]  }
 0x239   : > { %v1799_v4 = vsel %vm10475_vm14, %v1791_v38, %v1798_v8  ;;  %v1982_v40 = vsel %vm10303_vm2, %v1800_v10, %v1981_v6  ;;  %5675 = vmatprep.mubr.bf16.mxu0 %v8197_v27  ;;  %5844 = vmatprep.mubr.bf16.mxu1 %v9673_v18  ;;  %v2471_v30 = vshrl.u32 %v2176_v15, 16  ;;  %v8566_v50 = vpack.c.bf16 %v1461_v3, %v1461_v3  ;;  %v2178_v6 = vld [vmem:[#allocation2 + $0x90] sm:$0xf]  ;;  %v2179_v8 = vld [vmem:[#allocation2 + $0x94] sm:$0xf] }
 0x23a   : > { %1980 = vst [vmem:[#allocation2 + $0xac] sm:$0xf] %v1799_v4  ;;  %1983 = vst [vmem:[#allocation2 + $0xb0] sm:$0x1] %v1982_v40  ;;  %5676 = vmatmul.mubr.bf16.gmra.mrb[88].mxu0 %v9670_v14  ;;  %v1422_v37 = vadd.f32 %v8852_v31, %v10471_v22  ;;  %v2460_v49 = vrot.slane %v2458_v53, 4  ;;  %v2463_v21 = vrot.slane %v2461_v52, 5  ;;  %v8855_v38 = vadd.f32 %v10822_v44, %v10820_v55 }
 0x23b   : > { %v2469_v59 = vrot.slane %v2467_v43, 5  ;;  %v2473_v29 = vrot.slane %v2471_v30, 4  ;;  %v2477_v11 = vshll.u32 %v2177_v32, 16  ;;  %v8214_v33 = vrot.slane %v2690_v7, 9  ;;  %v9674_v7 = vld [vmem:[#allocation2 + $0x84] sm:$0xff]  }
 0x23c   : > { %v1802_v45 = vshrl.u32 %v8566_v50, 16  ;;  %v1805_v24 = vshll.u32 %v8566_v50, 16  ;;  %v1462_v61 = vmax.f32 %v1422_v37, 0.0  ;;  %v2464_v56 = vor.u32 %v2463_v21, %v2460_v49  ;;  %v1984_v12 = vld [vmem:[#allocation2 + $0xb4] sm:$0xf] }
 0x23d   : > { %v2474_v25 = vor.u32 %v2473_v29, %v2469_v59  ;;  %v2479_v54 = vrot.slane %v2477_v11, 5  ;;  %v2835_v19 = vrot.slane %v2691_v39, 5  ;;  %v2838_v1 = vrot.slane %v2692_v62, 5  ;;  %v2180_v53 = vld [vmem:[#allocation2 + $0x98] sm:$0x1]  ;;  %v13014_v37 = vld [vmem:[#allocation21_spill] sm:$0xff] }
 0x23e   : > { %v1804_v63 = vrot.slane %v1802_v45, 7  ;;  %v8567_v0 = vpack.c.bf16 %v1462_v61, %v1462_v61  ;;  %v2465_v17 = vrot.slane %v2464_v56, 4  ;;  %v401_v22 = vsel %vm10303_vm2, 0, %v400_v51  ;;  %v1988_v32 = vld [vmem:[#allocation2 + $0xbc] sm:$0x1] }
 0x23f   : > { %v2475_v60 = vrot.slane %v2474_v25, 4  ;;  %v2836_v5 = vsel %vm10417_vm10, %v8214_v33, %v2835_v19  ;;  %v2837_v41 = vrot.slane %v2835_v19, 4  ;;  %402 = vst [vmem:[#allocation2 + $0xc0] sm:$0x1] %v401_v22  ;;  %v1427_v15 = vadd.f32 %v8855_v38, %v13013_v48  ;;  %v2693_v39 = vld [vmem:[#allocation2 + $0x90] sm:$0xe] }
 0x240   : > { %v1807_v9 = vor.u32 %v1805_v24, %v1804_v63  ;;  %v1808_v57 = vrot.slane %v1804_v63, 4  ;;  %v1810_v18 = vshrl.u32 %v8567_v0, 16  ;;  %v1813_v28 = vshll.u32 %v8567_v0, 16  ;;  %v2695_v33 = vld [vmem:[#allocation2 + $0x98] sm:$0x1] }
 0x241   : > { %v2470_v36 = vsel %vm10336_vm7, %v2465_v17, %v2469_v59  ;;  %v2480_v16 = vsel %vm10336_vm7, %v2475_v60, %v2479_v54  ;;  %v2839_v26 = vsel %vm10417_vm10, %v2837_v41, %v2838_v1  ;;  %v1463_v14 = vmax.f32 %v1427_v15, 0.0  ;;  %v2694_v59 = vld [vmem:[#allocation2 + $0x94] sm:$0xf]  ;;  %v2181_v1 = vld [vmem:[#allocation2 + $0x9c] sm:$0xf] }
 0x242   : > { %v1985_v55 = vsel %vm10459_vm13, %v1807_v9, %v1984_v12  ;;  %v1812_v44 = vrot.slane %v1810_v18, 7  ;;  %v8198_v10 = vcombine.low %v2470_v36, %v2480_v16  ;;  %v8230_v27 = vcombine.low %v2836_v5, %v2839_v26  ;;  %v2182_v12 = vld [vmem:[#allocation2 + $0xa0] sm:$0xf]  ;;  %v2696_v36 = vld [vmem:[#allocation2 + $0x9c] sm:$0xe] }
 0x243   : > { %1986 = vst [vmem:[#allocation2 + $0xb4] sm:$0xf] %v1985_v55  ;;  %v457_v3 = vsel %vm10312_vm4, 0, %v456_v58  ;;  %v8858_v31 = vadd.f32 %v10826_v35, %v10824_v23  ;;  %v2482_v52 = vshrl.u32 %v2178_v6, 16  ;;  %v2485_v43 = vshll.u32 %v2178_v6, 16 }
 0x244   : > { %v1815_v4 = vor.u32 %v1813_v28, %v1812_v44  ;;  %v1817_v40 = vrot.slane %v1812_v44, 4  ;;  %5683 = vmatprep.mubr.bf16.mxu0 %v8198_v10  ;;  %5845 = vmatmul.mubr.bf16.gmra.mrb[124].mxu1 %v8230_v27  ;;  %458 = vst [vmem:[#allocation2 + $0xc8] sm:$0x1] %v457_v3  ;;  %v2491_v30 = vshll.u32 %v2179_v8, 16  ;;  %v8568_v50 = vpack.c.bf16 %v1463_v14, %v1463_v14  ;;  %v2183_v6 = vld [vmem:[#allocation2 + $0xa4] sm:$0x1] }
 0x245   : > { %5684 = vmatmul.mubr.bf16.gmra.mrb[92].mxu0 %v9674_v7  ;;  %v1430_v49 = vadd.f32 %v8858_v31, %v13014_v37  ;;  %5852 = vmatprep.mubr.bf16.mxu1 %v9675_v2  ;;  %v2484_v21 = vrot.slane %v2482_v52, 4  ;;  %v2495_v62 = vshrl.u32 %v2179_v8, 16  ;;  %v2487_v29 = vrot.slane %v2485_v43, 5  ;;  %v9683_v2 = vld [vmem:[#allocation2 + $0xa8] sm:$0xff]   ;;  %v2697_v55 = vld [vmem:[#allocation2 + $0xa0] sm:$0xf] }
 0x246   : > { %v1816_v23 = vsel %vm10475_vm14, %v1808_v57, %v1815_v4  ;;  %v1989_v35 = vsel %vm10303_vm2, %v1817_v40, %v1988_v32  ;;  %v2493_v11 = vrot.slane %v2491_v30, 5  ;;  %v1819_v51 = vshrl.u32 %v8568_v50, 16  ;;  %v1991_v0 = vld [vmem:[#allocation2 + $0xc0] sm:$0xf]  ;;  %v9677_v14 = vld [vmem:[#allocation2 + $0x90] sm:$0xff]  }
 0x247   : > { %1987 = vst [vmem:[#allocation2 + $0xb8] sm:$0xf] %v1816_v23  ;;  %1990 = vst [vmem:[#allocation2 + $0xbc] sm:$0x1] %v1989_v35  ;;  %v1822_v45 = vshll.u32 %v8568_v50, 16  ;;  %v1464_v24 = vmax.f32 %v1430_v49, 0.0  ;;  %v2488_v56 = vor.u32 %v2487_v29, %v2484_v21 }
 0x248   : > { %v2497_v61 = vrot.slane %v2495_v62, 4  ;;  %v2501_v25 = vshll.u32 %v2180_v53, 16  ;;  %v8215_v54 = vrot.slane %v2693_v39, 9  ;;  %v2842_v19 = vrot.slane %v2694_v59, 5  ;;  %v2698_v43 = vld [vmem:[#allocation2 + $0xa4] sm:$0x1] }
 0x249   : > { %v1821_v63 = vrot.slane %v1819_v51, 7  ;;  %v8569_v17 = vpack.c.bf16 %v1464_v24, %v1464_v24  ;;  %v2845_v58 = vrot.slane %v2695_v33, 5  ;;  %v2489_v60 = vrot.slane %v2488_v56, 4  ;;  %v2184_v30 = vld [vmem:[#allocation2 + $0xa8] sm:$0xf] }
 0x24a   : > { %v2498_v22 = vor.u32 %v2497_v61, %v2493_v11  ;;  %v2503_v5 = vrot.slane %v2501_v25, 5  ;;  %v2843_v41 = vsel %vm10417_vm10, %v8215_v54, %v2842_v19  ;;  %v2844_v38 = vrot.slane %v2842_v19, 4  ;;  %v2185_v21 = vld [vmem:[#allocation2 + $0xac] sm:$0xf]  ;;  %v2186_v29 = vld [vmem:[#allocation2 + $0xb0] sm:$0x1] }
 0x24b   : > { %v1824_v9 = vor.u32 %v1822_v45, %v1821_v63  ;;  %v1825_v57 = vrot.slane %v1821_v63, 4  ;;  %v1827_v18 = vshrl.u32 %v8569_v17, 16  ;;  %v1830_v28 = vshll.u32 %v8569_v17, 16  ;;  %v1995_v16 = vld [vmem:[#allocation2 + $0xc8] sm:$0x1] }
 0x24c   : > { %v2494_v26 = vsel %vm10336_vm7, %v2489_v60, %v2493_v11  ;;  %v2499_v48 = vrot.slane %v2498_v22, 4  ;;  %v2846_v15 = vsel %vm10417_vm10, %v2844_v38, %v2845_v58  ;;  %v2506_v8 = vshrl.u32 %v2181_v1, 16  ;;  %v2699_v25 = vld [vmem:[#allocation2 + $0xa8] sm:$0xe]  ;;  %v2700_v54 = vld [vmem:[#allocation2 + $0xac] sm:$0xf] }
 0x24d   : > { %v1992_v44 = vsel %vm10459_vm13, %v1824_v9, %v1991_v0  ;;  %v1829_v10 = vrot.slane %v1827_v18, 7  ;;  %v8231_v27 = vcombine.low %v2843_v41, %v2846_v15  ;;  %v2509_v32 = vshll.u32 %v2181_v1, 16  ;;  %v2187_v17 = vld [vmem:[#allocation2 + $0xb4] sm:$0xf]  ;;  %v2701_v18 = vld [vmem:[#allocation2 + $0xb0] sm:$0x1] }
 0x24e   : > { %1993 = vst [vmem:[#allocation2 + $0xc0] sm:$0xf] %v1992_v44  ;;  %v2504_v7 = vsel %vm10336_vm7, %v2499_v48, %v2503_v5  ;;  %v2508_v3 = vrot.slane %v2506_v8, 4  ;;  %v2515_v31 = vshll.u32 %v2182_v12, 16  ;;  %v2519_v53 = vshrl.u32 %v2182_v12, 16  ;;  %v9689_v12 = vld [vmem:[#allocation2 + $0xb4] sm:$0xff]  }
 0x24f   : > { %v1832_v52 = vor.u32 %v1830_v28, %v1829_v10  ;;  %v1834_v39 = vrot.slane %v1829_v10, 4  ;;  %v8199_v4 = vcombine.low %v2494_v26, %v2504_v7  ;;  %5853 = vmatmul.mubr.bf16.gmra.mrb[128].mxu1 %v8231_v27  ;;  %v2511_v40 = vrot.slane %v2509_v32, 5  ;;  %v2188_v28 = vld [vmem:[#allocation2 + $0xb8] sm:$0xf]  ;;  %v2702_v26 = vld [vmem:[#allocation2 + $0xb4] sm:$0xe] }
 0x250   : > { %5860 = vmatprep.mubr.bf16.mxu1 %v9683_v2  ;;  %v2517_v13 = vrot.slane %v2515_v31, 5  ;;  %v2521_v50 = vrot.slane %v2519_v53, 4  ;;  %v2525_v37 = vshll.u32 %v2183_v6, 16  ;;  %v8216_v49 = vrot.slane %v2696_v36, 9  ;;  %v9685_v48 = vld [vmem:[#allocation2 + $0x9c] sm:$0xff]  }
 0x251   : > { %v1833_v62 = vsel %vm10475_vm14, %v1825_v57, %v1832_v52  ;;  %v1996_v59 = vsel %vm10303_vm2, %v1834_v39, %v1995_v16  ;;  %5691 = vmatprep.mubr.bf16.mxu0 %v8199_v4  ;;  %v2512_v23 = vor.u32 %v2511_v40, %v2508_v3  ;;  %v2849_v35 = vrot.slane %v2697_v55, 5  ;;  %v2189_v55 = vld [vmem:[#allocation2 + $0xbc] sm:$0x1]  ;;  %v4037_v3 = vld [vmem:[#allocation2 + $0x18] sm:$0xf] }
 0x252   : > { %1994 = vst [vmem:[#allocation2 + $0xc4] sm:$0xf] %v1833_v62  ;;  %1997 = vst [vmem:[#allocation2 + $0xc8] sm:$0x1] %v1996_v59  ;;  %5692 = vmatmul.mubr.bf16.gmra.mrb[96].mxu0 %v9677_v14  ;;  %v2522_v11 = vor.u32 %v2521_v50, %v2517_v13  ;;  %v2527_v33 = vrot.slane %v2525_v37, 5  ;;  %v2852_v51 = vrot.slane %v2698_v43, 5 }
 0x253   : > { %v2530_v45 = vshrl.u32 %v2184_v30, 16  ;;  %v2513_v24 = vrot.slane %v2512_v23, 4  ;;  %v2850_v61 = vsel %vm10417_vm10, %v8216_v49, %v2849_v35  ;;  %v2851_v46 = vrot.slane %v2849_v35, 4  ;;  %v2703_v14 = vld [vmem:[#allocation2 + $0xb8] sm:$0xf] }
 0x254   : > { %v2533_v56 = vshll.u32 %v2184_v30, 16  ;;  %v2523_v19 = vrot.slane %v2522_v11, 4  ;;  %v2539_v63 = vshll.u32 %v2185_v21, 16  ;;  %v2543_v0 = vshrl.u32 %v2185_v21, 16  ;;  %v2704_v4 = vld [vmem:[#allocation2 + $0xbc] sm:$0x1] }
 0x255   : > { %v2532_v1 = vrot.slane %v2530_v45, 4  ;;  %v2518_v22 = vsel %vm10336_vm7, %v2513_v24, %v2517_v13  ;;  %v2853_v58 = vsel %vm10417_vm10, %v2851_v46, %v2852_v51  ;;  %v2549_v5 = vshll.u32 %v2186_v29, 16  ;;  %v4038_v62 = vld [vmem:[#allocation2 + $0x1c] sm:$0xf]  ;;  %v3604_v46 = vld [vmem:[#allocation2 + $0xc] sm:$0xe] }
 0x256   : > { %v2535_v60 = vrot.slane %v2533_v56, 5  ;;  %v2528_v41 = vsel %vm10336_vm7, %v2523_v19, %v2527_v33  ;;  %v8232_v38 = vcombine.low %v2850_v61, %v2853_v58  ;;  %v2541_v9 = vrot.slane %v2539_v63, 5  ;;  %v4039_v33 = vld [vmem:[#allocation2 + $0x20] sm:$0x1]  ;;  %v10948_v63 = vpop.f32.mrb[48].mxu0 }
 0x257   : > { %v2545_v57 = vrot.slane %v2543_v0, 4  ;;  %v8200_v6 = vcombine.low %v2518_v22, %v2528_v41  ;;  %v2551_v16 = vrot.slane %v2549_v5, 5  ;;  %v8217_v2 = vrot.slane %v2699_v25, 9  ;;  %v9691_v0 = vld [vmem:[#allocation2 + $0xa8] sm:$0xff]  }
 0x258   : > { %v2536_v36 = vor.u32 %v2535_v60, %v2532_v1  ;;  %5861 = vmatmul.mubr.bf16.gmra.mrb[132].mxu1 %v8232_v38  ;;  %v2856_v8 = vrot.slane %v2700_v54, 5  ;;  %v2554_v44 = vshrl.u32 %v2187_v17, 16  ;;  %v2859_v27 = vrot.slane %v2701_v18, 5  ;;  %v3605_v1 = vld [vmem:[#allocation2 + $0x10] sm:$0xf]  ;;  %v10952_v60 = vpop.f32.mrb[49].mxu0 }
 0x259   : > { %v2546_v15 = vor.u32 %v2545_v57, %v2541_v9  ;;  %5699 = vmatprep.mubr.bf16.mxu0 %v8200_v6  ;;  %5868 = vmatprep.mubr.bf16.mxu1 %v9689_v12  ;;  %v2557_v32 = vshll.u32 %v2187_v17, 16  ;;  %v2563_v7 = vshll.u32 %v2188_v28, 16  ;;  %v2567_v13 = vshrl.u32 %v2188_v28, 16  ;;  %v9697_v35 = vld [vmem:[#allocation2 + $0xc0] sm:$0xff]   ;;  %v3606_v57 = vld [vmem:[#allocation2 + $0x14] sm:$0x1] }
 0x25a   : > { %v2537_v10 = vrot.slane %v2536_v36, 4  ;;  %5700 = vmatmul.mubr.bf16.gmra.mrb[100].mxu0 %v9685_v48  ;;  %v2857_v53 = vsel %vm10417_vm10, %v8217_v2, %v2856_v8  ;;  %v2858_v52 = vrot.slane %v2856_v8, 4  ;;  %v2556_v39 = vrot.slane %v2554_v44, 4  ;;  %v10956_v18 = vpop.f32.mrb[50].mxu0  ;;  %v3093_v44 = vld [vmem:[#allocation2 + $0x10] sm:$0xf] }
 0x25b   : > { %v2547_v31 = vrot.slane %v2546_v15, 4  ;;  %v2559_v43 = vrot.slane %v2557_v32, 5  ;;  %v2565_v30 = vrot.slane %v2563_v7, 5  ;;  %v2573_v49 = vshll.u32 %v2189_v55, 16  ;;  %v10960_v48 = vpop.f32.mrb[51].mxu0 }
 0x25c   : > { %v2542_v40 = vsel %vm10336_vm7, %v2537_v10, %v2541_v9  ;;  %v2860_v37 = vsel %vm10417_vm10, %v2858_v52, %v2859_v27  ;;  %v8218_v21 = vrot.slane %v2702_v26, 9  ;;  %v2569_v11 = vrot.slane %v2567_v13, 4  ;;  %v3092_v26 = vld [vmem:[#allocation2 + $0xc] sm:$0xf]  ;;  %v4041_v13 = vld [vmem:[#allocation2 + $0x28] sm:$0xf] }
 0x25d   : > { %v2552_v50 = vsel %vm10336_vm7, %v2547_v31, %v2551_v16  ;;  %v8233_v23 = vcombine.low %v2857_v53, %v2860_v37  ;;  %v2560_v29 = vor.u32 %v2559_v43, %v2556_v39  ;;  %v2575_v51 = vrot.slane %v2573_v49, 5  ;;  %v4040_v39 = vld [vmem:[#allocation2 + $0x24] sm:$0xf] }
 0x25e   : > { %v8201_v59 = vcombine.low %v2542_v40, %v2552_v50  ;;  %v2863_v45 = vrot.slane %v2703_v14, 5  ;;  %v2866_v24 = vrot.slane %v2704_v4, 5  ;;  %v4086_v61 = vshrl.u32 %v4037_v3, 16  ;;  %v3094_v14 = vld [vmem:[#allocation2 + $0x14] sm:$0x1] }
 0x25f   : > { %v2561_v56 = vrot.slane %v2560_v29, 4  ;;  %v2570_v25 = vor.u32 %v2569_v11, %v2565_v30  ;;  %v4089_v54 = vshll.u32 %v4037_v3, 16  ;;  %v4095_v19 = vshll.u32 %v4038_v62, 16 }
 0x260   : > { %5707 = vmatprep.mubr.bf16.mxu0 %v8201_v59  ;;  %5869 = vmatmul.mubr.bf16.gmra.mrb[136].mxu1 %v8233_v23  ;;  %v2864_v17 = vsel %vm10417_vm10, %v8218_v21, %v2863_v45  ;;  %v2865_v22 = vrot.slane %v2863_v45, 4  ;;  %v4088_v58 = vrot.slane %v4086_v61, 4  ;;  %v4099_v12 = vshrl.u32 %v4038_v62, 16  ;;  %v4042_v62 = vld [vmem:[#allocation2 + $0x2c] sm:$0x1]  ;;  %v9699_v23 = vld [vmem:[#allocation2 + $0xb4] sm:$0xff]  }
 0x261   : > { %5876 = vmatprep.mubr.bf16.mxu1 %v9697_v35  ;;  %v2566_v5 = vsel %vm10336_vm7, %v2561_v56, %v2565_v30  ;;  %v2571_v41 = vrot.slane %v2570_v25, 4  ;;  %v4091_v38 = vrot.slane %v4089_v54, 5  ;;  %v4097_v9 = vrot.slane %v4095_v19, 5  ;;  %v3607_v59 = vld [vmem:[#allocation2 + $0x18] sm:$0xe] }
 0x262   : > { %5708 = vmatmul.mubr.bf16.gmra.mrb[104].mxu0 %v9691_v0  ;;  %v2867_v28 = vsel %vm10417_vm10, %v2865_v22, %v2866_v24  ;;  %v4101_v6 = vrot.slane %v4099_v12, 4  ;;  %v4105_v36 = vshll.u32 %v4039_v33, 16  ;;  %v8267_v16 = vrot.slane %v3604_v46, 9  ;;  %v3609_v56 = vld [vmem:[#allocation2 + $0x20] sm:$0x1] }
 0x263   : > { %v2576_v15 = vsel %vm10336_vm7, %v2571_v41, %v2575_v51  ;;  %v8234_v2 = vcombine.low %v2864_v17, %v2867_v28  ;;  %v4092_v8 = vor.u32 %v4091_v38, %v4088_v58  ;;  %v3702_v55 = vrot.slane %v3605_v1, 5  ;;  %v3608_v51 = vld [vmem:[#allocation2 + $0x1c] sm:$0xf]  ;;  %v3095_v0 = vld [vmem:[#allocation2 + $0x18] sm:$0xf] }
 0x264   : > { %v8202_v10 = vcombine.low %v2566_v5, %v2576_v15  ;;  %v4102_v27 = vor.u32 %v4101_v6, %v4097_v9  ;;  %v4107_v32 = vrot.slane %v4105_v36, 5  ;;  %v3705_v7 = vrot.slane %v3606_v57, 5 }
 0x265   : > { %v4093_v3 = vrot.slane %v4092_v8, 4  ;;  %v3703_v31 = vsel %vm10417_vm10, %v8267_v16, %v3702_v55  ;;  %v3704_v53 = vrot.slane %v3702_v55, 4  ;;  %v3141_v52 = vshrl.u32 %v3092_v26, 16  ;;  %v9703_v16 = vld [vmem:[#allocation2 + $0x18] sm:$0xff]  }
 0x266   : > { %5715 = vmatprep.mubr.bf16.mxu0 %v8202_v10  ;;  %v4103_v4 = vrot.slane %v4102_v27, 4  ;;  %v3144_v40 = vshll.u32 %v3092_v26, 16  ;;  %v3150_v43 = vshll.u32 %v3093_v44, 16  ;;  %v3154_v30 = vshrl.u32 %v3093_v44, 16  ;;  %v3096_v8 = vld [vmem:[#allocation2 + $0x1c] sm:$0xf] }
 0x267   : > { %v4098_v50 = vsel %vm10336_vm7, %v4093_v3, %v4097_v9  ;;  %v3706_v37 = vsel %vm10417_vm10, %v3704_v53, %v3705_v7  ;;  %v3143_v49 = vrot.slane %v3141_v52, 4  ;;  %v3160_v21 = vshll.u32 %v3094_v14, 16  ;;  %v4043_v52 = vld [vmem:[#allocation2 + $0x30] sm:$0xf] }
 0x268   : > { %5877 = vmatmul.mubr.bf16.gmra.mrb[140].mxu1 %v8234_v2  ;;  %v4108_v35 = vsel %vm10336_vm7, %v4103_v4, %v4107_v32  ;;  %v8283_v29 = vcombine.low %v3703_v31, %v3706_v37  ;;  %v3146_v11 = vrot.slane %v3144_v40, 5  ;;  %v3152_v33 = vrot.slane %v3150_v43, 5  ;;  %v3097_v32 = vld [vmem:[#allocation2 + $0x20] sm:$0x1] }
 0x269   : > { %v8315_v45 = vcombine.low %v4098_v50, %v4108_v35  ;;  %v3156_v24 = vrot.slane %v3154_v30, 4  ;;  %v3162_v61 = vrot.slane %v3160_v21, 5  ;;  %v4110_v46 = vshrl.u32 %v4040_v39, 16  ;;  %v9776_v35 = vld [vmem:[#allocation9 + $0x200] sm:$0xff]  }
 0x26a   : > { %5716 = vmatmul.mubr.bf16.gmra.mrb[108].mxu0 %v9699_v23  ;;  %v3147_v25 = vor.u32 %v3146_v11, %v3143_v49  ;;  %v4113_v54 = vshll.u32 %v4040_v39, 16  ;;  %v4119_v19 = vshll.u32 %v4041_v13, 16  ;;  %v4123_v1 = vshrl.u32 %v4041_v13, 16  ;;  %v9707_v39 = vld [vmem:[#allocation9 + $0x208] sm:$0xff]   ;;  %v4044_v13 = vld [vmem:[#allocation2 + $0x34] sm:$0xf] }
 0x26b   : > { %6078 = vmatprep.mubr.bf16.mxu1 %v8315_v45  ;;  %5917 = vmatprep.mubr.bf16.mxu0 %v8283_v29  ;;  %v3157_v17 = vor.u32 %v3156_v24, %v3152_v33  ;;  %v4112_v22 = vrot.slane %v4110_v46, 4  ;;  %v4129_v58 = vshll.u32 %v4042_v62, 16  ;;  %v8268_v12 = vrot.slane %v3607_v59, 9  ;;  %v4045_v62 = vld [vmem:[#allocation2 + $0x38] sm:$0x1] }
 0x26c   : > { %v3148_v5 = vrot.slane %v3147_v25, 4  ;;  %v4115_v41 = vrot.slane %v4113_v54, 5  ;;  %v4121_v38 = vrot.slane %v4119_v19, 5  ;;  %v4125_v9 = vrot.slane %v4123_v1, 4  ;;  %v3610_v59 = vld [vmem:[#allocation2 + $0x24] sm:$0xe] }
 0x26d   : > { %v3158_v57 = vrot.slane %v3157_v17, 4  ;;  %v4131_v28 = vrot.slane %v4129_v58, 5  ;;  %v3709_v6 = vrot.slane %v3608_v51, 5  ;;  %v3712_v36 = vrot.slane %v3609_v56, 5  ;;  %v3611_v51 = vld [vmem:[#allocation2 + $0x28] sm:$0xf] }
 0x26e   : > { %v3153_v26 = vsel %vm10336_vm7, %v3148_v5, %v3152_v33  ;;  %v4116_v15 = vor.u32 %v4115_v41, %v4112_v22  ;;  %v4126_v2 = vor.u32 %v4125_v9, %v4121_v38  ;;  %v3165_v55 = vshrl.u32 %v3095_v0, 16  ;;  %v3612_v45 = vld [vmem:[#allocation2 + $0x2c] sm:$0x1]  ;;  %v9705_v54 = vld [vmem:[#allocation2 + $0x24] sm:$0xff]  }
 0x26f   : > { %v3163_v44 = vsel %vm10336_vm7, %v3158_v57, %v3162_v61  ;;  %v3710_v10 = vsel %vm10417_vm10, %v8268_v12, %v3709_v6  ;;  %v3711_v27 = vrot.slane %v3709_v6, 4  ;;  %v3168_v7 = vshll.u32 %v3095_v0, 16  ;;  %v9710_v25 = vld [vmem:[#allocation9 + $0x210] sm:$0xff]   ;;  %v3098_v22 = vld [vmem:[#allocation2 + $0x24] sm:$0xf] }
 0x270   : > { %6079 = vmatmul.mubr.bf16.vlgmr.msra.gmra.mrb[144].mxu1 %v9703_v16  ;;  %v8251_v14 = vcombine.low %v3153_v26, %v3163_v44  ;;  %v4117_v3 = vrot.slane %v4116_v15, 4  ;;  %v4127_v31 = vrot.slane %v4126_v2, 4  ;;  %v3167_v53 = vrot.slane %v3165_v55, 4  ;;  %v9713_v2 = vld [vmem:[#allocation9 + $0x218] sm:$0xff]   ;;  %v3100_v44 = vld [vmem:[#allocation2 + $0x2c] sm:$0x1] }
 0x271   : > { %v3713_v4 = vsel %vm10417_vm10, %v3711_v27, %v3712_v36  ;;  %v3170_v40 = vrot.slane %v3168_v7, 5  ;;  %v3174_v43 = vshll.u32 %v3096_v8, 16  ;;  %v3178_v30 = vshrl.u32 %v3096_v8, 16 }
 0x272   : > { %5918 = vmatmul.mubr.bf16.vlgmr.msra.gmra.mrb[112].mxu0 %v8251_v14  ;;  %v4122_v50 = vsel %vm10336_vm7, %v4117_v3, %v4121_v38  ;;  %v4132_v37 = vsel %vm10336_vm7, %v4127_v31, %v4131_v28  ;;  %v8284_v49 = vcombine.low %v3710_v10, %v3713_v4  ;;  %v3184_v21 = vshll.u32 %v3097_v32, 16  ;;  %v3099_v38 = vld [vmem:[#allocation2 + $0x28] sm:$0xf]  ;;  %v4046_v31 = vld [vmem:[#allocation2 + $0x3c] sm:$0xf] }
 0x273   : > { %v8316_v23 = vcombine.low %v4122_v50, %v4132_v37  ;;  %9332 = vmatpush3.bf16.msra.mxu0 %v9776_v35  ;;  %v3171_v29 = vor.u32 %v3170_v40, %v3167_v53  ;;  %v3176_v11 = vrot.slane %v3174_v43, 5  ;;  %v3180_v33 = vrot.slane %v3178_v30, 4  ;;  %v4047_v53 = vld [vmem:[#allocation2 + $0x40] sm:$0xf]  ;;  %v9716_v37 = vld [vmem:[#allocation9 + $0x220] sm:$0xff]  }
 0x274   : > { %5925 = vmatprep.mubr.bf16.mxu0 %v8284_v49  ;;  %v3186_v24 = vrot.slane %v3184_v21, 5  ;;  %v4134_v61 = vshrl.u32 %v4043_v52, 16  ;;  %v4137_v46 = vshll.u32 %v4043_v52, 16  ;;  %v4143_v56 = vshll.u32 %v4044_v13, 16  ;;  %9333 = vmatprep.subr.bf16.mxu0 %v9707_v39  ;;  %v3613_v35 = vld [vmem:[#allocation2 + $0x30] sm:$0xe] }
 0x275   : > { %6086 = vmatprep.mubr.bf16.mxu1 %v8316_v23  ;;  %v3172_v19 = vrot.slane %v3171_v29, 4  ;;  %v3181_v1 = vor.u32 %v3180_v33, %v3176_v11  ;;  %v4147_v0 = vshrl.u32 %v4044_v13, 16  ;;  %v4153_v17 = vshll.u32 %v4045_v62, 16 }
 0x276   : > { %v4136_v58 = vrot.slane %v4134_v61, 4  ;;  %v4139_v12 = vrot.slane %v4137_v46, 5  ;;  %v4145_v5 = vrot.slane %v4143_v56, 5  ;;  %v8269_v41 = vrot.slane %v3610_v59, 9  ;;  %v4048_v59 = vld [vmem:[#allocation2 + $0x44] sm:$0x1] }
 0x277   : > { %v3177_v9 = vsel %vm10336_vm7, %v3172_v19, %v3176_v11  ;;  %v3182_v57 = vrot.slane %v3181_v1, 4  ;;  %v4149_v28 = vrot.slane %v4147_v0, 4  ;;  %v4155_v6 = vrot.slane %v4153_v17, 5  ;;  %9334 = vmatpush3.bf16.msra.mxu0 %v9707_v39  ;;  %v9706_v11 = vld [vmem:[#allocation2 + $0x30] sm:$0xff]  }
 0x278   : > { %6087 = vmatmul.mubr.bf16.gmra.mrb[148].mxu1 %v9705_v54  ;;  %v4140_v36 = vor.u32 %v4139_v12, %v4136_v58  ;;  %v3716_v16 = vrot.slane %v3611_v51, 5  ;;  %v3719_v26 = vrot.slane %v3612_v45, 5  ;;  %v3189_v15 = vshrl.u32 %v3098_v22, 16  ;;  %9335 = vmatprep.subr.bf16.mxu0 %v9710_v25  ;;  %v3615_v54 = vld [vmem:[#allocation2 + $0x38] sm:$0x1]  ;;  %v9719_v58 = vld [vmem:[#allocation9 + $0x228] sm:$0xff]  }
 0x279   : > { %v3187_v8 = vsel %vm10336_vm7, %v3182_v57, %v3186_v24  ;;  %v4150_v55 = vor.u32 %v4149_v28, %v4145_v5  ;;  %v3192_v10 = vshll.u32 %v3098_v22, 16  ;;  %v3198_v27 = vshll.u32 %v3099_v38, 16  ;;  %v3614_v24 = vld [vmem:[#allocation2 + $0x34] sm:$0xf]  ;;  %v3101_v22 = vld [vmem:[#allocation2 + $0x30] sm:$0xf] }
 0x27a   : > { %v8252_v32 = vcombine.low %v3177_v9, %v3187_v8  ;;  %v4141_v7 = vrot.slane %v4140_v36, 4  ;;  %v3717_v14 = vsel %vm10417_vm10, %v8269_v41, %v3716_v16  ;;  %v3718_v3 = vrot.slane %v3716_v16, 4  ;;  %v3102_v9 = vld [vmem:[#allocation2 + $0x34] sm:$0xf]  ;;  %v3103_v16 = vld [vmem:[#allocation2 + $0x38] sm:$0x1] }
 0x27b   : > { %v4151_v52 = vrot.slane %v4150_v55, 4  ;;  %v3191_v39 = vrot.slane %v3189_v15, 4  ;;  %v3194_v4 = vrot.slane %v3192_v10, 5  ;;  %v3200_v40 = vrot.slane %v3198_v27, 5  ;;  %9336 = vmatpush3.bf16.msra.mxu0 %v9710_v25  ;;  %v4049_v55 = vld [vmem:[#allocation2 + $0x48] sm:$0xf] }
 0x27c   : > { %5926 = vmatmul.mubr.bf16.gmra.mrb[116].mxu0 %v8252_v32  ;;  %v4146_v43 = vsel %vm10336_vm7, %v4141_v7, %v4145_v5  ;;  %v3720_v30 = vsel %vm10417_vm10, %v3718_v3, %v3719_v26  ;;  %v3202_v13 = vshrl.u32 %v3099_v38, 16  ;;  %v3208_v50 = vshll.u32 %v3100_v44, 16  ;;  %9337 = vmatprep.subr.bf16.mxu0 %v9713_v2 }
 0x27d   : > { %v4156_v49 = vsel %vm10336_vm7, %v4151_v52, %v4155_v6  ;;  %v8285_v21 = vcombine.low %v3717_v14, %v3720_v30  ;;  %v3195_v62 = vor.u32 %v3194_v4, %v3191_v39  ;;  %v4158_v23 = vshrl.u32 %v4046_v31, 16  ;;  %v9722_v52 = vld [vmem:[#allocation9 + $0x230] sm:$0xff]  }
 0x27e   : > { %v8317_v29 = vcombine.low %v4146_v43, %v4156_v49  ;;  %v3204_v33 = vrot.slane %v3202_v13, 4  ;;  %v3210_v51 = vrot.slane %v3208_v50, 5  ;;  %v4161_v45 = vshll.u32 %v4046_v31, 16  ;;  %v9708_v13 = vld [vmem:[#allocation2 + $0x3c] sm:$0xff]   ;;  %v4051_v49 = vld [vmem:[#allocation2 + $0x50] sm:$0x1] }
 0x27f   : > { %5933 = vmatprep.mubr.bf16.mxu0 %v8285_v21  ;;  %v3196_v61 = vrot.slane %v3195_v62, 4  ;;  %v4160_v46 = vrot.slane %v4158_v23, 4  ;;  %v4167_v56 = vshll.u32 %v4047_v53, 16  ;;  %v4171_v25 = vshrl.u32 %v4047_v53, 16  ;;  %9338 = vmatpush3.bf16.msra.mxu0 %v9713_v2  ;;  %v4050_v53 = vld [vmem:[#allocation2 + $0x4c] sm:$0xf] }
 0x280   : > { %6094 = vmatprep.mubr.bf16.mxu1 %v8317_v29  ;;  %v3205_v19 = vor.u32 %v3204_v33, %v3200_v40  ;;  %v4163_v1 = vrot.slane %v4161_v45, 5  ;;  %v4177_v0 = vshll.u32 %v4048_v59, 16  ;;  %v8270_v17 = vrot.slane %v3613_v35, 9  ;;  %9339 = vmatprep.subr.bf16.mxu0 %v9716_v37  ;;  %v3616_v29 = vld [vmem:[#allocation2 + $0x3c] sm:$0xe] }
 0x281   : > { %6095 = vmatmul.mubr.bf16.gmra.mrb[152].mxu1 %v9706_v11  ;;  %v3201_v12 = vsel %vm10336_vm7, %v3196_v61, %v3200_v40  ;;  %v4169_v5 = vrot.slane %v4167_v56, 5  ;;  %v4173_v41 = vrot.slane %v4171_v25, 4  ;;  %v3723_v38 = vrot.slane %v3614_v24, 5  ;;  %v3617_v11 = vld [vmem:[#allocation2 + $0x40] sm:$0xf] }
 0x282   : > { %v3206_v57 = vrot.slane %v3205_v19, 4  ;;  %v4164_v28 = vor.u32 %v4163_v1, %v4160_v46  ;;  %v4179_v6 = vrot.slane %v4177_v0, 5  ;;  %v3726_v36 = vrot.slane %v3615_v54, 5  ;;  %v3618_v61 = vld [vmem:[#allocation2 + $0x44] sm:$0x1] }
 0x283   : > { %v4174_v26 = vor.u32 %v4173_v41, %v4169_v5  ;;  %v3724_v15 = vsel %vm10417_vm10, %v8270_v17, %v3723_v38  ;;  %v3725_v2 = vrot.slane %v3723_v38, 4  ;;  %v3213_v8 = vshrl.u32 %v3101_v22, 16  ;;  %9340 = vmatpush3.bf16.msra.mxu0 %v9716_v37  ;;  %v3104_v19 = vld [vmem:[#allocation2 + $0x3c] sm:$0xf] }
 0x284   : > { %v3211_v44 = vsel %vm10336_vm7, %v3206_v57, %v3210_v51  ;;  %v4165_v10 = vrot.slane %v4164_v28, 4  ;;  %v3216_v27 = vshll.u32 %v3101_v22, 16  ;;  %v3222_v32 = vshll.u32 %v3102_v9, 16  ;;  %9341 = vmatprep.subr.bf16.mxu0 %v9719_v58 }
 0x285   : > { %v8253_v7 = vcombine.low %v3201_v12, %v3211_v44  ;;  %v4175_v14 = vrot.slane %v4174_v26, 4  ;;  %v3727_v3 = vsel %vm10417_vm10, %v3725_v2, %v3726_v36  ;;  %v3215_v31 = vrot.slane %v3213_v8, 4  ;;  %v3105_v12 = vld [vmem:[#allocation2 + $0x40] sm:$0xf] }
 0x286   : > { %v4170_v39 = vsel %vm10336_vm7, %v4165_v10, %v4169_v5  ;;  %v8286_v4 = vcombine.low %v3724_v15, %v3727_v3  ;;  %v3218_v40 = vrot.slane %v3216_v27, 5  ;;  %v3224_v43 = vrot.slane %v3222_v32, 5  ;;  %v9725_v5 = vld [vmem:[#allocation9 + $0x238] sm:$0xff]  }
 0x287   : > { %5934 = vmatmul.mubr.bf16.gmra.mrb[120].mxu0 %v8253_v7  ;;  %v4180_v30 = vsel %vm10336_vm7, %v4175_v14, %v4179_v6  ;;  %v3226_v50 = vshrl.u32 %v3102_v9, 16  ;;  %v3232_v37 = vshll.u32 %v3103_v16, 16  ;;  %v4182_v21 = vshrl.u32 %v4049_v55, 16  ;;  %v3106_v16 = vld [vmem:[#allocation2 + $0x44] sm:$0x1] }
 0x288   : > { %v8318_v62 = vcombine.low %v4170_v39, %v4180_v30  ;;  %5941 = vmatprep.mubr.bf16.mxu0 %v8286_v4  ;;  %v3219_v59 = vor.u32 %v3218_v40, %v3215_v31  ;;  %v4185_v23 = vshll.u32 %v4049_v55, 16  ;;  %v4191_v35 = vshll.u32 %v4050_v53, 16  ;;  %9342 = vmatpush3.bf16.msra.mxu0 %v9719_v58  ;;  %v4052_v7 = vld [vmem:[#allocation2 + $0x54] sm:$0xf]  ;;  %v4053_v39 = vld [vmem:[#allocation2 + $0x58] sm:$0xf] }
 0x289   : > { %v3228_v33 = vrot.slane %v3226_v50, 4  ;;  %v3234_v51 = vrot.slane %v3232_v37, 5  ;;  %v4184_v45 = vrot.slane %v4182_v21, 4  ;;  %v4195_v24 = vshrl.u32 %v4050_v53, 16  ;;  %9343 = vmatprep.subr.bf16.mxu0 %v9722_v52  ;;  %v4054_v50 = vld [vmem:[#allocation2 + $0x5c] sm:$0x1] }
 0x28a   : > { %6102 = vmatprep.mubr.bf16.mxu1 %v8318_v62  ;;  %v3220_v46 = vrot.slane %v3219_v59, 4  ;;  %v4187_v56 = vrot.slane %v4185_v23, 5  ;;  %v4193_v25 = vrot.slane %v4191_v35, 5  ;;  %v4201_v54 = vshll.u32 %v4051_v49, 16  ;;  %v9709_v21 = vld [vmem:[#allocation2 + $0x48] sm:$0xff]  }
 0x28b   : > { %6103 = vmatmul.mubr.bf16.gmra.mrb[156].mxu1 %v9708_v13  ;;  %v3229_v1 = vor.u32 %v3228_v33, %v3224_v43  ;;  %v4197_v0 = vrot.slane %v4195_v24, 4  ;;  %v8271_v17 = vrot.slane %v3616_v29, 9  ;;  %v3730_v22 = vrot.slane %v3617_v11, 5  ;;  %v3619_v35 = vld [vmem:[#allocation2 + $0x48] sm:$0xe] }
 0x28c   : > { %v3225_v58 = vsel %vm10336_vm7, %v3220_v46, %v3224_v43  ;;  %v4188_v41 = vor.u32 %v4187_v56, %v4184_v45  ;;  %v4203_v38 = vrot.slane %v4201_v54, 5  ;;  %v3733_v9 = vrot.slane %v3618_v61, 5  ;;  %9344 = vmatpush3.bf16.msra.mxu0 %v9722_v52  ;;  %v11012_v55 = vpop.f32.mrb[80].mxu1  ;;  %v3620_v45 = vld [vmem:[#allocation2 + $0x4c] sm:$0xf] }
 0x28d   : > { %v3230_v57 = vrot.slane %v3229_v1, 4  ;;  %v4198_v28 = vor.u32 %v4197_v0, %v4193_v25  ;;  %v3731_v6 = vsel %vm10417_vm10, %v8271_v17, %v3730_v22  ;;  %v3732_v36 = vrot.slane %v3730_v22, 4  ;;  %9345 = vmatprep.subr.bf16.mxu0 %v9725_v5  ;;  %v11018_v14 = vpop.f32.mrb[81].mxu1  ;;  %v3621_v24 = vld [vmem:[#allocation2 + $0x50] sm:$0x1] }
 0x28e   : > { %v4189_v26 = vrot.slane %v4188_v41, 4  ;;  %v3237_v15 = vshrl.u32 %v3104_v19, 16  ;;  %v3240_v2 = vshll.u32 %v3104_v19, 16  ;;  %v3246_v8 = vshll.u32 %v3105_v12, 16  ;;  %v11022_v4 = vpop.f32.mrb[82].mxu1 }
 0x28f   : > { %v3235_v44 = vsel %vm10336_vm7, %v3230_v57, %v3234_v51  ;;  %v4199_v10 = vrot.slane %v4198_v28, 4  ;;  %v3734_v27 = vsel %vm10417_vm10, %v3732_v36, %v3733_v9  ;;  %v3250_v32 = vshrl.u32 %v3105_v12, 16  ;;  %v11026_v37 = vpop.f32.mrb[83].mxu1  ;;  %v3107_v54 = vld [vmem:[#allocation2 + $0x48] sm:$0xf] }
 0x290   : > { %v8254_v3 = vcombine.low %v3225_v58, %v3235_v44  ;;  %v4194_v31 = vsel %vm10336_vm7, %v4189_v26, %v4193_v25  ;;  %v8287_v53 = vcombine.low %v3731_v6, %v3734_v27  ;;  %v3239_v52 = vrot.slane %v3237_v15, 4  ;;  %9346 = vmatpush3.bf16.msra.mxu0 %v9725_v5  ;;  %v3108_v41 = vld [vmem:[#allocation2 + $0x4c] sm:$0xf]  ;;  %v3109_v6 = vld [vmem:[#allocation2 + $0x50] sm:$0x1] }
 0x291   : > { %v4204_v40 = vsel %vm10336_vm7, %v4199_v10, %v4203_v38  ;;  %v3242_v43 = vrot.slane %v3240_v2, 5  ;;  %v3248_v30 = vrot.slane %v3246_v8, 5  ;;  %v3252_v13 = vrot.slane %v3250_v32, 4  ;;  %v4055_v2 = vld [vmem:[#allocation2 + $0x60] sm:$0xf] }
 0x292   : > { %5942 = vmatmul.mubr.bf16.gmra.mrb[124].mxu0 %v8254_v3  ;;  %v8319_v49 = vcombine.low %v4194_v31, %v4204_v40  ;;  %v3256_v62 = vshll.u32 %v3106_v16, 16  ;;  %v4206_v59 = vshrl.u32 %v4052_v7, 16  ;;  %v4209_v23 = vshll.u32 %v4052_v7, 16  ;;  %v4056_v32 = vld [vmem:[#allocation2 + $0x64] sm:$0xf] }
 0x293   : > { %5949 = vmatprep.mubr.bf16.mxu0 %v8287_v53  ;;  %v3243_v29 = vor.u32 %v3242_v43, %v3239_v52  ;;  %v3253_v11 = vor.u32 %v3252_v13, %v3248_v30  ;;  %v4215_v33 = vshll.u32 %v4053_v39, 16  ;;  %v4219_v51 = vshrl.u32 %v4053_v39, 16  ;;  %v4057_v52 = vld [vmem:[#allocation2 + $0x68] sm:$0x1]  ;;  %v3622_v39 = vld [vmem:[#allocation2 + $0x54] sm:$0xe] }
 0x294   : > { %6110 = vmatprep.mubr.bf16.mxu1 %v8319_v49  ;;  %v3258_v61 = vrot.slane %v3256_v62, 5  ;;  %v4208_v46 = vrot.slane %v4206_v59, 4  ;;  %v4211_v56 = vrot.slane %v4209_v23, 5  ;;  %v4225_v25 = vshll.u32 %v4054_v50, 16  ;;  %v3623_v50 = vld [vmem:[#allocation2 + $0x58] sm:$0xf] }
 0x295   : > { %6111 = vmatmul.mubr.bf16.gmra.mrb[160].mxu1 %v9709_v21  ;;  %v3244_v19 = vrot.slane %v3243_v29, 4  ;;  %v3254_v1 = vrot.slane %v3253_v11, 4  ;;  %v4217_v0 = vrot.slane %v4215_v33, 5  ;;  %v4221_v17 = vrot.slane %v4219_v51, 4  ;;  %v9711_v21 = vld [vmem:[#allocation2 + $0x54] sm:$0xff]  }
 0x296   : > { %v4212_v22 = vor.u32 %v4211_v56, %v4208_v46  ;;  %v4227_v12 = vrot.slane %v4225_v25, 5  ;;  %v8272_v5 = vrot.slane %v3619_v35, 9  ;;  %v3737_v58 = vrot.slane %v3620_v45, 5  ;;  %v3624_v51 = vld [vmem:[#allocation2 + $0x5c] sm:$0x1] }
 0x297   : > { %v3249_v38 = vsel %vm10336_vm7, %v3244_v19, %v3248_v30  ;;  %v3259_v9 = vsel %vm10336_vm7, %v3254_v1, %v3258_v61  ;;  %v4222_v57 = vor.u32 %v4221_v17, %v4217_v0  ;;  %v3740_v28 = vrot.slane %v3621_v24, 5  ;;  %v3110_v25 = vld [vmem:[#allocation2 + $0x54] sm:$0xf] }
 0x298   : > { %v8255_v36 = vcombine.low %v3249_v38, %v3259_v9  ;;  %v4213_v16 = vrot.slane %v4212_v22, 4  ;;  %v3738_v26 = vsel %vm10417_vm10, %v8272_v5, %v3737_v58  ;;  %v3739_v15 = vrot.slane %v3737_v58, 4 }
 0x299   : > { %v4223_v8 = vrot.slane %v4222_v57, 4  ;;  %v3261_v44 = vshrl.u32 %v3107_v54, 16  ;;  %v3264_v10 = vshll.u32 %v3107_v54, 16  ;;  %v3270_v27 = vshll.u32 %v3108_v41, 16 }
 0x29a   : > { %5950 = vmatmul.mubr.bf16.gmra.mrb[128].mxu0 %v8255_v36  ;;  %v4218_v7 = vsel %vm10336_vm7, %v4213_v16, %v4217_v0  ;;  %v3741_v3 = vsel %vm10417_vm10, %v3739_v15, %v3740_v28  ;;  %v3274_v31 = vshrl.u32 %v3108_v41, 16  ;;  %v3280_v53 = vshll.u32 %v3109_v6, 16  ;;  %v3111_v36 = vld [vmem:[#allocation2 + $0x58] sm:$0xf] }
 0x29b   : > { %v4228_v40 = vsel %vm10336_vm7, %v4223_v8, %v4227_v12  ;;  %v8288_v43 = vcombine.low %v3738_v26, %v3741_v3  ;;  %v3263_v30 = vrot.slane %v3261_v44, 4  ;;  %v3266_v13 = vrot.slane %v3264_v10, 5  ;;  %v11040_v45 = vpop.f32.mrb[52].mxu0  ;;  %v3112_v10 = vld [vmem:[#allocation2 + $0x5c] sm:$0x1] }
 0x29c   : > { %v8320_v49 = vcombine.low %v4218_v7, %v4228_v40  ;;  %v3272_v62 = vrot.slane %v3270_v27, 5  ;;  %v3276_v59 = vrot.slane %v3274_v31, 4  ;;  %v3282_v23 = vrot.slane %v3280_v53, 5  ;;  %v11042_v54 = vpop.f32.mrb[53].mxu0  ;;  %v4058_v53 = vld [vmem:[#allocation2 + $0x6c] sm:$0xf] }
 0x29d   : > { %5957 = vmatprep.mubr.bf16.mxu0 %v8288_v43  ;;  %v3267_v35 = vor.u32 %v3266_v13, %v3263_v30  ;;  %v4230_v29 = vshrl.u32 %v4055_v2, 16  ;;  %v4233_v11 = vshll.u32 %v4055_v2, 16  ;;  %v4239_v33 = vshll.u32 %v4056_v32, 16  ;;  %v11044_v22 = vpop.f32.mrb[54].mxu0  ;;  %v4059_v13 = vld [vmem:[#allocation2 + $0x70] sm:$0xf] }
 0x29e   : > { %6118 = vmatprep.mubr.bf16.mxu1 %v8320_v49  ;;  %v3277_v24 = vor.u32 %v3276_v59, %v3272_v62  ;;  %v4243_v61 = vshrl.u32 %v4056_v32, 16  ;;  %v4249_v46 = vshll.u32 %v4057_v52, 16  ;;  %v8273_v56 = vrot.slane %v3622_v39, 9  ;;  %v11048_v9 = vpop.f32.mrb[55].mxu0  ;;  %v4060_v59 = vld [vmem:[#allocation2 + $0x74] sm:$0x1] }
 0x29f   : > { %6119 = vmatmul.mubr.bf16.gmra.mrb[164].mxu1 %v9711_v21  ;;  %v3268_v19 = vrot.slane %v3267_v35, 4  ;;  %v4232_v1 = vrot.slane %v4230_v29, 4  ;;  %v4235_v0 = vrot.slane %v4233_v11, 5  ;;  %v4241_v17 = vrot.slane %v4239_v33, 5  ;;  %v11046_v38 = vpop.f32.mrb[84].mxu1 }
 0x2a0   : > { %v3278_v12 = vrot.slane %v3277_v24, 4  ;;  %v4245_v5 = vrot.slane %v4243_v61, 4  ;;  %v4251_v58 = vrot.slane %v4249_v46, 5  ;;  %v3744_v41 = vrot.slane %v3623_v50, 5  ;;  %v11052_v26 = vpop.f32.mrb[85].mxu1 }
 0x2a1   : > { %v3273_v57 = vsel %vm10336_vm7, %v3268_v19, %v3272_v62  ;;  %v4236_v28 = vor.u32 %v4235_v0, %v4232_v1  ;;  %v3747_v6 = vrot.slane %v3624_v51, 5  ;;  %v3285_v16 = vshrl.u32 %v3110_v25, 16  ;;  %v11058_v27 = vpop.f32.mrb[86].mxu1 }
 0x2a2   : > { %v3283_v15 = vsel %vm10336_vm7, %v3278_v12, %v3282_v23  ;;  %v4246_v2 = vor.u32 %v4245_v5, %v4241_v17  ;;  %v3745_v8 = vsel %vm10417_vm10, %v8273_v56, %v3744_v41  ;;  %v3746_v44 = vrot.slane %v3744_v41, 4  ;;  %v11060_v52 = vpop.f32.mrb[87].mxu1  ;;  %v3625_v23 = vld [vmem:[#allocation2 + $0x60] sm:$0xe]  ;;  %v3626_v56 = vld [vmem:[#allocation2 + $0x64] sm:$0xf] }
 0x2a3   : > { %v8256_v32 = vcombine.low %v3273_v57, %v3283_v15  ;;  %v4237_v7 = vrot.slane %v4236_v28, 4  ;;  %v3287_v3 = vrot.slane %v3285_v16, 4  ;;  %v3288_v31 = vshll.u32 %v3110_v25, 16  ;;  %v9712_v25 = vld [vmem:[#allocation2 + $0x60] sm:$0xff]   ;;  %v3627_v12 = vld [vmem:[#allocation2 + $0x68] sm:$0x1] }
 0x2a4   : > { %v4247_v39 = vrot.slane %v4246_v2, 4  ;;  %v3748_v40 = vsel %vm10417_vm10, %v3746_v44, %v3747_v6  ;;  %v3294_v43 = vshll.u32 %v3111_v36, 16  ;;  %v3298_v30 = vshrl.u32 %v3111_v36, 16  ;;  %v3113_v15 = vld [vmem:[#allocation2 + $0x60] sm:$0xf] }
 0x2a5   : > { %5958 = vmatmul.mubr.bf16.gmra.mrb[132].mxu0 %v8256_v32  ;;  %v4242_v50 = vsel %vm10336_vm7, %v4237_v7, %v4241_v17  ;;  %v8289_v49 = vcombine.low %v3745_v8, %v3748_v40  ;;  %v3290_v21 = vrot.slane %v3288_v31, 5  ;;  %v3304_v62 = vshll.u32 %v3112_v10, 16  ;;  %v3114_v32 = vld [vmem:[#allocation2 + $0x64] sm:$0xf]  ;;  %v4061_v40 = vld [vmem:[#allocation2 + $0x78] sm:$0xf] }
 0x2a6   : > { %v4252_v35 = vsel %vm10336_vm7, %v4247_v39, %v4251_v58  ;;  %v3296_v29 = vrot.slane %v3294_v43, 5  ;;  %v3300_v11 = vrot.slane %v3298_v30, 4  ;;  %v4254_v33 = vshrl.u32 %v4058_v53, 16  ;;  %v3115_v39 = vld [vmem:[#allocation2 + $0x68] sm:$0x1] }
 0x2a7   : > { %v8321_v51 = vcombine.low %v4242_v50, %v4252_v35  ;;  %5965 = vmatprep.mubr.bf16.mxu0 %v8289_v49  ;;  %v3291_v24 = vor.u32 %v3290_v21, %v3287_v3  ;;  %v3306_v61 = vrot.slane %v3304_v62, 5  ;;  %v4257_v46 = vshll.u32 %v4058_v53, 16  ;;  %v4062_v49 = vld [vmem:[#allocation2 + $0x7c] sm:$0xf] }
 0x2a8   : > { %v3301_v19 = vor.u32 %v3300_v11, %v3296_v29  ;;  %v4256_v1 = vrot.slane %v4254_v33, 4  ;;  %v4263_v0 = vshll.u32 %v4059_v13, 16  ;;  %v4267_v17 = vshrl.u32 %v4059_v13, 16 }
 0x2a9   : > { %6126 = vmatprep.mubr.bf16.mxu1 %v8321_v51  ;;  %v3292_v5 = vrot.slane %v3291_v24, 4  ;;  %v4259_v41 = vrot.slane %v4257_v46, 5  ;;  %v4273_v57 = vshll.u32 %v4060_v59, 16  ;;  %v8274_v58 = vrot.slane %v3625_v23, 9 }
 0x2aa   : > { %6127 = vmatmul.mubr.bf16.gmra.mrb[168].mxu1 %v9712_v25  ;;  %v3302_v28 = vrot.slane %v3301_v19, 4  ;;  %v4265_v6 = vrot.slane %v4263_v0, 5  ;;  %v4269_v36 = vrot.slane %v4267_v17, 4  ;;  %v3751_v16 = vrot.slane %v3626_v56, 5  ;;  %v4063_v56 = vld [vmem:[#allocation2 + $0x80] sm:$0x1] }
 0x2ab   : > { %v3297_v2 = vsel %vm10336_vm7, %v3292_v5, %v3296_v29  ;;  %v4260_v8 = vor.u32 %v4259_v41, %v4256_v1  ;;  %v4275_v44 = vrot.slane %v4273_v57, 5  ;;  %v3754_v10 = vrot.slane %v3627_v12, 5  ;;  %v11076_v62 = vpop.f32.mrb[56].mxu0 }
 0x2ac   : > { %v3307_v7 = vsel %vm10336_vm7, %v3302_v28, %v3306_v61  ;;  %v4270_v3 = vor.u32 %v4269_v36, %v4265_v6  ;;  %v3752_v31 = vsel %vm10417_vm10, %v8274_v58, %v3751_v16  ;;  %v3753_v53 = vrot.slane %v3751_v16, 4  ;;  %v11074_v21 = vpop.f32.mrb[88].mxu1  ;;  %v11082_v33 = vpop.f32.mrb[57].mxu0  ;;  %v3628_v36 = vld [vmem:[#allocation2 + $0x6c] sm:$0xe] }
 0x2ad   : > { %v8257_v43 = vcombine.low %v3297_v2, %v3307_v7  ;;  %v4261_v30 = vrot.slane %v4260_v8, 4  ;;  %v3309_v13 = vshrl.u32 %v3113_v15, 16  ;;  %v3312_v50 = vshll.u32 %v3113_v15, 16  ;;  %v11080_v11 = vpop.f32.mrb[89].mxu1  ;;  %v11088_v19 = vpop.f32.mrb[58].mxu0  ;;  %v9714_v15 = vld [vmem:[#allocation2 + $0x6c] sm:$0xff]  }
 0x2ae   : > { %v4271_v59 = vrot.slane %v4270_v3, 4  ;;  %v3755_v23 = vsel %vm10417_vm10, %v3753_v53, %v3754_v10  ;;  %v3318_v35 = vshll.u32 %v3114_v32, 16  ;;  %v3322_v29 = vshrl.u32 %v3114_v32, 16  ;;  %v11086_v25 = vpop.f32.mrb[90].mxu1  ;;  %v11094_v41 = vpop.f32.mrb[59].mxu0 }
 0x2af   : > { %5966 = vmatmul.mubr.bf16.gmra.mrb[136].mxu0 %v8257_v43  ;;  %v4266_v51 = vsel %vm10336_vm7, %v4261_v30, %v4265_v6  ;;  %v8290_v24 = vcombine.low %v3752_v31, %v3755_v23  ;;  %v3311_v61 = vrot.slane %v3309_v13, 4  ;;  %v3314_v46 = vrot.slane %v3312_v50, 5  ;;  %v11092_v5 = vpop.f32.mrb[91].mxu1  ;;  %v3629_v16 = vld [vmem:[#allocation2 + $0x70] sm:$0xf] }
 0x2b0   : > { %v4276_v1 = vsel %vm10336_vm7, %v4271_v59, %v4275_v44  ;;  %v3320_v0 = vrot.slane %v3318_v35, 5  ;;  %v3324_v17 = vrot.slane %v3322_v29, 4  ;;  %v3328_v12 = vshll.u32 %v3115_v39, 16  ;;  %v3630_v44 = vld [vmem:[#allocation2 + $0x74] sm:$0x1] }
 0x2b1   : > { %v8322_v57 = vcombine.low %v4266_v51, %v4276_v1  ;;  %5973 = vmatprep.mubr.bf16.mxu0 %v8290_v24  ;;  %v3315_v58 = vor.u32 %v3314_v46, %v3311_v61  ;;  %v4278_v28 = vshrl.u32 %v4061_v40, 16  ;;  %v4281_v6 = vshll.u32 %v4061_v40, 16  ;;  %v3116_v39 = vld [vmem:[#allocation2 + $0x6c] sm:$0xf]  ;;  %v3117_v29 = vld [vmem:[#allocation2 + $0x70] sm:$0xf] }
 0x2b2   : > { %v3325_v2 = vor.u32 %v3324_v17, %v3320_v0  ;;  %v3330_v8 = vrot.slane %v3328_v12, 5  ;;  %v4287_v10 = vshll.u32 %v4062_v49, 16  ;;  %v4291_v32 = vshrl.u32 %v4062_v49, 16  ;;  %v3118_v61 = vld [vmem:[#allocation2 + $0x74] sm:$0x1] }
 0x2b3   : > { %6134 = vmatprep.mubr.bf16.mxu1 %v8322_v57  ;;  %v3316_v7 = vrot.slane %v3315_v58, 4  ;;  %v4280_v3 = vrot.slane %v4278_v28, 4  ;;  %v4283_v31 = vrot.slane %v4281_v6, 5  ;;  %v4297_v53 = vshll.u32 %v4063_v56, 16  ;;  %v4064_v57 = vld [vmem:[#allocation2 + $0x84] sm:$0xf] }
 0x2b4   : > { %6135 = vmatmul.mubr.bf16.gmra.mrb[172].mxu1 %v9714_v15  ;;  %v3326_v43 = vrot.slane %v3325_v2, 4  ;;  %v4289_v30 = vrot.slane %v4287_v10, 5  ;;  %v4293_v13 = vrot.slane %v4291_v32, 4  ;;  %v8275_v50 = vrot.slane %v3628_v36, 9  ;;  %v4065_v36 = vld [vmem:[#allocation2 + $0x88] sm:$0xf] }
 0x2b5   : > { %v3321_v40 = vsel %vm10336_vm7, %v3316_v7, %v3320_v0  ;;  %v4284_v59 = vor.u32 %v4283_v31, %v4280_v3  ;;  %v4299_v23 = vrot.slane %v4297_v53, 5  ;;  %v3758_v35 = vrot.slane %v3629_v16, 5  ;;  %v4066_v10 = vld [vmem:[#allocation2 + $0x8c] sm:$0x1]  ;;  %v3631_v32 = vld [vmem:[#allocation2 + $0x78] sm:$0xe] }
 0x2b6   : > { %v3331_v49 = vsel %vm10336_vm7, %v3326_v43, %v3330_v8  ;;  %v4294_v51 = vor.u32 %v4293_v13, %v4289_v30  ;;  %v3761_v24 = vrot.slane %v3630_v44, 5  ;;  %v3333_v46 = vshrl.u32 %v3116_v39, 16  ;;  %v3632_v53 = vld [vmem:[#allocation2 + $0x7c] sm:$0xf] }
 0x2b7   : > { %v8258_v56 = vcombine.low %v3321_v40, %v3331_v49  ;;  %v4285_v1 = vrot.slane %v4284_v59, 4  ;;  %v3759_v17 = vsel %vm10417_vm10, %v8275_v50, %v3758_v35  ;;  %v3760_v12 = vrot.slane %v3758_v35, 4  ;;  %v3119_v35 = vld [vmem:[#allocation2 + $0x78] sm:$0xf] }
 0x2b8   : > { %v4295_v58 = vrot.slane %v4294_v51, 4  ;;  %v3335_v0 = vrot.slane %v3333_v46, 4  ;;  %v3336_v28 = vshll.u32 %v3116_v39, 16  ;;  %v3342_v6 = vshll.u32 %v3117_v29, 16  ;;  %v3633_v39 = vld [vmem:[#allocation2 + $0x80] sm:$0x1] }
 0x2b9   : > { %5974 = vmatmul.mubr.bf16.gmra.mrb[140].mxu0 %v8258_v56  ;;  %v4290_v16 = vsel %vm10336_vm7, %v4285_v1, %v4289_v30  ;;  %v3762_v15 = vsel %vm10417_vm10, %v3760_v12, %v3761_v24  ;;  %v3346_v2 = vshrl.u32 %v3117_v29, 16  ;;  %v3352_v8 = vshll.u32 %v3118_v61, 16  ;;  %v11108_v43 = vpop.f32.mrb[92].mxu1  ;;  %v11110_v13 = vpop.f32.mrb[60].mxu0 }
 0x2ba   : > { %v4300_v44 = vsel %vm10336_vm7, %v4295_v58, %v4299_v23  ;;  %v8291_v7 = vcombine.low %v3759_v17, %v3762_v15  ;;  %v3338_v3 = vrot.slane %v3336_v28, 5  ;;  %v3344_v31 = vrot.slane %v3342_v6, 5  ;;  %v11112_v29 = vpop.f32.mrb[93].mxu1  ;;  %v11114_v49 = vpop.f32.mrb[61].mxu0  ;;  %v9715_v23 = vld [vmem:[#allocation2 + $0x78] sm:$0xff]  }
 0x2bb   : > { %v8323_v30 = vcombine.low %v4290_v16, %v4300_v44  ;;  %v3348_v50 = vrot.slane %v3346_v2, 4  ;;  %v3354_v40 = vrot.slane %v3352_v8, 5  ;;  %v4302_v59 = vshrl.u32 %v4064_v57, 16  ;;  %v11116_v56 = vpop.f32.mrb[94].mxu1  ;;  %v11118_v1 = vpop.f32.mrb[62].mxu0 }
 0x2bc   : > { %5981 = vmatprep.mubr.bf16.mxu0 %v8291_v7  ;;  %v3339_v51 = vor.u32 %v3338_v3, %v3335_v0  ;;  %v4305_v24 = vshll.u32 %v4064_v57, 16  ;;  %v4311_v61 = vshll.u32 %v4065_v36, 16  ;;  %v4315_v46 = vshrl.u32 %v4065_v36, 16  ;;  %v11120_v6 = vpop.f32.mrb[95].mxu1  ;;  %v11122_v16 = vpop.f32.mrb[63].mxu0 }
 0x2bd   : > { %6142 = vmatprep.mubr.bf16.mxu1 %v8323_v30  ;;  %v3349_v17 = vor.u32 %v3348_v50, %v3344_v31  ;;  %v4304_v12 = vrot.slane %v4302_v59, 4  ;;  %v4321_v58 = vshll.u32 %v4066_v10, 16  ;;  %v8276_v28 = vrot.slane %v3631_v32, 9  ;;  %13015 = vst [vmem:[#allocation20_spill] sm:$0xff] %v11122_v16  ;;  %v3120_v10 = vld [vmem:[#allocation2 + $0x7c] sm:$0xf] }
 0x2be   : > { %6143 = vmatmul.mubr.bf16.gmra.mrb[176].mxu1 %v9715_v23  ;;  %v3340_v15 = vrot.slane %v3339_v51, 4  ;;  %v4307_v2 = vrot.slane %v4305_v24, 5  ;;  %v4313_v0 = vrot.slane %v4311_v61, 5  ;;  %v4317_v57 = vrot.slane %v4315_v46, 4  ;;  %v3121_v24 = vld [vmem:[#allocation2 + $0x80] sm:$0x1] }
 0x2bf   : > { %v3350_v8 = vrot.slane %v3349_v17, 4  ;;  %v4323_v36 = vrot.slane %v4321_v58, 5  ;;  %v3765_v44 = vrot.slane %v3632_v53, 5  ;;  %v3768_v7 = vrot.slane %v3633_v39, 5  ;;  %v4067_v58 = vld [vmem:[#allocation2 + $0x90] sm:$0xf] }
 0x2c0   : > { %v3345_v3 = vsel %vm10336_vm7, %v3340_v15, %v3344_v31  ;;  %v4308_v30 = vor.u32 %v4307_v2, %v4304_v12  ;;  %v4318_v50 = vor.u32 %v4317_v57, %v4313_v0  ;;  %v3357_v32 = vshrl.u32 %v3119_v35, 16  ;;  %v4068_v57 = vld [vmem:[#allocation2 + $0x94] sm:$0xf] }
 0x2c1   : > { %v3355_v59 = vsel %vm10336_vm7, %v3350_v8, %v3354_v40  ;;  %v3766_v23 = vsel %vm10417_vm10, %v8276_v28, %v3765_v44  ;;  %v3767_v51 = vrot.slane %v3765_v44, 4  ;;  %v3360_v61 = vshll.u32 %v3119_v35, 16  ;;  %v9717_v8 = vld [vmem:[#allocation2 + $0x84] sm:$0xff]  }
 0x2c2   : > { %v8259_v46 = vcombine.low %v3345_v3, %v3355_v59  ;;  %v4309_v17 = vrot.slane %v4308_v30, 4  ;;  %v4319_v53 = vrot.slane %v4318_v50, 4  ;;  %v3359_v39 = vrot.slane %v3357_v32, 4  ;;  %v4069_v3 = vld [vmem:[#allocation2 + $0x98] sm:$0x1] }
 0x2c3   : > { %v3769_v31 = vsel %vm10417_vm10, %v3767_v51, %v3768_v7  ;;  %v3362_v12 = vrot.slane %v3360_v61, 5  ;;  %v3366_v15 = vshll.u32 %v3120_v10, 16  ;;  %v3370_v2 = vshrl.u32 %v3120_v10, 16  ;;  %v3634_v30 = vld [vmem:[#allocation2 + $0x84] sm:$0xe] }
 0x2c4   : > { %5982 = vmatmul.mubr.bf16.gmra.mrb[144].mxu0 %v8259_v46  ;;  %v4314_v40 = vsel %vm10336_vm7, %v4309_v17, %v4313_v0  ;;  %v4324_v28 = vsel %vm10336_vm7, %v4319_v53, %v4323_v36  ;;  %v8292_v35 = vcombine.low %v3766_v23, %v3769_v31  ;;  %v3376_v44 = vshll.u32 %v3121_v24, 16  ;;  %v3635_v51 = vld [vmem:[#allocation2 + $0x88] sm:$0xf]  ;;  %v3636_v61 = vld [vmem:[#allocation2 + $0x8c] sm:$0x1]  ;;  %v11136_v47 = vpop.f32.mrb[96].mxu1 }
 0x2c5   : > { %v8324_v50 = vcombine.low %v4314_v40, %v4324_v28  ;;  %v3363_v32 = vor.u32 %v3362_v12, %v3359_v39  ;;  %v3368_v59 = vrot.slane %v3366_v15, 5  ;;  %v3372_v7 = vrot.slane %v3370_v2, 4  ;;  %v3122_v10 = vld [vmem:[#allocation2 + $0x84] sm:$0xf]  ;;  %13016 = vst [vmem:[#allocation21_spill] sm:$0xff] %v11136_v47  ;;  %v11138_v46 = vpop.f32.mrb[64].mxu0 }
 0x2c6   : > { %13017 = vst [vmem:[#allocation22_spill] sm:$0xff] %v11138_v46  ;;  %5989 = vmatprep.mubr.bf16.mxu0 %v8292_v35  ;;  %v3378_v0 = vrot.slane %v3376_v44, 5  ;;  %v4326_v17 = vshrl.u32 %v4067_v58, 16  ;;  %v4329_v36 = vshll.u32 %v4067_v58, 16  ;;  %v4335_v23 = vshll.u32 %v4068_v57, 16  ;;  %v11140_v24 = vpop.f32.mrb[97].mxu1 }
 0x2c7   : > { %v3123_v53 = vld [vmem:[#allocation2 + $0x88] sm:$0xf]  ;;  %13018 = vst [vmem:[#allocation23_spill] sm:$0xff] %v11140_v24  ;;  %v11142_v31 = vpop.f32.mrb[65].mxu0  ;;  %6150 = vmatprep.mubr.bf16.mxu1 %v8324_v50  ;;  %v3364_v39 = vrot.slane %v3363_v32, 4  ;;  %v3373_v12 = vor.u32 %v3372_v7, %v3368_v59  ;;  %v4339_v15 = vshrl.u32 %v4068_v57, 16 }
 0x2c8   : > { %13019 = vst [vmem:[#allocation24_spill] sm:$0xff] %v11142_v31  ;;  %v4345_v2 = vshll.u32 %v4069_v3, 16  ;;  %v11144_v40 = vpop.f32.mrb[98].mxu1  ;;  %v11146_v28 = vpop.f32.mrb[66].mxu0  ;;  %6151 = vmatmul.mubr.bf16.gmra.mrb[180].mxu1 %v9717_v8  ;;  %v4328_v35 = vrot.slane %v4326_v17, 4  ;;  %v4331_v44 = vrot.slane %v4329_v36, 5 }
 0x2c9   : > { %13020 = vst [vmem:[#allocation25_spill] sm:$0xff] %v11144_v40  ;;  %13021 = vst [vmem:[#allocation26_spill] sm:$0xff] %v11146_v28  ;;  %v4337_v42 = vrot.slane %v4335_v23, 5  ;;  %v8277_v58 = vrot.slane %v3634_v30, 9  ;;  %v11148_v46 = vpop.f32.mrb[99].mxu1  ;;  %v11150_v47 = vpop.f32.mrb[67].mxu0  ;;  %v3369_v50 = vsel %vm10336_vm7, %v3364_v39, %v3368_v59 }
 0x2ca   : > { %13022 = vst [vmem:[#allocation27_spill] sm:$0xff] %v11148_v46  ;;  %13023 = vst [vmem:[#allocation28_spill] sm:$0xff] %v11150_v47  ;;  %v3374_v32 = vrot.slane %v3373_v12, 4  ;;  %v4341_v7 = vrot.slane %v4339_v15, 4  ;;  %v4347_v57 = vrot.slane %v4345_v2, 5  ;;  %v4332_v3 = vor.u32 %v4331_v44, %v4328_v35 }
 0x2cb   : > { %v3772_v31 = vrot.slane %v3635_v51, 5  ;;  %v3775_v40 = vrot.slane %v3636_v61, 5  ;;  %v3381_v24 = vshrl.u32 %v3122_v10, 16  ;;  %v3124_v36 = vld [vmem:[#allocation2 + $0x8c] sm:$0x1]  ;;  %v3384_v30 = vshll.u32 %v3122_v10, 16 }
 0x2cc   : > { %v3379_v8 = vsel %vm10336_vm7, %v3374_v32, %v3378_v0  ;;  %v4342_v17 = vor.u32 %v4341_v7, %v4337_v42  ;;  %v3390_v23 = vshll.u32 %v3123_v53, 16  ;;  %v4333_v46 = vrot.slane %v4332_v3, 4  ;;  %v4070_v39 = vld [vmem:[#allocation2 + $0x9c] sm:$0xf]  ;;  %v4071_v44 = vld [vmem:[#allocation2 + $0xa0] sm:$0xf] }
 0x2cd   : > { %v8260_v28 = vcombine.low %v3369_v50, %v3379_v8  ;;  %v3773_v47 = vsel %vm10417_vm10, %v8277_v58, %v3772_v31  ;;  %v3774_v59 = vrot.slane %v3772_v31, 4  ;;  %v3383_v15 = vrot.slane %v3381_v24, 4  ;;  %v4072_v50 = vld [vmem:[#allocation2 + $0xa4] sm:$0x1]  ;;  %v3637_v24 = vld [vmem:[#allocation2 + $0x90] sm:$0xe] }
 0x2ce   : > { %v4343_v12 = vrot.slane %v4342_v17, 4  ;;  %v3386_v2 = vrot.slane %v3384_v30, 5  ;;  %v3392_v51 = vrot.slane %v3390_v23, 5  ;;  %v4338_v61 = vsel %vm10336_vm7, %v4333_v46, %v4337_v42  ;;  %v3638_v3 = vld [vmem:[#allocation2 + $0x94] sm:$0xf] }
 0x2cf   : > { %5990 = vmatmul.mubr.bf16.gmra.mrb[148].mxu0 %v8260_v28  ;;  %v3776_v0 = vsel %vm10417_vm10, %v3774_v59, %v3775_v40  ;;  %v3394_v10 = vshrl.u32 %v3123_v53, 16  ;;  %v3400_v35 = vshll.u32 %v3124_v36, 16  ;;  %v4350_v7 = vshrl.u32 %v4070_v39, 16  ;;  %v3639_v42 = vld [vmem:[#allocation2 + $0x98] sm:$0x1]  ;;  %v11164_v46 = vpop.f32.mrb[100].mxu1 }
 0x2d0   : > { %v4348_v58 = vsel %vm10336_vm7, %v4343_v12, %v4347_v57  ;;  %v8293_v31 = vcombine.low %v3773_v47, %v3776_v0  ;;  %v3387_v32 = vor.u32 %v3386_v2, %v3383_v15  ;;  %v4353_v30 = vshll.u32 %v4070_v39, 16  ;;  %v9718_v53 = vld [vmem:[#allocation2 + $0x90] sm:$0xff]   ;;  %v11166_v16 = vpop.f32.mrb[101].mxu1 }
 0x2d1   : > { %v8325_v8 = vcombine.low %v4338_v61, %v4348_v58  ;;  %v3396_v28 = vrot.slane %v3394_v10, 4  ;;  %v3402_v17 = vrot.slane %v3400_v35, 5  ;;  %v4352_v36 = vrot.slane %v4350_v7, 4  ;;  %v11170_v61 = vpop.f32.mrb[102].mxu1 }
 0x2d2   : > { %5997 = vmatprep.mubr.bf16.mxu0 %v8293_v31  ;;  %v3388_v40 = vrot.slane %v3387_v32, 4  ;;  %v4359_v23 = vshll.u32 %v4071_v44, 16  ;;  %v4363_v59 = vshrl.u32 %v4071_v44, 16  ;;  %v4355_v57 = vrot.slane %v4353_v30, 5  ;;  %v11168_v2 = vpop.f32.mrb[68].mxu0  ;;  %v11176_v44 = vpop.f32.mrb[103].mxu1 }
 0x2d3   : > { %6158 = vmatprep.mubr.bf16.mxu1 %v8325_v8  ;;  %v3397_v47 = vor.u32 %v3396_v28, %v3392_v51  ;;  %v4369_v12 = vshll.u32 %v4072_v50, 16  ;;  %v8278_v15 = vrot.slane %v3637_v24, 9  ;;  %v3779_v35 = vrot.slane %v3638_v3, 5  ;;  %v11174_v58 = vpop.f32.mrb[69].mxu0  ;;  %v11181_v24 = vld [vmem:[%s12967_s4] ss:$0 sm:$0xff] }
 0x2d4   : > { %6159 = vmatmul.mubr.bf16.gmra.mrb[184].mxu1 %v9718_v53  ;;  %v3393_v39 = vsel %vm10336_vm7, %v3388_v40, %v3392_v51  ;;  %v4361_v0 = vrot.slane %v4359_v23, 5  ;;  %v4365_v10 = vrot.slane %v4363_v59, 4  ;;  %v4356_v32 = vor.u32 %v4355_v57, %v4352_v36  ;;  %13024 = vst [vmem:[#allocation29_spill] sm:$0xff] %v11181_v24  ;;  %v11183_v8 = vpop.f32.mrb[70].mxu0  ;;  %v3125_v59 = vld [vmem:[#allocation2 + $0x90] sm:$0xf] }
 0x2d5   : > { %v3398_v31 = vrot.slane %v3397_v47, 4  ;;  %v4371_v7 = vrot.slane %v4369_v12, 5  ;;  %v3782_v50 = vrot.slane %v3639_v42, 5  ;;  %v3780_v51 = vsel %vm10417_vm10, %v8278_v15, %v3779_v35  ;;  %v11189_v53 = vpop.f32.mrb[71].mxu0 }
 0x2d6   : > { %v4366_v28 = vor.u32 %v4365_v10, %v4361_v0  ;;  %v3781_v3 = vrot.slane %v3779_v35, 4  ;;  %v8877_v30 = vadd.f32 %v10952_v60, %v10948_v63  ;;  %v4357_v40 = vrot.slane %v4356_v32, 4  ;;  %v3126_v60 = vld [vmem:[#allocation2 + $0x94] sm:$0xf]  ;;  %v9720_v35 = vld [vmem:[#allocation2 + $0x9c] sm:$0xff]  }
 0x2d7   : > { %v3403_v42 = vsel %vm10336_vm7, %v3398_v31, %v3402_v17  ;;  %v8880_v36 = vadd.f32 %v10960_v48, %v10956_v18  ;;  %v8989_v23 = vadd.f32 %v11018_v14, %v11012_v55  ;;  %v8992_v18 = vadd.f32 %v11026_v37, %v11022_v4  ;;  %v3127_v48 = vld [vmem:[#allocation2 + $0x98] sm:$0x1]  ;;  %v4073_v55 = vld [vmem:[#allocation2 + $0xa8] sm:$0xf]  ;;  %v3640_v4 = vld [vmem:[#allocation2 + $0x9c] sm:$0xe] }
 0x2d8   : > { %v8261_v47 = vcombine.low %v3393_v39, %v3403_v42  ;;  %v4367_v57 = vrot.slane %v4366_v28, 4  ;;  %v3783_v12 = vsel %vm10417_vm10, %v3781_v3, %v3782_v50  ;;  %v5598_v63 = vadd.f32 %v8877_v30, %v11181_v24  ;;  %v4074_v50 = vld [vmem:[#allocation2 + $0xac] sm:$0xf]  ;;  %v4075_v28 = vld [vmem:[#allocation2 + $0xb0] sm:$0x1] }
 0x2d9   : > { %v4362_v15 = vsel %vm10336_vm7, %v4357_v40, %v4361_v0  ;;  %v8294_v17 = vcombine.low %v3780_v51, %v3783_v12  ;;  %v5601_v10 = vadd.f32 %v8880_v36, %v11181_v24  ;;  %v3405_v31 = vshrl.u32 %v3125_v59, 16  ;;  %v9727_v37 = vld [vmem:[#allocation10] ss:$16 sps:$4 sm:$0xff]   ;;  %v9729_v42 = vld [vmem:[#allocation10 + $0x4] ss:$16 sps:$4 sm:$0xff]  }
 0x2da   : > { %5998 = vmatmul.mubr.bf16.gmra.mrb[152].mxu0 %v8261_v47  ;;  %v4372_v14 = vsel %vm10336_vm7, %v4367_v57, %v4371_v7  ;;  %v11207_v39 = vadd.f32 %v8989_v23, %v5598_v63  ;;  %v3408_v32 = vshll.u32 %v3125_v59, 16  ;;  %v3414_v3 = vshll.u32 %v3126_v60, 16  ;;  %v3641_v23 = vld [vmem:[#allocation2 + $0xa0] sm:$0xf]  ;;  %6629 = vmatprep.subr.bf16.mxu1 %v9729_v42 }
 0x2db   : > { %v8326_v0 = vcombine.low %v4362_v15, %v4372_v14  ;;  %6005 = vmatprep.mubr.bf16.mxu0 %v8294_v17  ;;  %v11209_v51 = vadd.f32 %v8992_v18, %v5601_v10  ;;  %v3418_v30 = vshrl.u32 %v3126_v60, 16  ;;  %v3407_v40 = vrot.slane %v3405_v31, 4  ;;  %v3642_v18 = vld [vmem:[#allocation2 + $0xa4] sm:$0x1]  ;;  %6630 = vmatpush1.bf16.msra.mxu1 %v9727_v37 }
 0x2dc   : > { %13025 = vst [vmem:[#allocation30_spill] sm:$0xff] %v11207_v39  ;;  %v3410_v36 = vrot.slane %v3408_v32, 5  ;;  %v3424_v47 = vshll.u32 %v3127_v48, 16  ;;  %v4374_v7 = vshrl.u32 %v4073_v55, 16  ;;  %v3416_v57 = vrot.slane %v3414_v3, 5  ;;  %v11211_v39 = vpop.f32.mrb[104].mxu1 }
 0x2dd   : > { %13026 = vst [vmem:[#allocation31_spill] sm:$0xff] %v11209_v51  ;;  %6166 = vmatprep.mubr.bf16.mxu1 %v8326_v0  ;;  %v3420_v12 = vrot.slane %v3418_v30, 4  ;;  %v4377_v59 = vshll.u32 %v4073_v55, 16  ;;  %v4383_v63 = vshll.u32 %v4074_v50, 16  ;;  %v4387_v10 = vshrl.u32 %v4074_v50, 16  ;;  %v11213_v14 = vpop.f32.mrb[105].mxu1 }
 0x2de   : > { %6167 = vmatmul.mubr.bf16.gmra.mrb[188].mxu1 %v9720_v35  ;;  %v3411_v15 = vor.u32 %v3410_v36, %v3407_v40  ;;  %v3426_v17 = vrot.slane %v3424_v47, 5  ;;  %v4376_v60 = vrot.slane %v4374_v7, 4  ;;  %v4393_v51 = vshll.u32 %v4075_v28, 16  ;;  %v11215_v0 = vpop.f32.mrb[106].mxu1  ;;  %v11217_v42 = vpop.f32.mrb[72].mxu0 }
 0x2df   : > { %v3421_v31 = vor.u32 %v3420_v12, %v3416_v57  ;;  %v4379_v48 = vrot.slane %v4377_v59, 5  ;;  %v4385_v32 = vrot.slane %v4383_v63, 5  ;;  %v4389_v3 = vrot.slane %v4387_v10, 4  ;;  %v11219_v35 = vpop.f32.mrb[107].mxu1  ;;  %v11221_v7 = vpop.f32.mrb[73].mxu0 }
 0x2e0   : > { %v3412_v55 = vrot.slane %v3411_v15, 4  ;;  %v8279_v30 = vrot.slane %v3640_v4, 9  ;;  %v3786_v24 = vrot.slane %v3641_v23, 5  ;;  %v4395_v36 = vrot.slane %v4393_v51, 5  ;;  %v11227_v4 = vpop.f32.mrb[74].mxu0 }
 0x2e1   : > { %v3422_v40 = vrot.slane %v3421_v31, 4  ;;  %v4380_v50 = vor.u32 %v4379_v48, %v4376_v60  ;;  %v3789_v47 = vrot.slane %v3642_v18, 5  ;;  %v4390_v12 = vor.u32 %v4389_v3, %v4385_v32  ;;  %v3129_v60 = vld [vmem:[#allocation2 + $0xa0] sm:$0xf]  ;;  %v11239_v10 = vpop.f32.mrb[75].mxu0  ;;  %v9721_v3 = vld [vmem:[#allocation2 + $0xa8] sm:$0xff]  }
 0x2e2   : > { %v3417_v28 = vsel %vm10336_vm7, %v3412_v55, %v3416_v57  ;;  %v3787_v37 = vsel %vm10417_vm10, %v8279_v30, %v3786_v24  ;;  %v3788_v59 = vrot.slane %v3786_v24, 4  ;;  %v11233_v51 = vadd.f32 %v11052_v26, %v11046_v38  ;;  %v3128_v57 = vld [vmem:[#allocation2 + $0x9c] sm:$0xf]  ;;  %v3130_v48 = vld [vmem:[#allocation2 + $0xa4] sm:$0x1] }
 0x2e3   : > { %v3427_v23 = vsel %vm10336_vm7, %v3422_v40, %v3426_v17  ;;  %v4381_v63 = vrot.slane %v4380_v50, 4  ;;  %v11237_v15 = vadd.f32 %v11042_v54, %v11040_v45  ;;  %v4391_v24 = vrot.slane %v4390_v12, 4  ;;  %v4076_v54 = vld [vmem:[#allocation2 + $0xb4] sm:$0xf]  ;;  %v3643_v12 = vld [vmem:[#allocation2 + $0xa8] sm:$0xe] }
 0x2e4   : > { %13027 = vst [vmem:[#allocation32_spill] sm:$0xff] %v11233_v51  ;;  %v8262_v18 = vcombine.low %v3417_v28, %v3427_v23  ;;  %v3790_v31 = vsel %vm10417_vm10, %v3788_v59, %v3789_v47  ;;  %v11245_v17 = vadd.f32 %v11060_v52, %v11058_v27  ;;  %v11251_v45 = vadd.f32 %v11048_v9, %v11044_v22  ;;  %v4077_v27 = vld [vmem:[#allocation2 + $0xb8] sm:$0xf]  ;;  %v3644_v23 = vld [vmem:[#allocation2 + $0xac] sm:$0xf] }
 0x2e5   : > { %13028 = vst [vmem:[#allocation33_spill] sm:$0xff] %v11237_v15  ;;  %v4386_v38 = vsel %vm10336_vm7, %v4381_v63, %v4385_v32  ;;  %v8295_v26 = vcombine.low %v3787_v37, %v3790_v31  ;;  %v4396_v55 = vsel %vm10336_vm7, %v4391_v24, %v4395_v36  ;;  %v3429_v30 = vshrl.u32 %v3128_v57, 16  ;;  %v4078_v32 = vld [vmem:[#allocation2 + $0xbc] sm:$0x1]  ;;  %v3645_v31 = vld [vmem:[#allocation2 + $0xb0] sm:$0x1] }
 0x2e6   : > { %13029 = vst [vmem:[#allocation34_spill] sm:$0xff] %v11245_v17  ;;  %13030 = vst [vmem:[#allocation35_spill] sm:$0xff] %v11251_v45  ;;  %6006 = vmatmul.mubr.bf16.gmra.mrb[156].mxu0 %v8262_v18  ;;  %v3432_v40 = vshll.u32 %v3128_v57, 16  ;;  %v3438_v50 = vshll.u32 %v3129_v60, 16  ;;  %v8327_v52 = vcombine.low %v4386_v38, %v4396_v55  ;;  %v3442_v47 = vshrl.u32 %v3129_v60, 16 }
 0x2e7   : > { %6013 = vmatprep.mubr.bf16.mxu0 %v8295_v26  ;;  %v3448_v28 = vshll.u32 %v3130_v48, 16  ;;  %v3431_v37 = vrot.slane %v3429_v30, 4  ;;  %v4398_v9 = vshrl.u32 %v4076_v54, 16  ;;  %v4401_v36 = vshll.u32 %v4076_v54, 16  ;;  %v11255_v60 = vpop.f32.mrb[108].mxu1 }
 0x2e8   : > { %v3434_v59 = vrot.slane %v3432_v40, 5  ;;  %v3440_v22 = vrot.slane %v3438_v50, 5  ;;  %6174 = vmatprep.mubr.bf16.mxu1 %v8327_v52  ;;  %v3444_v63 = vrot.slane %v3442_v47, 4  ;;  %v4407_v24 = vshll.u32 %v4077_v27, 16  ;;  %v9730_v48 = vld [vmem:[#allocation10 + $0x20] ss:$16 sps:$4 sm:$0xff]  }
 0x2e9   : > { %v3450_v18 = vrot.slane %v3448_v28, 5  ;;  %6175 = vmatmul.mubr.bf16.gmra.mrb[192].mxu1 %v9721_v3  ;;  %v4400_v17 = vrot.slane %v4398_v9, 4  ;;  %v4411_v38 = vshrl.u32 %v4077_v27, 16  ;;  %v4417_v26 = vshll.u32 %v4078_v32, 16  ;;  %v11257_v51 = vpop.f32.mrb[109].mxu1 }
 0x2ea   : > { %v3435_v57 = vor.u32 %v3434_v59, %v3431_v37  ;;  %v3445_v55 = vor.u32 %v3444_v63, %v3440_v22  ;;  %v4403_v30 = vrot.slane %v4401_v36, 5  ;;  %v4409_v40 = vrot.slane %v4407_v24, 5  ;;  %v9732_v52 = vld [vmem:[#allocation10 + $0x24] ss:$16 sps:$4 sm:$0xff]   ;;  %v11261_v3 = vpop.f32.mrb[110].mxu1 }
 0x2eb   : > { %v8280_v50 = vrot.slane %v3643_v12, 9  ;;  %v4413_v28 = vrot.slane %v4411_v38, 4  ;;  %v4419_v54 = vrot.slane %v4417_v26, 5  ;;  %v3793_v45 = vrot.slane %v3644_v23, 5  ;;  %v11259_v15 = vpop.f32.mrb[76].mxu0  ;;  %v11269_v12 = vpop.f32.mrb[111].mxu1  ;;  %6631 = vmatprep.subr.bf16.mxu1 %v9732_v52 }
 0x2ec   : > { %v3436_v47 = vrot.slane %v3435_v57, 4  ;;  %v3446_v27 = vrot.slane %v3445_v55, 4  ;;  %v4404_v32 = vor.u32 %v4403_v30, %v4400_v17  ;;  %v3796_v37 = vrot.slane %v3645_v31, 5  ;;  %v11267_v9 = vpop.f32.mrb[77].mxu0  ;;  %v3131_v57 = vld [vmem:[#allocation2 + $0xa8] sm:$0xf]  ;;  %6632 = vmatpush1.bf16.msra.mxu1 %v9730_v48 }
 0x2ed   : > { %v11265_v59 = vadd.f32 %v11080_v11, %v11074_v21  ;;  %v4414_v23 = vor.u32 %v4413_v28, %v4409_v40  ;;  %v3794_v36 = vsel %vm10417_vm10, %v8280_v50, %v3793_v45  ;;  %v3795_v24 = vrot.slane %v3793_v45, 4  ;;  %v11275_v17 = vpop.f32.mrb[78].mxu0  ;;  %v3132_v38 = vld [vmem:[#allocation2 + $0xac] sm:$0xf]  ;;  %v3133_v30 = vld [vmem:[#allocation2 + $0xb0] sm:$0x1] }
 0x2ee   : > { %v3441_v63 = vsel %vm10336_vm7, %v3436_v47, %v3440_v22  ;;  %v3451_v21 = vsel %vm10336_vm7, %v3446_v27, %v3450_v18  ;;  %v4405_v11 = vrot.slane %v4404_v32, 4  ;;  %v11281_v31 = vadd.f32 %v11082_v33, %v11076_v62  ;;  %v11287_v26 = vpop.f32.mrb[79].mxu0  ;;  %v4079_v33 = vld [vmem:[#allocation2 + $0xc0] sm:$0xf]  ;;  %v4080_v28 = vld [vmem:[#allocation2 + $0xc4] sm:$0xf] }
 0x2ef   : > { %13031 = vst [vmem:[#allocation36_spill] sm:$0xff] %v11265_v59  ;;  %v11285_v22 = vadd.f32 %v11092_v5, %v11086_v25  ;;  %v8263_v45 = vcombine.low %v3441_v63, %v3451_v21  ;;  %v4415_v55 = vrot.slane %v4414_v23, 4  ;;  %v3797_v48 = vsel %vm10417_vm10, %v3795_v24, %v3796_v37  ;;  %v9723_v32 = vld [vmem:[#allocation2 + $0xb4] sm:$0xff]   ;;  %v4081_v63 = vld [vmem:[#allocation2 + $0xc8] sm:$0x1] }
 0x2f0   : > { %v11293_v18 = vadd.f32 %v11094_v41, %v11088_v19  ;;  %v8296_v50 = vcombine.low %v3794_v36, %v3797_v48  ;;  %v3453_v62 = vshrl.u32 %v3131_v57, 16  ;;  %v4410_v25 = vsel %vm10336_vm7, %v4405_v11, %v4409_v40 }
 0x2f1   : > { %13032 = vst [vmem:[#allocation37_spill] sm:$0xff] %v11285_v22  ;;  %6014 = vmatmul.mubr.bf16.gmra.mrb[160].mxu0 %v8263_v45  ;;  %v4420_v5 = vsel %vm10336_vm7, %v4415_v55, %v4419_v54  ;;  %v3456_v52 = vshll.u32 %v3131_v57, 16  ;;  %v3462_v47 = vshll.u32 %v3132_v38, 16  ;;  %v3466_v19 = vshrl.u32 %v3132_v38, 16  ;;  %v3646_v45 = vld [vmem:[#allocation2 + $0xb4] sm:$0xe] }
 0x2f2   : > { %13033 = vst [vmem:[#allocation38_spill] sm:$0xff] %v11293_v18  ;;  %v8328_v27 = vcombine.low %v4410_v25, %v4420_v5  ;;  %6021 = vmatprep.mubr.bf16.mxu0 %v8296_v50  ;;  %v3455_v37 = vrot.slane %v3453_v62, 4  ;;  %v3472_v41 = vshll.u32 %v3133_v30, 16  ;;  %v4422_v24 = vshrl.u32 %v4079_v33, 16  ;;  %v3647_v54 = vld [vmem:[#allocation2 + $0xb8] sm:$0xf] }
 0x2f3   : > { %v3458_v23 = vrot.slane %v3456_v52, 5  ;;  %v3464_v36 = vrot.slane %v3462_v47, 5  ;;  %v4425_v21 = vshll.u32 %v4079_v33, 16  ;;  %v3468_v40 = vrot.slane %v3466_v19, 4  ;;  %v3648_v47 = vld [vmem:[#allocation2 + $0xbc] sm:$0x1] }
 0x2f4   : > { %6182 = vmatprep.mubr.bf16.mxu1 %v8328_v27  ;;  %v4431_v11 = vshll.u32 %v4080_v28, 16  ;;  %v4435_v48 = vshrl.u32 %v4080_v28, 16  ;;  %v4424_v55 = vrot.slane %v4422_v24, 4  ;;  %v4441_v50 = vshll.u32 %v4081_v63, 16  ;;  %v11299_v5 = vpop.f32.mrb[112].mxu1 }
 0x2f5   : > { %6183 = vmatmul.mubr.bf16.gmra.mrb[196].mxu1 %v9723_v32  ;;  %v3459_v57 = vor.u32 %v3458_v23, %v3455_v37  ;;  %v4427_v25 = vrot.slane %v4425_v21, 5  ;;  %v3469_v38 = vor.u32 %v3468_v40, %v3464_v36  ;;  %v3474_v30 = vrot.slane %v3472_v41, 5  ;;  %v11301_v22 = vpop.f32.mrb[113].mxu1 }
 0x2f6   : > { %v4433_v62 = vrot.slane %v4431_v11, 5  ;;  %v4437_v52 = vrot.slane %v4435_v48, 4  ;;  %v8281_v19 = vrot.slane %v3646_v45, 9  ;;  %v3800_v59 = vrot.slane %v3647_v54, 5  ;;  %v11303_v28 = vpop.f32.mrb[80].mxu0  ;;  %v11305_v32 = vpop.f32.mrb[114].mxu1 }
 0x2f7   : > { %v3460_v33 = vrot.slane %v3459_v57, 4  ;;  %v4428_v27 = vor.u32 %v4427_v25, %v4424_v55  ;;  %v3470_v37 = vrot.slane %v3469_v38, 4  ;;  %v4443_v63 = vrot.slane %v4441_v50, 5  ;;  %v11311_v41 = vpop.f32.mrb[81].mxu0  ;;  %v11313_v21 = vpop.f32.mrb[115].mxu1 }
 0x2f8   : > { %v4438_v23 = vor.u32 %v4437_v52, %v4433_v62  ;;  %v11309_v24 = vadd.f32 %v11112_v29, %v11108_v43  ;;  %v3802_v11 = vrot.slane %v3800_v59, 4  ;;  %v3803_v48 = vrot.slane %v3648_v47, 5  ;;  %v3134_v54 = vld [vmem:[#allocation2 + $0xb4] sm:$0xf]  ;;  %v11317_v57 = vpop.f32.mrb[82].mxu0 }
 0x2f9   : > { %v3465_v40 = vsel %vm10336_vm7, %v3460_v33, %v3464_v36  ;;  %v4429_v45 = vrot.slane %v4428_v27, 4  ;;  %v3475_v55 = vsel %vm10336_vm7, %v3470_v37, %v3474_v30  ;;  %v11323_v43 = vadd.f32 %v11114_v49, %v11110_v13  ;;  %v3135_v50 = vld [vmem:[#allocation2 + $0xb8] sm:$0xf]  ;;  %v11329_v36 = vpop.f32.mrb[83].mxu0  ;;  %v13037_v30 = vld [vmem:[#allocation20_spill] sm:$0xff] }
 0x2fa   : > { %13034 = vst [vmem:[#allocation39_spill] sm:$0xff] %v11309_v24  ;;  %v4439_v25 = vrot.slane %v4438_v23, 4  ;;  %v11327_v29 = vadd.f32 %v11120_v6, %v11116_v56  ;;  %v8264_v38 = vcombine.low %v3465_v40, %v3475_v55  ;;  %v3801_v52 = vsel %vm10417_vm10, %v8281_v19, %v3800_v59  ;;  %v3136_v13 = vld [vmem:[#allocation2 + $0xbc] sm:$0x1]  ;;  %v3650_v49 = vld [vmem:[#allocation2 + $0xc4] sm:$0xf] }
 0x2fb   : > { %13035 = vst [vmem:[#allocation40_spill] sm:$0xff] %v11323_v43  ;;  %v3804_v47 = vsel %vm10417_vm10, %v3802_v11, %v3803_v48  ;;  %v11337_v33 = vadd.f32 %v13037_v30, %v11118_v1  ;;  %v4434_v56 = vsel %vm10336_vm7, %v4429_v45, %v4433_v62  ;;  %v3477_v37 = vshrl.u32 %v3134_v54, 16  ;;  %v9733_v23 = vld [vmem:[#allocation10 + $0x40] ss:$16 sps:$4 sm:$0xff]   ;;  %v9735_v40 = vld [vmem:[#allocation10 + $0x44] ss:$16 sps:$4 sm:$0xff]  }
 0x2fc   : > { %13036 = vst [vmem:[#allocation41_spill] sm:$0xff] %v11327_v29  ;;  %v4444_v6 = vsel %vm10336_vm7, %v4439_v25, %v4443_v63  ;;  %v8297_v27 = vcombine.low %v3801_v52, %v3804_v47  ;;  %6022 = vmatmul.mubr.bf16.gmra.mrb[164].mxu0 %v8264_v38  ;;  %v9724_v19 = vld [vmem:[#allocation2 + $0xc0] sm:$0xff]   ;;  %v3480_v11 = vshll.u32 %v3134_v54, 16  ;;  %v3486_v48 = vshll.u32 %v3135_v50, 16  ;;  %v3651_v29 = vld [vmem:[#allocation2 + $0xc8] sm:$0x1]  ;;  %6633 = vmatprep.subr.bf16.mxu1 %v9735_v40 }
 0x2fd   : > { %13038 = vst [vmem:[#allocation20_spill] sm:$0xff] %v11337_v33  ;;  %v8329_v59 = vcombine.low %v4434_v56, %v4444_v6  ;;  %v3479_v1 = vrot.slane %v3477_v37, 4  ;;  %v3490_v55 = vshrl.u32 %v3135_v50, 16  ;;  %v3649_v30 = vld [vmem:[#allocation2 + $0xc0] sm:$0xe]  ;;  %v3496_v24 = vshll.u32 %v3136_v13, 16  ;;  %6634 = vmatpush1.bf16.msra.mxu1 %v9733_v23 }
 0x2fe   : > { %6029 = vmatprep.mubr.bf16.mxu0 %v8297_v27  ;;  %v3482_v62 = vrot.slane %v3480_v11, 5  ;;  %v3488_v45 = vrot.slane %v3486_v48, 5  ;;  %v3807_v63 = vrot.slane %v3650_v49, 5  ;;  %v3137_v25 = vld [vmem:[#allocation2 + $0xc0] sm:$0xf]  ;;  %v13039_v38 = vld [vmem:[#allocation21_spill] sm:$0xff] }
 0x2ff   : > { %6190 = vmatprep.mubr.bf16.mxu1 %v8329_v59  ;;  %v3492_v52 = vrot.slane %v3490_v55, 4  ;;  %v13040_v47 = vld [vmem:[#allocation23_spill] sm:$0xff]  ;;  %v13042_v54 = vld [vmem:[#allocation22_spill] sm:$0xff]  ;;  %v13043_v6 = vld [vmem:[#allocation24_spill] sm:$0xff]  ;;  %v11351_v37 = vpop.f32.mrb[116].mxu1  ;;  %v8282_v59 = vrot.slane %v3649_v30, 9 }
 0x300   : > { %6191 = vmatmul.mubr.bf16.gmra.mrb[200].mxu1 %v9724_v19  ;;  %v11345_v56 = vadd.f32 %v13040_v47, %v13039_v38  ;;  %v11349_v27 = vadd.f32 %v13043_v6, %v13042_v54  ;;  %v3138_v50 = vld [vmem:[#allocation2 + $0xc4] sm:$0xf]  ;;  %13045 = vst [vmem:[#allocation22_spill] sm:$0xff] %v11351_v37  ;;  %v3483_v40 = vor.u32 %v3482_v62, %v3479_v1  ;;  %v3809_v11 = vrot.slane %v3807_v63, 4  ;;  %v13046_v13 = vld [vmem:[#allocation25_spill] sm:$0xff]  ;;  %v11357_v55 = vpop.f32.mrb[117].mxu1 }
 0x301   : > { %v13047_v49 = vld [vmem:[#allocation27_spill] sm:$0xff]  ;;  %v3139_v23 = vld [vmem:[#allocation2 + $0xc8] sm:$0x1]  ;;  %v403_v19 = vld [vmem:[#allocation2 + $0xcc] sm:$0x1]  ;;  %13049 = vst [vmem:[#allocation25_spill] sm:$0xff] %v11357_v55  ;;  %v3493_v38 = vor.u32 %v3492_v52, %v3488_v45 }
 0x302   : > { %13041 = vst [vmem:[#allocation21_spill] sm:$0xff] %v11345_v56  ;;  %13044 = vst [vmem:[#allocation23_spill] sm:$0xff] %v11349_v27  ;;  %v11355_v48 = vadd.f32 %v13047_v49, %v13046_v13  ;;  %v3810_v47 = vrot.slane %v3651_v29, 5  ;;  %v13050_v56 = vld [vmem:[#allocation26_spill] sm:$0xff]  ;;  %v13051_v33 = vld [vmem:[#allocation28_spill] sm:$0xff]  ;;  %v3501_v6 = vshrl.u32 %v3137_v25, 16  ;;  %v3808_v29 = vsel %vm10417_vm10, %v8282_v59, %v3807_v63 }
 0x303   : > { %v11361_v54 = vadd.f32 %v13051_v33, %v13050_v56  ;;  %v459_v27 = vld [vmem:[#allocation2 + $0xd4] sm:$0x1]  ;;  %v11363_v43 = vpop.f32.mrb[84].mxu0  ;;  %v11365_v1 = vpop.f32.mrb[118].mxu1  ;;  %v3484_v30 = vrot.slane %v3483_v40, 4  ;;  %v3498_v62 = vrot.slane %v3496_v24, 5 }
 0x304   : > { %13048 = vst [vmem:[#allocation24_spill] sm:$0xff] %v11355_v48  ;;  %13053 = vst [vmem:[#allocation26_spill] sm:$0xff] %v11363_v43  ;;  %v3504_v13 = vshll.u32 %v3137_v25, 16  ;;  %v3510_v49 = vshll.u32 %v3138_v50, 16  ;;  %v11367_v48 = vpop.f32.mrb[85].mxu0  ;;  %v11369_v37 = vpop.f32.mrb[119].mxu1  ;;  %v3811_v33 = vsel %vm10417_vm10, %v3809_v11, %v3810_v47 }
 0x305   : > { %13052 = vst [vmem:[#allocation27_spill] sm:$0xff] %v11361_v54  ;;  %13054 = vst [vmem:[#allocation28_spill] sm:$0xff] %v11365_v1  ;;  %v3494_v52 = vrot.slane %v3493_v38, 4  ;;  %v3503_v56 = vrot.slane %v3501_v6, 4  ;;  %v4083_v54 = vld [vmem:[#allocation2 + $0xd0] sm:$0xf]  ;;  %v3489_v24 = vsel %vm10336_vm7, %v3484_v30, %v3488_v45 }
 0x306   : > { %13055 = vst [vmem:[#allocation42_spill] sm:$0xff] %v11367_v48  ;;  %13056 = vst [vmem:[#allocation43_spill] sm:$0xff] %v11369_v37  ;;  %v11375_v43 = vpop.f32.mrb[86].mxu0  ;;  %v3506_v25 = vrot.slane %v3504_v13, 5  ;;  %v3512_v40 = vrot.slane %v3510_v49, 5  ;;  %v3514_v1 = vshrl.u32 %v3138_v50, 16  ;;  %v8298_v50 = vcombine.low %v3808_v29, %v3811_v33 }
 0x307   : > { %13057 = vst [vmem:[#allocation44_spill] sm:$0xff] %v11375_v43  ;;  %v4550_v48 = vld [vmem:[#allocation2 + $0x1c] sm:$0xf]  ;;  %v11379_v55 = vpop.f32.mrb[87].mxu0  ;;  %v3499_v38 = vsel %vm10336_vm7, %v3494_v52, %v3498_v62  ;;  %v3520_v63 = vshll.u32 %v3139_v23, 16  ;;  %v404_v11 = vsel %vm10303_vm2, 0, %v403_v19  ;;  %v11407_v33 = vadd.f32 %v11189_v53, %v11183_v8 }
 0x308   : > { %13058 = vst [vmem:[#allocation45_spill] sm:$0xff] %v11379_v55  ;;  %v460_v6 = vsel %vm10312_vm4, 0, %v459_v27  ;;  %v8265_v43 = vcombine.low %v3489_v24, %v3499_v38  ;;  %v3507_v37 = vor.u32 %v3506_v25, %v3503_v56  ;;  %v3516_v18 = vrot.slane %v3514_v1, 4  ;;  %405 = vst [vmem:[#allocation2 + $0xcc] sm:$0x1] %v404_v11 }
 0x309   : > { %461 = vst [vmem:[#allocation2 + $0xd4] sm:$0x1] %v460_v6  ;;  %v4455_v45 = vshll.u32 %v4083_v54, 16  ;;  %v4459_v30 = vshrl.u32 %v4083_v54, 16  ;;  %v4551_v13 = vld [vmem:[#allocation2 + $0x20] sm:$0x1]  ;;  %v11391_v1 = vadd.f32 %v11166_v16, %v11164_v46  ;;  %v11427_v6 = vadd.f32 %v11213_v14, %v11211_v39 }
 0x30a   : > { %v4647_v49 = vrot.slane %v4550_v48, 5  ;;  %6030 = vmatmul.mubr.bf16.gmra.mrb[168].mxu0 %v8265_v43  ;;  %v3517_v55 = vor.u32 %v3516_v18, %v3512_v40  ;;  %v3522_v62 = vrot.slane %v3520_v63, 5  ;;  %v4549_v52 = vld [vmem:[#allocation2 + $0x18] sm:$0xe]  ;;  %v3508_v19 = vrot.slane %v3507_v37, 4 }
 0x30b   : > { %v11387_v23 = vrot.slane %v4455_v45, 5  ;;  %6037 = vmatprep.mubr.bf16.mxu0 %v8298_v50  ;;  %v4461_v59 = vrot.slane %v4459_v30, 4  ;;  %v11393_v56 = vld [vmem:[#allocation2 + $0x28] sm:$0xf]  ;;  %v4650_v54 = vrot.slane %v4551_v13, 5  ;;  %v11397_v43 = vadd.f32 %v11174_v58, %v11168_v2  ;;  %v11403_v48 = vpop.f32.mrb[120].mxu1 }
 0x30c   : > { %v4649_v27 = vrot.slane %v4647_v49, 4  ;;  %v3518_v29 = vrot.slane %v3517_v55, 4  ;;  %v11401_v18 = vadd.f32 %v11176_v44, %v11170_v61  ;;  %v8331_v37 = vrot.slane %v4549_v52, 9  ;;  %v11409_v16 = vpop.f32.mrb[121].mxu1  ;;  %v4554_v58 = vld [vmem:[#allocation2 + $0x2c] sm:$0x1] }
 0x30d   : > { %v4462_v55 = vor.u32 %v4461_v59, %v11387_v23  ;;  %v4654_v61 = vrot.slane %v11393_v56, 5  ;;  %v4556_v44 = vld [vmem:[#allocation2 + $0x34] sm:$0xf]  ;;  %v11417_v24 = vpop.f32.mrb[88].mxu0  ;;  %v11419_v25 = vpop.f32.mrb[122].mxu1  ;;  %v3513_v8 = vsel %vm10336_vm7, %v3508_v19, %v3512_v40  ;;  %13062 = vst [vmem:[#allocation19_spill] sm:$0xff] %v11427_v6  ;;  %v11614_v6 = vadd.f32 %v11409_v16, %v11403_v48 }
 0x30e   : > { %13061 = vst [vmem:[#allocation18_spill] sm:$0xff] %v11401_v18  ;;  %v3523_v46 = vsel %vm10336_vm7, %v3518_v29, %v3522_v62  ;;  %v4651_v2 = vsel %vm10417_vm10, %v4649_v27, %v4650_v54  ;;  %v4648_v63 = vsel %vm10417_vm10, %v8331_v37, %v4647_v49  ;;  %v4552_v11 = vld [vmem:[#allocation2 + $0x24] sm:$0xe]  ;;  %v4557_v47 = vld [vmem:[#allocation2 + $0x38] sm:$0x1]  ;;  %v11429_v52 = vpop.f32.mrb[89].mxu0 }
 0x30f   : > { %v4082_v53 = vld [vmem:[#allocation2 + $0xcc] sm:$0xf]  ;;  %v8266_v45 = vcombine.low %v3513_v8, %v3523_v46  ;;  %v4555_v62 = vld [vmem:[#allocation2 + $0x30] sm:$0xe]  ;;  %v8347_v59 = vcombine.low %v4648_v63, %v4651_v2  ;;  %v4656_v40 = vrot.slane %v4654_v61, 4  ;;  %v4661_v19 = vrot.slane %v4556_v44, 5 }
 0x310   : > { %v4084_v38 = vld [vmem:[#allocation2 + $0xd4] sm:$0x1]  ;;  %v4446_v50 = vshrl.u32 %v4082_v53, 16  ;;  %v4449_v30 = vshll.u32 %v4082_v53, 16  ;;  %v11431_v27 = vld [vmem:[#allocation2 + $0x40] sm:$0xf]  ;;  %v11441_v2 = vadd.f32 %v11221_v7, %v11217_v42  ;;  %v11453_v42 = vadd.f32 %v11239_v10, %v11227_v4 }
 0x311   : > { %v4465_v13 = vshll.u32 %v4084_v38, 16  ;;  %v11433_v56 = vpop.f32.mrb[90].mxu0  ;;  %v11435_v49 = vpop.f32.mrb[123].mxu1  ;;  %v4463_v14 = vrot.slane %v4462_v55, 4  ;;  %v4657_v46 = vrot.slane %v4554_v58, 5  ;;  %v4663_v8 = vrot.slane %v4661_v19, 4 }
 0x312   : > { %6038 = vmatmul.mubr.bf16.gmra.mrb[172].mxu0 %v8266_v45  ;;  %v4448_v29 = vrot.slane %v4446_v50, 4  ;;  %v4451_v39 = vrot.slane %v4449_v30, 5  ;;  %v11437_v37 = vpop.f32.mrb[91].mxu0  ;;  %v4664_v53 = vrot.slane %v4557_v47, 5  ;;  %v9736_v44 = vld [vmem:[#allocation10 + $0x60] ss:$16 sps:$4 sm:$0xff]   ;;  %v11445_v45 = vadd.f32 %v11219_v35, %v11215_v0 }
 0x313   : > { %v4467_v54 = vrot.slane %v4465_v13, 5  ;;  %9347 = vmatprep.mubr.bf16.mxu0 %v8347_v59  ;;  %v8332_v63 = vrot.slane %v4552_v11, 9  ;;  %v4562_v50 = vld [vmem:[#allocation2 + $0x4c] sm:$0xf]  ;;  %v4658_v30 = vsel %vm10417_vm10, %v4656_v40, %v4657_v46  ;;  %v8333_v13 = vrot.slane %v4555_v62, 9 }
 0x314   : > { %v4452_v38 = vor.u32 %v4451_v39, %v4448_v29  ;;  %13063 = vst [vmem:[#allocation46_spill] sm:$0xff] %v11445_v45  ;;  %v9738_v55 = vld [vmem:[#allocation10 + $0x64] ss:$16 sps:$4 sm:$0xff]   ;;  %v4665_v58 = vsel %vm10417_vm10, %v4663_v8, %v4664_v53  ;;  %v4668_v0 = vrot.slane %v11431_v27, 5  ;;  %v4675_v59 = vrot.slane %v4562_v50, 5 }
 0x315   : > { %v4468_v11 = vsel %vm10336_vm7, %v4463_v14, %v4467_v54  ;;  %6635 = vmatprep.subr.bf16.mxu1 %v9738_v55  ;;  %v4655_v35 = vsel %vm10417_vm10, %v8332_v63, %v4654_v61  ;;  %v4662_v47 = vsel %vm10417_vm10, %v8333_v13, %v4661_v19  ;;  %v4558_v62 = vld [vmem:[#allocation2 + $0x3c] sm:$0xe]  ;;  %v9726_v10 = vld [vmem:[#allocation2 + $0xcc] sm:$0xff]   ;;  %v4560_v39 = vld [vmem:[#allocation2 + $0x44] sm:$0x1]  ;;  %v11467_v27 = vadd.f32 %v11257_v51, %v11255_v60 }
 0x316   : > { %v4453_v7 = vrot.slane %v4452_v38, 4  ;;  %6636 = vmatpush1.bf16.msra.mxu1 %v9736_v44  ;;  %v8348_v40 = vcombine.low %v4655_v35, %v4658_v30  ;;  %v8349_v29 = vcombine.low %v4662_v47, %v4665_v58  ;;  %v4563_v14 = vld [vmem:[#allocation2 + $0x50] sm:$0x1]  ;;  %v4670_v19 = vrot.slane %v4668_v0, 4  ;;  %v4561_v44 = vld [vmem:[#allocation2 + $0x48] sm:$0xe] }
 0x317   : > { %13064 = vst [vmem:[#allocation47_spill] sm:$0xff] %v11467_v27  ;;  %v11469_v61 = vpop.f32.mrb[124].mxu1  ;;  %v4677_v46 = vrot.slane %v4675_v59, 4  ;;  %v11473_v8 = vadd.f32 %v11267_v9, %v11259_v15  ;;  %v11483_v51 = vadd.f32 %v11269_v12, %v11261_v3  ;;  %v11487_v60 = vadd.f32 %v11287_v26, %v11275_v17  ;;  %v11489_v38 = vld [vmem:[#allocation2 + $0x64] sm:$0xf] }
 0x318   : > { %v4458_v4 = vsel %vm10336_vm7, %v4453_v7, %v11387_v23  ;;  %v11477_v23 = vpop.f32.mrb[92].mxu0  ;;  %v11479_v53 = vpop.f32.mrb[125].mxu1  ;;  %v4671_v63 = vrot.slane %v4560_v39, 5  ;;  %v4678_v50 = vrot.slane %v4563_v14, 5  ;;  %v8334_v3 = vrot.slane %v4558_v62, 9  ;;  %v13070_v14 = vld [vmem:[#allocation33_spill] sm:$0xff] }
 0x319   : > { %v8330_v54 = vcombine.low %v4458_v4, %v4468_v11  ;;  %13065 = vst [vmem:[#allocation48_spill] sm:$0xff] %v11483_v51  ;;  %v11491_v15 = vpop.f32.mrb[93].mxu0  ;;  %v11493_v9 = vpop.f32.mrb[126].mxu1  ;;  %v4682_v12 = vrot.slane %v11475_v34, 5  ;;  %v8335_v13 = vrot.slane %v4561_v44, 9  ;;  %v4689_v7 = vrot.slane %v11489_v38, 5 }
 0x31a   : > { %9348 = vmatmul.mubr.bf16.vlgmr.msra.gmra.mrb[176].mxu0 %v8348_v40  ;;  %v11495_v55 = vpop.f32.mrb[94].mxu0  ;;  %v11497_v30 = vpop.f32.mrb[127].mxu1  ;;  %v4672_v26 = vsel %vm10417_vm10, %v4670_v19, %v4671_v63  ;;  %v4679_v58 = vsel %vm10417_vm10, %v4677_v46, %v4678_v50  ;;  %v13066_v11 = vmov 0   ;;  %v11510_v35 = vadd.f32 %v11301_v22, %v11299_v5  ;;  %v4566_v40 = vld [vmem:[#allocation2 + $0x5c] sm:$0x1] }
 0x31b   : > { %6198 = vmatprep.mubr.bf16.mxu1 %v8330_v54  ;;  %9351 = vmatprep.mubr.bf16.mxu0 %v8349_v29  ;;  %v11500_v17 = vpop.f32.mrb[95].mxu0  ;;  %v11514_v47 = vadd.f32 %v11311_v41, %v11303_v28  ;;  %v11518_v62 = vadd.f32 %v11313_v21, %v11305_v32  ;;  %v11522_v4 = vadd.f32 %v11329_v36, %v11317_v57  ;;  %v4564_v5 = vld [vmem:[#allocation2 + $0x54] sm:$0xe]  ;;  %v4684_v39 = vrot.slane %v4682_v12, 4  ;;  %v11528_v28 = vld [vmem:[#allocation2 + $0x70] sm:$0xf] }
 0x31c   : > { %6199 = vmatmul.mubr.bf16.gmra.mrb[204].mxu1 %v9726_v10  ;;  %13067 = vst [vmem:[#allocation49_spill] sm:$0xff] %v11510_v35  ;;  %v4669_v10 = vsel %vm10417_vm10, %v8334_v3, %v4668_v0  ;;  %v4676_v22 = vsel %vm10417_vm10, %v8335_v13, %v4675_v59  ;;  %v13069_v41 = vld [vmem:[#allocation29_spill] sm:$0xff]  ;;  %v13071_v21 = vld [vmem:[#allocation35_spill] sm:$0xff]  ;;  %v4569_v54 = vld [vmem:[#allocation2 + $0x68] sm:$0x1]  ;;  %v4685_v46 = vrot.slane %v4566_v40, 5  ;;  %v11618_v18 = vadd.f32 %v11429_v52, %v11417_v24 }
 0x31d   : > { %6661 = vmatprep.mubr.bf16.mxu1 %v13066_v11  ;;  %13068 = vst [vmem:[#allocation50_spill] sm:$0xff] %v11518_v62  ;;  %v8350_v29 = vcombine.low %v4669_v10, %v4672_v26  ;;  %v11532_v32 = vadd.f32 %v13070_v14, %v13069_v41  ;;  %v11536_v57 = vadd.f32 %v13071_v21, %v13069_v41  ;;  %v13072_v59 = vld [vmem:[#allocation38_spill] sm:$0xff]  ;;  %v4567_v34 = vld [vmem:[#allocation2 + $0x60] sm:$0xe]  ;;  %v4691_v44 = vrot.slane %v4689_v7, 4  ;;  %v13074_v26 = vld [vmem:[#allocation25_spill] sm:$0xff] }
 0x31e   : > { %v8351_v36 = vcombine.low %v4676_v22, %v4679_v58  ;;  %v11540_v0 = vadd.f32 %v11281_v31, %v13069_v41  ;;  %v11544_v19 = vadd.f32 %v13072_v59, %v13069_v41  ;;  %v11546_v38 = vld [vmem:[#allocation2 + $0x7c] sm:$0xf]  ;;  %v8336_v63 = vrot.slane %v4564_v5, 9  ;;  %v13078_v14 = vld [vmem:[#allocation28_spill] sm:$0xff]  ;;  %v13079_v21 = vld [vmem:[#allocation43_spill] sm:$0xff]  ;;  %13088 = vst [vmem:[#allocation35_spill] sm:$0xff] %v11614_v6 }
 0x31f   : > { %v13073_v3 = vld [vmem:[#allocation22_spill] sm:$0xff]  ;;  %v4686_v40 = vsel %vm10417_vm10, %v4684_v39, %v4685_v46  ;;  %v13081_v5 = vld [vmem:[#allocation44_spill] sm:$0xff]  ;;  %v13082_v59 = vld [vmem:[#allocation45_spill] sm:$0xff]  ;;  %v8337_v39 = vrot.slane %v4567_v34, 9  ;;  %v4703_v46 = vrot.slane %v11546_v38, 5  ;;  %v11632_v48 = vadd.f32 %v11407_v33, %v13069_v41 }
 0x320   : > { %v11551_v13 = vadd.f32 %v13074_v26, %v13073_v3  ;;  %v13076_v31 = vld [vmem:[#allocation26_spill] sm:$0xff]  ;;  %v11567_v50 = vadd.f32 %v13082_v59, %v13081_v5  ;;  %v13083_v26 = vld [vmem:[#allocation40_spill] sm:$0xff]  ;;  %v13086_v59 = vld [vmem:[#allocation27_spill] sm:$0xff] }
 0x321   : > { %v13077_v58 = vld [vmem:[#allocation42_spill] sm:$0xff]  ;;  %v4570_v34 = vld [vmem:[#allocation2 + $0x6c] sm:$0xe]  ;;  %v11594_v62 = vld [vmem:[#allocation2 + $0x88] sm:$0xf]  ;;  %v4705_v24 = vrot.slane %v4703_v46, 4 }
 0x322   : > { %9352 = vmatmul.mubr.bf16.gmra.mrb[180].mxu0 %v8350_v29  ;;  %13075 = vst [vmem:[#allocation29_spill] sm:$0xff] %v11551_v13  ;;  %v11555_v10 = vadd.f32 %v13077_v58, %v13076_v31  ;;  %v11557_v22 = vpop.f32.mrb[128].mxu1  ;;  %v4692_v29 = vrot.slane %v4569_v54, 5  ;;  %v11573_v31 = vadd.f32 %v13083_v26, %v13069_v41  ;;  %v13084_v58 = vld [vmem:[#allocation20_spill] sm:$0xff]  ;;  %v4572_v54 = vld [vmem:[#allocation2 + $0x74] sm:$0x1]  ;;  %v4683_v26 = vsel %vm10417_vm10, %v8336_v63, %v4682_v12 }
 0x323   : > { %9355 = vmatprep.mubr.bf16.mxu0 %v8351_v36  ;;  %v11563_v36 = vadd.f32 %v13079_v21, %v13078_v14  ;;  %v11569_v3 = vpop.f32.mrb[129].mxu1  ;;  %v11577_v11 = vadd.f32 %v13084_v58, %v13069_v41  ;;  %v13085_v21 = vld [vmem:[#allocation23_spill] sm:$0xff]  ;;  %v11596_v38 = vld [vmem:[#allocation2 + $0x94] sm:$0xf]  ;;  %v8352_v51 = vcombine.low %v4683_v26, %v4686_v40  ;;  %v4690_v12 = vsel %vm10417_vm10, %v8337_v39, %v4689_v7  ;;  %v9739_v27 = vld [vmem:[#allocation10 + $0x80] ss:$16 sps:$4 sm:$0xff]  }
 0x324   : > { %v11580_v14 = vpop.f32.mrb[130].mxu1  ;;  %v11584_v5 = vadd.f32 %v13085_v21, %v13069_v41  ;;  %v4693_v58 = vsel %vm10417_vm10, %v4691_v44, %v4692_v29  ;;  %v4575_v13 = vld [vmem:[#allocation2 + $0x80] sm:$0x1]  ;;  %v13087_v44 = vrot.slane %v11528_v28, 5  ;;  %v9741_v45 = vld [vmem:[#allocation10 + $0x84] ss:$16 sps:$4 sm:$0xff]   ;;  %v11626_v7 = vadd.f32 %v11437_v37, %v11433_v56 }
 0x325   : > { %13080 = vst [vmem:[#allocation33_spill] sm:$0xff] %v11563_v36  ;;  %v11588_v36 = vadd.f32 %v13086_v59, %v13069_v41  ;;  %v11598_v35 = vpop.f32.mrb[96].mxu0  ;;  %v11600_v21 = vpop.f32.mrb[131].mxu1  ;;  %v11604_v59 = vadd.f32 %v11397_v43, %v13069_v41  ;;  %v11622_v43 = vadd.f32 %v11435_v49, %v11419_v25  ;;  %v9742_v39 = vld [vmem:[#allocation10 + $0x8] ss:$16 sps:$4 sm:$0xff]   ;;  %v8353_v16 = vcombine.low %v4690_v12, %v4693_v58 }
 0x326   : > { %v4698_v63 = vrot.slane %v13087_v44, 4  ;;  %v11610_v29 = vpop.f32.mrb[97].mxu0  ;;  %v9744_v26 = vld [vmem:[#allocation10 + $0xc] ss:$16 sps:$4 sm:$0xff]   ;;  %v4573_v44 = vld [vmem:[#allocation2 + $0x78] sm:$0xe]  ;;  %6637 = vmatprep.subr.bf16.mxu1 %v9741_v45  ;;  %v11637_v25 = vadd.f32 %v11441_v2, %v13069_v41  ;;  %v11641_v56 = vadd.f32 %v11453_v42, %v13069_v41  ;;  %v11645_v49 = vadd.f32 %v11473_v8, %v13069_v41 }
 0x327   : > { %v11628_v40 = vpop.f32.mrb[98].mxu0  ;;  %v12981_v52 = vrot.slane %v11594_v62, 5  ;;  %v4699_v33 = vrot.slane %v4572_v54, 5  ;;  %6822 = vmatprep.subr.bf16.mxu0 %v9744_v26  ;;  %v11649_v37 = vadd.f32 %v11487_v60, %v13069_v41  ;;  %v8338_v45 = vrot.slane %v4570_v34, 9  ;;  %v4576_v2 = vld [vmem:[#allocation2 + $0x84] sm:$0xe]  ;;  %6638 = vmatpush1.bf16.msra.mxu1 %v9739_v27 }
 0x328   : > { %v8951_v6 = vpop.f32.mrb[99].mxu0  ;;  %v4706_v58 = vrot.slane %v4575_v13, 5  ;;  %v4717_v12 = vrot.slane %v11596_v38, 5  ;;  %v11654_v42 = vadd.f32 %v11514_v47, %v13069_v41  ;;  %v11658_v8 = vadd.f32 %v11522_v4, %v13069_v41  ;;  %v4578_v54 = vld [vmem:[#allocation2 + $0x8c] sm:$0x1]  ;;  %6823 = vmatpush1.bf16.msra.mxu0 %v9742_v39 }
 0x329   : > { %v8339_v60 = vrot.slane %v4573_v44, 9  ;;  %v11662_v26 = vld [vmem:[#allocation2 + $0xa0] sm:$0xf]  ;;  %v4712_v47 = vrot.slane %v12981_v52, 4  ;;  %v11668_v34 = vld [vmem:[#allocation2 + $0xac] sm:$0xf]  ;;  %v11672_v4 = vadd.f32 %v11479_v53, %v11469_v61  ;;  %v11676_v41 = vadd.f32 %v11491_v15, %v11477_v23 }
 0x32a   : > { %9356 = vmatmul.mubr.bf16.gmra.mrb[184].mxu0 %v8352_v51  ;;  %v4700_v51 = vsel %vm10417_vm10, %v4698_v63, %v4699_v33  ;;  %v4707_v27 = vsel %vm10417_vm10, %v4705_v24, %v4706_v58  ;;  %v13089_v63 = vrot.slane %v11528_v28, 5  ;;  %v4579_v44 = vld [vmem:[#allocation2 + $0x90] sm:$0xe]  ;;  %v4581_v24 = vld [vmem:[#allocation2 + $0x98] sm:$0x1]  ;;  %v11686_v33 = vadd.f32 %v11497_v30, %v11493_v9 }
 0x32b   : > { %9359 = vmatprep.mubr.bf16.mxu0 %v8353_v16  ;;  %v9065_v13 = vpop.f32.mrb[132].mxu1  ;;  %v4704_v16 = vsel %vm10417_vm10, %v8339_v60, %v4703_v46  ;;  %v11690_v61 = vadd.f32 %v11500_v17, %v11495_v55  ;;  %v8340_v15 = vrot.slane %v4576_v2, 9  ;;  %v4713_v28 = vrot.slane %v4578_v54, 5  ;;  %v11696_v9 = vld [vmem:[%s12967_s4] ss:$0 sm:$0xff] }
 0x32c   : > { %v9066_v38 = vpop.f32.mrb[133].mxu1  ;;  %v4697_v39 = vsel %vm10417_vm10, %v8338_v45, %v13089_v63  ;;  %13090 = vst [vmem:[#allocation38_spill] sm:$0xff] %v11686_v33  ;;  %v4719_v58 = vrot.slane %v4717_v12, 4  ;;  %v8355_v60 = vcombine.low %v4704_v16, %v4707_v27  ;;  %v11700_v55 = vadd.f32 %v11696_v9, %v11555_v10  ;;  %v11702_v30 = vld [vmem:[#allocation2 + $0x9c] sm:$0xe] }
 0x32d   : > { %v8953_v23 = vpop.f32.mrb[100].mxu0  ;;  %v9068_v53 = vpop.f32.mrb[134].mxu1  ;;  %v8354_v46 = vcombine.low %v4697_v39, %v4700_v51  ;;  %v11707_v54 = vadd.f32 %v11696_v9, %v11567_v50  ;;  %v4714_v51 = vsel %vm10417_vm10, %v4712_v47, %v4713_v28  ;;  %v8341_v27 = vrot.slane %v4579_v44, 9  ;;  %v9745_v45 = vld [vmem:[#allocation10 + $0x28] ss:$16 sps:$4 sm:$0xff]  }
 0x32e   : > { %v8954_v63 = vpop.f32.mrb[101].mxu0  ;;  %v9069_v52 = vpop.f32.mrb[135].mxu1  ;;  %v4720_v39 = vrot.slane %v4581_v24, 5  ;;  %v4584_v33 = vld [vmem:[#allocation2 + $0xa4] sm:$0x1]  ;;  %v11713_v10 = vadd.f32 %v11569_v3, %v11557_v22  ;;  %v11717_v17 = vadd.f32 %v11610_v29, %v11598_v35  ;;  %v11721_v50 = vadd.f32 %v11600_v21, %v11580_v14 }
 0x32f   : > { %v8956_v2 = vpop.f32.mrb[102].mxu0  ;;  %v11724_v47 = vadd.f32 %v8951_v6, %v11628_v40  ;;  %v9747_v44 = vld [vmem:[#allocation10 + $0x2c] ss:$16 sps:$4 sm:$0xff]   ;;  %v13091_v24 = vrot.slane %v11594_v62, 5  ;;  %v4718_v22 = vsel %vm10417_vm10, %v8341_v27, %v4717_v12  ;;  %v13092_v3 = vrot.slane %v11662_v26, 5 }
 0x330   : > { %v8957_v16 = vpop.f32.mrb[103].mxu0  ;;  %v4721_v35 = vsel %vm10417_vm10, %v4719_v58, %v4720_v39  ;;  %v11736_v21 = vld [vmem:[#allocation2 + $0xa8] sm:$0xe]  ;;  %v4587_v6 = vld [vmem:[#allocation2 + $0xb0] sm:$0x1]  ;;  %v5678_v40 = vadd.f32 %v11696_v9, %v11618_v18  ;;  %6824 = vmatprep.subr.bf16.mxu0 %v9747_v44  ;;  %v5681_v12 = vadd.f32 %v11696_v9, %v11626_v7  ;;  %v4727_v58 = vrot.slane %v4584_v33, 5 }
 0x331   : > { %v4711_v28 = vsel %vm10417_vm10, %v8340_v15, %v13091_v24  ;;  %v4726_v14 = vrot.slane %v13092_v3, 4  ;;  %v13093_v15 = vrot.slane %v11668_v34, 5  ;;  %v11745_v27 = vadd.f32 %v9066_v38, %v9065_v13  ;;  %6825 = vmatpush1.bf16.msra.mxu0 %v9745_v45  ;;  %v11750_v3 = vld [vmem:[#allocation2 + $0xb8] sm:$0xf]  ;;  %v13094_v45 = vld [vmem:[#allocation32_spill] sm:$0xff] }
 0x332   : > { %9360 = vmatmul.mubr.bf16.gmra.mrb[188].mxu0 %v8354_v46  ;;  %v8356_v29 = vcombine.low %v4711_v28, %v4714_v51  ;;  %v11747_v39 = vadd.f32 %v8954_v63, %v8953_v23  ;;  %v8357_v51 = vcombine.low %v4718_v22, %v4721_v35  ;;  %v8343_v18 = vrot.slane %v11736_v21, 9 }
 0x333   : > { %9363 = vmatprep.mubr.bf16.mxu0 %v8355_v60  ;;  %v4733_v46 = vrot.slane %v13093_v15, 4  ;;  %v9071_v60 = vpop.f32.mrb[136].mxu1  ;;  %v4734_v28 = vrot.slane %v4587_v6, 5  ;;  %v11752_v62 = vadd.f32 %v9069_v52, %v9068_v53  ;;  %v11756_v7 = vsel %vm10417_vm10, %v4726_v14, %v4727_v58  ;;  %v13097_v58 = vld [vmem:[#allocation37_spill] sm:$0xff] }
 0x334   : > { %v9072_v24 = vpop.f32.mrb[137].mxu1  ;;  %v11758_v13 = vadd.f32 %v8957_v16, %v8956_v2  ;;  %v11764_v63 = vadd.f32 %v13094_v45, %v11532_v32  ;;  %v13095_v2 = vld [vmem:[#allocation34_spill] sm:$0xff]  ;;  %v5686_v14 = vadd.f32 %v11696_v9, %v11676_v41  ;;  %v11781_v32 = vld [vmem:[#allocation2 + $0xc4] sm:$0xf] }
 0x335   : > { %v8959_v15 = vpop.f32.mrb[104].mxu0  ;;  %v9074_v44 = vpop.f32.mrb[138].mxu1  ;;  %v11760_v38 = vadd.f32 %v9072_v24, %v9071_v60  ;;  %v11768_v52 = vsel %vm10417_vm10, %v4733_v46, %v4734_v28  ;;  %v11776_v16 = vadd.f32 %v13095_v2, %v11536_v57  ;;  %v13096_v46 = vld [vmem:[#allocation36_spill] sm:$0xff]  ;;  %v11789_v24 = vadd.f32 %v13097_v58, %v11544_v19  ;;  %v13098_v41 = vld [vmem:[#allocation39_spill] sm:$0xff]  ;;  %v13107_v58 = vld [vmem:[#allocation49_spill] sm:$0xff] }
 0x336   : > { %v8960_v33 = vpop.f32.mrb[105].mxu0  ;;  %v9075_v23 = vpop.f32.mrb[139].mxu1  ;;  %v11785_v60 = vadd.f32 %v13096_v46, %v11540_v0  ;;  %v5689_v57 = vadd.f32 %v11696_v9, %v11690_v61  ;;  %v13100_v0 = vld [vmem:[#allocation21_spill] sm:$0xff]  ;;  %v13101_v19 = vld [vmem:[#allocation24_spill] sm:$0xff]  ;;  %v11813_v61 = vadd.f32 %v11391_v1, %v11604_v59  ;;  %v5705_v20 = vadd.f32 %v11696_v9, %v11758_v13 }
 0x337   : > { %v11770_v53 = vadd.f32 %v8960_v33, %v8959_v15  ;;  %v8962_v22 = vpop.f32.mrb[106].mxu0  ;;  %v11772_v35 = vadd.f32 %v9075_v23, %v9074_v44  ;;  %v11797_v15 = vadd.f32 %v13098_v41, %v11573_v31  ;;  %v13099_v44 = vld [vmem:[#allocation41_spill] sm:$0xff]  ;;  %v11805_v23 = vadd.f32 %v13100_v0, %v11584_v5  ;;  %v13102_v31 = vld [vmem:[#allocation18_spill] sm:$0xff]  ;;  %v13106_v59 = vld [vmem:[#allocation48_spill] sm:$0xff] }
 0x338   : > { %v8963_v6 = vpop.f32.mrb[107].mxu0  ;;  %v11801_v33 = vadd.f32 %v13099_v44, %v11577_v11  ;;  %v11817_v45 = vadd.f32 %v13102_v31, %v11632_v48  ;;  %v13104_v5 = vld [vmem:[#allocation46_spill] sm:$0xff]  ;;  %v11834_v48 = vadd.f32 %v13106_v59, %v11649_v37  ;;  %v11838_v41 = vadd.f32 %v13107_v58, %v11654_v42  ;;  %v13110_v37 = vld [vmem:[#allocation33_spill] sm:$0xff]  ;;  %v13111_v42 = vld [vmem:[#allocation35_spill] sm:$0xff] }
 0x339   : > { %v11793_v28 = vadd.f32 %v8963_v6, %v8962_v22  ;;  %v11826_v6 = vadd.f32 %v13104_v5, %v11641_v56  ;;  %v13109_v56 = vld [vmem:[#allocation29_spill] sm:$0xff]  ;;  %v11855_v59 = vadd.f32 %v13111_v42, %v5678_v40  ;;  %v11871_v42 = vadd.f32 %v11672_v4, %v5686_v14 }
 0x33a   : > { %9364 = vmatmul.mubr.bf16.gmra.mrb[192].mxu0 %v8356_v29  ;;  %v11809_v29 = vadd.f32 %v13101_v19, %v11588_v36  ;;  %v13105_v36 = vld [vmem:[#allocation47_spill] sm:$0xff]  ;;  %v11846_v0 = vadd.f32 %v13109_v56, %v11700_v55  ;;  %v9748_v19 = vld [vmem:[#allocation10 + $0xa0] ss:$16 sps:$4 sm:$0xff]   ;;  %v13112_v55 = vrot.slane %v11662_v26, 5  ;;  %v13113_v56 = vrot.slane %v11702_v30, 9 }
 0x33b   : > { %9367 = vmatprep.mubr.bf16.mxu0 %v8357_v51  ;;  %v9077_v22 = vpop.f32.mrb[140].mxu1  ;;  %v13103_v51 = vld [vmem:[#allocation19_spill] sm:$0xff]  ;;  %v11830_v46 = vadd.f32 %v13105_v36, %v11645_v49  ;;  %v9750_v49 = vld [vmem:[#allocation10 + $0xa4] ss:$16 sps:$4 sm:$0xff]   ;;  %v11852_v36 = vadd.f32 %v13110_v37, %v11707_v54  ;;  %13115 = vst [vmem:[#allocation22_spill] sm:$0xff] %v11871_v42  ;;  %v13118_v4 = vrot.slane %v11750_v3, 5 }
 0x33c   : > { %v11822_v2 = vadd.f32 %v13103_v51, %v11637_v25  ;;  %v9078_v1 = vpop.f32.mrb[141].mxu1  ;;  %v13108_v25 = vld [vmem:[#allocation50_spill] sm:$0xff]  ;;  %v9751_v58 = vld [vmem:[#allocation10 + $0x48] ss:$16 sps:$4 sm:$0xff]   ;;  %6639 = vmatprep.subr.bf16.mxu1 %v9750_v49  ;;  %v4593_v49 = vld [vmem:[#allocation2 + $0xc8] sm:$0x1] }
 0x33d   : > { %v11842_v44 = vadd.f32 %v13108_v25, %v11658_v8  ;;  %v8965_v31 = vpop.f32.mrb[108].mxu0  ;;  %v11848_v51 = vadd.f32 %v9078_v1, %v9077_v22  ;;  %v9080_v5 = vpop.f32.mrb[142].mxu1  ;;  %v11858_v8 = vadd.f32 %v11622_v43, %v5681_v12  ;;  %v9753_v25 = vld [vmem:[#allocation10 + $0x4c] ss:$16 sps:$4 sm:$0xff]   ;;  %v4725_v22 = vsel %vm10417_vm10, %v13113_v56, %v13112_v55  ;;  %v13116_v43 = vld [vmem:[#allocation38_spill] sm:$0xff]  ;;  %6640 = vmatpush1.bf16.msra.mxu1 %v9748_v19 }
 0x33e   : > { %v13114_v1 = vrot.slane %v11668_v34, 5  ;;  %v8966_v37 = vpop.f32.mrb[109].mxu0  ;;  %v9081_v40 = vpop.f32.mrb[143].mxu1  ;;  %v11874_v12 = vadd.f32 %v13116_v43, %v5689_v57  ;;  %v8358_v26 = vcombine.low %v4725_v22, %v11756_v7  ;;  %v4590_v30 = vld [vmem:[#allocation2 + $0xbc] sm:$0x1]  ;;  %6826 = vmatprep.subr.bf16.mxu0 %v9753_v25  ;;  %v4740_v14 = vrot.slane %v13118_v4, 4 }
 0x33f   : > { %v4595_v11 = vld [vmem:[#allocation2 + $0xd0] sm:$0xf]  ;;  %v11877_v21 = vadd.f32 %v8966_v37, %v8965_v31  ;;  %v8968_v55 = vpop.f32.mrb[110].mxu0  ;;  %v11879_v34 = vadd.f32 %v9081_v40, %v9080_v5  ;;  %v5694_v57 = vadd.f32 %v11696_v9, %v11717_v17  ;;  %6827 = vmatpush1.bf16.msra.mxu0 %v9751_v58  ;;  %v4588_v7 = vld [vmem:[#allocation2 + $0xb4] sm:$0xe]  ;;  %v13119_v31 = vrot.slane %v11781_v32, 5 }
 0x340   : > { %v4732_v54 = vsel %vm10417_vm10, %v8343_v18, %v13114_v1  ;;  %13117 = vst [vmem:[#allocation25_spill] sm:$0xff] %v11874_v12  ;;  %v8969_v56 = vpop.f32.mrb[111].mxu0  ;;  %v4741_v19 = vrot.slane %v4590_v30, 5  ;;  %v4591_v25 = vld [vmem:[#allocation2 + $0xc0] sm:$0xe]  ;;  %v4748_v1 = vrot.slane %v4593_v49, 5  ;;  %v5697_v58 = vadd.f32 %v11696_v9, %v11724_v47 }
 0x341   : > { %v8359_v18 = vcombine.low %v4732_v54, %v11768_v52  ;;  %v4747_v22 = vrot.slane %v13119_v31, 4  ;;  %v11888_v5 = vadd.f32 %v8969_v56, %v8968_v55  ;;  %v4752_v52 = vrot.slane %v4595_v11, 5  ;;  %v4594_v54 = vld [vmem:[#allocation2 + $0xcc] sm:$0xe]  ;;  %v4596_v37 = vld [vmem:[#allocation2 + $0xd4] sm:$0x1] }
 0x342   : > { %9368 = vmatmul.mubr.bf16.gmra.mrb[196].mxu0 %v8358_v26  ;;  %v8344_v43 = vrot.slane %v4588_v7, 9  ;;  %v4742_v17 = vsel %vm10417_vm10, %v4740_v14, %v4741_v19  ;;  %v11895_v4 = vadd.f32 %v11713_v10, %v5694_v57  ;;  %v8345_v55 = vrot.slane %v4591_v25, 9  ;;  %v9756_v42 = vld [vmem:[#allocation10 + $0x6c] ss:$16 sps:$4 sm:$0xff]  }
 0x343   : > { %9371 = vmatprep.mubr.bf16.mxu0 %v8359_v18  ;;  %v9211_v40 = vpop.f32.mrb[144].mxu1  ;;  %v4749_v30 = vsel %vm10417_vm10, %v4747_v22, %v4748_v1  ;;  %v13121_v56 = vrot.slane %v11750_v3, 5  ;;  %v8346_v7 = vrot.slane %v4594_v54, 9  ;;  %v4754_v31 = vrot.slane %v4752_v52, 4  ;;  %6828 = vmatprep.subr.bf16.mxu0 %v9756_v42 }
 0x344   : > { %v9212_v26 = vpop.f32.mrb[145].mxu1  ;;  %13120 = vst [vmem:[#allocation26_spill] sm:$0xff] %v11895_v4  ;;  %v4755_v47 = vrot.slane %v4596_v37, 5  ;;  %v13122_v57 = vrot.slane %v11781_v32, 5  ;;  %v9754_v4 = vld [vmem:[#allocation10 + $0x68] ss:$16 sps:$4 sm:$0xff]   ;;  %v11912_v54 = vadd.f32 %v11721_v50, %v5697_v58  ;;  %v5702_v50 = vadd.f32 %v11696_v9, %v11747_v39 }
 0x345   : > { %v9099_v11 = vpop.f32.mrb[112].mxu0  ;;  %v11899_v18 = vadd.f32 %v9212_v26, %v9211_v40  ;;  %v9214_v49 = vpop.f32.mrb[146].mxu1  ;;  %v4739_v14 = vsel %vm10417_vm10, %v8344_v43, %v13121_v56  ;;  %v13123_v37 = vld [vmem:[#allocation30_spill] sm:$0xff]  ;;  %v4753_v32 = vsel %vm10417_vm10, %v8346_v7, %v4752_v52  ;;  %6829 = vmatpush1.bf16.msra.mxu0 %v9754_v4 }
 0x346   : > { %v9100_v19 = vpop.f32.mrb[113].mxu0  ;;  %v9215_v12 = vpop.f32.mrb[147].mxu1  ;;  %v8360_v10 = vcombine.low %v4739_v14, %v4742_v17  ;;  %v4746_v22 = vsel %vm10417_vm10, %v8345_v55, %v13122_v57  ;;  %v13124_v55 = vld [vmem:[#allocation31_spill] sm:$0xff]  ;;  %v11933_v7 = vadd.f32 %v11745_v27, %v5702_v50 }
 0x347   : > { %v9101_v25 = vadd.f32 %v9100_v19, %v9099_v11  ;;  %v9102_v1 = vpop.f32.mrb[114].mxu0  ;;  %v11909_v40 = vadd.f32 %v9215_v12, %v9214_v49  ;;  %v8361_v26 = vcombine.low %v4746_v22, %v4749_v30  ;;  %v4756_v12 = vsel %vm10417_vm10, %v4754_v31, %v4755_v47 }
 0x348   : > { %v9103_v3 = vpop.f32.mrb[115].mxu0  ;;  %v8362_v49 = vcombine.low %v4753_v32, %v4756_v12  ;;  %v13125_v47 = vmov 0  }
 0x349   : > { %v11915_v43 = vadd.f32 %v9101_v25, %v13123_v37  ;;  %v9104_v17 = vadd.f32 %v9103_v3, %v9102_v1  ;;  %v9757_v1 = vld [vmem:[#allocation10 + $0xc0] ss:$16 sps:$4 sm:$0xff]   ;;  %v11940_v3 = vadd.f32 %v11752_v62, %v5705_v20  ;;  %v9760_v37 = vld [vmem:[#allocation10 + $0x88] ss:$16 sps:$4 sm:$0xff]  }
 0x34a   : > { %9372 = vmatmul.mubr.bf16.gmra.mrb[200].mxu0 %v8360_v10 }
 0x34b   : > { %9375 = vmatprep.mubr.bf16.mxu0 %v8361_v26  ;;  %v11922_v30 = vadd.f32 %v9104_v17, %v13124_v55  ;;  %v9217_v11 = vpop.f32.mrb[148].mxu1  ;;  %v9759_v26 = vld [vmem:[#allocation10 + $0xc4] ss:$16 sps:$4 sm:$0xff]   ;;  %v9762_v17 = vld [vmem:[#allocation10 + $0x8c] ss:$16 sps:$4 sm:$0xff]  }
 0x34c   : > { %v9218_v58 = vpop.f32.mrb[149].mxu1  ;;  %6641 = vmatprep.subr.bf16.mxu1 %v9759_v26  ;;  %6830 = vmatprep.subr.bf16.mxu0 %v9762_v17 }
 0x34d   : > { %v11926_v56 = vadd.f32 %v9218_v58, %v9217_v11  ;;  %v9220_v14 = vpop.f32.mrb[150].mxu1  ;;  %6642 = vmatpush1.bf16.msra.mxu1 %v9757_v1  ;;  %6831 = vmatpush1.bf16.msra.mxu0 %v9760_v37 }
 0x34e   : > { %v9221_v19 = vpop.f32.mrb[151].mxu1 }
 0x34f   : > { %v9105_v10 = vpop.f32.mrb[116].mxu0  ;;  %v11928_v52 = vadd.f32 %v9221_v19, %v9220_v14 }
 0x350   : > { %v9106_v42 = vpop.f32.mrb[117].mxu0 }
 0x351   : > { %v9107_v4 = vadd.f32 %v9106_v42, %v9105_v10  ;;  %v9108_v31 = vpop.f32.mrb[118].mxu0 }
 0x352   : > { %9376 = vmatmul.mubr.bf16.gmra.mrb[204].mxu0 %v8362_v49  ;;  %v9109_v39 = vpop.f32.mrb[119].mxu0 }
 0x353   : > { %6854 = vmatprep.mubr.bf16.mxu0 %v13125_v47  ;;  %v11937_v57 = vadd.f32 %v9107_v4, %v11764_v63  ;;  %v9110_v22 = vadd.f32 %v9109_v39, %v9108_v31  ;;  %v5710_v63 = vadd.f32 %v11696_v9, %v11770_v53  ;;  %v5718_v4 = vadd.f32 %v11696_v9, %v11877_v21 }
 0x354   : > { %v9223_v25 = vpop.f32.mrb[152].mxu1 }
 0x355   : > { %v11943_v13 = vadd.f32 %v9110_v22, %v11776_v16  ;;  %v9224_v27 = vpop.f32.mrb[153].mxu1  ;;  %v5713_v16 = vadd.f32 %v11696_v9, %v11793_v28  ;;  %v11954_v14 = vadd.f32 %v11760_v38, %v5710_v63  ;;  %v9763_v22 = vld [vmem:[#allocation10 + $0xa8] ss:$16 sps:$4 sm:$0xff]  }
 0x356   : > { %v11945_v32 = vadd.f32 %v9224_v27, %v9223_v25  ;;  %v9226_v12 = vpop.f32.mrb[154].mxu1  ;;  %v9765_v25 = vld [vmem:[#allocation10 + $0xac] ss:$16 sps:$4 sm:$0xff]  }
 0x357   : > { %v9227_v55 = vpop.f32.mrb[155].mxu1  ;;  %v11965_v38 = vadd.f32 %v11772_v35, %v5713_v16  ;;  %6832 = vmatprep.subr.bf16.mxu0 %v9765_v25  ;;  %v5721_v35 = vadd.f32 %v11696_v9, %v11888_v5  ;;  %v9771_v25 = vld [vmem:[#allocation10 + $0xcc] ss:$16 sps:$4 sm:$0xff]  }
 0x358   : > { %v11949_v11 = vadd.f32 %v9227_v55, %v9226_v12  ;;  %6833 = vmatpush1.bf16.msra.mxu0 %v9763_v22  ;;  %v9769_v22 = vld [vmem:[#allocation10 + $0xc8] ss:$16 sps:$4 sm:$0xff]  }
 0x359   : > { %6834 = vmatprep.subr.bf16.mxu0 %v9771_v25 }
 0x35a   : > { %v9111_v62 = vpop.f32.mrb[120].mxu0 }
 0x35b   : > { %v9112_v50 = vpop.f32.mrb[121].mxu0 }
 0x35c   : > { %v9113_v58 = vadd.f32 %v9112_v50, %v9111_v62  ;;  %v9114_v49 = vpop.f32.mrb[122].mxu0  ;;  %6835 = vmatpush1.bf16.msra.mxu0 %v9769_v22 }
 0x35d   : > { %v9115_v19 = vpop.f32.mrb[123].mxu0 }
 0x35e   : > { %v11957_v10 = vadd.f32 %v9113_v58, %v11785_v60  ;;  %v9116_v20 = vadd.f32 %v9115_v19, %v9114_v49  ;;  %v9229_v42 = vpop.f32.mrb[156].mxu1  ;;  %v11968_v60 = vadd.f32 %v11848_v51, %v5718_v4  ;;  %v11975_v4 = vadd.f32 %v11879_v34, %v5721_v35 }
 0x35f   : > { %v9230_v53 = vpop.f32.mrb[157].mxu1  ;;  %v11984_v34 = vadd.f32 %v11899_v18, %v11915_v43 }
 0x360   : > { %v11962_v31 = vadd.f32 %v9116_v20, %v11789_v24  ;;  %v9231_v39 = vadd.f32 %v9230_v53, %v9229_v42  ;;  %v9232_v28 = vpop.f32.mrb[158].mxu1  ;;  %v9766_v42 = vld [vmem:[#allocation10 + $0xe0] ss:$16 sps:$4 sm:$0xff]   ;;  %v9768_v53 = vld [vmem:[#allocation10 + $0xe4] ss:$16 sps:$4 sm:$0xff]   ;;  %v11999_v43 = vadd.f32 %v11945_v32, %v11957_v10 }
 0x361   : > { %v9233_v1 = vpop.f32.mrb[159].mxu1  ;;  %6643 = vmatprep.subr.bf16.mxu1 %v9768_v53 }
 0x362   : > { %v9234_v26 = vadd.f32 %v9233_v1, %v9232_v28  ;;  %6644 = vmatpush1.bf16.msra.mxu1 %v9766_v42 }
 0x365   : > { %v9117_v27 = vpop.f32.mrb[124].mxu0 }
 0x366   : > { %v9118_v37 = vpop.f32.mrb[125].mxu0 }
 0x367   : > { %v9119_v21 = vadd.f32 %v9118_v37, %v9117_v27  ;;  %v9120_v17 = vpop.f32.mrb[126].mxu0  ;;  %v11980_v27 = vadd.f32 %v11926_v56, %v11937_v57  ;;  %v11988_v37 = vadd.f32 %v11928_v52, %v11943_v13 }
 0x368   : > { %v9121_v24 = vpop.f32.mrb[127].mxu0  ;;  %v9235_v12 = vpop.f32.mrb[160].mxu1 }
 0x369   : > { %v5944_v55 = vadd.f32 %v9119_v21, %v11797_v15  ;;  %v9122_v63 = vadd.f32 %v9121_v24, %v9120_v17  ;;  %v9236_v62 = vpop.f32.mrb[161].mxu1  ;;  %v9772_v17 = vld [vmem:[#allocation10 + $0xe8] ss:$16 sps:$4 sm:$0xff]   ;;  %v9774_v24 = vld [vmem:[#allocation10 + $0xec] ss:$16 sps:$4 sm:$0xff]  }
 0x36a   : > { %v9237_v50 = vadd.f32 %v9236_v62, %v9235_v12  ;;  %v9238_v16 = vpop.f32.mrb[162].mxu1  ;;  %v11993_v12 = vadd.f32 %v11909_v40, %v11922_v30  ;;  %6836 = vmatprep.subr.bf16.mxu0 %v9774_v24  ;;  %v12005_v30 = vadd.f32 %v11949_v11, %v11962_v31 }
 0x36b   : > { %v5947_v58 = vadd.f32 %v9122_v63, %v11801_v33  ;;  %v9239_v49 = vpop.f32.mrb[163].mxu1  ;;  %v11995_v57 = vadd.f32 %v9231_v39, %v5944_v55  ;;  %6837 = vmatpush1.bf16.msra.mxu0 %v9772_v17 }
 0x36c   : > { %v9240_v51 = vadd.f32 %v9239_v49, %v9238_v16 }
 0x36d   : > { %v9123_v19 = vpop.f32.mrb[128].mxu0  ;;  %v12001_v52 = vadd.f32 %v9234_v26, %v5947_v58 }
 0x36e   : > { %v9124_v20 = vpop.f32.mrb[129].mxu0 }
 0x36f   : > { %v9125_v28 = vadd.f32 %v9124_v20, %v9123_v19  ;;  %v9126_v15 = vpop.f32.mrb[130].mxu0 }
 0x370   : > { %v9127_v1 = vpop.f32.mrb[131].mxu0 }
 0x371   : > { %v5952_v9 = vadd.f32 %v9125_v28, %v11805_v23  ;;  %v9128_v5 = vadd.f32 %v9127_v1, %v9126_v15 }
 0x372   : > { %v9241_v33 = vpop.f32.mrb[164].mxu1 }
 0x373   : > { %v5955_v21 = vadd.f32 %v9128_v5, %v11809_v29  ;;  %v9242_v23 = vpop.f32.mrb[165].mxu1  ;;  %v12011_v58 = vadd.f32 %v9237_v50, %v5952_v9 }
 0x374   : > { %v9243_v63 = vadd.f32 %v9242_v23, %v9241_v33  ;;  %v9244_v56 = vpop.f32.mrb[166].mxu1 }
 0x375   : > { %v9245_v62 = vpop.f32.mrb[167].mxu1  ;;  %v12015_v31 = vadd.f32 %v9240_v51, %v5955_v21 }
 0x376   : > { %v9246_v18 = vadd.f32 %v9245_v62, %v9244_v56 }
 0x378   : > { %v9129_v29 = vpop.f32.mrb[132].mxu0 }
 0x379   : > { %v9130_v13 = vpop.f32.mrb[133].mxu0 }
 0x37a   : > { %v9131_v35 = vadd.f32 %v9130_v13, %v9129_v29  ;;  %v9132_v16 = vpop.f32.mrb[134].mxu0 }
 0x37b   : > { %v9133_v40 = vpop.f32.mrb[135].mxu0 }
 0x37c   : > { %v5960_v39 = vadd.f32 %v9131_v35, %v11813_v61  ;;  %v9134_v55 = vadd.f32 %v9133_v40, %v9132_v16 }
 0x37d   : > { %v9247_v49 = vpop.f32.mrb[168].mxu1 }
 0x37e   : > { %v5963_v19 = vadd.f32 %v9134_v55, %v11817_v45  ;;  %v9248_v20 = vpop.f32.mrb[169].mxu1  ;;  %v12009_v32 = vadd.f32 %v9243_v63, %v5960_v39 }
 0x37f   : > { %v9249_v10 = vadd.f32 %v9248_v20, %v9247_v49  ;;  %v9250_v26 = vpop.f32.mrb[170].mxu1 }
 0x380   : > { %v9251_v42 = vpop.f32.mrb[171].mxu1  ;;  %v12013_v53 = vadd.f32 %v9246_v18, %v5963_v19 }
 0x381   : > { %v9252_v28 = vadd.f32 %v9251_v42, %v9250_v26 }
 0x382   : > { %v9135_v15 = vpop.f32.mrb[136].mxu0 }
 0x383   : > { %v9136_v11 = vpop.f32.mrb[137].mxu0 }
 0x384   : > { %v9137_v61 = vadd.f32 %v9136_v11, %v9135_v15  ;;  %v9138_v22 = vpop.f32.mrb[138].mxu0 }
 0x385   : > { %v9139_v25 = vpop.f32.mrb[139].mxu0 }
 0x386   : > { %v5968_v45 = vadd.f32 %v9137_v61, %v11822_v2  ;;  %v9140_v1 = vadd.f32 %v9139_v25, %v9138_v22 }
 0x387   : > { %v9253_v5 = vpop.f32.mrb[172].mxu1 }
 0x388   : > { %v5971_v33 = vadd.f32 %v9140_v1, %v11826_v6  ;;  %v9254_v23 = vpop.f32.mrb[173].mxu1  ;;  %v12019_v50 = vadd.f32 %v9249_v10, %v5968_v45 }
 0x389   : > { %v9255_v9 = vadd.f32 %v9254_v23, %v9253_v5  ;;  %v9256_v17 = vpop.f32.mrb[174].mxu1 }
 0x38a   : > { %v9257_v24 = vpop.f32.mrb[175].mxu1  ;;  %v12021_v56 = vadd.f32 %v9252_v28, %v5971_v33 }
 0x38b   : > { %v9258_v63 = vadd.f32 %v9257_v24, %v9256_v17 }
 0x38c   : > { %v9141_v51 = vpop.f32.mrb[140].mxu0 }
 0x38d   : > { %v9142_v21 = vpop.f32.mrb[141].mxu0 }
 0x38e   : > { %v9143_v62 = vadd.f32 %v9142_v21, %v9141_v51  ;;  %v9144_v18 = vpop.f32.mrb[142].mxu0 }
 0x38f   : > { %v9145_v29 = vpop.f32.mrb[143].mxu0 }
 0x390   : > { %v5976_v2 = vadd.f32 %v9143_v62, %v11830_v46  ;;  %v9146_v13 = vadd.f32 %v9145_v29, %v9144_v18 }
 0x391   : > { %v9259_v35 = vpop.f32.mrb[176].mxu1 }
 0x392   : > { %v5979_v6 = vadd.f32 %v9146_v13, %v11834_v48  ;;  %v9260_v16 = vpop.f32.mrb[177].mxu1  ;;  %v12025_v40 = vadd.f32 %v9255_v9, %v5976_v2 }
 0x393   : > { %v9261_v39 = vadd.f32 %v9260_v16, %v9259_v35  ;;  %v9262_v55 = vpop.f32.mrb[178].mxu1 }
 0x394   : > { %v9263_v49 = vpop.f32.mrb[179].mxu1  ;;  %v12027_v19 = vadd.f32 %v9258_v63, %v5979_v6 }
 0x395   : > { %v9264_v20 = vadd.f32 %v9263_v49, %v9262_v55 }
 0x397   : > { %v9147_v10 = vpop.f32.mrb[144].mxu0 }
 0x398   : > { %v9148_v26 = vpop.f32.mrb[145].mxu0 }
 0x399   : > { %v9149_v42 = vadd.f32 %v9148_v26, %v9147_v10  ;;  %v9150_v28 = vpop.f32.mrb[146].mxu0 }
 0x39a   : > { %v9151_v15 = vpop.f32.mrb[147].mxu0 }
 0x39b   : > { %v5984_v46 = vadd.f32 %v9149_v42, %v11838_v41  ;;  %v9152_v11 = vadd.f32 %v9151_v15, %v9150_v28  ;;  %v9265_v61 = vpop.f32.mrb[180].mxu1 }
 0x39c   : > { %v9266_v22 = vpop.f32.mrb[181].mxu1 }
 0x39d   : > { %v5987_v48 = vadd.f32 %v9152_v11, %v11842_v44  ;;  %v9267_v25 = vadd.f32 %v9266_v22, %v9265_v61  ;;  %v9268_v45 = vpop.f32.mrb[182].mxu1  ;;  %v12031_v1 = vadd.f32 %v9261_v39, %v5984_v46 }
 0x39e   : > { %v9269_v5 = vpop.f32.mrb[183].mxu1 }
 0x39f   : > { %v9270_v33 = vadd.f32 %v9269_v5, %v9268_v45  ;;  %v12033_v23 = vadd.f32 %v9264_v20, %v5987_v48 }
 0x3a2   : > { %v9153_v9 = vpop.f32.mrb[148].mxu0 }
 0x3a3   : > { %v9154_v17 = vpop.f32.mrb[149].mxu0 }
 0x3a4   : > { %v9155_v24 = vadd.f32 %v9154_v17, %v9153_v9  ;;  %v9156_v63 = vpop.f32.mrb[150].mxu0  ;;  %v13126_v17 = vld [vmem:[#allocation22_spill] sm:$0xff] }
 0x3a5   : > { %v9157_v51 = vpop.f32.mrb[151].mxu0 }
 0x3a6   : > { %v5992_v41 = vadd.f32 %v9155_v24, %v11846_v0  ;;  %v9158_v21 = vadd.f32 %v9157_v51, %v9156_v63 }
 0x3a7   : > { %v9271_v62 = vpop.f32.mrb[184].mxu1 }
 0x3a8   : > { %v5995_v18 = vadd.f32 %v9158_v21, %v11852_v36  ;;  %v9272_v44 = vpop.f32.mrb[185].mxu1  ;;  %v12037_v29 = vadd.f32 %v9267_v25, %v5992_v41  ;;  %v13127_v41 = vld [vmem:[#allocation25_spill] sm:$0xff] }
 0x3a9   : > { %v9273_v2 = vadd.f32 %v9272_v44, %v9271_v62  ;;  %v9274_v13 = vpop.f32.mrb[186].mxu1 }
 0x3aa   : > { %v9275_v35 = vpop.f32.mrb[187].mxu1  ;;  %v12039_v6 = vadd.f32 %v9270_v33, %v5995_v18 }
 0x3ab   : > { %v9276_v16 = vadd.f32 %v9275_v35, %v9274_v13 }
 0x3ad   : > { %v9159_v39 = vpop.f32.mrb[152].mxu0 }
 0x3ae   : > { %v9160_v55 = vpop.f32.mrb[153].mxu0 }
 0x3af   : > { %v9161_v49 = vadd.f32 %v9160_v55, %v9159_v39  ;;  %v9162_v20 = vpop.f32.mrb[154].mxu0 }
 0x3b0   : > { %v9163_v10 = vpop.f32.mrb[155].mxu0 }
 0x3b1   : > { %v6000_v0 = vadd.f32 %v9161_v49, %v11855_v59  ;;  %v9164_v26 = vadd.f32 %v9163_v10, %v9162_v20  ;;  %v9277_v42 = vpop.f32.mrb[188].mxu1  ;;  %v13128_v20 = vld [vmem:[#allocation26_spill] sm:$0xff] }
 0x3b2   : > { %v9278_v28 = vpop.f32.mrb[189].mxu1 }
 0x3b3   : > { %v6003_v36 = vadd.f32 %v9164_v26, %v11858_v8  ;;  %v9279_v15 = vadd.f32 %v9278_v28, %v9277_v42  ;;  %v9280_v46 = vpop.f32.mrb[190].mxu1  ;;  %v12043_v11 = vadd.f32 %v9273_v2, %v6000_v0 }
 0x3b4   : > { %v9281_v61 = vpop.f32.mrb[191].mxu1 }
 0x3b5   : > { %v9282_v22 = vadd.f32 %v9281_v61, %v9280_v46  ;;  %v12045_v48 = vadd.f32 %v9276_v16, %v6003_v36 }
 0x3b9   : > { %v9165_v25 = vpop.f32.mrb[156].mxu0 }
 0x3ba   : > { %v9166_v45 = vpop.f32.mrb[157].mxu0 }
 0x3bb   : > { %v9167_v5 = vadd.f32 %v9166_v45, %v9165_v25  ;;  %v9168_v33 = vpop.f32.mrb[158].mxu0 }
 0x3bc   : > { %v9169_v9 = vpop.f32.mrb[159].mxu0  ;;  %v9283_v63 = vpop.f32.mrb[192].mxu1 }
 0x3bd   : > { %v6008_v59 = vadd.f32 %v9167_v5, %v13126_v17  ;;  %v9170_v24 = vadd.f32 %v9169_v9, %v9168_v33  ;;  %v9284_v51 = vpop.f32.mrb[193].mxu1 }
 0x3be   : > { %v9285_v21 = vadd.f32 %v9284_v51, %v9283_v63  ;;  %v9286_v62 = vpop.f32.mrb[194].mxu1 }
 0x3bf   : > { %v6011_v8 = vadd.f32 %v9170_v24, %v13127_v41  ;;  %v12049_v18 = vadd.f32 %v9279_v15, %v6008_v59  ;;  %v9287_v44 = vpop.f32.mrb[195].mxu1 }
 0x3c0   : > { %v9288_v2 = vadd.f32 %v9287_v44, %v9286_v62 }
 0x3c1   : > { %v12051_v13 = vadd.f32 %v9282_v22, %v6011_v8 }
 0x3c4   : > { %v9171_v35 = vpop.f32.mrb[160].mxu0 }
 0x3c5   : > { %v9172_v16 = vpop.f32.mrb[161].mxu0 }
 0x3c6   : > { %v9173_v39 = vadd.f32 %v9172_v16, %v9171_v35  ;;  %v9174_v55 = vpop.f32.mrb[162].mxu0 }
 0x3c7   : > { %v9175_v49 = vpop.f32.mrb[163].mxu0 }
 0x3c8   : > { %v6016_v10 = vadd.f32 %v9173_v39, %v13128_v20  ;;  %v9176_v0 = vadd.f32 %v9175_v49, %v9174_v55  ;;  %v9289_v26 = vpop.f32.mrb[196].mxu1 }
 0x3c9   : > { %v9290_v42 = vpop.f32.mrb[197].mxu1 }
 0x3ca   : > { %v6019_v28 = vadd.f32 %v9176_v0, %v11912_v54  ;;  %v9291_v36 = vadd.f32 %v9290_v42, %v9289_v26  ;;  %v9292_v46 = vpop.f32.mrb[198].mxu1  ;;  %v12055_v15 = vadd.f32 %v9285_v21, %v6016_v10 }
 0x3cb   : > { %v9293_v61 = vpop.f32.mrb[199].mxu1 }
 0x3cc   : > { %v9294_v25 = vadd.f32 %v9293_v61, %v9292_v46  ;;  %v12057_v22 = vadd.f32 %v9288_v2, %v6019_v28 }
 0x3cf   : > { %v9177_v45 = vpop.f32.mrb[164].mxu0 }
 0x3d0   : > { %v9178_v5 = vpop.f32.mrb[165].mxu0 }
 0x3d1   : > { %v9179_v33 = vadd.f32 %v9178_v5, %v9177_v45  ;;  %v9180_v9 = vpop.f32.mrb[166].mxu0 }
 0x3d2   : > { %v9181_v17 = vpop.f32.mrb[167].mxu0 }
 0x3d3   : > { %v9295_v59 = vpop.f32.mrb[200].mxu1  ;;  %v6024_v24 = vadd.f32 %v9179_v33, %v11933_v7  ;;  %v9182_v63 = vadd.f32 %v9181_v17, %v9180_v9 }
 0x3d4   : > { %v9296_v51 = vpop.f32.mrb[201].mxu1 }
 0x3d5   : > { %v9297_v41 = vadd.f32 %v9296_v51, %v9295_v59  ;;  %v9298_v54 = vpop.f32.mrb[202].mxu1  ;;  %v6027_v8 = vadd.f32 %v9182_v63, %v11940_v3  ;;  %v12061_v62 = vadd.f32 %v9291_v36, %v6024_v24 }
 0x3d6   : > { %v9299_v21 = vpop.f32.mrb[203].mxu1 }
 0x3d7   : > { %v9300_v44 = vadd.f32 %v9299_v21, %v9298_v54  ;;  %v12063_v2 = vadd.f32 %v9294_v25, %v6027_v8 }
 0x3dd   : > { %v9183_v35 = vpop.f32.mrb[168].mxu0 }
 0x3de   : > { %v9184_v16 = vpop.f32.mrb[169].mxu0 }
 0x3df   : > { %v9185_v39 = vadd.f32 %v9184_v16, %v9183_v35  ;;  %v9186_v55 = vpop.f32.mrb[170].mxu0 }
 0x3e0   : > { %v9187_v49 = vpop.f32.mrb[171].mxu0 }
 0x3e1   : > { %v6032_v20 = vadd.f32 %v9185_v39, %v11954_v14  ;;  %v9188_v7 = vadd.f32 %v9187_v49, %v9186_v55 }
 0x3e3   : > { %v6035_v10 = vadd.f32 %v9188_v7, %v11965_v38  ;;  %v12067_v0 = vadd.f32 %v9297_v41, %v6032_v20 }
 0x3e5   : > { %v9189_v26 = vpop.f32.mrb[172].mxu0  ;;  %v12069_v3 = vadd.f32 %v9300_v44, %v6035_v10 }
 0x3e6   : > { %v9190_v42 = vpop.f32.mrb[173].mxu0 }
 0x3e7   : > { %v9191_v28 = vadd.f32 %v9190_v42, %v9189_v26  ;;  %v9192_v36 = vpop.f32.mrb[174].mxu0 }
 0x3e8   : > { %v9193_v46 = vpop.f32.mrb[175].mxu0 }
 0x3e9   : > { %v6040_v61 = vadd.f32 %v9191_v28, %v11968_v60  ;;  %v9194_v25 = vadd.f32 %v9193_v46, %v9192_v36 }
 0x3eb   : > { %v6043_v45 = vadd.f32 %v9194_v25, %v11975_v4 }
 0x3ed   : > { %v9349_v5 = vpop.f32.mrb[176].mxu0 }
 0x3ee   : > { %v6250_v14 = vadd.f32 %v9349_v5, %v11980_v27  ;;  %v6241_v33 = vpop.f32.mrb[177].mxu0 }
 0x3ef   : > { %v9301_v9 = vpop.f32.mrb[204].mxu1  ;;  %v6242_v38 = vadd.f32 %v6241_v33, %v11984_v34  ;;  %v9350_v17 = vpop.f32.mrb[178].mxu0 }
 0x3f0   : > { %v9302_v59 = vpop.f32.mrb[205].mxu1  ;;  %v6253_v24 = vadd.f32 %v9350_v17, %v11988_v37  ;;  %v6244_v63 = vpop.f32.mrb[179].mxu0  ;;  %v6370_v8 = vmax.f32 %v6250_v14, 0.0 }
 0x3f1   : > { %v9303_v51 = vadd.f32 %v9302_v59, %v9301_v9  ;;  %v9304_v41 = vpop.f32.mrb[206].mxu1  ;;  %v6245_v54 = vadd.f32 %v6244_v63, %v11993_v12  ;;  %v6368_v44 = vmax.f32 %v6242_v38, 0.0 }
 0x3f2   : > { %v9305_v60 = vpop.f32.mrb[207].mxu1  ;;  %v6371_v21 = vmax.f32 %v6253_v24, 0.0 }
 0x3f3   : > { %v9306_v4 = vadd.f32 %v9305_v60, %v9304_v41  ;;  %v6369_v35 = vmax.f32 %v6245_v54, 0.0  ;;  %v12077_v27 = vadd.f32 %v9303_v51, %v6040_v61 }
 0x3f4   : > { %v6401_v16 = vpack.c.bf16 %v6371_v21, %v6370_v8 }
 0x3f5   : > { %v6400_v39 = vpack.c.bf16 %v6369_v35, %v6368_v44  ;;  %v9353_v34 = vpop.f32.mrb[180].mxu0  ;;  %v12079_v55 = vadd.f32 %v9306_v4, %v6043_v45 }
 0x3f6   : > { %v6266_v37 = vadd.f32 %v9353_v34, %v11995_v57  ;;  %v6257_v49 = vpop.f32.mrb[181].mxu0 }
 0x3f7   : > { %v6258_v20 = vadd.f32 %v6257_v49, %v11999_v43  ;;  %v9354_v7 = vpop.f32.mrb[182].mxu0  ;;  %6662 = vmatmul.mubr.bf16.vlgmr.msra.gmra.mrb[208].mxu1 %v6400_v39  ;;  %6855 = vmatmul.mubr.bf16.vlgmr.msra.gmra.mrb[208].mxu0 %v6400_v39 }
 0x3f8   : > { %v6269_v12 = vadd.f32 %v9354_v7, %v12001_v52  ;;  %v6260_v10 = vpop.f32.mrb[183].mxu0  ;;  %6671 = vmatprep.mubr.bf16.mxu1 %v13125_v47  ;;  %6864 = vmatprep.mubr.bf16.mxu0 %v13125_v47  ;;  %v6374_v42 = vmax.f32 %v6266_v37, 0.0 }
 0x3f9   : > { %v6261_v26 = vadd.f32 %v6260_v10, %v12005_v30  ;;  %v6372_v36 = vmax.f32 %v6258_v20, 0.0 }
 0x3fa   : > { %v6375_v28 = vmax.f32 %v6269_v12, 0.0 }
 0x3fb   : > { %v6373_v46 = vmax.f32 %v6261_v26, 0.0 }
 0x3fc   : > { %v6403_v57 = vpack.c.bf16 %v6375_v28, %v6374_v42 }
 0x3fd   : > { %v6402_v61 = vpack.c.bf16 %v6373_v46, %v6372_v36  ;;  %v9357_v25 = vpop.f32.mrb[184].mxu0 }
 0x3fe   : > { %v6282_v43 = vadd.f32 %v9357_v25, %v12009_v32  ;;  %v6273_v45 = vpop.f32.mrb[185].mxu0 }
 0x3ff   : > { %v6274_v5 = vadd.f32 %v6273_v45, %v12011_v58  ;;  %v9358_v52 = vpop.f32.mrb[186].mxu0  ;;  %6672 = vmatmul.mubr.bf16.gmra.mrb[212].mxu1 %v6401_v16  ;;  %6865 = vmatmul.mubr.bf16.gmra.mrb[212].mxu0 %v6401_v16 }
 0x400   : > { %v6285_v14 = vadd.f32 %v9358_v52, %v12013_v53  ;;  %v6276_v33 = vpop.f32.mrb[187].mxu0  ;;  %6681 = vmatprep.mubr.bf16.mxu1 %v13125_v47  ;;  %6874 = vmatprep.mubr.bf16.mxu0 %v13125_v47  ;;  %v6378_v9 = vmax.f32 %v6282_v43, 0.0 }
 0x401   : > { %v6277_v30 = vadd.f32 %v6276_v33, %v12015_v31  ;;  %v6376_v17 = vmax.f32 %v6274_v5, 0.0 }
 0x402   : > { %v6379_v38 = vmax.f32 %v6285_v14, 0.0 }
 0x403   : > { %v6377_v59 = vmax.f32 %v6277_v30, 0.0 }
 0x404   : > { %v6405_v32 = vpack.c.bf16 %v6379_v38, %v6378_v9 }
 0x405   : > { %v6404_v24 = vpack.c.bf16 %v6377_v59, %v6376_v17  ;;  %v9361_v63 = vpop.f32.mrb[188].mxu0 }
 0x406   : > { %v6298_v58 = vadd.f32 %v9361_v63, %v12025_v40  ;;  %v6289_v51 = vpop.f32.mrb[189].mxu0 }
 0x407   : > { %v6290_v41 = vadd.f32 %v6289_v51, %v12019_v50  ;;  %v9362_v53 = vpop.f32.mrb[190].mxu0  ;;  %6682 = vmatmul.mubr.bf16.gmra.mrb[216].mxu1 %v6402_v61  ;;  %6875 = vmatmul.mubr.bf16.gmra.mrb[216].mxu0 %v6402_v61 }
 0x408   : > { %v6301_v54 = vadd.f32 %v9362_v53, %v12027_v19  ;;  %v6292_v60 = vpop.f32.mrb[191].mxu0  ;;  %6691 = vmatprep.mubr.bf16.mxu1 %v13125_v47  ;;  %6884 = vmatprep.mubr.bf16.mxu0 %v13125_v47  ;;  %v6382_v8 = vmax.f32 %v6298_v58, 0.0 }
 0x409   : > { %v6293_v31 = vadd.f32 %v6292_v60, %v12021_v56  ;;  %v6380_v4 = vmax.f32 %v6290_v41, 0.0 }
 0x40a   : > { %v6383_v21 = vmax.f32 %v6301_v54, 0.0 }
 0x40b   : > { %v6381_v44 = vmax.f32 %v6293_v31, 0.0 }
 0x40c   : > { %v12099_v40 = vpack.c.bf16 %v6383_v21, %v6382_v8 }
 0x40d   : > { %v6406_v35 = vpack.c.bf16 %v6381_v44, %v6380_v4  ;;  %v9365_v50 = vpop.f32.mrb[192].mxu0  ;;  %v464_v4 = vld [vmem:[%s12969_s6] sm:$0xf]  ;;  %v12151_v44 = vld [vmem:[%s10225_s15] sm:$0xff] }
 0x40e   : > { %v6314_v16 = vadd.f32 %v9365_v50, %v12037_v29  ;;  %v6305_v39 = vpop.f32.mrb[193].mxu0 }
 0x40f   : > { %v6306_v19 = vadd.f32 %v6305_v39, %v12031_v1  ;;  %v9366_v34 = vpop.f32.mrb[194].mxu0  ;;  %6692 = vmatmul.mubr.bf16.gmra.mrb[220].mxu1 %v6403_v57  ;;  %6885 = vmatmul.mubr.bf16.gmra.mrb[220].mxu0 %v6403_v57  ;;  %v12160_v39 = vld [vmem:[%s10225_s15 + $0x18] sm:$0xff] }
 0x410   : > { %v6317_v37 = vadd.f32 %v9366_v34, %v12039_v6  ;;  %v6308_v49 = vpop.f32.mrb[195].mxu0  ;;  %6701 = vmatprep.mubr.bf16.mxu1 %v13125_v47  ;;  %6894 = vmatprep.mubr.bf16.mxu0 %v13125_v47  ;;  %v6386_v20 = vmax.f32 %v6314_v16, 0.0  ;;  %v12157_v16 = vld [vmem:[%s10225_s15 + $0x10] sm:$0xff]  ;;  %v7079_v34 = vunpack.c.l.bf16 %v12151_v44 }
 0x411   : > { %v6309_v56 = vadd.f32 %v6308_v49, %v12033_v23  ;;  %v6384_v12 = vmax.f32 %v6306_v19, 0.0  ;;  %v7080_v49 = vunpack.c.h.bf16 %v12151_v44 }
 0x412   : > { %v6387_v7 = vmax.f32 %v6317_v37, 0.0 }
 0x413   : > { %v6385_v10 = vmax.f32 %v6309_v56, 0.0  ;;  %v12168_v56 = vld [vmem:[%s10225_s15 + $0x20] sm:$0xff] }
 0x414   : > { %v12107_v29 = vpack.c.bf16 %v6387_v7, %v6386_v20  ;;  %v12171_v20 = vld [vmem:[%s10225_s15 + $0x28] sm:$0xff] }
 0x415   : > { %v6408_v26 = vpack.c.bf16 %v6385_v10, %v6384_v12  ;;  %v9369_v1 = vpop.f32.mrb[196].mxu0 }
 0x416   : > { %v6330_v42 = vadd.f32 %v9369_v1, %v12049_v18  ;;  %v6321_v28 = vpop.f32.mrb[197].mxu0  ;;  %v12183_v1 = vld [vmem:[%s10225_s15 + $0x38] sm:$0xff] }
 0x417   : > { %v6322_v6 = vadd.f32 %v6321_v28, %v12043_v11  ;;  %v9370_v36 = vpop.f32.mrb[198].mxu0  ;;  %6702 = vmatmul.mubr.bf16.gmra.mrb[224].mxu1 %v6404_v24  ;;  %6895 = vmatmul.mubr.bf16.gmra.mrb[224].mxu0 %v6404_v24  ;;  %v7085_v28 = vunpack.c.l.bf16 %v12160_v39 }
 0x418   : > { %v6333_v46 = vadd.f32 %v9370_v36, %v12051_v13  ;;  %v6324_v57 = vpop.f32.mrb[199].mxu0  ;;  %6711 = vmatprep.mubr.bf16.mxu1 %v13125_v47  ;;  %6904 = vmatprep.mubr.bf16.mxu0 %v13125_v47  ;;  %v6390_v61 = vmax.f32 %v6330_v42, 0.0  ;;  %v7086_v36 = vunpack.c.h.bf16 %v12160_v39 }
 0x419   : > { %v6325_v23 = vadd.f32 %v6324_v57, %v12045_v48  ;;  %v6388_v43 = vmax.f32 %v6322_v6, 0.0  ;;  %v7084_v6 = vunpack.c.h.bf16 %v12157_v16  ;;  %v12194_v57 = vld [vmem:[%s10225_s15 + $0x48] sm:$0xff] }
 0x41a   : > { %v6391_v25 = vmax.f32 %v6333_v46, 0.0  ;;  %v12191_v46 = vld [vmem:[%s10225_s15 + $0x40] sm:$0xff] }
 0x41b   : > { %v6389_v45 = vmax.f32 %v6325_v23, 0.0  ;;  %v7087_v23 = vunpack.c.l.bf16 %v12168_v56 }
 0x41c   : > { %v6411_v18 = vpack.c.bf16 %v6391_v25, %v6390_v61  ;;  %v7089_v61 = vunpack.c.l.bf16 %v12171_v20 }
 0x41d   : > { %v6410_v5 = vpack.c.bf16 %v6389_v45, %v6388_v43  ;;  %v9373_v52 = vpop.f32.mrb[200].mxu0  ;;  %v12201_v45 = vld [vmem:[%s10225_s15 + $0x50] sm:$0xff] }
 0x41e   : > { %v6346_v11 = vadd.f32 %v9373_v52, %v12061_v62  ;;  %v6337_v14 = vpop.f32.mrb[201].mxu0 }
 0x41f   : > { %v6338_v33 = vadd.f32 %v6337_v14, %v12055_v15  ;;  %v9374_v13 = vpop.f32.mrb[202].mxu0  ;;  %6712 = vmatmul.mubr.bf16.gmra.mrb[228].mxu1 %v6405_v32  ;;  %6905 = vmatmul.mubr.bf16.gmra.mrb[228].mxu0 %v6405_v32 }
 0x420   : > { %v6349_v30 = vadd.f32 %v9374_v13, %v12063_v2  ;;  %v6340_v9 = vpop.f32.mrb[203].mxu0  ;;  %6721 = vmatprep.mubr.bf16.mxu1 %v13125_v47  ;;  %6914 = vmatprep.mubr.bf16.mxu0 %v13125_v47  ;;  %v6394_v38 = vmax.f32 %v6346_v11, 0.0  ;;  %v12214_v13 = vld [vmem:[%s10225_s15 + $0x68] sm:$0xff] }
 0x421   : > { %v6341_v48 = vadd.f32 %v6340_v9, %v12057_v22  ;;  %v6392_v59 = vmax.f32 %v6338_v33, 0.0  ;;  %v12211_v33 = vld [vmem:[%s10225_s15 + $0x60] sm:$0xff] }
 0x422   : > { %v6395_v17 = vmax.f32 %v6349_v30, 0.0 }
 0x423   : > { %v6393_v24 = vmax.f32 %v6341_v48, 0.0  ;;  %v12318_v48 = vld [vmem:[%s10225_s15 + $0x108] sm:$0xff] }
 0x424   : > { %v6413_v62 = vpack.c.bf16 %v6395_v17, %v6394_v38  ;;  %v12221_v17 = vld [vmem:[%s10225_s15 + $0x70] sm:$0xff]  ;;  %v12311_v38 = vld [vmem:[%s10225_s15 + $0x100] sm:$0xff] }
 0x425   : > { %v6412_v63 = vpack.c.bf16 %v6393_v24, %v6392_v59  ;;  %v9377_v58 = vpop.f32.mrb[204].mxu0  ;;  %v12224_v59 = vld [vmem:[%s10225_s15 + $0x78] sm:$0xff] }
 0x426   : > { %v6362_v15 = vadd.f32 %v9377_v58, %v12077_v27  ;;  %v6353_v51 = vpop.f32.mrb[205].mxu0 }
 0x427   : > { %v6354_v32 = vadd.f32 %v6353_v51, %v12067_v0  ;;  %v9378_v2 = vpop.f32.mrb[206].mxu0  ;;  %6722 = vmatmul.mubr.bf16.gmra.mrb[232].mxu1 %v6406_v35  ;;  %6915 = vmatmul.mubr.bf16.gmra.mrb[232].mxu0 %v6406_v35  ;;  %v6449_v0 = vlaneseq  ;;  %v12154_v35 = vld [vmem:[%s10225_s15 + $0x8] sm:$0xff] }
 0x428   : > { %v6365_v41 = vadd.f32 %v9378_v2, %v12079_v55  ;;  %v6356_v53 = vpop.f32.mrb[207].mxu0  ;;  %6731 = vmatprep.mubr.bf16.mxu1 %v13125_v47  ;;  %6924 = vmatprep.mubr.bf16.mxu0 %v13125_v47  ;;  %v6398_v54 = vmax.f32 %v6362_v15, 0.0  ;;  %v7081_v37 = vunpack.c.l.bf16 %v12154_v35  ;;  %v7082_v10 = vunpack.c.h.bf16 %v12154_v35  ;;  %v12231_v15 = vld [vmem:[%s10225_s15 + $0x80] sm:$0xff]  ;;  %v12234_v51 = vld [vmem:[%s10225_s15 + $0x88] sm:$0xff] }
 0x429   : > { %v6357_v22 = vadd.f32 %v6356_v53, %v12069_v3  ;;  %v6396_v31 = vmax.f32 %v6354_v32, 0.0  ;;  %v6450_v3 = vshrl.u32 %v6449_v0, 7  ;;  %v12254_v0 = vld [vmem:[%s10225_s15 + $0xa8] sm:$0xff]  ;;  %v12291_v32 = vld [vmem:[%s10225_s15 + $0xe0] sm:$0xff] }
 0x42a   : > { %v6399_v60 = vmax.f32 %v6365_v41, 0.0  ;;  %v12284_v41 = vld [vmem:[%s10225_s15 + $0xd8] sm:$0xff] }
 0x42b   : > { %v6397_v8 = vmax.f32 %v6357_v22, 0.0  ;;  %v6451_v55 = vsub.s32 0, %v6450_v3  ;;  %v6455_v50 = vsub.s32 1, %v6450_v3  ;;  %v12241_v22 = vld [vmem:[%s10225_s15 + $0x90] sm:$0xff] }
 0x42c   : > { %v6415_v27 = vpack.c.bf16 %v6399_v60, %v6398_v54  ;;  %v12244_v54 = vld [vmem:[%s10225_s15 + $0x98] sm:$0xff]  ;;  %v12274_v60 = vld [vmem:[%s10225_s15 + $0xc8] sm:$0xff] }
 0x42d   : > { %v6414_v21 = vpack.c.bf16 %v6397_v8, %v6396_v31  ;;  %v12162_v19 = vrot.slane %v464_v4, %v6451_v55  ;;  %v12175_v12 = vrot.slane %v464_v4, %v6455_v50  ;;  %v12261_v50 = vld [vmem:[%s10225_s15 + $0xb0] sm:$0xff]  ;;  %v12271_v55 = vld [vmem:[%s10225_s15 + $0xc0] sm:$0xff] }
 0x42e   : > { %v12281_v8 = vld [vmem:[%s10225_s15 + $0xd0] sm:$0xff] }
 0x42f   : > { %6732 = vmatmul.mubr.bf16.gmra.mrb[236].mxu1 %v12099_v40  ;;  %6925 = vmatmul.mubr.bf16.gmra.mrb[236].mxu0 %v12099_v40  ;;  %v6459_v40 = vsub.s32 2, %v6450_v3 }
 0x430   : > { %6741 = vmatprep.mubr.bf16.mxu1 %v13125_v47  ;;  %6934 = vmatprep.mubr.bf16.mxu0 %v13125_v47 }
 0x431   : > { %v12173_v7 = vrot.slane %v464_v4, %v6459_v40 }
 0x437   : > { %6742 = vmatmul.mubr.bf16.gmra.mrb[240].mxu1 %v6408_v26  ;;  %6935 = vmatmul.mubr.bf16.gmra.mrb[240].mxu0 %v6408_v26  ;;  %v12180_v26 = vld [vmem:[%s10225_s15 + $0x30] sm:$0xff] }
 0x438   : > { %6751 = vmatprep.mubr.bf16.mxu1 %v13125_v47  ;;  %6944 = vmatprep.mubr.bf16.mxu0 %v13125_v47 }
 0x43f   : > { %6752 = vmatmul.mubr.bf16.gmra.mrb[244].mxu1 %v12107_v29  ;;  %6945 = vmatmul.mubr.bf16.gmra.mrb[244].mxu0 %v12107_v29  ;;  %v7083_v29 = vunpack.c.l.bf16 %v12157_v16 }
 0x440   : > { %6761 = vmatprep.mubr.bf16.mxu1 %v13125_v47  ;;  %6954 = vmatprep.mubr.bf16.mxu0 %v13125_v47 }
 0x447   : > { %6762 = vmatmul.mubr.bf16.gmra.mrb[248].mxu1 %v6410_v5  ;;  %6955 = vmatmul.mubr.bf16.gmra.mrb[248].mxu0 %v6410_v5 }
 0x448   : > { %6771 = vmatprep.mubr.bf16.mxu1 %v13125_v47  ;;  %6964 = vmatprep.mubr.bf16.mxu0 %v13125_v47 }
 0x44f   : > { %6772 = vmatmul.mubr.bf16.gmra.mrb[252].mxu1 %v6411_v18  ;;  %6965 = vmatmul.mubr.bf16.gmra.mrb[252].mxu0 %v6411_v18  ;;  %v12204_v18 = vld [vmem:[%s10225_s15 + $0x58] sm:$0xff] }
 0x450   : > { %6781 = vmatprep.mubr.bf16.mxu1 %v13125_v47  ;;  %6974 = vmatprep.mubr.bf16.mxu0 %v13125_v47 }
 0x457   : > { %6782 = vmatmul.mubr.bf16.gmra.mrb[0].mxu1 %v6412_v63  ;;  %6975 = vmatmul.mubr.bf16.gmra.mrb[0].mxu0 %v6412_v63  ;;  %v12301_v63 = vld [vmem:[%s10225_s15 + $0xf0] sm:$0xff] }
 0x458   : > { %6791 = vmatprep.mubr.bf16.mxu1 %v13125_v47  ;;  %6984 = vmatprep.mubr.bf16.mxu0 %v13125_v47 }
 0x45f   : > { %6792 = vmatmul.mubr.bf16.gmra.mrb[4].mxu1 %v6413_v62  ;;  %6985 = vmatmul.mubr.bf16.gmra.mrb[4].mxu0 %v6413_v62 }
 0x460   : > { %6801 = vmatprep.mubr.bf16.mxu1 %v13125_v47  ;;  %6994 = vmatprep.mubr.bf16.mxu0 %v13125_v47 }
 0x467   : > { %6802 = vmatmul.mubr.bf16.gmra.mrb[8].mxu1 %v6414_v21  ;;  %6995 = vmatmul.mubr.bf16.gmra.mrb[8].mxu0 %v6414_v21  ;;  %v12251_v21 = vld [vmem:[%s10225_s15 + $0xa0] sm:$0xff] }
 0x468   : > { %6811 = vmatprep.mubr.bf16.mxu1 %v13125_v47  ;;  %7004 = vmatprep.mubr.bf16.mxu0 %v13125_v47  ;;  %v6463_v47 = vsub.s32 3, %v6450_v3  ;;  %v12304_v3 = vld [vmem:[%s10225_s15 + $0xf8] sm:$0xff] }
 0x46a   : > { %v12185_v42 = vrot.slane %v464_v4, %v6463_v47  ;;  %v12264_v47 = vld [vmem:[%s10225_s15 + $0xb8] sm:$0xff]  ;;  %v12294_v4 = vld [vmem:[%s10225_s15 + $0xe8] sm:$0xff] }
 0x46f   : > { %6812 = vmatmul.mubr.bf16.gmra.mrb[12].mxu1 %v6415_v27  ;;  %7005 = vmatmul.mubr.bf16.gmra.mrb[12].mxu0 %v6415_v27 }
 0x4ca   : > { %v6663_v9 = vpop.f32.mrb[208].mxu1  ;;  %v6856_v2 = vpop.f32.mrb[208].mxu0 }
 0x4cb   : > { %v6664_v27 = vadd.f32 %v6663_v9, %v12162_v19  ;;  %v6857_v58 = vadd.f32 %v6856_v2, %v12173_v7  ;;  %v6665_v14 = vpop.f32.mrb[209].mxu1  ;;  %v6858_v31 = vpop.f32.mrb[209].mxu0 }
 0x4cc   : > { %v6666_v52 = vadd.f32 %v6665_v14, %v12175_v12  ;;  %v6859_v40 = vadd.f32 %v6858_v31, %v12185_v42  ;;  %v6667_v62 = vpop.f32.mrb[210].mxu1  ;;  %v6860_v24 = vpop.f32.mrb[210].mxu0 }
 0x4cd   : > { %v7207_v2 = vadd.f32 %v7079_v34, %v6664_v27  ;;  %v7209_v53 = vadd.f32 %v7081_v37, %v6857_v58  ;;  %v6668_v11 = vadd.f32 %v6667_v62, %v12162_v19  ;;  %v6861_v14 = vadd.f32 %v6860_v24, %v12173_v7  ;;  %v6669_v5 = vpop.f32.mrb[211].mxu1  ;;  %v6862_v43 = vpop.f32.mrb[211].mxu0  ;;  %v12345_v34 = vld [vmem:[%s10225_s15 + $0x110] sm:$0xff]  ;;  %v12348_v27 = vld [vmem:[%s10225_s15 + $0x118] sm:$0xff] }
 0x4ce   : > { %v7208_v31 = vadd.f32 %v7080_v49, %v6666_v52  ;;  %v7210_v30 = vadd.f32 %v7082_v10, %v6859_v40  ;;  %v6670_v9 = vadd.f32 %v6669_v5, %v12175_v12  ;;  %v6863_v25 = vadd.f32 %v6862_v43, %v12185_v42 }
 0x4cf   : > { %v7335_v37 = vmax.f32 %v7207_v2, 0.0  ;;  %v7337_v62 = vmax.f32 %v7209_v53, 0.0  ;;  %v7211_v24 = vadd.f32 %v7083_v29, %v6668_v11  ;;  %v7213_v44 = vadd.f32 %v7085_v28, %v6861_v14 }
 0x4d0   : > { %v7336_v49 = vmax.f32 %v7208_v31, 0.0  ;;  %v7338_v52 = vmax.f32 %v7210_v30, 0.0  ;;  %v7212_v35 = vadd.f32 %v7084_v6, %v6670_v9  ;;  %v7214_v10 = vadd.f32 %v7086_v36, %v6863_v25 }
 0x4d1   : > { %v7339_v43 = vmax.f32 %v7211_v24, 0.0  ;;  %v7341_v5 = vmax.f32 %v7213_v44, 0.0  ;;  %v7147_v58 = vunpack.c.l.bf16 %v12345_v34  ;;  %v7149_v53 = vunpack.c.l.bf16 %v12348_v27 }
 0x4d2   : > { %v8570_v40 = vpack.c.bf16 %v7336_v49, %v7335_v37  ;;  %v8571_v29 = vpack.c.bf16 %v7338_v52, %v7337_v62  ;;  %v7340_v11 = vmax.f32 %v7212_v35, 0.0  ;;  %v7342_v2 = vmax.f32 %v7214_v10, 0.0  ;;  %v6673_v28 = vpop.f32.mrb[212].mxu1  ;;  %v6866_v14 = vpop.f32.mrb[212].mxu0 }
 0x4d3   : > { %v6674_v30 = vadd.f32 %v6673_v28, %v12162_v19  ;;  %v6867_v16 = vadd.f32 %v6866_v14, %v12173_v7  ;;  %v6675_v6 = vpop.f32.mrb[213].mxu1  ;;  %v6868_v39 = vpop.f32.mrb[213].mxu0  ;;  %v7148_v36 = vunpack.c.h.bf16 %v12345_v34  ;;  %v7150_v25 = vunpack.c.h.bf16 %v12348_v27 }
 0x4d4   : > { %7847 = vst [vmem:[%s12366_s29] sm:$0xff] %v8570_v40  ;;  %7848 = vst [vmem:[%s12366_s29 + $0x8] sm:$0xff] %v8571_v29  ;;  %v8572_v9 = vpack.c.bf16 %v7340_v11, %v7339_v43  ;;  %v8573_v31 = vpack.c.bf16 %v7342_v2, %v7341_v5  ;;  %v6676_v37 = vadd.f32 %v6675_v6, %v12175_v12  ;;  %v6677_v24 = vpop.f32.mrb[214].mxu1  ;;  %v6870_v44 = vpop.f32.mrb[214].mxu0  ;;  %v13129_v5 = vunpack.c.h.bf16 %v12168_v56 }
 0x4d5   : > { %v6869_v62 = vadd.f32 %v6868_v39, %v12185_v42  ;;  %v7215_v49 = vadd.f32 %v7087_v23, %v6674_v30  ;;  %v7217_v52 = vadd.f32 %v7089_v61, %v6867_v16  ;;  %v6678_v35 = vadd.f32 %v6677_v24, %v12162_v19  ;;  %v6679_v40 = vpop.f32.mrb[215].mxu1  ;;  %v6872_v43 = vpop.f32.mrb[215].mxu0  ;;  %v12387_v61 = vld [vmem:[%s10225_s15 + $0x120] sm:$0xff] }
 0x4d6   : > { %v6871_v10 = vadd.f32 %v6870_v44, %v12173_v7  ;;  %7849 = vst [vmem:[%s12366_s29 + $0x10] sm:$0xff] %v8572_v9  ;;  %7850 = vst [vmem:[%s12366_s29 + $0x18] sm:$0xff] %v8573_v31  ;;  %v7216_v29 = vadd.f32 %v13129_v5, %v6676_v37  ;;  %v13130_v11 = vunpack.c.h.bf16 %v12171_v20  ;;  %v6680_v23 = vadd.f32 %v6679_v40, %v12175_v12  ;;  %v12398_v44 = vld [vmem:[%s10225_s15 + $0x128] sm:$0xff] }
 0x4d7   : > { %v6873_v28 = vadd.f32 %v6872_v43, %v12185_v42  ;;  %v7343_v14 = vmax.f32 %v7215_v49, 0.0  ;;  %v7345_v30 = vmax.f32 %v7217_v52, 0.0  ;;  %v13131_v16 = vunpack.c.l.bf16 %v12180_v26 }
 0x4d8   : > { %v7218_v2 = vadd.f32 %v13130_v11, %v6869_v62  ;;  %v13132_v39 = vunpack.c.l.bf16 %v12183_v1  ;;  %v7344_v31 = vmax.f32 %v7216_v29, 0.0  ;;  %v13133_v37 = vunpack.c.h.bf16 %v12180_v26 }
 0x4d9   : > { %v7219_v6 = vadd.f32 %v13131_v16, %v6678_v35  ;;  %v13134_v62 = vunpack.c.h.bf16 %v12183_v1  ;;  %v7151_v52 = vunpack.c.l.bf16 %v12387_v61  ;;  %v7152_v35 = vunpack.c.h.bf16 %v12387_v61 }
 0x4da   : > { %v7221_v9 = vadd.f32 %v13132_v39, %v6871_v10  ;;  %v7346_v56 = vmax.f32 %v7218_v2, 0.0  ;;  %v7220_v20 = vadd.f32 %v13133_v37, %v6680_v23  ;;  %v8574_v43 = vpack.c.bf16 %v7344_v31, %v7343_v14  ;;  %v6683_v11 = vpop.f32.mrb[216].mxu1  ;;  %v6876_v26 = vpop.f32.mrb[216].mxu0 }
 0x4db   : > { %v7222_v24 = vadd.f32 %v13134_v62, %v6873_v28  ;;  %v7347_v40 = vmax.f32 %v7219_v6, 0.0  ;;  %v6684_v2 = vadd.f32 %v6683_v11, %v12162_v19  ;;  %v6877_v1 = vadd.f32 %v6876_v26, %v12173_v7  ;;  %v6685_v23 = vpop.f32.mrb[217].mxu1  ;;  %v6878_v28 = vpop.f32.mrb[217].mxu0 }
 0x4dc   : > { %v7349_v49 = vmax.f32 %v7221_v9, 0.0  ;;  %v8575_v10 = vpack.c.bf16 %v7346_v56, %v7345_v30  ;;  %v7348_v5 = vmax.f32 %v7220_v20, 0.0  ;;  %v7153_v16 = vunpack.c.l.bf16 %v12398_v44  ;;  %7851 = vst [vmem:[%s12366_s29 + $0x20] sm:$0xff] %v8574_v43  ;;  %v6687_v31 = vpop.f32.mrb[218].mxu1  ;;  %v6880_v56 = vpop.f32.mrb[218].mxu0 }
 0x4dd   : > { %v7350_v29 = vmax.f32 %v7222_v24, 0.0  ;;  %v6686_v39 = vadd.f32 %v6685_v23, %v12175_v12  ;;  %v6879_v9 = vadd.f32 %v6878_v28, %v12185_v42  ;;  %v13135_v37 = vunpack.c.l.bf16 %v12191_v46  ;;  %v12425_v28 = vld [vmem:[%s10225_s15 + $0x130] sm:$0xff] }
 0x4de   : > { %7852 = vst [vmem:[%s12366_s29 + $0x28] sm:$0xff] %v8575_v10  ;;  %v8576_v14 = vpack.c.bf16 %v7348_v5, %v7347_v40  ;;  %v13136_v62 = vunpack.c.l.bf16 %v12194_v57  ;;  %v6688_v11 = vadd.f32 %v6687_v31, %v12162_v19  ;;  %v6881_v43 = vadd.f32 %v6880_v56, %v12173_v7  ;;  %v6689_v40 = vpop.f32.mrb[219].mxu1 }
 0x4df   : > { %v8577_v30 = vpack.c.bf16 %v7350_v29, %v7349_v49  ;;  %v7223_v20 = vadd.f32 %v13135_v37, %v6684_v2  ;;  %v6882_v49 = vpop.f32.mrb[219].mxu0  ;;  %v13137_v10 = vunpack.c.h.bf16 %v12191_v46  ;;  %v13138_v29 = vunpack.c.h.bf16 %v12194_v57 }
 0x4e0   : > { %v7225_v24 = vadd.f32 %v13136_v62, %v6877_v1  ;;  %7853 = vst [vmem:[%s12366_s29 + $0x30] sm:$0xff] %v8576_v14  ;;  %v6690_v23 = vadd.f32 %v6689_v40, %v12175_v12  ;;  %v6883_v2 = vadd.f32 %v6882_v49, %v12185_v42  ;;  %v12428_v1 = vld [vmem:[%s10225_s15 + $0x138] sm:$0xff]  ;;  %v13139_v37 = vunpack.c.l.bf16 %v12201_v45 }
 0x4e1   : > { %7854 = vst [vmem:[%s12366_s29 + $0x38] sm:$0xff] %v8577_v30  ;;  %v7224_v5 = vadd.f32 %v13137_v10, %v6686_v39  ;;  %v7226_v26 = vadd.f32 %v13138_v29, %v6879_v9  ;;  %v7351_v31 = vmax.f32 %v7223_v20, 0.0  ;;  %v13140_v30 = vunpack.c.l.bf16 %v12204_v18 }
 0x4e2   : > { %v7353_v56 = vmax.f32 %v7225_v24, 0.0  ;;  %v7227_v14 = vadd.f32 %v13139_v37, %v6688_v11  ;;  %v13141_v57 = vunpack.c.h.bf16 %v12201_v45  ;;  %v13142_v40 = vunpack.c.h.bf16 %v12204_v18 }
 0x4e3   : > { %v7229_v46 = vadd.f32 %v13140_v30, %v6881_v43  ;;  %v7352_v39 = vmax.f32 %v7224_v5, 0.0  ;;  %v7354_v62 = vmax.f32 %v7226_v26, 0.0  ;;  %v7155_v20 = vunpack.c.l.bf16 %v12425_v28  ;;  %v6693_v5 = vpop.f32.mrb[220].mxu1  ;;  %v6886_v26 = vpop.f32.mrb[220].mxu0 }
 0x4e4   : > { %v7228_v9 = vadd.f32 %v13141_v57, %v6690_v23  ;;  %v7230_v49 = vadd.f32 %v13142_v40, %v6883_v2  ;;  %v7355_v10 = vmax.f32 %v7227_v14, 0.0  ;;  %v7157_v24 = vunpack.c.l.bf16 %v12428_v1  ;;  %v6695_v18 = vpop.f32.mrb[221].mxu1  ;;  %v6888_v2 = vpop.f32.mrb[221].mxu0 }
 0x4e5   : > { %v7357_v29 = vmax.f32 %v7229_v46, 0.0  ;;  %v8578_v11 = vpack.c.bf16 %v7352_v39, %v7351_v31  ;;  %v8579_v37 = vpack.c.bf16 %v7354_v62, %v7353_v56  ;;  %v6694_v45 = vadd.f32 %v6693_v5, %v12162_v19  ;;  %v6697_v62 = vpop.f32.mrb[222].mxu1  ;;  %v6890_v57 = vpop.f32.mrb[222].mxu0 }
 0x4e6   : > { %v7356_v6 = vmax.f32 %v7228_v9, 0.0  ;;  %v7358_v43 = vmax.f32 %v7230_v49, 0.0  ;;  %v6887_v23 = vadd.f32 %v6886_v26, %v12173_v7  ;;  %v7156_v14 = vunpack.c.h.bf16 %v12425_v28 }
 0x4e7   : > { %7855 = vst [vmem:[%s12366_s29 + $0x40] sm:$0xff] %v8578_v11  ;;  %7856 = vst [vmem:[%s12366_s29 + $0x48] sm:$0xff] %v8579_v37  ;;  %v6696_v46 = vadd.f32 %v6695_v18, %v12175_v12  ;;  %v6889_v39 = vadd.f32 %v6888_v2, %v12185_v42  ;;  %v13143_v9 = vunpack.c.l.bf16 %v12211_v33  ;;  %v13144_v49 = vunpack.c.l.bf16 %v12214_v13  ;;  %v6699_v37 = vpop.f32.mrb[223].mxu1 }
 0x4e8   : > { %v8580_v31 = vpack.c.bf16 %v7356_v6, %v7355_v10  ;;  %v8581_v56 = vpack.c.bf16 %v7358_v43, %v7357_v29  ;;  %v6698_v26 = vadd.f32 %v6697_v62, %v12162_v19  ;;  %v6891_v11 = vadd.f32 %v6890_v57, %v12173_v7  ;;  %v6892_v6 = vpop.f32.mrb[223].mxu0 }
 0x4e9   : > { %v7231_v40 = vadd.f32 %v13143_v9, %v6694_v45  ;;  %v7233_v5 = vadd.f32 %v13144_v49, %v6887_v23  ;;  %v13145_v10 = vunpack.c.h.bf16 %v12211_v33  ;;  %v13146_v43 = vunpack.c.h.bf16 %v12214_v13  ;;  %v12463_v23 = vld [vmem:[%s10225_s15 + $0x140] sm:$0xff] }
 0x4ea   : > { %7857 = vst [vmem:[%s12366_s29 + $0x50] sm:$0xff] %v8580_v31  ;;  %7858 = vst [vmem:[%s12366_s29 + $0x58] sm:$0xff] %v8581_v56  ;;  %v6700_v45 = vadd.f32 %v6699_v37, %v12175_v12  ;;  %v6893_v2 = vadd.f32 %v6892_v6, %v12185_v42  ;;  %v13147_v57 = vunpack.c.l.bf16 %v12221_v17  ;;  %v13148_v31 = vunpack.c.l.bf16 %v12224_v59 }
 0x4eb   : > { %v7232_v29 = vadd.f32 %v13145_v10, %v6696_v46  ;;  %v7234_v18 = vadd.f32 %v13146_v43, %v6889_v39  ;;  %v7359_v62 = vmax.f32 %v7231_v40, 0.0  ;;  %v7361_v9 = vmax.f32 %v7233_v5, 0.0  ;;  %v12474_v10 = vld [vmem:[%s10225_s15 + $0x148] sm:$0xff] }
 0x4ec   : > { %v7235_v49 = vadd.f32 %v13147_v57, %v6698_v26  ;;  %v7237_v56 = vadd.f32 %v13148_v31, %v6891_v11  ;;  %v13149_v46 = vunpack.c.h.bf16 %v12221_v17  ;;  %v13150_v39 = vunpack.c.h.bf16 %v12224_v59  ;;  %v6703_v57 = vpop.f32.mrb[224].mxu1  ;;  %v6896_v17 = vpop.f32.mrb[224].mxu0 }
 0x4ed   : > { %v7360_v30 = vmax.f32 %v7232_v29, 0.0  ;;  %v7362_v33 = vmax.f32 %v7234_v18, 0.0  ;;  %v7159_v5 = vunpack.c.l.bf16 %v12463_v23  ;;  %v6897_v59 = vadd.f32 %v6896_v17, %v12173_v7  ;;  %v6898_v31 = vpop.f32.mrb[225].mxu0 }
 0x4ee   : > { %v7236_v13 = vadd.f32 %v13149_v46, %v6700_v45  ;;  %v7238_v37 = vadd.f32 %v13150_v39, %v6893_v2  ;;  %v7363_v6 = vmax.f32 %v7235_v49, 0.0  ;;  %v7365_v40 = vmax.f32 %v7237_v56, 0.0  ;;  %v6705_v2 = vpop.f32.mrb[225].mxu1 }
 0x4ef   : > { %v8582_v43 = vpack.c.bf16 %v7360_v30, %v7359_v62  ;;  %v8583_v11 = vpack.c.bf16 %v7362_v33, %v7361_v9  ;;  %v6704_v45 = vadd.f32 %v6703_v57, %v12162_v19  ;;  %v6706_v9 = vadd.f32 %v6705_v2, %v12175_v12  ;;  %v6707_v46 = vpop.f32.mrb[226].mxu1 }
 0x4f0   : > { %v7364_v29 = vmax.f32 %v7236_v13, 0.0  ;;  %v7366_v18 = vmax.f32 %v7238_v37, 0.0  ;;  %v6899_v33 = vadd.f32 %v6898_v31, %v12185_v42  ;;  %v6900_v13 = vpop.f32.mrb[226].mxu0  ;;  %v13151_v39 = vunpack.c.l.bf16 %v12231_v15 }
 0x4f1   : > { %7859 = vst [vmem:[%s12366_s29 + $0x60] sm:$0xff] %v8582_v43  ;;  %7860 = vst [vmem:[%s12366_s29 + $0x68] sm:$0xff] %v8583_v11  ;;  %v13152_v57 = vunpack.c.l.bf16 %v12234_v51  ;;  %v6708_v56 = vadd.f32 %v6707_v46, %v12162_v19  ;;  %v6901_v43 = vadd.f32 %v6900_v13, %v12173_v7  ;;  %v13153_v11 = vunpack.c.h.bf16 %v12231_v15 }
 0x4f2   : > { %v8584_v30 = vpack.c.bf16 %v7364_v29, %v7363_v6  ;;  %v8585_v62 = vpack.c.bf16 %v7366_v18, %v7365_v40  ;;  %v7239_v37 = vadd.f32 %v13151_v39, %v6704_v45  ;;  %v6709_v6 = vpop.f32.mrb[227].mxu1  ;;  %v6902_v40 = vpop.f32.mrb[227].mxu0  ;;  %v13154_v18 = vunpack.c.h.bf16 %v12234_v51  ;;  %v12501_v39 = vld [vmem:[%s10225_s15 + $0x150] sm:$0xff] }
 0x4f3   : > { %v7241_v17 = vadd.f32 %v13152_v57, %v6897_v59  ;;  %v7240_v29 = vadd.f32 %v13153_v11, %v6706_v9  ;;  %v6710_v31 = vadd.f32 %v6709_v6, %v12175_v12  ;;  %v6903_v45 = vadd.f32 %v6902_v40, %v12185_v42  ;;  %v12504_v59 = vld [vmem:[%s10225_s15 + $0x158] sm:$0xff] }
 0x4f4   : > { %7861 = vst [vmem:[%s12366_s29 + $0x70] sm:$0xff] %v8584_v30  ;;  %7862 = vst [vmem:[%s12366_s29 + $0x78] sm:$0xff] %v8585_v62  ;;  %v7242_v2 = vadd.f32 %v13154_v18, %v6899_v33  ;;  %v7367_v46 = vmax.f32 %v7239_v37, 0.0  ;;  %v13155_v57 = vunpack.c.l.bf16 %v12241_v22  ;;  %v13156_v62 = vunpack.c.l.bf16 %v12244_v54 }
 0x4f5   : > { %v7369_v13 = vmax.f32 %v7241_v17, 0.0  ;;  %v7368_v9 = vmax.f32 %v7240_v29, 0.0  ;;  %v13157_v51 = vunpack.c.h.bf16 %v12241_v22  ;;  %v13158_v6 = vunpack.c.h.bf16 %v12244_v54  ;;  %v6713_v29 = vpop.f32.mrb[228].mxu1 }
 0x4f6   : > { %v7243_v30 = vadd.f32 %v13155_v57, %v6708_v56  ;;  %v7245_v15 = vadd.f32 %v13156_v62, %v6901_v43  ;;  %v7370_v11 = vmax.f32 %v7242_v2, 0.0  ;;  %v7163_v37 = vunpack.c.l.bf16 %v12501_v39  ;;  %v6906_v2 = vpop.f32.mrb[228].mxu0  ;;  %v6715_v54 = vpop.f32.mrb[229].mxu1 }
 0x4f7   : > { %v7244_v33 = vadd.f32 %v13157_v51, %v6710_v31  ;;  %v7246_v40 = vadd.f32 %v13158_v6, %v6903_v45  ;;  %v7165_v17 = vunpack.c.l.bf16 %v12504_v59  ;;  %v8586_v56 = vpack.c.bf16 %v7368_v9, %v7367_v46  ;;  %v6908_v45 = vpop.f32.mrb[229].mxu0 }
 0x4f8   : > { %v7371_v18 = vmax.f32 %v7243_v30, 0.0  ;;  %v7373_v26 = vmax.f32 %v7245_v15, 0.0  ;;  %v8587_v57 = vpack.c.bf16 %v7370_v11, %v7369_v13  ;;  %v6714_v22 = vadd.f32 %v6713_v29, %v12162_v19  ;;  %v6717_v11 = vpop.f32.mrb[230].mxu1  ;;  %v6910_v51 = vpop.f32.mrb[230].mxu0 }
 0x4f9   : > { %v7372_v49 = vmax.f32 %v7244_v33, 0.0  ;;  %v7374_v43 = vmax.f32 %v7246_v40, 0.0  ;;  %v6907_v31 = vadd.f32 %v6906_v2, %v12173_v7  ;;  %v7164_v30 = vunpack.c.h.bf16 %v12501_v39  ;;  %7863 = vst [vmem:[%s12366_s29 + $0x80] sm:$0xff] %v8586_v56 }
 0x4fa   : > { %7864 = vst [vmem:[%s12366_s29 + $0x88] sm:$0xff] %v8587_v57  ;;  %v6716_v15 = vadd.f32 %v6715_v54, %v12175_v12  ;;  %v6909_v9 = vadd.f32 %v6908_v45, %v12185_v42  ;;  %v13159_v33 = vunpack.c.l.bf16 %v12251_v21  ;;  %v13160_v40 = vunpack.c.l.bf16 %v12254_v0  ;;  %v6719_v57 = vpop.f32.mrb[231].mxu1 }
 0x4fb   : > { %v8588_v46 = vpack.c.bf16 %v7372_v49, %v7371_v18  ;;  %v8589_v13 = vpack.c.bf16 %v7374_v43, %v7373_v26  ;;  %v6718_v2 = vadd.f32 %v6717_v11, %v12162_v19  ;;  %v6911_v56 = vadd.f32 %v6910_v51, %v12173_v7  ;;  %v6912_v49 = vpop.f32.mrb[231].mxu0 }
 0x4fc   : > { %v7247_v6 = vadd.f32 %v13159_v33, %v6714_v22  ;;  %v7249_v29 = vadd.f32 %v13160_v40, %v6907_v31  ;;  %v13161_v26 = vunpack.c.h.bf16 %v12251_v21  ;;  %v13162_v43 = vunpack.c.h.bf16 %v12254_v0  ;;  %v12539_v31 = vld [vmem:[%s10225_s15 + $0x160] sm:$0xff] }
 0x4fd   : > { %7865 = vst [vmem:[%s12366_s29 + $0x90] sm:$0xff] %v8588_v46  ;;  %7866 = vst [vmem:[%s12366_s29 + $0x98] sm:$0xff] %v8589_v13  ;;  %v6720_v22 = vadd.f32 %v6719_v57, %v12175_v12  ;;  %v6913_v45 = vadd.f32 %v6912_v49, %v12185_v42  ;;  %v13163_v51 = vunpack.c.l.bf16 %v12261_v50  ;;  %v13164_v46 = vunpack.c.l.bf16 %v12264_v47 }
 0x4fe   : > { %v7248_v18 = vadd.f32 %v13161_v26, %v6716_v15  ;;  %v7250_v54 = vadd.f32 %v13162_v43, %v6909_v9  ;;  %v7375_v11 = vmax.f32 %v7247_v6, 0.0  ;;  %v7377_v33 = vmax.f32 %v7249_v29, 0.0  ;;  %v12550_v26 = vld [vmem:[%s10225_s15 + $0x168] sm:$0xff] }
 0x4ff   : > { %v7251_v40 = vadd.f32 %v13163_v51, %v6718_v2  ;;  %v7253_v13 = vadd.f32 %v13164_v46, %v6911_v56  ;;  %v13165_v15 = vunpack.c.h.bf16 %v12261_v50  ;;  %v13166_v9 = vunpack.c.h.bf16 %v12264_v47  ;;  %v6723_v51 = vpop.f32.mrb[232].mxu1  ;;  %v6916_v50 = vpop.f32.mrb[232].mxu0 }
 0x500   : > { %v7376_v62 = vmax.f32 %v7248_v18, 0.0  ;;  %v7378_v21 = vmax.f32 %v7250_v54, 0.0  ;;  %v7167_v29 = vunpack.c.l.bf16 %v12539_v31  ;;  %v6917_v47 = vadd.f32 %v6916_v50, %v12173_v7  ;;  %v6918_v46 = vpop.f32.mrb[233].mxu0 }
 0x501   : > { %v7252_v0 = vadd.f32 %v13165_v15, %v6720_v22  ;;  %v7254_v57 = vadd.f32 %v13166_v9, %v6913_v45  ;;  %v7379_v49 = vmax.f32 %v7251_v40, 0.0  ;;  %v7381_v6 = vmax.f32 %v7253_v13, 0.0  ;;  %v6725_v45 = vpop.f32.mrb[233].mxu1 }
 0x502   : > { %v8590_v43 = vpack.c.bf16 %v7376_v62, %v7375_v11  ;;  %v8591_v56 = vpack.c.bf16 %v7378_v21, %v7377_v33  ;;  %v6724_v22 = vadd.f32 %v6723_v51, %v12162_v19  ;;  %v6726_v33 = vadd.f32 %v6725_v45, %v12175_v12  ;;  %v6727_v15 = vpop.f32.mrb[234].mxu1 }
 0x503   : > { %v7380_v18 = vmax.f32 %v7252_v0, 0.0  ;;  %v7382_v54 = vmax.f32 %v7254_v57, 0.0  ;;  %v6919_v21 = vadd.f32 %v6918_v46, %v12185_v42  ;;  %v6920_v0 = vpop.f32.mrb[234].mxu0  ;;  %v13167_v9 = vunpack.c.l.bf16 %v12271_v55 }
 0x504   : > { %7867 = vst [vmem:[%s12366_s29 + $0xa0] sm:$0xff] %v8590_v43  ;;  %7868 = vst [vmem:[%s12366_s29 + $0xa8] sm:$0xff] %v8591_v56  ;;  %v13168_v51 = vunpack.c.l.bf16 %v12274_v60  ;;  %v6728_v13 = vadd.f32 %v6727_v15, %v12162_v19  ;;  %v6921_v43 = vadd.f32 %v6920_v0, %v12173_v7  ;;  %v13169_v56 = vunpack.c.h.bf16 %v12271_v55 }
 0x505   : > { %v8592_v62 = vpack.c.bf16 %v7380_v18, %v7379_v49  ;;  %v8593_v11 = vpack.c.bf16 %v7382_v54, %v7381_v6  ;;  %v7255_v57 = vadd.f32 %v13167_v9, %v6724_v22  ;;  %v6729_v49 = vpop.f32.mrb[235].mxu1  ;;  %v6922_v6 = vpop.f32.mrb[235].mxu0  ;;  %v13170_v54 = vunpack.c.h.bf16 %v12274_v60  ;;  %v12577_v9 = vld [vmem:[%s10225_s15 + $0x170] sm:$0xff] }
 0x506   : > { %v7257_v50 = vadd.f32 %v13168_v51, %v6917_v47  ;;  %v7256_v18 = vadd.f32 %v13169_v56, %v6726_v33  ;;  %v6730_v46 = vadd.f32 %v6729_v49, %v12175_v12  ;;  %v6923_v22 = vadd.f32 %v6922_v6, %v12185_v42  ;;  %v12580_v47 = vld [vmem:[%s10225_s15 + $0x178] sm:$0xff] }
 0x507   : > { %7869 = vst [vmem:[%s12366_s29 + $0xb0] sm:$0xff] %v8592_v62  ;;  %7870 = vst [vmem:[%s12366_s29 + $0xb8] sm:$0xff] %v8593_v11  ;;  %v7258_v45 = vadd.f32 %v13170_v54, %v6919_v21  ;;  %v7383_v15 = vmax.f32 %v7255_v57, 0.0  ;;  %v13171_v51 = vunpack.c.l.bf16 %v12281_v8  ;;  %v13172_v11 = vunpack.c.l.bf16 %v12284_v41 }
 0x508   : > { %v7385_v0 = vmax.f32 %v7257_v50, 0.0  ;;  %v7384_v33 = vmax.f32 %v7256_v18, 0.0  ;;  %v13173_v60 = vunpack.c.h.bf16 %v12281_v8  ;;  %v13174_v49 = vunpack.c.h.bf16 %v12284_v41  ;;  %v6733_v18 = vpop.f32.mrb[236].mxu1 }
 0x509   : > { %v7259_v62 = vadd.f32 %v13171_v51, %v6728_v13  ;;  %v7261_v55 = vadd.f32 %v13172_v11, %v6921_v43  ;;  %v7386_v56 = vmax.f32 %v7258_v45, 0.0  ;;  %v7171_v57 = vunpack.c.l.bf16 %v12577_v9  ;;  %v6926_v45 = vpop.f32.mrb[236].mxu0  ;;  %v6735_v41 = vpop.f32.mrb[237].mxu1 }
 0x50a   : > { %v7260_v21 = vadd.f32 %v13173_v60, %v6730_v46  ;;  %v7262_v6 = vadd.f32 %v13174_v49, %v6923_v22  ;;  %v7173_v50 = vunpack.c.l.bf16 %v12580_v47  ;;  %v8594_v13 = vpack.c.bf16 %v7384_v33, %v7383_v15  ;;  %v6928_v22 = vpop.f32.mrb[237].mxu0 }
 0x50b   : > { %v7387_v54 = vmax.f32 %v7259_v62, 0.0  ;;  %v7389_v2 = vmax.f32 %v7261_v55, 0.0  ;;  %v8595_v51 = vpack.c.bf16 %v7386_v56, %v7385_v0  ;;  %v6734_v8 = vadd.f32 %v6733_v18, %v12162_v19  ;;  %v6737_v56 = vpop.f32.mrb[238].mxu1  ;;  %v6930_v60 = vpop.f32.mrb[238].mxu0 }
 0x50c   : > { %v7388_v40 = vmax.f32 %v7260_v21, 0.0  ;;  %v7390_v43 = vmax.f32 %v7262_v6, 0.0  ;;  %v6927_v46 = vadd.f32 %v6926_v45, %v12173_v7  ;;  %v7172_v62 = vunpack.c.h.bf16 %v12577_v9  ;;  %7871 = vst [vmem:[%s12366_s29 + $0xc0] sm:$0xff] %v8594_v13 }
 0x50d   : > { %7872 = vst [vmem:[%s12366_s29 + $0xc8] sm:$0xff] %v8595_v51  ;;  %v6736_v55 = vadd.f32 %v6735_v41, %v12175_v12  ;;  %v6929_v33 = vadd.f32 %v6928_v22, %v12185_v42  ;;  %v13175_v21 = vunpack.c.l.bf16 %v12291_v32  ;;  %v13176_v6 = vunpack.c.l.bf16 %v12294_v4  ;;  %v6739_v51 = vpop.f32.mrb[239].mxu1 }
 0x50e   : > { %v8596_v15 = vpack.c.bf16 %v7388_v40, %v7387_v54  ;;  %v8597_v0 = vpack.c.bf16 %v7390_v43, %v7389_v2  ;;  %v6738_v45 = vadd.f32 %v6737_v56, %v12162_v19  ;;  %v6931_v13 = vadd.f32 %v6930_v60, %v12173_v7  ;;  %v6932_v40 = vpop.f32.mrb[239].mxu0 }
 0x50f   : > { %v7263_v49 = vadd.f32 %v13175_v21, %v6734_v8  ;;  %v7265_v18 = vadd.f32 %v13176_v6, %v6927_v46  ;;  %v13177_v2 = vunpack.c.h.bf16 %v12291_v32  ;;  %v13178_v43 = vunpack.c.h.bf16 %v12294_v4  ;;  %v12615_v46 = vld [vmem:[%s10225_s15 + $0x180] sm:$0xff] }
 0x510   : > { %7873 = vst [vmem:[%s12366_s29 + $0xd0] sm:$0xff] %v8596_v15  ;;  %7874 = vst [vmem:[%s12366_s29 + $0xd8] sm:$0xff] %v8597_v0  ;;  %v6740_v8 = vadd.f32 %v6739_v51, %v12175_v12  ;;  %v6933_v22 = vadd.f32 %v6932_v40, %v12185_v42  ;;  %v13179_v60 = vunpack.c.l.bf16 %v12301_v63  ;;  %v13180_v15 = vunpack.c.l.bf16 %v12304_v3 }
 0x511   : > { %v7264_v54 = vadd.f32 %v13177_v2, %v6736_v55  ;;  %v7266_v41 = vadd.f32 %v13178_v43, %v6929_v33  ;;  %v7391_v56 = vmax.f32 %v7263_v49, 0.0  ;;  %v7393_v21 = vmax.f32 %v7265_v18, 0.0  ;;  %v12626_v2 = vld [vmem:[%s10225_s15 + $0x188] sm:$0xff] }
 0x512   : > { %v7267_v6 = vadd.f32 %v13179_v60, %v6738_v45  ;;  %v7269_v0 = vadd.f32 %v13180_v15, %v6931_v13  ;;  %v13181_v55 = vunpack.c.h.bf16 %v12301_v63  ;;  %v13182_v33 = vunpack.c.h.bf16 %v12304_v3  ;;  %v6743_v60 = vpop.f32.mrb[240].mxu1  ;;  %v6936_v63 = vpop.f32.mrb[240].mxu0 }
 0x513   : > { %v7392_v11 = vmax.f32 %v7264_v54, 0.0  ;;  %v7394_v32 = vmax.f32 %v7266_v41, 0.0  ;;  %v7175_v18 = vunpack.c.l.bf16 %v12615_v46  ;;  %v7176_v45 = vunpack.c.h.bf16 %v12615_v46  ;;  %v6938_v15 = vpop.f32.mrb[241].mxu0 }
 0x514   : > { %v7268_v4 = vadd.f32 %v13181_v55, %v6740_v8  ;;  %v7270_v51 = vadd.f32 %v13182_v33, %v6933_v22  ;;  %v7395_v40 = vmax.f32 %v7267_v6, 0.0  ;;  %v7397_v49 = vmax.f32 %v7269_v0, 0.0  ;;  %v6745_v22 = vpop.f32.mrb[241].mxu1 }
 0x515   : > { %v8598_v43 = vpack.c.bf16 %v7392_v11, %v7391_v56  ;;  %v8599_v13 = vpack.c.bf16 %v7394_v32, %v7393_v21  ;;  %v6744_v8 = vadd.f32 %v6743_v60, %v12162_v19  ;;  %v6937_v3 = vadd.f32 %v6936_v63, %v12173_v7  ;;  %v6747_v55 = vpop.f32.mrb[242].mxu1 }
 0x516   : > { %v7396_v54 = vmax.f32 %v7268_v4, 0.0  ;;  %v7398_v41 = vmax.f32 %v7270_v51, 0.0  ;;  %v7177_v6 = vunpack.c.l.bf16 %v12626_v2  ;;  %v6746_v21 = vadd.f32 %v6745_v22, %v12175_v12  ;;  %v6940_v4 = vpop.f32.mrb[242].mxu0 }
 0x517   : > { %7875 = vst [vmem:[%s12366_s29 + $0xe0] sm:$0xff] %v8598_v43  ;;  %7876 = vst [vmem:[%s12366_s29 + $0xe8] sm:$0xff] %v8599_v13  ;;  %v6939_v32 = vadd.f32 %v6938_v15, %v12185_v42  ;;  %v13183_v33 = vunpack.c.l.bf16 %v12311_v38  ;;  %v13184_v60 = vunpack.c.l.bf16 %v12318_v48  ;;  %v6748_v0 = vadd.f32 %v6747_v55, %v12162_v19 }
 0x518   : > { %v8600_v11 = vpack.c.bf16 %v7396_v54, %v7395_v40  ;;  %v8601_v56 = vpack.c.bf16 %v7398_v41, %v7397_v49  ;;  %v6941_v43 = vadd.f32 %v6940_v4, %v12173_v7  ;;  %v6749_v40 = vpop.f32.mrb[243].mxu1  ;;  %v6942_v49 = vpop.f32.mrb[243].mxu0  ;;  %v13185_v13 = vunpack.c.h.bf16 %v12311_v38 }
 0x519   : > { %v7271_v51 = vadd.f32 %v13183_v33, %v6744_v8  ;;  %v7273_v63 = vadd.f32 %v13184_v60, %v6937_v3  ;;  %v13186_v41 = vunpack.c.h.bf16 %v12318_v48  ;;  %v6750_v15 = vadd.f32 %v6749_v40, %v12175_v12  ;;  %v12653_v33 = vld [vmem:[%s10225_s15 + $0x190] sm:$0xff]  ;;  %v12656_v3 = vld [vmem:[%s10225_s15 + $0x198] sm:$0xff] }
 0x51a   : > { %7877 = vst [vmem:[%s12366_s29 + $0xf0] sm:$0xff] %v8600_v11  ;;  %7878 = vst [vmem:[%s12366_s29 + $0xf8] sm:$0xff] %v8601_v56  ;;  %v7272_v54 = vadd.f32 %v13185_v13, %v6746_v21  ;;  %v6943_v8 = vadd.f32 %v6942_v49, %v12185_v42  ;;  %v7275_v11 = vadd.f32 %v7147_v58, %v6748_v0  ;;  %v6946_v13 = vpop.f32.mrb[244].mxu0 }
 0x51b   : > { %v7274_v22 = vadd.f32 %v13186_v41, %v6939_v32  ;;  %v7399_v55 = vmax.f32 %v7271_v51, 0.0  ;;  %v7401_v4 = vmax.f32 %v7273_v63, 0.0  ;;  %v7277_v38 = vadd.f32 %v7149_v53, %v6941_v43  ;;  %v6753_v43 = vpop.f32.mrb[244].mxu1 }
 0x51c   : > { %v7400_v56 = vmax.f32 %v7272_v54, 0.0  ;;  %v7276_v48 = vadd.f32 %v7148_v36, %v6750_v15  ;;  %v7278_v32 = vadd.f32 %v7150_v25, %v6943_v8  ;;  %v7403_v60 = vmax.f32 %v7275_v11, 0.0  ;;  %v6755_v27 = vpop.f32.mrb[245].mxu1  ;;  %v6948_v25 = vpop.f32.mrb[245].mxu0 }
 0x51d   : > { %v7402_v21 = vmax.f32 %v7274_v22, 0.0  ;;  %v7405_v40 = vmax.f32 %v7277_v38, 0.0  ;;  %v7179_v51 = vunpack.c.l.bf16 %v12653_v33  ;;  %v7181_v63 = vunpack.c.l.bf16 %v12656_v3  ;;  %v6950_v11 = vpop.f32.mrb[246].mxu0 }
 0x51e   : > { %v8602_v58 = vpack.c.bf16 %v7400_v56, %v7399_v55  ;;  %v7404_v49 = vmax.f32 %v7276_v48, 0.0  ;;  %v7406_v53 = vmax.f32 %v7278_v32, 0.0  ;;  %v6754_v34 = vadd.f32 %v6753_v43, %v12162_v19 }
 0x51f   : > { %v8603_v0 = vpack.c.bf16 %v7402_v21, %v7401_v4  ;;  %v6947_v36 = vadd.f32 %v6946_v13, %v12173_v7  ;;  %v7180_v54 = vunpack.c.h.bf16 %v12653_v33  ;;  %v7182_v41 = vunpack.c.h.bf16 %v12656_v3  ;;  %v6757_v4 = vpop.f32.mrb[246].mxu1 }
 0x520   : > { %7879 = vst [vmem:[%s12366_s29 + $0x100] sm:$0xff] %v8602_v58  ;;  %v8604_v22 = vpack.c.bf16 %v7404_v49, %v7403_v60  ;;  %v8605_v15 = vpack.c.bf16 %v7406_v53, %v7405_v40  ;;  %v6756_v8 = vadd.f32 %v6755_v27, %v12175_v12  ;;  %v6949_v55 = vadd.f32 %v6948_v25, %v12185_v42  ;;  %v6759_v32 = vpop.f32.mrb[247].mxu1  ;;  %v6952_v60 = vpop.f32.mrb[247].mxu0  ;;  %v12702_v25 = vld [vmem:[%s10225_s15 + $0x1a8] sm:$0xff] }
 0x521   : > { %7880 = vst [vmem:[%s12366_s29 + $0x108] sm:$0xff] %v8603_v0  ;;  %v7279_v38 = vadd.f32 %v7151_v52, %v6754_v34  ;;  %v7281_v56 = vadd.f32 %v7153_v16, %v6947_v36  ;;  %v6758_v21 = vadd.f32 %v6757_v4, %v12162_v19  ;;  %v6951_v48 = vadd.f32 %v6950_v11, %v12173_v7  ;;  %v12691_v16 = vld [vmem:[%s10225_s15 + $0x1a0] sm:$0xff]  ;;  %v6956_v28 = vpop.f32.mrb[248].mxu0 }
 0x522   : > { %7881 = vst [vmem:[%s12366_s29 + $0x110] sm:$0xff] %v8604_v22  ;;  %7882 = vst [vmem:[%s12366_s29 + $0x118] sm:$0xff] %v8605_v15  ;;  %v7280_v40 = vadd.f32 %v7152_v35, %v6756_v8  ;;  %v13187_v58 = vunpack.c.h.bf16 %v12398_v44  ;;  %v6760_v52 = vadd.f32 %v6759_v32, %v12175_v12  ;;  %v6953_v49 = vadd.f32 %v6952_v60, %v12185_v42 }
 0x523   : > { %v7407_v53 = vmax.f32 %v7279_v38, 0.0  ;;  %v7409_v43 = vmax.f32 %v7281_v56, 0.0  ;;  %v7283_v13 = vadd.f32 %v7155_v20, %v6758_v21  ;;  %v7285_v34 = vadd.f32 %v7157_v24, %v6951_v48  ;;  %v6763_v38 = vpop.f32.mrb[248].mxu1  ;;  %v6958_v21 = vpop.f32.mrb[249].mxu0 }
 0x524   : > { %v7282_v0 = vadd.f32 %v13187_v58, %v6949_v55  ;;  %v7408_v36 = vmax.f32 %v7280_v40, 0.0  ;;  %v7284_v44 = vadd.f32 %v7156_v14, %v6760_v52  ;;  %v13188_v35 = vunpack.c.h.bf16 %v12428_v1  ;;  %v6765_v56 = vpop.f32.mrb[249].mxu1 }
 0x525   : > { %v7411_v22 = vmax.f32 %v7283_v13, 0.0  ;;  %v7413_v15 = vmax.f32 %v7285_v34, 0.0  ;;  %v7183_v8 = vunpack.c.l.bf16 %v12691_v16  ;;  %v7184_v20 = vunpack.c.h.bf16 %v12691_v16  ;;  %v6767_v52 = vpop.f32.mrb[250].mxu1 }
 0x526   : > { %v7410_v61 = vmax.f32 %v7282_v0, 0.0  ;;  %v7286_v27 = vadd.f32 %v13188_v35, %v6953_v49  ;;  %v8606_v55 = vpack.c.bf16 %v7408_v36, %v7407_v53  ;;  %v7412_v4 = vmax.f32 %v7284_v44, 0.0  ;;  %v6960_v49 = vpop.f32.mrb[250].mxu0 }
 0x527   : > { %v6764_v14 = vadd.f32 %v6763_v38, %v12162_v19  ;;  %v6957_v1 = vadd.f32 %v6956_v28, %v12173_v7  ;;  %v7185_v48 = vunpack.c.l.bf16 %v12702_v25  ;;  %v7186_v32 = vunpack.c.h.bf16 %v12702_v25  ;;  %v6962_v44 = vpop.f32.mrb[251].mxu0 }
 0x528   : > { %v8607_v24 = vpack.c.bf16 %v7410_v61, %v7409_v43  ;;  %v7414_v11 = vmax.f32 %v7286_v27, 0.0  ;;  %7883 = vst [vmem:[%s12366_s29 + $0x120] sm:$0xff] %v8606_v55  ;;  %v8608_v60 = vpack.c.bf16 %v7412_v4, %v7411_v22  ;;  %v6766_v58 = vadd.f32 %v6765_v56, %v12175_v12  ;;  %v6769_v61 = vpop.f32.mrb[251].mxu1  ;;  %v12732_v4 = vld [vmem:[%s10225_s15 + $0x1b8] sm:$0xff] }
 0x529   : > { %v6959_v0 = vadd.f32 %v6958_v21, %v12185_v42  ;;  %v7287_v53 = vadd.f32 %v7159_v5, %v6764_v14  ;;  %v13189_v43 = vunpack.c.l.bf16 %v12474_v10  ;;  %v6768_v34 = vadd.f32 %v6767_v52, %v12162_v19 }
 0x52a   : > { %7884 = vst [vmem:[%s12366_s29 + $0x128] sm:$0xff] %v8607_v24  ;;  %v8609_v40 = vpack.c.bf16 %v7414_v11, %v7413_v15  ;;  %v6961_v36 = vadd.f32 %v6960_v49, %v12173_v7  ;;  %7885 = vst [vmem:[%s12366_s29 + $0x130] sm:$0xff] %v8608_v60  ;;  %v13190_v35 = vunpack.c.h.bf16 %v12463_v23  ;;  %v13191_v22 = vunpack.c.h.bf16 %v12474_v10  ;;  %v12729_v24 = vld [vmem:[%s10225_s15 + $0x1b0] sm:$0xff] }
 0x52b   : > { %v7289_v13 = vadd.f32 %v13189_v43, %v6957_v1  ;;  %v6770_v55 = vadd.f32 %v6769_v61, %v12175_v12  ;;  %v6963_v5 = vadd.f32 %v6962_v44, %v12185_v42  ;;  %v7415_v11 = vmax.f32 %v7287_v53, 0.0  ;;  %v6773_v53 = vpop.f32.mrb[252].mxu1  ;;  %v6966_v43 = vpop.f32.mrb[252].mxu0 }
 0x52c   : > { %7886 = vst [vmem:[%s12366_s29 + $0x138] sm:$0xff] %v8609_v40  ;;  %v7288_v27 = vadd.f32 %v13190_v35, %v6766_v58  ;;  %v7290_v15 = vadd.f32 %v13191_v22, %v6959_v0  ;;  %v7291_v28 = vadd.f32 %v7163_v37, %v6768_v34  ;;  %v7293_v23 = vadd.f32 %v7165_v17, %v6961_v36 }
 0x52d   : > { %v7417_v38 = vmax.f32 %v7289_v13, 0.0  ;;  %v7292_v10 = vadd.f32 %v7164_v30, %v6770_v55  ;;  %v13192_v56 = vunpack.c.h.bf16 %v12504_v59  ;;  %v7187_v58 = vunpack.c.l.bf16 %v12729_v24  ;;  %v6775_v59 = vpop.f32.mrb[253].mxu1  ;;  %v6968_v13 = vpop.f32.mrb[253].mxu0 }
 0x52e   : > { %v7416_v14 = vmax.f32 %v7288_v27, 0.0  ;;  %v7418_v1 = vmax.f32 %v7290_v15, 0.0  ;;  %v7419_v60 = vmax.f32 %v7291_v28, 0.0  ;;  %v7421_v40 = vmax.f32 %v7293_v23, 0.0  ;;  %v6777_v22 = vpop.f32.mrb[254].mxu1  ;;  %v6970_v15 = vpop.f32.mrb[254].mxu0 }
 0x52f   : > { %v7294_v21 = vadd.f32 %v13192_v56, %v6963_v5  ;;  %v7189_v0 = vunpack.c.l.bf16 %v12732_v4  ;;  %v7420_v49 = vmax.f32 %v7292_v10, 0.0  ;;  %v6774_v39 = vadd.f32 %v6773_v53, %v12162_v19  ;;  %v6779_v23 = vpop.f32.mrb[255].mxu1 }
 0x530   : > { %v8610_v37 = vpack.c.bf16 %v7416_v14, %v7415_v11  ;;  %v8611_v52 = vpack.c.bf16 %v7418_v1, %v7417_v38  ;;  %v6967_v30 = vadd.f32 %v6966_v43, %v12173_v7  ;;  %v7188_v34 = vunpack.c.h.bf16 %v12729_v24  ;;  %v6972_v14 = vpop.f32.mrb[255].mxu0 }
 0x531   : > { %v7422_v17 = vmax.f32 %v7294_v21, 0.0  ;;  %v7190_v36 = vunpack.c.h.bf16 %v12732_v4  ;;  %v8612_v61 = vpack.c.bf16 %v7420_v49, %v7419_v60  ;;  %v6776_v35 = vadd.f32 %v6775_v59, %v12175_v12  ;;  %v6976_v9 = vpop.f32.mrb[0].mxu0 }
 0x532   : > { %7887 = vst [vmem:[%s12366_s29 + $0x140] sm:$0xff] %v8610_v37  ;;  %7888 = vst [vmem:[%s12366_s29 + $0x148] sm:$0xff] %v8611_v52  ;;  %v6969_v27 = vadd.f32 %v6968_v13, %v12185_v42  ;;  %v7295_v55 = vadd.f32 %v7167_v29, %v6774_v39  ;;  %v13193_v5 = vunpack.c.l.bf16 %v12550_v26  ;;  %v6778_v38 = vadd.f32 %v6777_v22, %v12162_v19  ;;  %v6783_v22 = vpop.f32.mrb[0].mxu1 }
 0x533   : > { %v8613_v44 = vpack.c.bf16 %v7422_v17, %v7421_v40  ;;  %v6971_v28 = vadd.f32 %v6970_v15, %v12173_v7  ;;  %7889 = vst [vmem:[%s12366_s29 + $0x150] sm:$0xff] %v8612_v61  ;;  %v13194_v1 = vunpack.c.h.bf16 %v12539_v31  ;;  %v13195_v56 = vunpack.c.h.bf16 %v12550_v26  ;;  %v12767_v40 = vld [vmem:[%s10225_s15 + $0x1c0] sm:$0xff]  ;;  %v6785_v15 = vpop.f32.mrb[1].mxu1 }
 0x534   : > { %v7297_v11 = vadd.f32 %v13193_v5, %v6967_v30  ;;  %v6780_v29 = vadd.f32 %v6779_v23, %v12175_v12  ;;  %v6973_v60 = vadd.f32 %v6972_v14, %v12185_v42  ;;  %v7423_v37 = vmax.f32 %v7295_v55, 0.0  ;;  %v12778_v30 = vld [vmem:[%s10225_s15 + $0x1c8] sm:$0xff]  ;;  %v6978_v55 = vpop.f32.mrb[1].mxu0 }
 0x535   : > { %7890 = vst [vmem:[%s12366_s29 + $0x158] sm:$0xff] %v8613_v44  ;;  %v7296_v10 = vadd.f32 %v13194_v1, %v6776_v35  ;;  %v7298_v21 = vadd.f32 %v13195_v56, %v6969_v27  ;;  %v7299_v49 = vadd.f32 %v7171_v57, %v6778_v38  ;;  %v7301_v17 = vadd.f32 %v7173_v50, %v6971_v28  ;;  %v6787_v1 = vpop.f32.mrb[2].mxu1 }
 0x536   : > { %v7425_v52 = vmax.f32 %v7297_v11, 0.0  ;;  %v7300_v26 = vadd.f32 %v7172_v62, %v6780_v29  ;;  %v13196_v43 = vunpack.c.h.bf16 %v12580_v47  ;;  %v7191_v61 = vunpack.c.l.bf16 %v12767_v40 }
 0x537   : > { %v7424_v53 = vmax.f32 %v7296_v10, 0.0  ;;  %v7426_v31 = vmax.f32 %v7298_v21, 0.0  ;;  %v7427_v59 = vmax.f32 %v7299_v49, 0.0  ;;  %v7429_v13 = vmax.f32 %v7301_v17, 0.0  ;;  %v6980_v10 = vpop.f32.mrb[2].mxu0 }
 0x538   : > { %v7302_v39 = vadd.f32 %v13196_v43, %v6973_v60  ;;  %v7192_v57 = vunpack.c.h.bf16 %v12767_v40  ;;  %v7428_v35 = vmax.f32 %v7300_v26, 0.0  ;;  %v6784_v62 = vadd.f32 %v6783_v22, %v12162_v19  ;;  %v12805_v26 = vld [vmem:[%s10225_s15 + $0x1d0] sm:$0xff] }
 0x539   : > { %v8614_v44 = vpack.c.bf16 %v7424_v53, %v7423_v37  ;;  %v8615_v50 = vpack.c.bf16 %v7426_v31, %v7425_v52  ;;  %v6977_v47 = vadd.f32 %v6976_v9, %v12173_v7  ;;  %v7193_v5 = vunpack.c.l.bf16 %v12778_v30  ;;  %v6789_v37 = vpop.f32.mrb[3].mxu1  ;;  %v6982_v52 = vpop.f32.mrb[3].mxu0 }
 0x53a   : > { %v7430_v27 = vmax.f32 %v7302_v39, 0.0  ;;  %v7194_v11 = vunpack.c.h.bf16 %v12778_v30  ;;  %v8616_v38 = vpack.c.bf16 %v7428_v35, %v7427_v59  ;;  %v6786_v23 = vadd.f32 %v6785_v15, %v12175_v12  ;;  %v6986_v15 = vpop.f32.mrb[4].mxu0 }
 0x53b   : > { %7891 = vst [vmem:[%s12366_s29 + $0x160] sm:$0xff] %v8614_v44  ;;  %7892 = vst [vmem:[%s12366_s29 + $0x168] sm:$0xff] %v8615_v50  ;;  %v6979_v14 = vadd.f32 %v6978_v55, %v12185_v42  ;;  %v7303_v56 = vadd.f32 %v7175_v18, %v6784_v62  ;;  %v7305_v21 = vadd.f32 %v7177_v6, %v6977_v47  ;;  %v13197_v17 = vunpack.c.h.bf16 %v12626_v2  ;;  %v12808_v6 = vld [vmem:[%s10225_s15 + $0x1d8] sm:$0xff]  ;;  %v6793_v47 = vpop.f32.mrb[4].mxu1 }
 0x53c   : > { %v8617_v28 = vpack.c.bf16 %v7430_v27, %v7429_v13  ;;  %v6788_v29 = vadd.f32 %v6787_v1, %v12162_v19  ;;  %v6981_v60 = vadd.f32 %v6980_v10, %v12173_v7  ;;  %7893 = vst [vmem:[%s12366_s29 + $0x170] sm:$0xff] %v8616_v38  ;;  %v7304_v49 = vadd.f32 %v7176_v45, %v6786_v23  ;;  %v6795_v3 = vpop.f32.mrb[5].mxu1 }
 0x53d   : > { %v7306_v53 = vadd.f32 %v13197_v17, %v6979_v14  ;;  %v6790_v31 = vadd.f32 %v6789_v37, %v12175_v12  ;;  %v6983_v18 = vadd.f32 %v6982_v52, %v12185_v42  ;;  %v7431_v43 = vmax.f32 %v7303_v56, 0.0  ;;  %v6797_v10 = vpop.f32.mrb[6].mxu1 }
 0x53e   : > { %7894 = vst [vmem:[%s12366_s29 + $0x178] sm:$0xff] %v8617_v28  ;;  %v7433_v39 = vmax.f32 %v7305_v21, 0.0  ;;  %v7307_v59 = vadd.f32 %v7179_v51, %v6788_v29  ;;  %v7309_v46 = vadd.f32 %v7181_v63, %v6981_v60  ;;  %v7432_v45 = vmax.f32 %v7304_v49, 0.0  ;;  %v6799_v52 = vpop.f32.mrb[7].mxu1 }
 0x53f   : > { %v7434_v13 = vmax.f32 %v7306_v53, 0.0  ;;  %v7308_v2 = vadd.f32 %v7180_v54, %v6790_v31  ;;  %v7310_v44 = vadd.f32 %v7182_v41, %v6983_v18  ;;  %v7195_v27 = vunpack.c.l.bf16 %v12805_v26  ;;  %v6988_v41 = vpop.f32.mrb[5].mxu0 }
 0x540   : > { %v7435_v50 = vmax.f32 %v7307_v59, 0.0  ;;  %v7437_v35 = vmax.f32 %v7309_v46, 0.0  ;;  %v7197_v22 = vunpack.c.l.bf16 %v12808_v6  ;;  %v8618_v51 = vpack.c.bf16 %v7432_v45, %v7431_v43  ;;  %v6990_v56 = vpop.f32.mrb[6].mxu0 }
 0x541   : > { %v8619_v9 = vpack.c.bf16 %v7434_v13, %v7433_v39  ;;  %v7436_v62 = vmax.f32 %v7308_v2, 0.0  ;;  %v7438_v63 = vmax.f32 %v7310_v44, 0.0  ;;  %v6794_v33 = vadd.f32 %v6793_v47, %v12162_v19  ;;  %v6992_v49 = vpop.f32.mrb[7].mxu0 }
 0x542   : > { %v6987_v54 = vadd.f32 %v6986_v15, %v12173_v7  ;;  %v7196_v55 = vunpack.c.h.bf16 %v12805_v26  ;;  %v7198_v38 = vunpack.c.h.bf16 %v12808_v6  ;;  %7895 = vst [vmem:[%s12366_s29 + $0x180] sm:$0xff] %v8618_v51  ;;  %v6796_v14 = vadd.f32 %v6795_v3, %v12175_v12  ;;  %v6803_v51 = vpop.f32.mrb[8].mxu1  ;;  %v6996_v24 = vpop.f32.mrb[8].mxu0 }
 0x543   : > { %7896 = vst [vmem:[%s12366_s29 + $0x188] sm:$0xff] %v8619_v9  ;;  %v8620_v28 = vpack.c.bf16 %v7436_v62, %v7435_v50  ;;  %v8621_v23 = vpack.c.bf16 %v7438_v63, %v7437_v35  ;;  %v6989_v1 = vadd.f32 %v6988_v41, %v12185_v42  ;;  %v7311_v21 = vadd.f32 %v7183_v8, %v6794_v33  ;;  %v6998_v9 = vpop.f32.mrb[9].mxu0 }
 0x544   : > { %v7313_v29 = vadd.f32 %v7185_v48, %v6987_v54  ;;  %v6798_v60 = vadd.f32 %v6797_v10, %v12162_v19  ;;  %v6991_v37 = vadd.f32 %v6990_v56, %v12173_v7  ;;  %v7312_v17 = vadd.f32 %v7184_v20, %v6796_v14  ;;  %v12843_v48 = vld [vmem:[%s10225_s15 + $0x1e0] sm:$0xff]  ;;  %v7000_v41 = vpop.f32.mrb[10].mxu0 }
 0x545   : > { %7897 = vst [vmem:[%s12366_s29 + $0x190] sm:$0xff] %v8620_v28  ;;  %7898 = vst [vmem:[%s12366_s29 + $0x198] sm:$0xff] %v8621_v23  ;;  %v7314_v53 = vadd.f32 %v7186_v32, %v6989_v1  ;;  %v6800_v8 = vadd.f32 %v6799_v52, %v12175_v12  ;;  %v6993_v31 = vadd.f32 %v6992_v49, %v12185_v42  ;;  %v7439_v18 = vmax.f32 %v7311_v21, 0.0  ;;  %v12854_v32 = vld [vmem:[%s10225_s15 + $0x1e8] sm:$0xff]  ;;  %v7002_v56 = vpop.f32.mrb[11].mxu0 }
 0x546   : > { %v7441_v43 = vmax.f32 %v7313_v29, 0.0  ;;  %v7315_v39 = vadd.f32 %v7187_v58, %v6798_v60  ;;  %v7317_v59 = vadd.f32 %v7189_v0, %v6991_v37  ;;  %v7440_v46 = vmax.f32 %v7312_v17, 0.0  ;;  %v7077_v37 = vld [vmem:[%s10225_s15 + $0x1f0] sm:$0xff] }
 0x547   : > { %v7442_v16 = vmax.f32 %v7314_v53, 0.0  ;;  %v7316_v25 = vadd.f32 %v7188_v34, %v6800_v8  ;;  %v7318_v20 = vadd.f32 %v7190_v36, %v6993_v31  ;;  %v7199_v2 = vunpack.c.l.bf16 %v12843_v48  ;;  %v6805_v36 = vpop.f32.mrb[9].mxu1 }
 0x548   : > { %v7443_v45 = vmax.f32 %v7315_v39, 0.0  ;;  %v7445_v13 = vmax.f32 %v7317_v59, 0.0  ;;  %v7200_v58 = vunpack.c.h.bf16 %v12843_v48  ;;  %v8622_v44 = vpack.c.bf16 %v7440_v46, %v7439_v18  ;;  %v6807_v3 = vpop.f32.mrb[10].mxu1 }
 0x549   : > { %v8623_v0 = vpack.c.bf16 %v7442_v16, %v7441_v43  ;;  %v7444_v50 = vmax.f32 %v7316_v25, 0.0  ;;  %v7446_v35 = vmax.f32 %v7318_v20, 0.0  ;;  %v6804_v34 = vadd.f32 %v6803_v51, %v12162_v19  ;;  %v6809_v10 = vpop.f32.mrb[11].mxu1 }
 0x54a   : > { %v6997_v4 = vadd.f32 %v6996_v24, %v12173_v7  ;;  %v7201_v62 = vunpack.c.l.bf16 %v12854_v32  ;;  %v7202_v63 = vunpack.c.h.bf16 %v12854_v32  ;;  %7899 = vst [vmem:[%s12366_s29 + $0x1a0] sm:$0xff] %v8622_v44  ;;  %v6806_v33 = vadd.f32 %v6805_v36, %v12175_v12  ;;  %v6813_v16 = vpop.f32.mrb[12].mxu1 }
 0x54b   : > { %7900 = vst [vmem:[%s12366_s29 + $0x1a8] sm:$0xff] %v8623_v0  ;;  %v8624_v47 = vpack.c.bf16 %v7444_v50, %v7443_v45  ;;  %v8625_v15 = vpack.c.bf16 %v7446_v35, %v7445_v13  ;;  %v6999_v54 = vadd.f32 %v6998_v9, %v12185_v42  ;;  %v7319_v28 = vadd.f32 %v7191_v61, %v6804_v34 }
 0x54c   : > { %v7321_v23 = vadd.f32 %v7193_v5, %v6997_v4  ;;  %v6808_v14 = vadd.f32 %v6807_v3, %v12162_v19  ;;  %v7001_v1 = vadd.f32 %v7000_v41, %v12173_v7  ;;  %v7320_v21 = vadd.f32 %v7192_v57, %v6806_v33  ;;  %v7078_v5 = vld [vmem:[%s10225_s15 + $0x1f8] sm:$0xff] }
 0x54d   : > { %7901 = vst [vmem:[%s12366_s29 + $0x1b0] sm:$0xff] %v8624_v47  ;;  %7902 = vst [vmem:[%s12366_s29 + $0x1b8] sm:$0xff] %v8625_v15  ;;  %v7322_v29 = vadd.f32 %v7194_v11, %v6999_v54  ;;  %v6810_v60 = vadd.f32 %v6809_v10, %v12175_v12  ;;  %v7003_v61 = vadd.f32 %v7002_v56, %v12185_v42  ;;  %v7447_v52 = vmax.f32 %v7319_v28, 0.0 }
 0x54e   : > { %v7449_v49 = vmax.f32 %v7321_v23, 0.0  ;;  %v7323_v17 = vadd.f32 %v7195_v27, %v6808_v14  ;;  %v7325_v53 = vadd.f32 %v7197_v22, %v7001_v1  ;;  %v7448_v8 = vmax.f32 %v7320_v21, 0.0  ;;  %v7006_v22 = vpop.f32.mrb[12].mxu0 }
 0x54f   : > { %v7450_v40 = vmax.f32 %v7322_v29, 0.0  ;;  %v7324_v30 = vadd.f32 %v7196_v55, %v6810_v60  ;;  %v7326_v57 = vadd.f32 %v7198_v38, %v7003_v61  ;;  %v7203_v18 = vunpack.c.l.bf16 %v7077_v37  ;;  %v6815_v55 = vpop.f32.mrb[13].mxu1  ;;  %v7008_v20 = vpop.f32.mrb[13].mxu0 }
 0x550   : > { %v7451_v11 = vmax.f32 %v7323_v17, 0.0  ;;  %v7453_v31 = vmax.f32 %v7325_v53, 0.0  ;;  %v7205_v43 = vunpack.c.l.bf16 %v7078_v5  ;;  %v8626_v39 = vpack.c.bf16 %v7448_v8, %v7447_v52  ;;  %v6817_v50 = vpop.f32.mrb[14].mxu1  ;;  %v7010_v35 = vpop.f32.mrb[14].mxu0 }
 0x551   : > { %v8627_v59 = vpack.c.bf16 %v7450_v40, %v7449_v49  ;;  %v7452_v27 = vmax.f32 %v7324_v30, 0.0  ;;  %v7454_v46 = vmax.f32 %v7326_v57, 0.0  ;;  %v6814_v25 = vadd.f32 %v6813_v16, %v12162_v19  ;;  %v6819_v36 = vpop.f32.mrb[15].mxu1  ;;  %v7012_v9 = vpop.f32.mrb[15].mxu0 }
 0x552   : > { %v7007_v26 = vadd.f32 %v7006_v22, %v12173_v7  ;;  %v7204_v6 = vunpack.c.h.bf16 %v7077_v37  ;;  %v7206_v38 = vunpack.c.h.bf16 %v7078_v5  ;;  %7903 = vst [vmem:[%s12366_s29 + $0x1c0] sm:$0xff] %v8626_v39  ;;  %v6816_v44 = vadd.f32 %v6815_v55, %v12175_v12 }
 0x553   : > { %7904 = vst [vmem:[%s12366_s29 + $0x1c8] sm:$0xff] %v8627_v59  ;;  %v8628_v45 = vpack.c.bf16 %v7452_v27, %v7451_v11  ;;  %v8629_v13 = vpack.c.bf16 %v7454_v46, %v7453_v31  ;;  %v7009_v0 = vadd.f32 %v7008_v20, %v12185_v42  ;;  %v7327_v51 = vadd.f32 %v7199_v2, %v6814_v25 }
 0x554   : > { %v7329_v24 = vadd.f32 %v7201_v62, %v7007_v26  ;;  %v6818_v34 = vadd.f32 %v6817_v50, %v12162_v19  ;;  %v7011_v4 = vadd.f32 %v7010_v35, %v12173_v7  ;;  %v7328_v47 = vadd.f32 %v7200_v58, %v6816_v44 }
 0x555   : > { %7905 = vst [vmem:[%s12366_s29 + $0x1d0] sm:$0xff] %v8628_v45  ;;  %7906 = vst [vmem:[%s12366_s29 + $0x1d8] sm:$0xff] %v8629_v13  ;;  %v7330_v15 = vadd.f32 %v7202_v63, %v7009_v0  ;;  %v6820_v33 = vadd.f32 %v6819_v36, %v12175_v12  ;;  %v7013_v2 = vadd.f32 %v7012_v9, %v12185_v42  ;;  %v7455_v62 = vmax.f32 %v7327_v51, 0.0 }
 0x556   : > { %v7457_v19 = vmax.f32 %v7329_v24, 0.0  ;;  %v7331_v54 = vadd.f32 %v7203_v18, %v6818_v34  ;;  %v7333_v7 = vadd.f32 %v7205_v43, %v7011_v4  ;;  %v7456_v3 = vmax.f32 %v7328_v47, 0.0 }
 0x557   : > { %v7458_v41 = vmax.f32 %v7330_v15, 0.0  ;;  %v7332_v28 = vadd.f32 %v7204_v6, %v6820_v33  ;;  %v7334_v23 = vadd.f32 %v7206_v38, %v7013_v2 }
 0x558   : > { %v7459_v48 = vmax.f32 %v7331_v54, 0.0  ;;  %v7461_v32 = vmax.f32 %v7333_v7, 0.0  ;;  %v8630_v12 = vpack.c.bf16 %v7456_v3, %v7455_v62 }
 0x559   : > { %v8631_v42 = vpack.c.bf16 %v7458_v41, %v7457_v19  ;;  %v7460_v58 = vmax.f32 %v7332_v28, 0.0  ;;  %v7462_v63 = vmax.f32 %v7334_v23, 0.0 }
 0x55a   : > { %7907 = vst [vmem:[%s12366_s29 + $0x1e0] sm:$0xff] %v8630_v12 }
 0x55b   : > { %7908 = vst [vmem:[%s12366_s29 + $0x1e8] sm:$0xff] %v8631_v42  ;;  %v8632_v14 = vpack.c.bf16 %v7460_v58, %v7459_v48  ;;  %v8633_v1 = vpack.c.bf16 %v7462_v63, %v7461_v32 }
 0x55d   : > { %7909 = vst [vmem:[%s12366_s29 + $0x1f0] sm:$0xff] %v8632_v14  ;;  %7910 = vst [vmem:[%s12366_s29 + $0x1f8] sm:$0xff] %v8633_v1 }
 0x55e   : > { %9905 = shalt.err (!%p9902_p4)
}
 0x55f   : > { %s9906_s17 = scalar_lea.hbm %s12913_s9, 8192  ;;  %s9910_s16 = scalar_lea.hbm %s12970_s7, 16384 }
 0x560   : > { %p9907_p9 = scmp.ne.s32.totalorder %s12913_s9, %s9906_s17  ;;  %p9911_p8 = scmp.lt.u32.totalorder %s12913_s9, %s12970_s7 }
 0x561   : > { %p9912_p13 = scmp.lt.u32.totalorder %s9910_s16, %s9906_s17  ;;  %p9914_p10 = scmp.lt.u32.totalorder %s9906_s17, %s12913_s9 }
 0x562   : > { %p9908_p0 = pnand %p9907_p9, %p10168_p5 }
 0x563   : > { %p9913_p6 = por %p9912_p13, %p9911_p8 }
 0x564   : > { %p9909_p11 = pneg %p9908_p0 }
 0x565   : > { %p9915_p3 = por %p9914_p10, %p9913_p6 }
 0x567   : > { %p9916_p7 = pnand %p9915_p3, %p9909_p11 }
 0x569   : > { %9919 = shalt.err (!%p9916_p7)
}
 0x56a   : > { %s9978_s15 = smov 256   ;;  %s9979_s30 = smov 16  }
 0x56b   : > { %9409 = dma.vmem_to_hbm [thread:$0]  (%p10168_p5), %s12915_s11, 8192, %s12913_s9, %s7912_s28, %s9978_s15, %s9978_s15, %s9979_s30  }
 0x56c PF: > { %s13198_s14 = sld [smem:[#allocation17_spill]]  ;;  %s7940_s22 = sand.u32 1, %s9954_s24  }
 0x56d   : > { %p13200_p2 = scmp.ge.s32.totalorder %s9966_s27, 2  ;;  %s7941_s10 = scalar_lea.sflag [#allocation6], %s7940_s22 }
 0x572   : > { %p13199_p12 = scmp.ne.s32.totalorder %s13198_s14, 0 }
 0x574   : > { %p9426_p1 = pnand %p13200_p2, %p13199_p12 }
 0x576   : > { %9949 = dma.done.wait (!%p9426_p1), %s7941_s10, 8192  }
 0x577   : > { %9951 = vsyncadd (!%p9426_p1), %s7941_s10, 4294959104  ;;  %p22_p4 = scmp.ge.s32.totalorder %s10154_s8, 4   ;;  %s13201_s24 = smov %s9958_s25 }
 0x578   : > { %s13202_s25 = smov %s9962_s26  ;;  %s13203_s26 = smov %s10164_s19 }
 0x579   : > { %s13204_s27 = smov %s10154_s8  ;;  %24 = sbr.rel (!%p22_p4) target bundleno = 7 (0x7), region = 108 }
 0x580   :  { %7946 = vsyncpa [#allocation5], 1 }
 0x581   :  { %7948 = vsyncpa [#allocation5 + $0x1], 1 }
 0x582   :  { %7949 = vsyncpa [#allocation8], 1 }
 0x583   :  { %7950 = vsyncpa [#allocation11], 1 }
 0x584   :  { %7951 = vsyncpa [#allocation6], 1 }
 0x585   :  { %7953 = vsyncpa [#allocation6 + $0x1], 1 }

</bundles_post_ra>
